<compile_context>
chip_gen: v5e
topology: v5e:2x2
jax: 0.10.0
libtpu: 0.0.40
codegen_flags: <defaults>
</compile_context>

<pallas_src>
import functools

import jax
import jax.numpy as jnp
from jax import lax
from jax.experimental import pallas as pl
from jax.experimental.pallas import tpu as pltpu

LANES = 128                    # lane-dense output width
CONV1_TILE_M = 576             # conv1 row tile (multiple of 16; divides n_pad*144)
VMEM_LIMIT = 32 * 1024 * 1024  # safe on v5e/v6e/v7x, above v5e's 16 MiB default


def _round_up(x, m):
    return ((x + m - 1) // m) * m


# ----------------------------- Pallas kernels ------------------------------

def _conv1_pool_kernel(p_ref, w_ref, b_ref, o_ref):
    """conv1 (im2col matmul) + bias + ReLU + 2x2 max-pool for one row tile.

    p_ref : (4, T, K1)  patch slabs, one per 2x2 pool position
    w_ref : (K1, 128)   conv1 weight (32 valid cols, zero padded)
    b_ref : (1, 128)    conv1 bias
    o_ref : (T, 128)    pooled activations (bf16)
    """
    t = o_ref.shape[0]
    k = p_ref.shape[2]
    x = p_ref[...].reshape(4 * t, k)                  # one matmul for all 4 slabs
    acc = jnp.dot(x, w_ref[...], preferred_element_type=jnp.float32)
    # max over pool positions first, then a single bias + ReLU
    m = jnp.maximum(jnp.maximum(acc[0:t], acc[t:2 * t]),
                    jnp.maximum(acc[2 * t:3 * t], acc[3 * t:4 * t]))
    o_ref[...] = jnp.maximum(m + b_ref[...], 0.0).astype(o_ref.dtype)


def _conv2_fc_kernel(p_ref, w2_ref, b2_ref, wfc_ref, bfc_ref, o_ref):
    """conv2 (im2col matmul) + bias + ReLU + 2x2 max-pool + flatten + FC.

    p_ref  : (64, Bt, K2)  patch rows grouped as g = pool*16 + spatial
    w2_ref : (K2, 128)     conv2 weight (64 valid cols)
    b2_ref : (1, 128)      conv2 bias
    wfc_ref: (16, 128, 128) FC weight, one (channels x classes) block per
                            spatial position (rows 64:, cols nc: are zero)
    bfc_ref: (1, 128)      FC bias
    o_ref  : (Bt, 128)     logits (f32, num_classes valid cols)
    """
    bt = o_ref.shape[0]
    k = p_ref.shape[2]
    x = p_ref[...].reshape(64 * bt, k)
    acc = jnp.dot(x, w2_ref[...], preferred_element_type=jnp.float32)  # (64Bt,128)
    q = 16 * bt
    m = jnp.maximum(jnp.maximum(acc[0:q], acc[q:2 * q]),
                    jnp.maximum(acc[2 * q:3 * q], acc[3 * q:4 * q]))   # (16Bt,128)
    h2 = jnp.maximum(m + b2_ref[...], 0.0).astype(jnp.bfloat16)        # pooled conv2
    # FC as a sum over the 16 spatial positions (rows s*Bt:(s+1)*Bt are the
    # activations of spatial position s for all Bt images) -- no flatten needed.
    fc = jnp.dot(h2[0:bt], wfc_ref[0], preferred_element_type=jnp.float32)
    for s in range(1, 16):
        fc = fc + jnp.dot(h2[s * bt:(s + 1) * bt], wfc_ref[s],
                          preferred_element_type=jnp.float32)
    o_ref[...] = (fc + bfc_ref[...]).astype(o_ref.dtype)


# ------------------------------ pallas_call wrappers ------------------------

def conv1_pool(p1, w1, b1):
    _, m, k = p1.shape
    tile_m = CONV1_TILE_M
    assert m % tile_m == 0
    grid = m // tile_m
    return pl.pallas_call(
        _conv1_pool_kernel,
        out_shape=jax.ShapeDtypeStruct((m, LANES), jnp.bfloat16),
        grid=(grid,),
        in_specs=[pl.BlockSpec((4, tile_m, k), lambda i: (0, i, 0)),
                  pl.BlockSpec((k, LANES), lambda i: (0, 0)),
                  pl.BlockSpec((1, LANES), lambda i: (0, 0))],
        out_specs=pl.BlockSpec((tile_m, LANES), lambda i: (i, 0)),
        compiler_params=pltpu.CompilerParams(
            dimension_semantics=("parallel",),
            vmem_limit_bytes=VMEM_LIMIT),
        cost_estimate=pl.CostEstimate(
            flops=2 * 4 * m * k * LANES, transcendentals=0,
            bytes_accessed=(4 * m * k + k * LANES + m * LANES) * 2),
    )(p1, w1, b1)


def conv2_fc(p2, w2, b2, wfc, bfc, bt):
    _, n_pad, k = p2.shape
    assert n_pad % bt == 0
    grid = n_pad // bt
    return pl.pallas_call(
        _conv2_fc_kernel,
        out_shape=jax.ShapeDtypeStruct((n_pad, LANES), jnp.float32),
        grid=(grid,),
        in_specs=[pl.BlockSpec((64, bt, k), lambda i: (0, i, 0)),
                  pl.BlockSpec((k, LANES), lambda i: (0, 0)),
                  pl.BlockSpec((1, LANES), lambda i: (0, 0)),
                  pl.BlockSpec((16, LANES, LANES), lambda i: (0, 0, 0)),
                  pl.BlockSpec((1, LANES), lambda i: (0, 0))],
        out_specs=pl.BlockSpec((bt, LANES), lambda i: (i, 0)),
        compiler_params=pltpu.CompilerParams(
            dimension_semantics=("parallel",),
            vmem_limit_bytes=VMEM_LIMIT),
        cost_estimate=pl.CostEstimate(
            flops=2 * 64 * n_pad * k * LANES + 2 * 16 * n_pad * LANES * LANES,
            transcendentals=0,
            bytes_accessed=(64 * n_pad * k + k * LANES
                            + 16 * LANES * LANES) * 2 + n_pad * LANES * 4),
    )(p2, w2, b2, wfc, bfc)


# --------------------------------- JAX glue ---------------------------------

def _im2col_pool(x, k):
    """im2col for a kxk 'valid' conv, split per 2x2 max-pool position.

    x: (n, h, w, c) -> (4, n, oh//2, ow//2, k*k*c); feature order (kh, kw, c).
    Pooling floors odd output sizes (24->12, 8->4 here, matching PyTorch).
    """
    n, h, w, c = x.shape
    oh, ow = h - k + 1, w - k + 1
    cols = [x[:, kh:kh + oh, kw:kw + ow, :] for kh in range(k) for kw in range(k)]
    pat = jnp.concatenate(cols, axis=-1)                       # (n, oh, ow, k*k*c)
    parts = [pat[:, pr::2, pc::2, :] for pr in (0, 1) for pc in (0, 1)]
    return jnp.stack(parts, axis=0)


def prepare_params(params):
    """One-time hoisted weight prep: matmul layout, 128-lane zero padding,
    bf16 MXU operands, and FC-weight permutation that kills the flatten."""
    def conv_w(w_oihw):
        o, i, kh, kw = w_oihw.shape
        wm = jnp.transpose(w_oihw, (2, 3, 1, 0)).reshape(kh * kw * i, o)
        return jnp.pad(wm, ((0, 0), (0, LANES - o))).astype(jnp.bfloat16)

    def bias_row(b):
        return jnp.pad(b, (0, LANES - b.shape[0])).reshape(1, LANES).astype(jnp.float32)

    wfc = params["wfc"]                       # (nc, 1024); 1024 = (C=64,H=4,W=4) flat
    nc = wfc.shape[0]
    # Per-spatial-position blocks: wfc_s[s, c, n] = wfc[n, c*16 + s], s = h*4 + w.
    wfc_s = jnp.transpose(wfc.reshape(nc, 64, 16), (2, 1, 0))          # (16, 64, nc)
    wfc_s = jnp.pad(wfc_s, ((0, 0), (0, LANES - 64), (0, LANES - nc))).astype(jnp.bfloat16)
    return {
        "w1": conv_w(params["w1"]), "b1": bias_row(params["b1"]),
        "w2": conv_w(params["w2"]), "b2": bias_row(params["b2"]),
        "wfc": wfc_s, "bfc": bias_row(params["bfc"]),
    }


@functools.partial(jax.jit, static_argnames=("num_classes",))
def cnn_forward(prep, x_nchw, num_classes=10):
    n = x_nchw.shape[0]
    bt = 16 if n <= 64 else 32                 # batch tile for conv2+FC kernel
    n_pad = max(2 * bt, _round_up(n, bt))      # >= 2 grid steps (v7x: feed both TCs)

    x = jnp.transpose(x_nchw, (0, 2, 3, 1)).astype(jnp.bfloat16)       # NHWC bf16
    if n_pad != n:
        x = jnp.pad(x, ((0, n_pad - n), (0, 0), (0, 0), (0, 0)))

    # layer 1: im2col glue + fused matmul/bias/ReLU/maxpool kernel
    p1 = _im2col_pool(x, 5).reshape(4, n_pad * 144, 25)
    h1_rows = conv1_pool(p1, prep["w1"], prep["b1"])                   # (n_pad*144,128) bf16
    h1 = h1_rows[:, :32].reshape(n_pad, 12, 12, 32)                    # (N,12,12,32)

    # layer 2 + flatten + FC fused in one kernel; rows grouped (pool, spatial, img)
    p2 = _im2col_pool(h1, 5).reshape(4, n_pad, 16, 800)
    p2 = jnp.transpose(p2, (0, 2, 1, 3)).reshape(64, n_pad, 800)
    logits = conv2_fc(p2, prep["w2"], prep["b2"], prep["wfc"], prep["bfc"], bt)
    return logits[:n, :num_classes]


def init_params(key, in_ch, num_classes):
    k1, k2, k3, k4, k5, k6 = jax.random.split(key, 6)
    return {
        "w1": jax.random.normal(k1, (32, in_ch, 5, 5), jnp.float32) * 0.1,
        "b1": jax.random.normal(k2, (32,), jnp.float32) * 0.1,
        "w2": jax.random.normal(k3, (64, 32, 5, 5), jnp.float32) * 0.05,
        "b2": jax.random.normal(k4, (64,), jnp.float32) * 0.1,
        "wfc": jax.random.normal(k5, (num_classes, 4 * 4 * 64), jnp.float32) * 0.02,
        "bfc": jax.random.normal(k6, (num_classes,), jnp.float32) * 0.1,
    }


def reference_forward(params, x):
    """Pure-JAX f32 reference matching the PyTorch module."""
    dn = ("NCHW", "OIHW", "NCHW")

    def conv(z, w, b):
        y = lax.conv_general_dilated(z, w, (1, 1), "VALID", dimension_numbers=dn)
        return y + b[None, :, None, None]

    def pool2(z):
        n, c, h, w = z.shape
        return z.reshape(n, c, h // 2, 2, w // 2, 2).max(axis=(3, 5))

    y = pool2(jnp.maximum(conv(x, params["w1"], params["b1"]), 0.0))
    y = pool2(jnp.maximum(conv(y, params["w2"], params["b2"]), 0.0))
    y = y.reshape(y.shape[0], -1)
    return y @ params["wfc"].T + params["bfc"]


if __name__ == "__main__":
    key = jax.random.PRNGKey(0)
    pkey, xkey = jax.random.split(key)

    # input_size = (1, 28, 28) (MNIST), num_classes = 10 (implied by fc1 = 4*4*64)
    params = init_params(pkey, in_ch=1, num_classes=10)
    prep = prepare_params(params)                 # hoisted one-time weight prep
    x = jax.random.normal(xkey, (2, 1, 28, 28), jnp.float32)

    out = jax.block_until_ready(cnn_forward(prep, x, num_classes=10))
    assert out.shape == (2, 10) and out.dtype == jnp.float32

    ref = jax.block_until_ready(reference_forward(params, x))
    # bf16 MXU operands (f32 accumulation) -> small numeric deviation allowed.
    assert float(jnp.max(jnp.abs(out - ref))) < 0.1, "mismatch vs f32 reference"

    print("KERNEL_OK")
</pallas_src>

<mosaic_0001>
module attributes {stable_mosaic.version = 11 : i64} {
  func.func @_conv1_pool_kernel(%arg0: i32, %arg1: memref<4x576x25xbf16, #tpu.memory_space<vmem>>, %arg2: memref<25x128xbf16, #tpu.memory_space<vmem>>, %arg3: memref<1x128xf32, #tpu.memory_space<vmem>>, %arg4: memref<576x128xbf16, #tpu.memory_space<vmem>>) attributes {dimension_semantics = [#tpu.dimension_semantics<parallel>], iteration_bounds = array<i64: 8>, scalar_prefetch = 0 : i64, scratch_operands = 0 : i64, tpu.core_type = #tpu.core_type<tc>, window_params = [{transform_indices = @transform_0, window_bounds = array<i64: 4, 576, 25>}, {pipeline_mode = #tpu.pipeline_mode<synchronous>, transform_indices = @transform_1, window_bounds = array<i64: 25, 128>}, {pipeline_mode = #tpu.pipeline_mode<synchronous>, transform_indices = @transform_2, window_bounds = array<i64: 1, 128>}, {transform_indices = @transform_3, window_bounds = array<i64: 576, 128>}]} {
    %c0 = arith.constant 0 : index
    %c0_0 = arith.constant 0 : index
    %c0_1 = arith.constant 0 : index
    %0 = vector.load %arg1[%c0, %c0_0, %c0_1] : memref<4x576x25xbf16, #tpu.memory_space<vmem>>, vector<4x576x25xbf16>
    %1 = vector.shape_cast %0 : vector<4x576x25xbf16> to vector<2304x25xbf16>
    %c0_2 = arith.constant 0 : index
    %c0_3 = arith.constant 0 : index
    %2 = vector.load %arg2[%c0_2, %c0_3] : memref<25x128xbf16, #tpu.memory_space<vmem>>, vector<25x128xbf16>
    %cst = arith.constant dense<0.000000e+00> : vector<2304x128xf32>
    %3 = tpu.matmul %1, %2, %cst {dimension_numbers = #tpu.dot_dimension_numbers<[1], [0], [0], [1], [0, 0, 1, 1], [], []>} : vector<2304x25xbf16>, vector<25x128xbf16>, vector<2304x128xf32> -> vector<2304x128xf32>
    %4 = vector.extract_strided_slice %3 {offsets = [0, 0], sizes = [576, 128], strides = [1, 1]} : vector<2304x128xf32> to vector<576x128xf32>
    %5 = vector.extract_strided_slice %3 {offsets = [576, 0], sizes = [576, 128], strides = [1, 1]} : vector<2304x128xf32> to vector<576x128xf32>
    %6 = arith.maximumf %4, %5 : vector<576x128xf32>
    %7 = vector.extract_strided_slice %3 {offsets = [1152, 0], sizes = [576, 128], strides = [1, 1]} : vector<2304x128xf32> to vector<576x128xf32>
    %8 = vector.extract_strided_slice %3 {offsets = [1728, 0], sizes = [576, 128], strides = [1, 1]} : vector<2304x128xf32> to vector<576x128xf32>
    %9 = arith.maximumf %7, %8 : vector<576x128xf32>
    %10 = arith.maximumf %6, %9 : vector<576x128xf32>
    %c0_4 = arith.constant 0 : index
    %c0_5 = arith.constant 0 : index
    %11 = vector.load %arg3[%c0_4, %c0_5] : memref<1x128xf32, #tpu.memory_space<vmem>>, vector<1x128xf32>
    %12 = vector.broadcast %11 : vector<1x128xf32> to vector<576x128xf32>
    %13 = arith.addf %10, %12 : vector<576x128xf32>
    %cst_6 = arith.constant 0.000000e+00 : f32
    %14 = vector.broadcast %cst_6 : f32 to vector<576x128xf32>
    %15 = arith.maximumf %13, %14 : vector<576x128xf32>
    %16 = arith.truncf %15 : vector<576x128xf32> to vector<576x128xbf16>
    %c0_7 = arith.constant 0 : index
    %c0_8 = arith.constant 0 : index
    %17 = vector.load %arg4[%c0_7, %c0_8] : memref<576x128xbf16, #tpu.memory_space<vmem>>, vector<576x128xbf16>
    tpu.vector_store %arg4[%c0_7, %c0_8], %16 {strides = array<i32>} : memref<576x128xbf16, #tpu.memory_space<vmem>>, vector<576x128xbf16>,
    return
  }
  func.func @transform_0(%arg0: i32) -> (i32, i32, i32) {
    %c0_i32 = arith.constant 0 : i32
    %c0_i32_0 = arith.constant 0 : i32
    %c0_i32_1 = arith.constant 0 : i32
    return %c0_i32, %arg0, %c0_i32_0 : i32, i32, i32
  }
  func.func @transform_1(%arg0: i32) -> (i32, i32) {
    %c0_i32 = arith.constant 0 : i32
    %c0_i32_0 = arith.constant 0 : i32
    %c0_i32_1 = arith.constant 0 : i32
    return %c0_i32, %c0_i32_0 : i32, i32
  }
  func.func @transform_2(%arg0: i32) -> (i32, i32) {
    %c0_i32 = arith.constant 0 : i32
    %c0_i32_0 = arith.constant 0 : i32
    %c0_i32_1 = arith.constant 0 : i32
    return %c0_i32, %c0_i32_0 : i32, i32
  }
  func.func @transform_3(%arg0: i32) -> (i32, i32) {
    %c0_i32 = arith.constant 0 : i32
    %c0_i32_0 = arith.constant 0 : i32
    return %arg0, %c0_i32 : i32, i32
  }
}

module attributes {stable_mosaic.version = 11 : i64} {
  func.func @_conv2_fc_kernel(%arg0: i32, %arg1: memref<64x16x800xbf16, #tpu.memory_space<vmem>>, %arg2: memref<800x128xbf16, #tpu.memory_space<vmem>>, %arg3: memref<1x128xf32, #tpu.memory_space<vmem>>, %arg4: memref<16x128x128xbf16, #tpu.memory_space<vmem>>, %arg5: memref<1x128xf32, #tpu.memory_space<vmem>>, %arg6: memref<16x128xf32, #tpu.memory_space<vmem>>) attributes {dimension_semantics = [#tpu.dimension_semantics<parallel>], iteration_bounds = array<i64: 2>, scalar_prefetch = 0 : i64, scratch_operands = 0 : i64, tpu.core_type = #tpu.core_type<tc>, window_params = [{transform_indices = @transform_0, window_bounds = array<i64: 64, 16, 800>}, {pipeline_mode = #tpu.pipeline_mode<synchronous>, transform_indices = @transform_1, window_bounds = array<i64: 800, 128>}, {pipeline_mode = #tpu.pipeline_mode<synchronous>, transform_indices = @transform_2, window_bounds = array<i64: 1, 128>}, {pipeline_mode = #tpu.pipeline_mode<synchronous>, transform_indices = @transform_3, window_bounds = array<i64: 16, 128, 128>}, {pipeline_mode = #tpu.pipeline_mode<synchronous>, transform_indices = @transform_4, window_bounds = array<i64: 1, 128>}, {transform_indices = @transform_5, window_bounds = array<i64: 16, 128>}]} {
    %c0 = arith.constant 0 : index
    %c0_0 = arith.constant 0 : index
    %c0_1 = arith.constant 0 : index
    %0 = vector.load %arg1[%c0, %c0_0, %c0_1] : memref<64x16x800xbf16, #tpu.memory_space<vmem>>, vector<64x16x800xbf16>
    %1 = vector.shape_cast %0 : vector<64x16x800xbf16> to vector<1024x800xbf16>
    %c0_2 = arith.constant 0 : index
    %c0_3 = arith.constant 0 : index
    %2 = vector.load %arg2[%c0_2, %c0_3] : memref<800x128xbf16, #tpu.memory_space<vmem>>, vector<800x128xbf16>
    %cst = arith.constant dense<0.000000e+00> : vector<1024x128xf32>
    %3 = tpu.matmul %1, %2, %cst {dimension_numbers = #tpu.dot_dimension_numbers<[1], [0], [0], [1], [0, 0, 1, 1], [], []>} : vector<1024x800xbf16>, vector<800x128xbf16>, vector<1024x128xf32> -> vector<1024x128xf32>
    %4 = vector.extract_strided_slice %3 {offsets = [0, 0], sizes = [256, 128], strides = [1, 1]} : vector<1024x128xf32> to vector<256x128xf32>
    %5 = vector.extract_strided_slice %3 {offsets = [256, 0], sizes = [256, 128], strides = [1, 1]} : vector<1024x128xf32> to vector<256x128xf32>
    %6 = arith.maximumf %4, %5 : vector<256x128xf32>
    %7 = vector.extract_strided_slice %3 {offsets = [512, 0], sizes = [256, 128], strides = [1, 1]} : vector<1024x128xf32> to vector<256x128xf32>
    %8 = vector.extract_strided_slice %3 {offsets = [768, 0], sizes = [256, 128], strides = [1, 1]} : vector<1024x128xf32> to vector<256x128xf32>
    %9 = arith.maximumf %7, %8 : vector<256x128xf32>
    %10 = arith.maximumf %6, %9 : vector<256x128xf32>
    %c0_4 = arith.constant 0 : index
    %c0_5 = arith.constant 0 : index
    %11 = vector.load %arg3[%c0_4, %c0_5] : memref<1x128xf32, #tpu.memory_space<vmem>>, vector<1x128xf32>
    %12 = vector.broadcast %11 : vector<1x128xf32> to vector<256x128xf32>
    %13 = arith.addf %10, %12 : vector<256x128xf32>
    %cst_6 = arith.constant 0.000000e+00 : f32
    %14 = vector.broadcast %cst_6 : f32 to vector<256x128xf32>
    %15 = arith.maximumf %13, %14 : vector<256x128xf32>
    %16 = arith.truncf %15 : vector<256x128xf32> to vector<256x128xbf16>
    %17 = vector.extract_strided_slice %16 {offsets = [0, 0], sizes = [16, 128], strides = [1, 1]} : vector<256x128xbf16> to vector<16x128xbf16>
    %c0_7 = arith.constant 0 : index
    %c0_8 = arith.constant 0 : index
    %c0_9 = arith.constant 0 : index
    %18 = vector.load %arg4[%c0_7, %c0_8, %c0_9] : memref<16x128x128xbf16, #tpu.memory_space<vmem>>, vector<1x128x128xbf16>
    %19 = vector.shape_cast %18 : vector<1x128x128xbf16> to vector<128x128xbf16>
    %cst_10 = arith.constant dense<0.000000e+00> : vector<16x128xf32>
    %20 = tpu.matmul %17, %19, %cst_10 {dimension_numbers = #tpu.dot_dimension_numbers<[1], [0], [0], [1], [0, 0, 1, 1], [], []>} : vector<16x128xbf16>, vector<128x128xbf16>, vector<16x128xf32> -> vector<16x128xf32>
    %21 = vector.extract_strided_slice %16 {offsets = [16, 0], sizes = [16, 128], strides = [1, 1]} : vector<256x128xbf16> to vector<16x128xbf16>
    %c1 = arith.constant 1 : index
    %c0_11 = arith.constant 0 : index
    %c0_12 = arith.constant 0 : index
    %22 = vector.load %arg4[%c1, %c0_11, %c0_12] : memref<16x128x128xbf16, #tpu.memory_space<vmem>>, vector<1x128x128xbf16>
    %23 = vector.shape_cast %22 : vector<1x128x128xbf16> to vector<128x128xbf16>
    %cst_13 = arith.constant dense<0.000000e+00> : vector<16x128xf32>
    %24 = tpu.matmul %21, %23, %cst_13 {dimension_numbers = #tpu.dot_dimension_numbers<[1], [0], [0], [1], [0, 0, 1, 1], [], []>} : vector<16x128xbf16>, vector<128x128xbf16>, vector<16x128xf32> -> vector<16x128xf32>
    %25 = arith.addf %20, %24 : vector<16x128xf32>
    %26 = vector.extract_strided_slice %16 {offsets = [32, 0], sizes = [16, 128], strides = [1, 1]} : vector<256x128xbf16> to vector<16x128xbf16>
    %c2 = arith.constant 2 : index
    %c0_14 = arith.constant 0 : index
    %c0_15 = arith.constant 0 : index
    %27 = vector.load %arg4[%c2, %c0_14, %c0_15] : memref<16x128x128xbf16, #tpu.memory_space<vmem>>, vector<1x128x128xbf16>
    %28 = vector.shape_cast %27 : vector<1x128x128xbf16> to vector<128x128xbf16>
    %cst_16 = arith.constant dense<0.000000e+00> : vector<16x128xf32>
    %29 = tpu.matmul %26, %28, %cst_16 {dimension_numbers = #tpu.dot_dimension_numbers<[1], [0], [0], [1], [0, 0, 1, 1], [], []>} : vector<16x128xbf16>, vector<128x128xbf16>, vector<16x128xf32> -> vector<16x128xf32>
    %30 = arith.addf %25, %29 : vector<16x128xf32>
    %31 = vector.extract_strided_slice %16 {offsets = [48, 0], sizes = [16, 128], strides = [1, 1]} : vector<256x128xbf16> to vector<16x128xbf16>
    %c3 = arith.constant 3 : index
    %c0_17 = arith.constant 0 : index
    %c0_18 = arith.constant 0 : index
    %32 = vector.load %arg4[%c3, %c0_17, %c0_18] : memref<16x128x128xbf16, #tpu.memory_space<vmem>>, vector<1x128x128xbf16>
    %33 = vector.shape_cast %32 : vector<1x128x128xbf16> to vector<128x128xbf16>
    %cst_19 = arith.constant dense<0.000000e+00> : vector<16x128xf32>
    %34 = tpu.matmul %31, %33, %cst_19 {dimension_numbers = #tpu.dot_dimension_numbers<[1], [0], [0], [1], [0, 0, 1, 1], [], []>} : vector<16x128xbf16>, vector<128x128xbf16>, vector<16x128xf32> -> vector<16x128xf32>
    %35 = arith.addf %30, %34 : vector<16x128xf32>
    %36 = vector.extract_strided_slice %16 {offsets = [64, 0], sizes = [16, 128], strides = [1, 1]} : vector<256x128xbf16> to vector<16x128xbf16>
    %c4 = arith.constant 4 : index
    %c0_20 = arith.constant 0 : index
    %c0_21 = arith.constant 0 : index
    %37 = vector.load %arg4[%c4, %c0_20, %c0_21] : memref<16x128x128xbf16, #tpu.memory_space<vmem>>, vector<1x128x128xbf16>
    %38 = vector.shape_cast %37 : vector<1x128x128xbf16> to vector<128x128xbf16>
    %cst_22 = arith.constant dense<0.000000e+00> : vector<16x128xf32>
    %39 = tpu.matmul %36, %38, %cst_22 {dimension_numbers = #tpu.dot_dimension_numbers<[1], [0], [0], [1], [0, 0, 1, 1], [], []>} : vector<16x128xbf16>, vector<128x128xbf16>, vector<16x128xf32> -> vector<16x128xf32>
    %40 = arith.addf %35, %39 : vector<16x128xf32>
    %41 = vector.extract_strided_slice %16 {offsets = [80, 0], sizes = [16, 128], strides = [1, 1]} : vector<256x128xbf16> to vector<16x128xbf16>
    %c5 = arith.constant 5 : index
    %c0_23 = arith.constant 0 : index
    %c0_24 = arith.constant 0 : index
    %42 = vector.load %arg4[%c5, %c0_23, %c0_24] : memref<16x128x128xbf16, #tpu.memory_space<vmem>>, vector<1x128x128xbf16>
    %43 = vector.shape_cast %42 : vector<1x128x128xbf16> to vector<128x128xbf16>
    %cst_25 = arith.constant dense<0.000000e+00> : vector<16x128xf32>
    %44 = tpu.matmul %41, %43, %cst_25 {dimension_numbers = #tpu.dot_dimension_numbers<[1], [0], [0], [1], [0, 0, 1, 1], [], []>} : vector<16x128xbf16>, vector<128x128xbf16>, vector<16x128xf32> -> vector<16x128xf32>
    %45 = arith.addf %40, %44 : vector<16x128xf32>
    %46 = vector.extract_strided_slice %16 {offsets = [96, 0], sizes = [16, 128], strides = [1, 1]} : vector<256x128xbf16> to vector<16x128xbf16>
    %c6 = arith.constant 6 : index
    %c0_26 = arith.constant 0 : index
    %c0_27 = arith.constant 0 : index
    %47 = vector.load %arg4[%c6, %c0_26, %c0_27] : memref<16x128x128xbf16, #tpu.memory_space<vmem>>, vector<1x128x128xbf16>
    %48 = vector.shape_cast %47 : vector<1x128x128xbf16> to vector<128x128xbf16>
    %cst_28 = arith.constant dense<0.000000e+00> : vector<16x128xf32>
    %49 = tpu.matmul %46, %48, %cst_28 {dimension_numbers = #tpu.dot_dimension_numbers<[1], [0], [0], [1], [0, 0, 1, 1], [], []>} : vector<16x128xbf16>, vector<128x128xbf16>, vector<16x128xf32> -> vector<16x128xf32>
    %50 = arith.addf %45, %49 : vector<16x128xf32>
    %51 = vector.extract_strided_slice %16 {offsets = [112, 0], sizes = [16, 128], strides = [1, 1]} : vector<256x128xbf16> to vector<16x128xbf16>
    %c7 = arith.constant 7 : index
    %c0_29 = arith.constant 0 : index
    %c0_30 = arith.constant 0 : index
    %52 = vector.load %arg4[%c7, %c0_29, %c0_30] : memref<16x128x128xbf16, #tpu.memory_space<vmem>>, vector<1x128x128xbf16>
    %53 = vector.shape_cast %52 : vector<1x128x128xbf16> to vector<128x128xbf16>
    %cst_31 = arith.constant dense<0.000000e+00> : vector<16x128xf32>
    %54 = tpu.matmul %51, %53, %cst_31 {dimension_numbers = #tpu.dot_dimension_numbers<[1], [0], [0], [1], [0, 0, 1, 1], [], []>} : vector<16x128xbf16>, vector<128x128xbf16>, vector<16x128xf32> -> vector<16x128xf32>
    %55 = arith.addf %50, %54 : vector<16x128xf32>
    %56 = vector.extract_strided_slice %16 {offsets = [128, 0], sizes = [16, 128], strides = [1, 1]} : vector<256x128xbf16> to vector<16x128xbf16>
    %c8 = arith.constant 8 : index
    %c0_32 = arith.constant 0 : index
    %c0_33 = arith.constant 0 : index
    %57 = vector.load %arg4[%c8, %c0_32, %c0_33] : memref<16x128x128xbf16, #tpu.memory_space<vmem>>, vector<1x128x128xbf16>
    %58 = vector.shape_cast %57 : vector<1x128x128xbf16> to vector<128x128xbf16>
    %cst_34 = arith.constant dense<0.000000e+00> : vector<16x128xf32>
    %59 = tpu.matmul %56, %58, %cst_34 {dimension_numbers = #tpu.dot_dimension_numbers<[1], [0], [0], [1], [0, 0, 1, 1], [], []>} : vector<16x128xbf16>, vector<128x128xbf16>, vector<16x128xf32> -> vector<16x128xf32>
    %60 = arith.addf %55, %59 : vector<16x128xf32>
    %61 = vector.extract_strided_slice %16 {offsets = [144, 0], sizes = [16, 128], strides = [1, 1]} : vector<256x128xbf16> to vector<16x128xbf16>
    %c9 = arith.constant 9 : index
    %c0_35 = arith.constant 0 : index
    %c0_36 = arith.constant 0 : index
    %62 = vector.load %arg4[%c9, %c0_35, %c0_36] : memref<16x128x128xbf16, #tpu.memory_space<vmem>>, vector<1x128x128xbf16>
    %63 = vector.shape_cast %62 : vector<1x128x128xbf16> to vector<128x128xbf16>
    %cst_37 = arith.constant dense<0.000000e+00> : vector<16x128xf32>
    %64 = tpu.matmul %61, %63, %cst_37 {dimension_numbers = #tpu.dot_dimension_numbers<[1], [0], [0], [1], [0, 0, 1, 1], [], []>} : vector<16x128xbf16>, vector<128x128xbf16>, vector<16x128xf32> -> vector<16x128xf32>
    %65 = arith.addf %60, %64 : vector<16x128xf32>
    %66 = vector.extract_strided_slice %16 {offsets = [160, 0], sizes = [16, 128], strides = [1, 1]} : vector<256x128xbf16> to vector<16x128xbf16>
    %c10 = arith.constant 10 : index
    %c0_38 = arith.constant 0 : index
    %c0_39 = arith.constant 0 : index
    %67 = vector.load %arg4[%c10, %c0_38, %c0_39] : memref<16x128x128xbf16, #tpu.memory_space<vmem>>, vector<1x128x128xbf16>
    %68 = vector.shape_cast %67 : vector<1x128x128xbf16> to vector<128x128xbf16>
    %cst_40 = arith.constant dense<0.000000e+00> : vector<16x128xf32>
    %69 = tpu.matmul %66, %68, %cst_40 {dimension_numbers = #tpu.dot_dimension_numbers<[1], [0], [0], [1], [0, 0, 1, 1], [], []>} : vector<16x128xbf16>, vector<128x128xbf16>, vector<16x128xf32> -> vector<16x128xf32>
    %70 = arith.addf %65, %69 : vector<16x128xf32>
    %71 = vector.extract_strided_slice %16 {offsets = [176, 0], sizes = [16, 128], strides = [1, 1]} : vector<256x128xbf16> to vector<16x128xbf16>
    %c11 = arith.constant 11 : index
    %c0_41 = arith.constant 0 : index
    %c0_42 = arith.constant 0 : index
    %72 = vector.load %arg4[%c11, %c0_41, %c0_42] : memref<16x128x128xbf16, #tpu.memory_space<vmem>>, vector<1x128x128xbf16>
    %73 = vector.shape_cast %72 : vector<1x128x128xbf16> to vector<128x128xbf16>
    %cst_43 = arith.constant dense<0.000000e+00> : vector<16x128xf32>
    %74 = tpu.matmul %71, %73, %cst_43 {dimension_numbers = #tpu.dot_dimension_numbers<[1], [0], [0], [1], [0, 0, 1, 1], [], []>} : vector<16x128xbf16>, vector<128x128xbf16>, vector<16x128xf32> -> vector<16x128xf32>
    %75 = arith.addf %70, %74 : vector<16x128xf32>
    %76 = vector.extract_strided_slice %16 {offsets = [192, 0], sizes = [16, 128], strides = [1, 1]} : vector<256x128xbf16> to vector<16x128xbf16>
    %c12 = arith.constant 12 : index
    %c0_44 = arith.constant 0 : index
    %c0_45 = arith.constant 0 : index
    %77 = vector.load %arg4[%c12, %c0_44, %c0_45] : memref<16x128x128xbf16, #tpu.memory_space<vmem>>, vector<1x128x128xbf16>
    %78 = vector.shape_cast %77 : vector<1x128x128xbf16> to vector<128x128xbf16>
    %cst_46 = arith.constant dense<0.000000e+00> : vector<16x128xf32>
    %79 = tpu.matmul %76, %78, %cst_46 {dimension_numbers = #tpu.dot_dimension_numbers<[1], [0], [0], [1], [0, 0, 1, 1], [], []>} : vector<16x128xbf16>, vector<128x128xbf16>, vector<16x128xf32> -> vector<16x128xf32>
    %80 = arith.addf %75, %79 : vector<16x128xf32>
    %81 = vector.extract_strided_slice %16 {offsets = [208, 0], sizes = [16, 128], strides = [1, 1]} : vector<256x128xbf16> to vector<16x128xbf16>
    %c13 = arith.constant 13 : index
    %c0_47 = arith.constant 0 : index
    %c0_48 = arith.constant 0 : index
    %82 = vector.load %arg4[%c13, %c0_47, %c0_48] : memref<16x128x128xbf16, #tpu.memory_space<vmem>>, vector<1x128x128xbf16>
    %83 = vector.shape_cast %82 : vector<1x128x128xbf16> to vector<128x128xbf16>
    %cst_49 = arith.constant dense<0.000000e+00> : vector<16x128xf32>
    %84 = tpu.matmul %81, %83, %cst_49 {dimension_numbers = #tpu.dot_dimension_numbers<[1], [0], [0], [1], [0, 0, 1, 1], [], []>} : vector<16x128xbf16>, vector<128x128xbf16>, vector<16x128xf32> -> vector<16x128xf32>
    %85 = arith.addf %80, %84 : vector<16x128xf32>
    %86 = vector.extract_strided_slice %16 {offsets = [224, 0], sizes = [16, 128], strides = [1, 1]} : vector<256x128xbf16> to vector<16x128xbf16>
    %c14 = arith.constant 14 : index
    %c0_50 = arith.constant 0 : index
    %c0_51 = arith.constant 0 : index
    %87 = vector.load %arg4[%c14, %c0_50, %c0_51] : memref<16x128x128xbf16, #tpu.memory_space<vmem>>, vector<1x128x128xbf16>
    %88 = vector.shape_cast %87 : vector<1x128x128xbf16> to vector<128x128xbf16>
    %cst_52 = arith.constant dense<0.000000e+00> : vector<16x128xf32>
    %89 = tpu.matmul %86, %88, %cst_52 {dimension_numbers = #tpu.dot_dimension_numbers<[1], [0], [0], [1], [0, 0, 1, 1], [], []>} : vector<16x128xbf16>, vector<128x128xbf16>, vector<16x128xf32> -> vector<16x128xf32>
    %90 = arith.addf %85, %89 : vector<16x128xf32>
    %91 = vector.extract_strided_slice %16 {offsets = [240, 0], sizes = [16, 128], strides = [1, 1]} : vector<256x128xbf16> to vector<16x128xbf16>
    %c15 = arith.constant 15 : index
    %c0_53 = arith.constant 0 : index
    %c0_54 = arith.constant 0 : index
    %92 = vector.load %arg4[%c15, %c0_53, %c0_54] : memref<16x128x128xbf16, #tpu.memory_space<vmem>>, vector<1x128x128xbf16>
    %93 = vector.shape_cast %92 : vector<1x128x128xbf16> to vector<128x128xbf16>
    %cst_55 = arith.constant dense<0.000000e+00> : vector<16x128xf32>
    %94 = tpu.matmul %91, %93, %cst_55 {dimension_numbers = #tpu.dot_dimension_numbers<[1], [0], [0], [1], [0, 0, 1, 1], [], []>} : vector<16x128xbf16>, vector<128x128xbf16>, vector<16x128xf32> -> vector<16x128xf32>
    %95 = arith.addf %90, %94 : vector<16x128xf32>
    %c0_56 = arith.constant 0 : index
    %c0_57 = arith.constant 0 : index
    %96 = vector.load %arg5[%c0_56, %c0_57] : memref<1x128xf32, #tpu.memory_space<vmem>>, vector<1x128xf32>
    %97 = vector.broadcast %96 : vector<1x128xf32> to vector<16x128xf32>
    %98 = arith.addf %95, %97 : vector<16x128xf32>
    %c0_58 = arith.constant 0 : index
    %c0_59 = arith.constant 0 : index
    %99 = vector.load %arg6[%c0_58, %c0_59] : memref<16x128xf32, #tpu.memory_space<vmem>>, vector<16x128xf32>
    tpu.vector_store %arg6[%c0_58, %c0_59], %98 {strides = array<i32>} : memref<16x128xf32, #tpu.memory_space<vmem>>, vector<16x128xf32>,
    return
  }
  func.func @transform_0(%arg0: i32) -> (i32, i32, i32) {
    %c0_i32 = arith.constant 0 : i32
    %c0_i32_0 = arith.constant 0 : i32
    %c0_i32_1 = arith.constant 0 : i32
    return %c0_i32, %arg0, %c0_i32_0 : i32, i32, i32
  }
  func.func @transform_1(%arg0: i32) -> (i32, i32) {
    %c0_i32 = arith.constant 0 : i32
    %c0_i32_0 = arith.constant 0 : i32
    %c0_i32_1 = arith.constant 0 : i32
    return %c0_i32, %c0_i32_0 : i32, i32
  }
  func.func @transform_2(%arg0: i32) -> (i32, i32) {
    %c0_i32 = arith.constant 0 : i32
    %c0_i32_0 = arith.constant 0 : i32
    %c0_i32_1 = arith.constant 0 : i32
    return %c0_i32, %c0_i32_0 : i32, i32
  }
  func.func @transform_3(%arg0: i32) -> (i32, i32, i32) {
    %c0_i32 = arith.constant 0 : i32
    %c0_i32_0 = arith.constant 0 : i32
    %c0_i32_1 = arith.constant 0 : i32
    %c0_i32_2 = arith.constant 0 : i32
    return %c0_i32, %c0_i32_0, %c0_i32_1 : i32, i32, i32
  }
  func.func @transform_4(%arg0: i32) -> (i32, i32) {
    %c0_i32 = arith.constant 0 : i32
    %c0_i32_0 = arith.constant 0 : i32
    %c0_i32_1 = arith.constant 0 : i32
    return %c0_i32, %c0_i32_0 : i32, i32
  }
  func.func @transform_5(%arg0: i32) -> (i32, i32) {
    %c0_i32 = arith.constant 0 : i32
    %c0_i32_0 = arith.constant 0 : i32
    return %arg0, %c0_i32 : i32, i32
  }
}

</mosaic_0001>

<bundles_post_ra>
// kernel: cnn_forward.2
= control target key start
LH: loop header
LB: loop body
LE: loop exit
PB: predicated region body
PF: predicated region fallthrough
CT: control target
= control target key end

     0   :  { %s6493_s12 = smov 0   ;;  %s6495_s13 = smov 0   ;;  %s7256_s0 = inlined_call_operand.vmem [shape: bf16[4,4608,25], index: 0, kind: input, shape index: {}]   ;;  %s7257_s1 = inlined_call_operand.vmem [shape: bf16[25,128], index: 1, kind: input, shape index: {}]   ;;  %s7258_s2 = inlined_call_operand.vmem [shape: f32[1,128], index: 2, kind: input, shape index: {}]   ;;  %s7259_s3 = inlined_call_operand.vmem [shape: bf16[4608,128], index: 3, kind: output, shape index: {}]  }
   0x1   :  { %s6497_s14 = smov 0  }
   0x2 LB: > { %s5314_s15 = sadd.s32 4294967295, %s6470_s14   ;;  %s6510_s16 = sadd.s32 1, %s6470_s14   ;;  %s6470_s14 = sphi %s6497_s14, %s7262_s14   ;;  %s6466_s13 = sphi %s6495_s13, %s7261_s13   ;;  %s6462_s12 = sphi %s6493_s12, %s7260_s12  }
   0x3   : > { %s17_s17 = ssub.s32 %s6470_s14, %s6510_s16  ;;  %s20_s18 = sadd.s32 1, %s6466_s13 }
   0x4   : > { %p18_p0 = scmp.eq.s32.totalorder %s17_s17, 0  ;;  %p27_p1 = scmp.ne.s32.totalorder %s6466_s13, %s6462_s12 }
   0x5   : > { %p28_p2 = scmp.eq.s32.totalorder %s6470_s14, 0  ;;  %p5317_p4 = scmp.ge.s32.totalorder %s6470_s14, 8 }
   0x6   : > { %s6519_s19 = scalar_select %p18_p0, %s6466_s13, %s20_s18  }
   0x7   : > { %p29_p3 = por %p28_p2, %p27_p1  ;;  %127 = sbr.rel (%p5317_p4) target bundleno = 161 (0xa1), region = 24 }
   0xc   : > { %130 = sbr.rel (!%p29_p3) target bundleno = 161 (0xa1), region = 28  ;;  %s132_s20 = sand.u32 (%p29_p3), 1, %s6466_s13  }
   0xd   : > { %s6051_s21 = smul.u32 (%p29_p3), 288, %s6470_s14 }
   0xe   : > { %s6419_s22 = smul.u32 (%p29_p3), 1152, %s132_s20 }
   0xf   : > { %s6527_s25 = scalar_lea.vmem (%p29_p3), %s7256_s0, %s6051_s21 }
  0x10   : > { %v154_v0 = vld [vmem:[%s6527_s25] sm:$0xff] (%p29_p3)   ;;  %v158_v1 = vld [vmem:[%s6527_s25 + $0x8] sm:$0xff] (%p29_p3)   ;;  %v162_v2 = vld [vmem:[%s6527_s25 + $0x10] sm:$0xff] (%p29_p3)   ;;  %s6532_s26 = scalar_lea.vmem (%p29_p3), [#allocation2], %s6419_s22 }
  0x11   : > { %155 = vst [vmem:[%s6532_s26] sm:$0xff] %v154_v0   ;;  %v166_v3 = vld [vmem:[%s6527_s25 + $0x18] sm:$0xff]   ;;  %v170_v4 = vld [vmem:[%s6527_s25 + $0x20] sm:$0xff]   ;;  %v174_v5 = vld [vmem:[%s6527_s25 + $0x28] sm:$0xff]  }
  0x12   : > { %159 = vst [vmem:[%s6532_s26 + $0x8] sm:$0xff] %v158_v1   ;;  %v178_v6 = vld [vmem:[%s6527_s25 + $0x30] sm:$0xff]   ;;  %v182_v7 = vld [vmem:[%s6527_s25 + $0x38] sm:$0xff]   ;;  %v186_v8 = vld [vmem:[%s6527_s25 + $0x40] sm:$0xff]  }
  0x13   : > { %163 = vst [vmem:[%s6532_s26 + $0x10] sm:$0xff] %v162_v2   ;;  %v190_v9 = vld [vmem:[%s6527_s25 + $0x48] sm:$0xff]   ;;  %v194_v10 = vld [vmem:[%s6527_s25 + $0x50] sm:$0xff]   ;;  %v198_v11 = vld [vmem:[%s6527_s25 + $0x58] sm:$0xff]  }
  0x14   : > { %167 = vst [vmem:[%s6532_s26 + $0x18] sm:$0xff] %v166_v3   ;;  %v202_v12 = vld [vmem:[%s6527_s25 + $0x60] sm:$0xff]   ;;  %v206_v13 = vld [vmem:[%s6527_s25 + $0x68] sm:$0xff]   ;;  %v210_v14 = vld [vmem:[%s6527_s25 + $0x70] sm:$0xff]  }
  0x15   : > { %171 = vst [vmem:[%s6532_s26 + $0x20] sm:$0xff] %v170_v4   ;;  %v214_v15 = vld [vmem:[%s6527_s25 + $0x78] sm:$0xff]   ;;  %v218_v16 = vld [vmem:[%s6527_s25 + $0x80] sm:$0xff]   ;;  %v222_v17 = vld [vmem:[%s6527_s25 + $0x88] sm:$0xff]  }
  0x16   : > { %175 = vst [vmem:[%s6532_s26 + $0x28] sm:$0xff] %v174_v5   ;;  %v226_v18 = vld [vmem:[%s6527_s25 + $0x90] sm:$0xff]   ;;  %v230_v19 = vld [vmem:[%s6527_s25 + $0x98] sm:$0xff]   ;;  %v234_v20 = vld [vmem:[%s6527_s25 + $0xa0] sm:$0xff]  }
  0x17   : > { %179 = vst [vmem:[%s6532_s26 + $0x30] sm:$0xff] %v178_v6   ;;  %v238_v21 = vld [vmem:[%s6527_s25 + $0xa8] sm:$0xff]   ;;  %v242_v22 = vld [vmem:[%s6527_s25 + $0xb0] sm:$0xff]   ;;  %v246_v23 = vld [vmem:[%s6527_s25 + $0xb8] sm:$0xff]  }
  0x18   : > { %183 = vst [vmem:[%s6532_s26 + $0x38] sm:$0xff] %v182_v7   ;;  %v250_v24 = vld [vmem:[%s6527_s25 + $0xc0] sm:$0xff]   ;;  %v254_v25 = vld [vmem:[%s6527_s25 + $0xc8] sm:$0xff]   ;;  %v258_v26 = vld [vmem:[%s6527_s25 + $0xd0] sm:$0xff]  }
  0x19   : > { %187 = vst [vmem:[%s6532_s26 + $0x40] sm:$0xff] %v186_v8   ;;  %v262_v27 = vld [vmem:[%s6527_s25 + $0xd8] sm:$0xff]   ;;  %v266_v28 = vld [vmem:[%s6527_s25 + $0xe0] sm:$0xff]   ;;  %v270_v29 = vld [vmem:[%s6527_s25 + $0xe8] sm:$0xff]  }
  0x1a   : > { %191 = vst [vmem:[%s6532_s26 + $0x48] sm:$0xff] %v190_v9   ;;  %v274_v30 = vld [vmem:[%s6527_s25 + $0xf0] sm:$0xff]   ;;  %v278_v31 = vld [vmem:[%s6527_s25 + $0xf8] sm:$0xff]   ;;  %v282_v32 = vld [vmem:[%s6527_s25 + $0x100] sm:$0xff]  }
  0x1b   : > { %195 = vst [vmem:[%s6532_s26 + $0x50] sm:$0xff] %v194_v10   ;;  %v286_v33 = vld [vmem:[%s6527_s25 + $0x108] sm:$0xff]   ;;  %v290_v34 = vld [vmem:[%s6527_s25 + $0x110] sm:$0xff]   ;;  %v294_v35 = vld [vmem:[%s6527_s25 + $0x118] sm:$0xff]  }
  0x1c   : > { %199 = vst [vmem:[%s6532_s26 + $0x58] sm:$0xff] %v198_v11   ;;  %v298_v36 = vld [vmem:[%s6527_s25 + $0x900] sm:$0xff]   ;;  %v302_v37 = vld [vmem:[%s6527_s25 + $0x908] sm:$0xff]   ;;  %v306_v38 = vld [vmem:[%s6527_s25 + $0x910] sm:$0xff]  }
  0x1d   : > { %203 = vst [vmem:[%s6532_s26 + $0x60] sm:$0xff] %v202_v12   ;;  %v310_v39 = vld [vmem:[%s6527_s25 + $0x918] sm:$0xff]   ;;  %v314_v40 = vld [vmem:[%s6527_s25 + $0x920] sm:$0xff]   ;;  %v318_v41 = vld [vmem:[%s6527_s25 + $0x928] sm:$0xff]  }
  0x1e   : > { %207 = vst [vmem:[%s6532_s26 + $0x68] sm:$0xff] %v206_v13   ;;  %v322_v42 = vld [vmem:[%s6527_s25 + $0x930] sm:$0xff]   ;;  %v326_v43 = vld [vmem:[%s6527_s25 + $0x938] sm:$0xff]   ;;  %v330_v44 = vld [vmem:[%s6527_s25 + $0x940] sm:$0xff]  }
  0x1f   : > { %211 = vst [vmem:[%s6532_s26 + $0x70] sm:$0xff] %v210_v14   ;;  %v334_v45 = vld [vmem:[%s6527_s25 + $0x948] sm:$0xff]   ;;  %v338_v46 = vld [vmem:[%s6527_s25 + $0x950] sm:$0xff]   ;;  %v342_v47 = vld [vmem:[%s6527_s25 + $0x958] sm:$0xff]  }
  0x20   : > { %215 = vst [vmem:[%s6532_s26 + $0x78] sm:$0xff] %v214_v15   ;;  %v346_v48 = vld [vmem:[%s6527_s25 + $0x960] sm:$0xff]   ;;  %v350_v49 = vld [vmem:[%s6527_s25 + $0x968] sm:$0xff]   ;;  %v354_v50 = vld [vmem:[%s6527_s25 + $0x970] sm:$0xff]  }
  0x21   : > { %219 = vst [vmem:[%s6532_s26 + $0x80] sm:$0xff] %v218_v16   ;;  %v358_v51 = vld [vmem:[%s6527_s25 + $0x978] sm:$0xff]   ;;  %v362_v52 = vld [vmem:[%s6527_s25 + $0x980] sm:$0xff]   ;;  %v366_v53 = vld [vmem:[%s6527_s25 + $0x988] sm:$0xff]  }
  0x22   : > { %223 = vst [vmem:[%s6532_s26 + $0x88] sm:$0xff] %v222_v17   ;;  %v370_v54 = vld [vmem:[%s6527_s25 + $0x990] sm:$0xff]   ;;  %v374_v55 = vld [vmem:[%s6527_s25 + $0x998] sm:$0xff]   ;;  %v378_v56 = vld [vmem:[%s6527_s25 + $0x9a0] sm:$0xff]  }
  0x23   : > { %227 = vst [vmem:[%s6532_s26 + $0x90] sm:$0xff] %v226_v18   ;;  %v382_v57 = vld [vmem:[%s6527_s25 + $0x9a8] sm:$0xff]   ;;  %v386_v58 = vld [vmem:[%s6527_s25 + $0x9b0] sm:$0xff]   ;;  %v390_v59 = vld [vmem:[%s6527_s25 + $0x9b8] sm:$0xff]  }
  0x24   : > { %231 = vst [vmem:[%s6532_s26 + $0x98] sm:$0xff] %v230_v19   ;;  %v394_v60 = vld [vmem:[%s6527_s25 + $0x9c0] sm:$0xff]   ;;  %v398_v61 = vld [vmem:[%s6527_s25 + $0x9c8] sm:$0xff]   ;;  %v402_v62 = vld [vmem:[%s6527_s25 + $0x9d0] sm:$0xff]  }
  0x25   : > { %235 = vst [vmem:[%s6532_s26 + $0xa0] sm:$0xff] %v234_v20   ;;  %v406_v63 = vld [vmem:[%s6527_s25 + $0x9d8] sm:$0xff]   ;;  %v410_v0 = vld [vmem:[%s6527_s25 + $0x9e0] sm:$0xff]   ;;  %v414_v1 = vld [vmem:[%s6527_s25 + $0x9e8] sm:$0xff]  }
  0x26   : > { %239 = vst [vmem:[%s6532_s26 + $0xa8] sm:$0xff] %v238_v21   ;;  %v418_v2 = vld [vmem:[%s6527_s25 + $0x9f0] sm:$0xff]   ;;  %v422_v3 = vld [vmem:[%s6527_s25 + $0x9f8] sm:$0xff]   ;;  %v426_v4 = vld [vmem:[%s6527_s25 + $0xa00] sm:$0xff]  }
  0x27   : > { %243 = vst [vmem:[%s6532_s26 + $0xb0] sm:$0xff] %v242_v22   ;;  %v430_v5 = vld [vmem:[%s6527_s25 + $0xa08] sm:$0xff]   ;;  %v434_v6 = vld [vmem:[%s6527_s25 + $0xa10] sm:$0xff]   ;;  %v438_v7 = vld [vmem:[%s6527_s25 + $0xa18] sm:$0xff]  }
  0x28   : > { %247 = vst [vmem:[%s6532_s26 + $0xb8] sm:$0xff] %v246_v23   ;;  %v442_v8 = vld [vmem:[%s6527_s25 + $0x1200] sm:$0xff]   ;;  %v446_v9 = vld [vmem:[%s6527_s25 + $0x1208] sm:$0xff]   ;;  %v450_v10 = vld [vmem:[%s6527_s25 + $0x1210] sm:$0xff]  }
  0x29   : > { %251 = vst [vmem:[%s6532_s26 + $0xc0] sm:$0xff] %v250_v24   ;;  %v454_v11 = vld [vmem:[%s6527_s25 + $0x1218] sm:$0xff]   ;;  %v458_v12 = vld [vmem:[%s6527_s25 + $0x1220] sm:$0xff]   ;;  %v462_v13 = vld [vmem:[%s6527_s25 + $0x1228] sm:$0xff]  }
  0x2a   : > { %255 = vst [vmem:[%s6532_s26 + $0xc8] sm:$0xff] %v254_v25   ;;  %v466_v14 = vld [vmem:[%s6527_s25 + $0x1230] sm:$0xff]   ;;  %v470_v15 = vld [vmem:[%s6527_s25 + $0x1238] sm:$0xff]   ;;  %v474_v16 = vld [vmem:[%s6527_s25 + $0x1240] sm:$0xff]  }
  0x2b   : > { %259 = vst [vmem:[%s6532_s26 + $0xd0] sm:$0xff] %v258_v26   ;;  %v478_v17 = vld [vmem:[%s6527_s25 + $0x1248] sm:$0xff]   ;;  %v482_v18 = vld [vmem:[%s6527_s25 + $0x1250] sm:$0xff]   ;;  %v486_v19 = vld [vmem:[%s6527_s25 + $0x1258] sm:$0xff]  }
  0x2c   : > { %263 = vst [vmem:[%s6532_s26 + $0xd8] sm:$0xff] %v262_v27   ;;  %v490_v20 = vld [vmem:[%s6527_s25 + $0x1260] sm:$0xff]   ;;  %v494_v21 = vld [vmem:[%s6527_s25 + $0x1268] sm:$0xff]   ;;  %v498_v22 = vld [vmem:[%s6527_s25 + $0x1270] sm:$0xff]  }
  0x2d   : > { %267 = vst [vmem:[%s6532_s26 + $0xe0] sm:$0xff] %v266_v28   ;;  %v502_v23 = vld [vmem:[%s6527_s25 + $0x1278] sm:$0xff]   ;;  %v506_v24 = vld [vmem:[%s6527_s25 + $0x1280] sm:$0xff]   ;;  %v510_v25 = vld [vmem:[%s6527_s25 + $0x1288] sm:$0xff]  }
  0x2e   : > { %271 = vst [vmem:[%s6532_s26 + $0xe8] sm:$0xff] %v270_v29   ;;  %v514_v26 = vld [vmem:[%s6527_s25 + $0x1290] sm:$0xff]   ;;  %v518_v27 = vld [vmem:[%s6527_s25 + $0x1298] sm:$0xff]   ;;  %v522_v28 = vld [vmem:[%s6527_s25 + $0x12a0] sm:$0xff]  }
  0x2f   : > { %275 = vst [vmem:[%s6532_s26 + $0xf0] sm:$0xff] %v274_v30   ;;  %v526_v29 = vld [vmem:[%s6527_s25 + $0x12a8] sm:$0xff]   ;;  %v530_v30 = vld [vmem:[%s6527_s25 + $0x12b0] sm:$0xff]  }
  0x30   : > { %279 = vst [vmem:[%s6532_s26 + $0xf8] sm:$0xff] %v278_v31   ;;  %v534_v31 = vld [vmem:[%s6527_s25 + $0x12b8] sm:$0xff]  }
  0x31   : > { %283 = vst [vmem:[%s6532_s26 + $0x100] sm:$0xff] %v282_v32   ;;  %v538_v32 = vld [vmem:[%s6527_s25 + $0x12c0] sm:$0xff]  }
  0x32   : > { %287 = vst [vmem:[%s6532_s26 + $0x108] sm:$0xff] %v286_v33   ;;  %v542_v33 = vld [vmem:[%s6527_s25 + $0x12c8] sm:$0xff]  }
  0x33   : > { %291 = vst [vmem:[%s6532_s26 + $0x110] sm:$0xff] %v290_v34   ;;  %v546_v34 = vld [vmem:[%s6527_s25 + $0x12d0] sm:$0xff]  }
  0x34   : > { %295 = vst [vmem:[%s6532_s26 + $0x118] sm:$0xff] %v294_v35   ;;  %v550_v35 = vld [vmem:[%s6527_s25 + $0x12d8] sm:$0xff]  }
  0x35   : > { %299 = vst [vmem:[%s6532_s26 + $0x120] sm:$0xff] %v298_v36   ;;  %v554_v36 = vld [vmem:[%s6527_s25 + $0x12e0] sm:$0xff]  }
  0x36   : > { %303 = vst [vmem:[%s6532_s26 + $0x128] sm:$0xff] %v302_v37   ;;  %v558_v37 = vld [vmem:[%s6527_s25 + $0x12e8] sm:$0xff]  }
  0x37   : > { %307 = vst [vmem:[%s6532_s26 + $0x130] sm:$0xff] %v306_v38   ;;  %v562_v38 = vld [vmem:[%s6527_s25 + $0x12f0] sm:$0xff]  }
  0x38   : > { %311 = vst [vmem:[%s6532_s26 + $0x138] sm:$0xff] %v310_v39   ;;  %v566_v39 = vld [vmem:[%s6527_s25 + $0x12f8] sm:$0xff]  }
  0x39   : > { %315 = vst [vmem:[%s6532_s26 + $0x140] sm:$0xff] %v314_v40   ;;  %v570_v40 = vld [vmem:[%s6527_s25 + $0x1300] sm:$0xff]  }
  0x3a   : > { %319 = vst [vmem:[%s6532_s26 + $0x148] sm:$0xff] %v318_v41   ;;  %v574_v41 = vld [vmem:[%s6527_s25 + $0x1308] sm:$0xff]  }
  0x3b   : > { %323 = vst [vmem:[%s6532_s26 + $0x150] sm:$0xff] %v322_v42   ;;  %v578_v42 = vld [vmem:[%s6527_s25 + $0x1310] sm:$0xff]  }
  0x3c   : > { %327 = vst [vmem:[%s6532_s26 + $0x158] sm:$0xff] %v326_v43   ;;  %v582_v43 = vld [vmem:[%s6527_s25 + $0x1318] sm:$0xff]  }
  0x3d   : > { %331 = vst [vmem:[%s6532_s26 + $0x160] sm:$0xff] %v330_v44   ;;  %v586_v44 = vld [vmem:[%s6527_s25 + $0x1b00] sm:$0xff]  }
  0x3e   : > { %335 = vst [vmem:[%s6532_s26 + $0x168] sm:$0xff] %v334_v45   ;;  %v590_v45 = vld [vmem:[%s6527_s25 + $0x1b08] sm:$0xff]  }
  0x3f   : > { %339 = vst [vmem:[%s6532_s26 + $0x170] sm:$0xff] %v338_v46   ;;  %v594_v46 = vld [vmem:[%s6527_s25 + $0x1b10] sm:$0xff]  }
  0x40   : > { %343 = vst [vmem:[%s6532_s26 + $0x178] sm:$0xff] %v342_v47   ;;  %v598_v47 = vld [vmem:[%s6527_s25 + $0x1b18] sm:$0xff]  }
  0x41   : > { %347 = vst [vmem:[%s6532_s26 + $0x180] sm:$0xff] %v346_v48   ;;  %v602_v48 = vld [vmem:[%s6527_s25 + $0x1b20] sm:$0xff]  }
  0x42   : > { %351 = vst [vmem:[%s6532_s26 + $0x188] sm:$0xff] %v350_v49   ;;  %v606_v49 = vld [vmem:[%s6527_s25 + $0x1b28] sm:$0xff]  }
  0x43   : > { %355 = vst [vmem:[%s6532_s26 + $0x190] sm:$0xff] %v354_v50   ;;  %v610_v50 = vld [vmem:[%s6527_s25 + $0x1b30] sm:$0xff]  }
  0x44   : > { %359 = vst [vmem:[%s6532_s26 + $0x198] sm:$0xff] %v358_v51   ;;  %v614_v51 = vld [vmem:[%s6527_s25 + $0x1b38] sm:$0xff]  }
  0x45   : > { %363 = vst [vmem:[%s6532_s26 + $0x1a0] sm:$0xff] %v362_v52   ;;  %v618_v52 = vld [vmem:[%s6527_s25 + $0x1b40] sm:$0xff]  }
  0x46   : > { %367 = vst [vmem:[%s6532_s26 + $0x1a8] sm:$0xff] %v366_v53   ;;  %v622_v53 = vld [vmem:[%s6527_s25 + $0x1b48] sm:$0xff]  }
  0x47   : > { %371 = vst [vmem:[%s6532_s26 + $0x1b0] sm:$0xff] %v370_v54   ;;  %v626_v54 = vld [vmem:[%s6527_s25 + $0x1b50] sm:$0xff]  }
  0x48   : > { %375 = vst [vmem:[%s6532_s26 + $0x1b8] sm:$0xff] %v374_v55   ;;  %v630_v55 = vld [vmem:[%s6527_s25 + $0x1b58] sm:$0xff]  }
  0x49   : > { %379 = vst [vmem:[%s6532_s26 + $0x1c0] sm:$0xff] %v378_v56   ;;  %v634_v56 = vld [vmem:[%s6527_s25 + $0x1b60] sm:$0xff]  }
  0x4a   : > { %383 = vst [vmem:[%s6532_s26 + $0x1c8] sm:$0xff] %v382_v57   ;;  %v638_v57 = vld [vmem:[%s6527_s25 + $0x1b68] sm:$0xff]  }
  0x4b   : > { %387 = vst [vmem:[%s6532_s26 + $0x1d0] sm:$0xff] %v386_v58   ;;  %v642_v58 = vld [vmem:[%s6527_s25 + $0x1b70] sm:$0xff]  }
  0x4c   : > { %391 = vst [vmem:[%s6532_s26 + $0x1d8] sm:$0xff] %v390_v59   ;;  %v646_v59 = vld [vmem:[%s6527_s25 + $0x1b78] sm:$0xff]  }
  0x4d   : > { %395 = vst [vmem:[%s6532_s26 + $0x1e0] sm:$0xff] %v394_v60   ;;  %v650_v60 = vld [vmem:[%s6527_s25 + $0x1b80] sm:$0xff]  }
  0x4e   : > { %399 = vst [vmem:[%s6532_s26 + $0x1e8] sm:$0xff] %v398_v61   ;;  %v654_v61 = vld [vmem:[%s6527_s25 + $0x1b88] sm:$0xff]  }
  0x4f   : > { %403 = vst [vmem:[%s6532_s26 + $0x1f0] sm:$0xff] %v402_v62   ;;  %v658_v62 = vld [vmem:[%s6527_s25 + $0x1b90] sm:$0xff]  }
  0x50   : > { %407 = vst [vmem:[%s6532_s26 + $0x1f8] sm:$0xff] %v406_v63   ;;  %v662_v63 = vld [vmem:[%s6527_s25 + $0x1b98] sm:$0xff]  }
  0x51   : > { %411 = vst [vmem:[%s6532_s26 + $0x200] sm:$0xff] %v410_v0   ;;  %v666_v0 = vld [vmem:[%s6527_s25 + $0x1ba0] sm:$0xff]  }
  0x52   : > { %415 = vst [vmem:[%s6532_s26 + $0x208] sm:$0xff] %v414_v1   ;;  %v670_v1 = vld [vmem:[%s6527_s25 + $0x1ba8] sm:$0xff]  }
  0x53   : > { %419 = vst [vmem:[%s6532_s26 + $0x210] sm:$0xff] %v418_v2   ;;  %v674_v2 = vld [vmem:[%s6527_s25 + $0x1bb0] sm:$0xff]  }
  0x54   : > { %423 = vst [vmem:[%s6532_s26 + $0x218] sm:$0xff] %v422_v3   ;;  %v678_v3 = vld [vmem:[%s6527_s25 + $0x1bb8] sm:$0xff]  }
  0x55   : > { %427 = vst [vmem:[%s6532_s26 + $0x220] sm:$0xff] %v426_v4   ;;  %v682_v4 = vld [vmem:[%s6527_s25 + $0x1bc0] sm:$0xff]  }
  0x56   : > { %431 = vst [vmem:[%s6532_s26 + $0x228] sm:$0xff] %v430_v5   ;;  %v686_v5 = vld [vmem:[%s6527_s25 + $0x1bc8] sm:$0xff]  }
  0x57   : > { %435 = vst [vmem:[%s6532_s26 + $0x230] sm:$0xff] %v434_v6   ;;  %v690_v6 = vld [vmem:[%s6527_s25 + $0x1bd0] sm:$0xff]  }
  0x58   : > { %439 = vst [vmem:[%s6532_s26 + $0x238] sm:$0xff] %v438_v7   ;;  %v694_v7 = vld [vmem:[%s6527_s25 + $0x1bd8] sm:$0xff]  }
  0x59   : > { %443 = vst [vmem:[%s6532_s26 + $0x240] sm:$0xff] %v442_v8   ;;  %v698_v8 = vld [vmem:[%s6527_s25 + $0x1be0] sm:$0xff]  }
  0x5a   : > { %447 = vst [vmem:[%s6532_s26 + $0x248] sm:$0xff] %v446_v9   ;;  %v702_v9 = vld [vmem:[%s6527_s25 + $0x1be8] sm:$0xff]  }
  0x5b   : > { %451 = vst [vmem:[%s6532_s26 + $0x250] sm:$0xff] %v450_v10   ;;  %v706_v10 = vld [vmem:[%s6527_s25 + $0x1bf0] sm:$0xff]  }
  0x5c   : > { %455 = vst [vmem:[%s6532_s26 + $0x258] sm:$0xff] %v454_v11   ;;  %v710_v11 = vld [vmem:[%s6527_s25 + $0x1bf8] sm:$0xff]  }
  0x5d   : > { %459 = vst [vmem:[%s6532_s26 + $0x260] sm:$0xff] %v458_v12   ;;  %v714_v12 = vld [vmem:[%s6527_s25 + $0x1c00] sm:$0xff]  }
  0x5e   : > { %463 = vst [vmem:[%s6532_s26 + $0x268] sm:$0xff] %v462_v13   ;;  %v718_v13 = vld [vmem:[%s6527_s25 + $0x1c08] sm:$0xff]  }
  0x5f   : > { %467 = vst [vmem:[%s6532_s26 + $0x270] sm:$0xff] %v466_v14   ;;  %v722_v14 = vld [vmem:[%s6527_s25 + $0x1c10] sm:$0xff]  }
  0x60   : > { %471 = vst [vmem:[%s6532_s26 + $0x278] sm:$0xff] %v470_v15   ;;  %v726_v15 = vld [vmem:[%s6527_s25 + $0x1c18] sm:$0xff]  }
  0x61   : > { %475 = vst [vmem:[%s6532_s26 + $0x280] sm:$0xff] %v474_v16  }
  0x62   : > { %479 = vst [vmem:[%s6532_s26 + $0x288] sm:$0xff] %v478_v17  }
  0x63   : > { %483 = vst [vmem:[%s6532_s26 + $0x290] sm:$0xff] %v482_v18  }
  0x64   : > { %487 = vst [vmem:[%s6532_s26 + $0x298] sm:$0xff] %v486_v19  }
  0x65   : > { %491 = vst [vmem:[%s6532_s26 + $0x2a0] sm:$0xff] %v490_v20  }
  0x66   : > { %495 = vst [vmem:[%s6532_s26 + $0x2a8] sm:$0xff] %v494_v21  }
  0x67   : > { %499 = vst [vmem:[%s6532_s26 + $0x2b0] sm:$0xff] %v498_v22  }
  0x68   : > { %503 = vst [vmem:[%s6532_s26 + $0x2b8] sm:$0xff] %v502_v23  }
  0x69   : > { %507 = vst [vmem:[%s6532_s26 + $0x2c0] sm:$0xff] %v506_v24  }
  0x6a   : > { %511 = vst [vmem:[%s6532_s26 + $0x2c8] sm:$0xff] %v510_v25  }
  0x6b   : > { %515 = vst [vmem:[%s6532_s26 + $0x2d0] sm:$0xff] %v514_v26  }
  0x6c   : > { %519 = vst [vmem:[%s6532_s26 + $0x2d8] sm:$0xff] %v518_v27  }
  0x6d   : > { %523 = vst [vmem:[%s6532_s26 + $0x2e0] sm:$0xff] %v522_v28  }
  0x6e   : > { %527 = vst [vmem:[%s6532_s26 + $0x2e8] sm:$0xff] %v526_v29  }
  0x6f   : > { %531 = vst [vmem:[%s6532_s26 + $0x2f0] sm:$0xff] %v530_v30  }
  0x70   : > { %535 = vst [vmem:[%s6532_s26 + $0x2f8] sm:$0xff] %v534_v31  }
  0x71   : > { %539 = vst [vmem:[%s6532_s26 + $0x300] sm:$0xff] %v538_v32  }
  0x72   : > { %543 = vst [vmem:[%s6532_s26 + $0x308] sm:$0xff] %v542_v33  }
  0x73   : > { %547 = vst [vmem:[%s6532_s26 + $0x310] sm:$0xff] %v546_v34  }
  0x74   : > { %551 = vst [vmem:[%s6532_s26 + $0x318] sm:$0xff] %v550_v35  }
  0x75   : > { %555 = vst [vmem:[%s6532_s26 + $0x320] sm:$0xff] %v554_v36  }
  0x76   : > { %559 = vst [vmem:[%s6532_s26 + $0x328] sm:$0xff] %v558_v37  }
  0x77   : > { %563 = vst [vmem:[%s6532_s26 + $0x330] sm:$0xff] %v562_v38  }
  0x78   : > { %567 = vst [vmem:[%s6532_s26 + $0x338] sm:$0xff] %v566_v39  }
  0x79   : > { %571 = vst [vmem:[%s6532_s26 + $0x340] sm:$0xff] %v570_v40  }
  0x7a   : > { %575 = vst [vmem:[%s6532_s26 + $0x348] sm:$0xff] %v574_v41  }
  0x7b   : > { %579 = vst [vmem:[%s6532_s26 + $0x350] sm:$0xff] %v578_v42  }
  0x7c   : > { %583 = vst [vmem:[%s6532_s26 + $0x358] sm:$0xff] %v582_v43  }
  0x7d   : > { %587 = vst [vmem:[%s6532_s26 + $0x360] sm:$0xff] %v586_v44  }
  0x7e   : > { %591 = vst [vmem:[%s6532_s26 + $0x368] sm:$0xff] %v590_v45  }
  0x7f   : > { %595 = vst [vmem:[%s6532_s26 + $0x370] sm:$0xff] %v594_v46  }
  0x80   : > { %599 = vst [vmem:[%s6532_s26 + $0x378] sm:$0xff] %v598_v47  }
  0x81   : > { %603 = vst [vmem:[%s6532_s26 + $0x380] sm:$0xff] %v602_v48  }
  0x82   : > { %607 = vst [vmem:[%s6532_s26 + $0x388] sm:$0xff] %v606_v49  }
  0x83   : > { %611 = vst [vmem:[%s6532_s26 + $0x390] sm:$0xff] %v610_v50  }
  0x84   : > { %615 = vst [vmem:[%s6532_s26 + $0x398] sm:$0xff] %v614_v51  }
  0x85   : > { %619 = vst [vmem:[%s6532_s26 + $0x3a0] sm:$0xff] %v618_v52  }
  0x86   : > { %623 = vst [vmem:[%s6532_s26 + $0x3a8] sm:$0xff] %v622_v53  }
  0x87   : > { %627 = vst [vmem:[%s6532_s26 + $0x3b0] sm:$0xff] %v626_v54  }
  0x88   : > { %631 = vst [vmem:[%s6532_s26 + $0x3b8] sm:$0xff] %v630_v55  }
  0x89   : > { %635 = vst [vmem:[%s6532_s26 + $0x3c0] sm:$0xff] %v634_v56  }
  0x8a   : > { %639 = vst [vmem:[%s6532_s26 + $0x3c8] sm:$0xff] %v638_v57  }
  0x8b   : > { %643 = vst [vmem:[%s6532_s26 + $0x3d0] sm:$0xff] %v642_v58  }
  0x8c   : > { %647 = vst [vmem:[%s6532_s26 + $0x3d8] sm:$0xff] %v646_v59  }
  0x8d   : > { %651 = vst [vmem:[%s6532_s26 + $0x3e0] sm:$0xff] %v650_v60  }
  0x8e   : > { %655 = vst [vmem:[%s6532_s26 + $0x3e8] sm:$0xff] %v654_v61  }
  0x8f   : > { %659 = vst [vmem:[%s6532_s26 + $0x3f0] sm:$0xff] %v658_v62  }
  0x90   : > { %663 = vst [vmem:[%s6532_s26 + $0x3f8] sm:$0xff] %v662_v63  }
  0x91   : > { %667 = vst [vmem:[%s6532_s26 + $0x400] sm:$0xff] %v666_v0  }
  0x92   : > { %671 = vst [vmem:[%s6532_s26 + $0x408] sm:$0xff] %v670_v1  }
  0x93   : > { %675 = vst [vmem:[%s6532_s26 + $0x410] sm:$0xff] %v674_v2  }
  0x94   : > { %679 = vst [vmem:[%s6532_s26 + $0x418] sm:$0xff] %v678_v3  }
  0x95   : > { %683 = vst [vmem:[%s6532_s26 + $0x420] sm:$0xff] %v682_v4  }
  0x96   : > { %687 = vst [vmem:[%s6532_s26 + $0x428] sm:$0xff] %v686_v5  }
  0x97   : > { %691 = vst [vmem:[%s6532_s26 + $0x430] sm:$0xff] %v690_v6  }
  0x98   : > { %695 = vst [vmem:[%s6532_s26 + $0x438] sm:$0xff] %v694_v7  }
  0x99   : > { %699 = vst [vmem:[%s6532_s26 + $0x440] sm:$0xff] %v698_v8  }
  0x9a   : > { %703 = vst [vmem:[%s6532_s26 + $0x448] sm:$0xff] %v702_v9  }
  0x9b   : > { %707 = vst [vmem:[%s6532_s26 + $0x450] sm:$0xff] %v706_v10  }
  0x9c   : > { %711 = vst [vmem:[%s6532_s26 + $0x458] sm:$0xff] %v710_v11  }
  0x9d   : > { %715 = vst [vmem:[%s6532_s26 + $0x460] sm:$0xff] %v714_v12  }
  0x9e   : > { %719 = vst [vmem:[%s6532_s26 + $0x468] sm:$0xff] %v718_v13  }
  0x9f   : > { %723 = vst [vmem:[%s6532_s26 + $0x470] sm:$0xff] %v722_v14  }
  0xa0   : > { %727 = vst [vmem:[%s6532_s26 + $0x478] sm:$0xff] %v726_v15  }
  0xa1 PF: > { %p5319_p5 = scmp.ge.s32.totalorder %s6470_s14, 1  ;;  %p2506_p6 = scmp.lt.s32.totalorder %s6470_s14, 9 }
  0xa3   : > { %p2507_p7 = pnand %p5319_p5, %p2506_p6 }
  0xa4   : > { %s2513_s4 = sand.u32 (!%p2507_p7), 1, %s6462_s12   ;;  %s2537_s9 = smul.u32 (!%p2507_p7), 72, %s5314_s15 }
  0xa5   : > { %2510 = sbr.rel (%p2507_p7) target bundleno = 895 (0x37f), region = 80 }
  0xa6   : > { %s6420_s5 = smul.u32 (!%p2507_p7), 1152, %s2513_s4  ;;  %p2538_p8 = scmp.lt.s32.totalorder (!%p2507_p7), %s2537_s9, 575 }
  0xa8   : > { %s6831_s8 = scalar_lea.vmem (!%p2507_p7), [#allocation2], %s6420_s5 }
  0xaa   : > { %v5903_v16 = vld [vmem:[%s7257_s1 + $0x8] sm:$0xf]  ;;  %v6197_v17 = vld [vmem:[%s7257_s1 + $0x8] sm:$0x10]  ;;  %vm4000_vm0 = vcmask 1043456   ;;  %vm4001_vm1 = vcmask 1044480  }
  0xab   : > { %v5904_v18 = vor.u32 %v6197_v17, %v5903_v16  ;;  %v6472_v19 = vmov 65535   ;;  %v6196_v23 = vld [vmem:[%s7257_s1] sm:$0xff]  ;;  %vm3567_vm2 = vcmask 203776   ;;  %v6053_v28 = vld [vmem:[%s6831_s8 + $0x8] sm:$0xff]  ;;  %v6054_v32 = vld [vmem:[%s6831_s8 + $0x10] sm:$0xff]  ;;  %s7264_s9 = smov (!%p2538_p8, %s2537_s9), 575 }
  0xac   : > { %v4002_v20 = vsel %vm4000_vm0, 4294967295, %v6472_v19  ;;  %v6052_v24 = vld [vmem:[%s6831_s8] sm:$0xff]  ;;  %v6089_v29 = vld [vmem:[%s6831_s8 + $0x128] sm:$0xff]  ;;  %v6090_v33 = vld [vmem:[%s6831_s8 + $0x130] sm:$0xff]  ;;  %s5320_s12 = sshll.u32 %s7264_s9, 2 }
  0xad   : > { %v4003_v21 = vsel %vm4001_vm1, %v4002_v20, 0  ;;  %v6088_v25 = vld [vmem:[%s6831_s8 + $0x120] sm:$0xff]  ;;  %v6125_v30 = vld [vmem:[%s6831_s8 + $0x248] sm:$0xff]  ;;  %v6126_v34 = vld [vmem:[%s6831_s8 + $0x250] sm:$0xff]  ;;  %s6925_s17 = scalar_lea.vmem %s7259_s3, %s5320_s12 }
  0xae   : > { %v4005_v22 = vand.u32 %v5904_v18, %v4003_v21  ;;  %v6124_v26 = vld [vmem:[%s6831_s8 + $0x240] sm:$0xff]  ;;  %v6161_v31 = vld [vmem:[%s6831_s8 + $0x368] sm:$0xff]  ;;  %v6162_v35 = vld [vmem:[%s6831_s8 + $0x370] sm:$0xff] }
  0xaf   : > { %v6160_v27 = vld [vmem:[%s6831_s8 + $0x360] sm:$0xff]  ;;  %v6055_v36 = vld [vmem:[%s6831_s8 + $0x18] sm:$0xff]  ;;  %v6057_v44 = vld [vmem:[%s6831_s8 + $0x28] sm:$0xff] }
  0xb0   : > { %4013 = vmatpush.bf16.msra.mxu0 %v4005_v22  ;;  %6413 = vmatpush.bf16.msra.mxu1 %v4005_v22  ;;  %v6091_v37 = vld [vmem:[%s6831_s8 + $0x138] sm:$0xff]  ;;  %v6056_v40 = vld [vmem:[%s6831_s8 + $0x20] sm:$0xff]  ;;  %v6093_v45 = vld [vmem:[%s6831_s8 + $0x148] sm:$0xff] }
  0xb1   : > { %6414 = vmatpush.bf16.msra.mxu2 %v4005_v22  ;;  %6415 = vmatpush.bf16.msra.mxu3 %v4005_v22  ;;  %v6127_v38 = vld [vmem:[%s6831_s8 + $0x258] sm:$0xff]  ;;  %v6092_v41 = vld [vmem:[%s6831_s8 + $0x140] sm:$0xff]  ;;  %v6129_v46 = vld [vmem:[%s6831_s8 + $0x268] sm:$0xff] }
  0xb2   : > { %v6163_v39 = vld [vmem:[%s6831_s8 + $0x378] sm:$0xff]  ;;  %v6128_v42 = vld [vmem:[%s6831_s8 + $0x260] sm:$0xff]  ;;  %v6165_v47 = vld [vmem:[%s6831_s8 + $0x388] sm:$0xff] }
  0xb3   : > { %v6164_v43 = vld [vmem:[%s6831_s8 + $0x380] sm:$0xff]  ;;  %v6058_v48 = vld [vmem:[%s6831_s8 + $0x30] sm:$0xff]  ;;  %v6059_v52 = vld [vmem:[%s6831_s8 + $0x38] sm:$0xff] }
  0xb4   : > { %4014 = vmatpush.bf16.msra.mxu0 %v6196_v23  ;;  %6416 = vmatpush.bf16.msra.mxu1 %v6196_v23  ;;  %v6094_v49 = vld [vmem:[%s6831_s8 + $0x150] sm:$0xff]  ;;  %v6095_v53 = vld [vmem:[%s6831_s8 + $0x158] sm:$0xff]  ;;  %v6060_v56 = vld [vmem:[%s6831_s8 + $0x40] sm:$0xff] }
  0xb5   : > { %6417 = vmatpush.bf16.msra.mxu2 %v6196_v23  ;;  %6418 = vmatpush.bf16.msra.mxu3 %v6196_v23  ;;  %v6130_v50 = vld [vmem:[%s6831_s8 + $0x270] sm:$0xff]  ;;  %v6131_v54 = vld [vmem:[%s6831_s8 + $0x278] sm:$0xff]  ;;  %v6096_v57 = vld [vmem:[%s6831_s8 + $0x160] sm:$0xff] }
  0xb6   : > { %v6166_v51 = vld [vmem:[%s6831_s8 + $0x390] sm:$0xff]  ;;  %v6167_v55 = vld [vmem:[%s6831_s8 + $0x398] sm:$0xff]  ;;  %v6132_v60 = vld [vmem:[%s6831_s8 + $0x280] sm:$0xff] }
  0xb7   : > { %5905 = vmatmul.msk.bf16.vlgmr.msra.gmra.mxu0 %vm3567_vm2, %v6052_v24  ;;  %5941 = vmatmul.msk.bf16.vlgmr.msra.gmra.mxu1 %vm3567_vm2, %v6088_v25  ;;  %v6168_v61 = vld [vmem:[%s6831_s8 + $0x3a0] sm:$0xff]  ;;  %v6061_v8 = vld [vmem:[%s6831_s8 + $0x48] sm:$0xff] }
  0xb8   : > { %5977 = vmatmul.msk.bf16.vlgmr.msra.gmra.mxu2 %vm3567_vm2, %v6124_v26  ;;  %6013 = vmatmul.msk.bf16.vlgmr.msra.gmra.mxu3 %vm3567_vm2, %v6160_v27  ;;  %v6910_v5 = vld [vmem:[%s7258_s2] ss:$0 sm:$0xff]  ;;  %v6097_v9 = vld [vmem:[%s6831_s8 + $0x168] sm:$0xff] }
  0xb9   : > { %v6133_v14 = vld [vmem:[%s6831_s8 + $0x288] sm:$0xff] }
  0xba   : > { %v6169_v15 = vld [vmem:[%s6831_s8 + $0x3a8] sm:$0xff] }
  0xc7   : > { %5906 = vmatmul.msk.bf16.gmra.mxu0 %vm3567_vm2, %v6053_v28  ;;  %5942 = vmatmul.msk.bf16.gmra.mxu1 %vm3567_vm2, %v6089_v29 }
  0xc8   : > { %5978 = vmatmul.msk.bf16.gmra.mxu2 %vm3567_vm2, %v6125_v30  ;;  %6014 = vmatmul.msk.bf16.gmra.mxu3 %vm3567_vm2, %v6161_v31  ;;  %v6062_v31 = vld [vmem:[%s6831_s8 + $0x50] sm:$0xff] }
  0xd7   : > { %5907 = vmatmul.msk.bf16.gmra.mxu0 %vm3567_vm2, %v6054_v32  ;;  %5943 = vmatmul.msk.bf16.gmra.mxu1 %vm3567_vm2, %v6090_v33  ;;  %v6098_v32 = vld [vmem:[%s6831_s8 + $0x170] sm:$0xff] }
  0xd8   : > { %5979 = vmatmul.msk.bf16.gmra.mxu2 %vm3567_vm2, %v6126_v34  ;;  %6015 = vmatmul.msk.bf16.gmra.mxu3 %vm3567_vm2, %v6162_v35 }
  0xe7   : > { %5908 = vmatmul.msk.bf16.gmra.mxu0 %vm3567_vm2, %v6055_v36  ;;  %5944 = vmatmul.msk.bf16.gmra.mxu1 %vm3567_vm2, %v6091_v37  ;;  %v6134_v37 = vld [vmem:[%s6831_s8 + $0x290] sm:$0xff] }
  0xe8   : > { %5980 = vmatmul.msk.bf16.gmra.mxu2 %vm3567_vm2, %v6127_v38  ;;  %6016 = vmatmul.msk.bf16.gmra.mxu3 %vm3567_vm2, %v6163_v39  ;;  %v6170_v38 = vld [vmem:[%s6831_s8 + $0x3b0] sm:$0xff] }
  0xf7   : > { %5909 = vmatmul.msk.bf16.gmra.mxu0 %vm3567_vm2, %v6056_v40  ;;  %5945 = vmatmul.msk.bf16.gmra.mxu1 %vm3567_vm2, %v6092_v41 }
  0xf8   : > { %5981 = vmatmul.msk.bf16.gmra.mxu2 %vm3567_vm2, %v6128_v42  ;;  %6017 = vmatmul.msk.bf16.gmra.mxu3 %vm3567_vm2, %v6164_v43 }
 0x107   : > { %5910 = vmatmul.msk.bf16.gmra.mxu0 %vm3567_vm2, %v6057_v44  ;;  %5946 = vmatmul.msk.bf16.gmra.mxu1 %vm3567_vm2, %v6093_v45 }
 0x108   : > { %5982 = vmatmul.msk.bf16.gmra.mxu2 %vm3567_vm2, %v6129_v46  ;;  %6018 = vmatmul.msk.bf16.gmra.mxu3 %vm3567_vm2, %v6165_v47 }
 0x117   : > { %5911 = vmatmul.msk.bf16.gmra.mxu0 %vm3567_vm2, %v6058_v48  ;;  %5947 = vmatmul.msk.bf16.gmra.mxu1 %vm3567_vm2, %v6094_v49 }
 0x118   : > { %5983 = vmatmul.msk.bf16.gmra.mxu2 %vm3567_vm2, %v6130_v50  ;;  %6019 = vmatmul.msk.bf16.gmra.mxu3 %vm3567_vm2, %v6166_v51 }
 0x127   : > { %5912 = vmatmul.msk.bf16.gmra.mxu0 %vm3567_vm2, %v6059_v52  ;;  %5948 = vmatmul.msk.bf16.gmra.mxu1 %vm3567_vm2, %v6095_v53 }
 0x128   : > { %5984 = vmatmul.msk.bf16.gmra.mxu2 %vm3567_vm2, %v6131_v54  ;;  %6020 = vmatmul.msk.bf16.gmra.mxu3 %vm3567_vm2, %v6167_v55  ;;  %v6063_v54 = vld [vmem:[%s6831_s8 + $0x58] sm:$0xff] }
 0x129   : > { %v6099_v55 = vld [vmem:[%s6831_s8 + $0x178] sm:$0xff] }
 0x134   : > { %v4016_v58 = vpop.f32.mrf.mxu0  ;;  %v4196_v59 = vpop.f32.mrf.mxu1 }
 0x135   : > { %v4736_v2 = vmax.f32 %v4016_v58, %v4196_v59 }
 0x137   : > { %5913 = vmatmul.msk.bf16.gmra.mxu0 %vm3567_vm2, %v6060_v56  ;;  %5949 = vmatmul.msk.bf16.gmra.mxu1 %vm3567_vm2, %v6096_v57 }
 0x138   : > { %5985 = vmatmul.msk.bf16.gmra.mxu2 %vm3567_vm2, %v6132_v60  ;;  %6021 = vmatmul.msk.bf16.gmra.mxu3 %vm3567_vm2, %v6168_v61  ;;  %v6135_v60 = vld [vmem:[%s6831_s8 + $0x298] sm:$0xff] }
 0x139   : > { %v6171_v61 = vld [vmem:[%s6831_s8 + $0x3b8] sm:$0xff] }
 0x13b   : > { %v4376_v62 = vpop.f32.mrf.mxu2  ;;  %v4556_v63 = vpop.f32.mrf.mxu3 }
 0x13c   : > { %v4018_v0 = vpop.f32.mrf.mxu0  ;;  %v4198_v1 = vpop.f32.mrf.mxu1  ;;  %v4808_v3 = vmax.f32 %v4376_v62, %v4556_v63 }
 0x13d   : > { %v4737_v10 = vmax.f32 %v4018_v0, %v4198_v1 }
 0x13e   : > { %v4880_v4 = vmax.f32 %v4736_v2, %v4808_v3 }
 0x140   : > { %v4956_v16 = vadd.f32 %v6910_v5, %v4880_v4 }
 0x142   : > { %v5028_v19 = vmax.f32 %v4956_v16, 0.0 }
 0x143   : > { %v4378_v6 = vpop.f32.mrf.mxu2  ;;  %v4558_v7 = vpop.f32.mrf.mxu3 }
 0x144   : > { %v4809_v11 = vmax.f32 %v4378_v6, %v4558_v7  ;;  %v4021_v12 = vpop.f32.mrf.mxu0  ;;  %v4201_v13 = vpop.f32.mrf.mxu1 }
 0x145   : > { %v4738_v26 = vmax.f32 %v4021_v12, %v4201_v13 }
 0x146   : > { %v4881_v17 = vmax.f32 %v4737_v10, %v4809_v11 }
 0x147   : > { %5914 = vmatmul.msk.bf16.gmra.mxu0 %vm3567_vm2, %v6061_v8  ;;  %5950 = vmatmul.msk.bf16.gmra.mxu1 %vm3567_vm2, %v6097_v9 }
 0x148   : > { %v4957_v18 = vadd.f32 %v6910_v5, %v4881_v17  ;;  %5986 = vmatmul.msk.bf16.gmra.mxu2 %vm3567_vm2, %v6133_v14  ;;  %6022 = vmatmul.msk.bf16.gmra.mxu3 %vm3567_vm2, %v6169_v15  ;;  %v6064_v14 = vld [vmem:[%s6831_s8 + $0x60] sm:$0xff] }
 0x149   : > { %v6100_v15 = vld [vmem:[%s6831_s8 + $0x180] sm:$0xff] }
 0x14a   : > { %v5029_v20 = vmax.f32 %v4957_v18, 0.0 }
 0x14b   : > { %v4381_v21 = vpop.f32.mrf.mxu2  ;;  %v4561_v22 = vpop.f32.mrf.mxu3 }
 0x14c   : > { %v6201_v23 = vpack.c.bf16 %v5029_v20, %v5028_v19  ;;  %v4023_v24 = vpop.f32.mrf.mxu0  ;;  %v4203_v25 = vpop.f32.mrf.mxu1  ;;  %v4810_v27 = vmax.f32 %v4381_v21, %v4561_v22  ;;  %v6136_v20 = vld [vmem:[%s6831_s8 + $0x2a0] sm:$0xff] }
 0x14d   : > { %v4739_v33 = vmax.f32 %v4023_v24, %v4203_v25  ;;  %v6172_v21 = vld [vmem:[%s6831_s8 + $0x3c0] sm:$0xff] }
 0x14e   : > { %6202 = vst [vmem:[%s6925_s17] sm:$0xff] %v6201_v23   ;;  %v4882_v28 = vmax.f32 %v4738_v26, %v4810_v27 }
 0x150   : > { %v4958_v39 = vadd.f32 %v6910_v5, %v4882_v28 }
 0x152   : > { %v5030_v42 = vmax.f32 %v4958_v39, 0.0 }
 0x153   : > { %v4383_v29 = vpop.f32.mrf.mxu2  ;;  %v4563_v30 = vpop.f32.mrf.mxu3 }
 0x154   : > { %v4811_v34 = vmax.f32 %v4383_v29, %v4563_v30  ;;  %v4026_v35 = vpop.f32.mrf.mxu0  ;;  %v4206_v36 = vpop.f32.mrf.mxu1 }
 0x155   : > { %v4740_v49 = vmax.f32 %v4026_v35, %v4206_v36 }
 0x156   : > { %v4883_v40 = vmax.f32 %v4739_v33, %v4811_v34 }
 0x157   : > { %5915 = vmatmul.msk.bf16.gmra.mxu0 %vm3567_vm2, %v6062_v31  ;;  %5951 = vmatmul.msk.bf16.gmra.mxu1 %vm3567_vm2, %v6098_v32 }
 0x158   : > { %v4959_v41 = vadd.f32 %v6910_v5, %v4883_v40  ;;  %5987 = vmatmul.msk.bf16.gmra.mxu2 %vm3567_vm2, %v6134_v37  ;;  %6023 = vmatmul.msk.bf16.gmra.mxu3 %vm3567_vm2, %v6170_v38  ;;  %v6065_v37 = vld [vmem:[%s6831_s8 + $0x68] sm:$0xff] }
 0x159   : > { %v6101_v38 = vld [vmem:[%s6831_s8 + $0x188] sm:$0xff] }
 0x15a   : > { %v5031_v43 = vmax.f32 %v4959_v41, 0.0 }
 0x15b   : > { %v4386_v44 = vpop.f32.mrf.mxu2  ;;  %v4566_v45 = vpop.f32.mrf.mxu3 }
 0x15c   : > { %v6206_v46 = vpack.c.bf16 %v5031_v43, %v5030_v42  ;;  %v4028_v47 = vpop.f32.mrf.mxu0  ;;  %v4208_v48 = vpop.f32.mrf.mxu1  ;;  %v4812_v50 = vmax.f32 %v4386_v44, %v4566_v45  ;;  %v6137_v43 = vld [vmem:[%s6831_s8 + $0x2a8] sm:$0xff] }
 0x15d   : > { %v4741_v56 = vmax.f32 %v4028_v47, %v4208_v48  ;;  %v6173_v44 = vld [vmem:[%s6831_s8 + $0x3c8] sm:$0xff] }
 0x15e   : > { %6378 = vst [vmem:[%s6925_s17 + $0x8] sm:$0xff] %v6206_v46   ;;  %v4884_v51 = vmax.f32 %v4740_v49, %v4812_v50 }
 0x160   : > { %v4960_v62 = vadd.f32 %v6910_v5, %v4884_v51 }
 0x162   : > { %v5032_v1 = vmax.f32 %v4960_v62, 0.0 }
 0x163   : > { %v4388_v52 = vpop.f32.mrf.mxu2  ;;  %v4568_v53 = vpop.f32.mrf.mxu3 }
 0x164   : > { %v4813_v57 = vmax.f32 %v4388_v52, %v4568_v53  ;;  %v4031_v58 = vpop.f32.mrf.mxu0  ;;  %v4211_v59 = vpop.f32.mrf.mxu1 }
 0x165   : > { %v4742_v9 = vmax.f32 %v4031_v58, %v4211_v59 }
 0x166   : > { %v4885_v63 = vmax.f32 %v4741_v56, %v4813_v57 }
 0x167   : > { %5916 = vmatmul.msk.bf16.gmra.mxu0 %vm3567_vm2, %v6063_v54  ;;  %5952 = vmatmul.msk.bf16.gmra.mxu1 %vm3567_vm2, %v6099_v55 }
 0x168   : > { %v4961_v0 = vadd.f32 %v6910_v5, %v4885_v63  ;;  %5988 = vmatmul.msk.bf16.gmra.mxu2 %vm3567_vm2, %v6135_v60  ;;  %6024 = vmatmul.msk.bf16.gmra.mxu3 %vm3567_vm2, %v6171_v61  ;;  %v6066_v60 = vld [vmem:[%s6831_s8 + $0x70] sm:$0xff] }
 0x169   : > { %v6102_v61 = vld [vmem:[%s6831_s8 + $0x190] sm:$0xff] }
 0x16a   : > { %v5033_v2 = vmax.f32 %v4961_v0, 0.0 }
 0x16b   : > { %v4391_v3 = vpop.f32.mrf.mxu2  ;;  %v4571_v4 = vpop.f32.mrf.mxu3 }
 0x16c   : > { %v6211_v6 = vpack.c.bf16 %v5033_v2, %v5032_v1  ;;  %v4033_v7 = vpop.f32.mrf.mxu0  ;;  %v4213_v8 = vpop.f32.mrf.mxu1  ;;  %v4814_v10 = vmax.f32 %v4391_v3, %v4571_v4  ;;  %v6138_v2 = vld [vmem:[%s6831_s8 + $0x2b0] sm:$0xff] }
 0x16d   : > { %v4743_v16 = vmax.f32 %v4033_v7, %v4213_v8  ;;  %v6174_v3 = vld [vmem:[%s6831_s8 + $0x3d0] sm:$0xff] }
 0x16e   : > { %6379 = vst [vmem:[%s6925_s17 + $0x10] sm:$0xff] %v6211_v6   ;;  %v4886_v11 = vmax.f32 %v4742_v9, %v4814_v10 }
 0x170   : > { %v4962_v22 = vadd.f32 %v6910_v5, %v4886_v11 }
 0x172   : > { %v5034_v25 = vmax.f32 %v4962_v22, 0.0 }
 0x173   : > { %v4393_v12 = vpop.f32.mrf.mxu2  ;;  %v4573_v13 = vpop.f32.mrf.mxu3 }
 0x174   : > { %v4815_v17 = vmax.f32 %v4393_v12, %v4573_v13  ;;  %v4036_v18 = vpop.f32.mrf.mxu0  ;;  %v4216_v19 = vpop.f32.mrf.mxu1 }
 0x175   : > { %v4744_v32 = vmax.f32 %v4036_v18, %v4216_v19 }
 0x176   : > { %v4887_v23 = vmax.f32 %v4743_v16, %v4815_v17 }
 0x177   : > { %5917 = vmatmul.msk.bf16.gmra.mxu0 %vm3567_vm2, %v6064_v14  ;;  %5953 = vmatmul.msk.bf16.gmra.mxu1 %vm3567_vm2, %v6100_v15 }
 0x178   : > { %v4963_v24 = vadd.f32 %v6910_v5, %v4887_v23  ;;  %5989 = vmatmul.msk.bf16.gmra.mxu2 %vm3567_vm2, %v6136_v20  ;;  %6025 = vmatmul.msk.bf16.gmra.mxu3 %vm3567_vm2, %v6172_v21  ;;  %v6067_v20 = vld [vmem:[%s6831_s8 + $0x78] sm:$0xff] }
 0x179   : > { %v6103_v21 = vld [vmem:[%s6831_s8 + $0x198] sm:$0xff] }
 0x17a   : > { %v5035_v26 = vmax.f32 %v4963_v24, 0.0 }
 0x17b   : > { %v4396_v27 = vpop.f32.mrf.mxu2  ;;  %v4576_v28 = vpop.f32.mrf.mxu3 }
 0x17c   : > { %v6216_v29 = vpack.c.bf16 %v5035_v26, %v5034_v25  ;;  %v4038_v30 = vpop.f32.mrf.mxu0  ;;  %v4218_v31 = vpop.f32.mrf.mxu1  ;;  %v4816_v33 = vmax.f32 %v4396_v27, %v4576_v28  ;;  %v6139_v26 = vld [vmem:[%s6831_s8 + $0x2b8] sm:$0xff] }
 0x17d   : > { %v4745_v39 = vmax.f32 %v4038_v30, %v4218_v31  ;;  %v6175_v27 = vld [vmem:[%s6831_s8 + $0x3d8] sm:$0xff] }
 0x17e   : > { %6380 = vst [vmem:[%s6925_s17 + $0x18] sm:$0xff] %v6216_v29   ;;  %v4888_v34 = vmax.f32 %v4744_v32, %v4816_v33 }
 0x180   : > { %v4964_v45 = vadd.f32 %v6910_v5, %v4888_v34 }
 0x182   : > { %v5036_v48 = vmax.f32 %v4964_v45, 0.0 }
 0x183   : > { %v4398_v35 = vpop.f32.mrf.mxu2  ;;  %v4578_v36 = vpop.f32.mrf.mxu3 }
 0x184   : > { %v4817_v40 = vmax.f32 %v4398_v35, %v4578_v36  ;;  %v4041_v41 = vpop.f32.mrf.mxu0  ;;  %v4221_v42 = vpop.f32.mrf.mxu1 }
 0x185   : > { %v4746_v55 = vmax.f32 %v4041_v41, %v4221_v42 }
 0x186   : > { %v4889_v46 = vmax.f32 %v4745_v39, %v4817_v40 }
 0x187   : > { %5918 = vmatmul.msk.bf16.gmra.mxu0 %vm3567_vm2, %v6065_v37  ;;  %5954 = vmatmul.msk.bf16.gmra.mxu1 %vm3567_vm2, %v6101_v38 }
 0x188   : > { %v4965_v47 = vadd.f32 %v6910_v5, %v4889_v46  ;;  %5990 = vmatmul.msk.bf16.gmra.mxu2 %vm3567_vm2, %v6137_v43  ;;  %6026 = vmatmul.msk.bf16.gmra.mxu3 %vm3567_vm2, %v6173_v44  ;;  %v6068_v43 = vld [vmem:[%s6831_s8 + $0x80] sm:$0xff] }
 0x189   : > { %v6104_v44 = vld [vmem:[%s6831_s8 + $0x1a0] sm:$0xff] }
 0x18a   : > { %v5037_v49 = vmax.f32 %v4965_v47, 0.0 }
 0x18b   : > { %v4401_v50 = vpop.f32.mrf.mxu2  ;;  %v4581_v51 = vpop.f32.mrf.mxu3 }
 0x18c   : > { %v6221_v52 = vpack.c.bf16 %v5037_v49, %v5036_v48  ;;  %v4043_v53 = vpop.f32.mrf.mxu0  ;;  %v4223_v54 = vpop.f32.mrf.mxu1  ;;  %v4818_v56 = vmax.f32 %v4401_v50, %v4581_v51  ;;  %v6140_v49 = vld [vmem:[%s6831_s8 + $0x2c0] sm:$0xff] }
 0x18d   : > { %v4747_v62 = vmax.f32 %v4043_v53, %v4223_v54  ;;  %v6176_v50 = vld [vmem:[%s6831_s8 + $0x3e0] sm:$0xff] }
 0x18e   : > { %6381 = vst [vmem:[%s6925_s17 + $0x20] sm:$0xff] %v6221_v52   ;;  %v4890_v57 = vmax.f32 %v4746_v55, %v4818_v56 }
 0x190   : > { %v4966_v4 = vadd.f32 %v6910_v5, %v4890_v57 }
 0x192   : > { %v5038_v8 = vmax.f32 %v4966_v4, 0.0 }
 0x193   : > { %v4403_v58 = vpop.f32.mrf.mxu2  ;;  %v4583_v59 = vpop.f32.mrf.mxu3 }
 0x194   : > { %v4819_v63 = vmax.f32 %v4403_v58, %v4583_v59  ;;  %v4046_v0 = vpop.f32.mrf.mxu0  ;;  %v4226_v1 = vpop.f32.mrf.mxu1 }
 0x195   : > { %v4748_v15 = vmax.f32 %v4046_v0, %v4226_v1 }
 0x196   : > { %v4891_v6 = vmax.f32 %v4747_v62, %v4819_v63 }
 0x197   : > { %5919 = vmatmul.msk.bf16.gmra.mxu0 %vm3567_vm2, %v6066_v60  ;;  %5955 = vmatmul.msk.bf16.gmra.mxu1 %vm3567_vm2, %v6102_v61 }
 0x198   : > { %v4967_v7 = vadd.f32 %v6910_v5, %v4891_v6  ;;  %5991 = vmatmul.msk.bf16.gmra.mxu2 %vm3567_vm2, %v6138_v2  ;;  %6027 = vmatmul.msk.bf16.gmra.mxu3 %vm3567_vm2, %v6174_v3  ;;  %v6069_v2 = vld [vmem:[%s6831_s8 + $0x88] sm:$0xff] }
 0x199   : > { %v6105_v3 = vld [vmem:[%s6831_s8 + $0x1a8] sm:$0xff] }
 0x19a   : > { %v5039_v9 = vmax.f32 %v4967_v7, 0.0 }
 0x19b   : > { %v4406_v10 = vpop.f32.mrf.mxu2  ;;  %v4586_v11 = vpop.f32.mrf.mxu3 }
 0x19c   : > { %v6226_v12 = vpack.c.bf16 %v5039_v9, %v5038_v8  ;;  %v4048_v13 = vpop.f32.mrf.mxu0  ;;  %v4228_v14 = vpop.f32.mrf.mxu1  ;;  %v4820_v16 = vmax.f32 %v4406_v10, %v4586_v11  ;;  %v6141_v9 = vld [vmem:[%s6831_s8 + $0x2c8] sm:$0xff] }
 0x19d   : > { %v4749_v22 = vmax.f32 %v4048_v13, %v4228_v14  ;;  %v6177_v10 = vld [vmem:[%s6831_s8 + $0x3e8] sm:$0xff] }
 0x19e   : > { %6382 = vst [vmem:[%s6925_s17 + $0x28] sm:$0xff] %v6226_v12   ;;  %v4892_v17 = vmax.f32 %v4748_v15, %v4820_v16 }
 0x1a0   : > { %v4968_v28 = vadd.f32 %v6910_v5, %v4892_v17 }
 0x1a2   : > { %v5040_v31 = vmax.f32 %v4968_v28, 0.0 }
 0x1a3   : > { %v4408_v18 = vpop.f32.mrf.mxu2  ;;  %v4588_v19 = vpop.f32.mrf.mxu3 }
 0x1a4   : > { %v4821_v23 = vmax.f32 %v4408_v18, %v4588_v19  ;;  %v4051_v24 = vpop.f32.mrf.mxu0  ;;  %v4231_v25 = vpop.f32.mrf.mxu1 }
 0x1a5   : > { %v4750_v38 = vmax.f32 %v4051_v24, %v4231_v25 }
 0x1a6   : > { %v4893_v29 = vmax.f32 %v4749_v22, %v4821_v23 }
 0x1a7   : > { %5920 = vmatmul.msk.bf16.gmra.mxu0 %vm3567_vm2, %v6067_v20  ;;  %5956 = vmatmul.msk.bf16.gmra.mxu1 %vm3567_vm2, %v6103_v21 }
 0x1a8   : > { %v4969_v30 = vadd.f32 %v6910_v5, %v4893_v29  ;;  %5992 = vmatmul.msk.bf16.gmra.mxu2 %vm3567_vm2, %v6139_v26  ;;  %6028 = vmatmul.msk.bf16.gmra.mxu3 %vm3567_vm2, %v6175_v27  ;;  %v6070_v26 = vld [vmem:[%s6831_s8 + $0x90] sm:$0xff] }
 0x1a9   : > { %v6106_v27 = vld [vmem:[%s6831_s8 + $0x1b0] sm:$0xff] }
 0x1aa   : > { %v5041_v32 = vmax.f32 %v4969_v30, 0.0 }
 0x1ab   : > { %v4411_v33 = vpop.f32.mrf.mxu2  ;;  %v4591_v34 = vpop.f32.mrf.mxu3 }
 0x1ac   : > { %v6231_v35 = vpack.c.bf16 %v5041_v32, %v5040_v31  ;;  %v4053_v36 = vpop.f32.mrf.mxu0  ;;  %v4233_v37 = vpop.f32.mrf.mxu1  ;;  %v4822_v39 = vmax.f32 %v4411_v33, %v4591_v34  ;;  %v6142_v32 = vld [vmem:[%s6831_s8 + $0x2d0] sm:$0xff] }
 0x1ad   : > { %v4751_v45 = vmax.f32 %v4053_v36, %v4233_v37  ;;  %v6178_v33 = vld [vmem:[%s6831_s8 + $0x3f0] sm:$0xff] }
 0x1ae   : > { %6383 = vst [vmem:[%s6925_s17 + $0x30] sm:$0xff] %v6231_v35   ;;  %v4894_v40 = vmax.f32 %v4750_v38, %v4822_v39 }
 0x1b0   : > { %v4970_v51 = vadd.f32 %v6910_v5, %v4894_v40 }
 0x1b2   : > { %v5042_v54 = vmax.f32 %v4970_v51, 0.0 }
 0x1b3   : > { %v4413_v41 = vpop.f32.mrf.mxu2  ;;  %v4593_v42 = vpop.f32.mrf.mxu3 }
 0x1b4   : > { %v4823_v46 = vmax.f32 %v4413_v41, %v4593_v42  ;;  %v4056_v47 = vpop.f32.mrf.mxu0  ;;  %v4236_v48 = vpop.f32.mrf.mxu1 }
 0x1b5   : > { %v4752_v61 = vmax.f32 %v4056_v47, %v4236_v48 }
 0x1b6   : > { %v4895_v52 = vmax.f32 %v4751_v45, %v4823_v46 }
 0x1b7   : > { %5921 = vmatmul.msk.bf16.gmra.mxu0 %vm3567_vm2, %v6068_v43  ;;  %5957 = vmatmul.msk.bf16.gmra.mxu1 %vm3567_vm2, %v6104_v44 }
 0x1b8   : > { %v4971_v53 = vadd.f32 %v6910_v5, %v4895_v52  ;;  %5993 = vmatmul.msk.bf16.gmra.mxu2 %vm3567_vm2, %v6140_v49  ;;  %6029 = vmatmul.msk.bf16.gmra.mxu3 %vm3567_vm2, %v6176_v50  ;;  %v6071_v49 = vld [vmem:[%s6831_s8 + $0x98] sm:$0xff] }
 0x1b9   : > { %v6107_v50 = vld [vmem:[%s6831_s8 + $0x1b8] sm:$0xff] }
 0x1ba   : > { %v5043_v55 = vmax.f32 %v4971_v53, 0.0 }
 0x1bb   : > { %v4416_v56 = vpop.f32.mrf.mxu2  ;;  %v4596_v57 = vpop.f32.mrf.mxu3 }
 0x1bc   : > { %v6236_v58 = vpack.c.bf16 %v5043_v55, %v5042_v54  ;;  %v4058_v59 = vpop.f32.mrf.mxu0  ;;  %v4238_v60 = vpop.f32.mrf.mxu1  ;;  %v4824_v62 = vmax.f32 %v4416_v56, %v4596_v57  ;;  %v6143_v55 = vld [vmem:[%s6831_s8 + $0x2d8] sm:$0xff] }
 0x1bd   : > { %v4753_v4 = vmax.f32 %v4058_v59, %v4238_v60  ;;  %v6179_v56 = vld [vmem:[%s6831_s8 + $0x3f8] sm:$0xff] }
 0x1be   : > { %6384 = vst [vmem:[%s6925_s17 + $0x38] sm:$0xff] %v6236_v58   ;;  %v4896_v63 = vmax.f32 %v4752_v61, %v4824_v62 }
 0x1c0   : > { %v4972_v11 = vadd.f32 %v6910_v5, %v4896_v63 }
 0x1c2   : > { %v5044_v14 = vmax.f32 %v4972_v11, 0.0 }
 0x1c3   : > { %v4418_v0 = vpop.f32.mrf.mxu2  ;;  %v4598_v1 = vpop.f32.mrf.mxu3 }
 0x1c4   : > { %v4825_v6 = vmax.f32 %v4418_v0, %v4598_v1  ;;  %v4061_v7 = vpop.f32.mrf.mxu0  ;;  %v4241_v8 = vpop.f32.mrf.mxu1 }
 0x1c5   : > { %v4754_v21 = vmax.f32 %v4061_v7, %v4241_v8 }
 0x1c6   : > { %v4897_v12 = vmax.f32 %v4753_v4, %v4825_v6 }
 0x1c7   : > { %5922 = vmatmul.msk.bf16.gmra.mxu0 %vm3567_vm2, %v6069_v2  ;;  %5958 = vmatmul.msk.bf16.gmra.mxu1 %vm3567_vm2, %v6105_v3 }
 0x1c8   : > { %v4973_v13 = vadd.f32 %v6910_v5, %v4897_v12  ;;  %5994 = vmatmul.msk.bf16.gmra.mxu2 %vm3567_vm2, %v6141_v9  ;;  %6030 = vmatmul.msk.bf16.gmra.mxu3 %vm3567_vm2, %v6177_v10  ;;  %v6072_v9 = vld [vmem:[%s6831_s8 + $0xa0] sm:$0xff] }
 0x1c9   : > { %v6108_v10 = vld [vmem:[%s6831_s8 + $0x1c0] sm:$0xff] }
 0x1ca   : > { %v5045_v15 = vmax.f32 %v4973_v13, 0.0 }
 0x1cb   : > { %v4421_v16 = vpop.f32.mrf.mxu2  ;;  %v4601_v17 = vpop.f32.mrf.mxu3 }
 0x1cc   : > { %v6241_v18 = vpack.c.bf16 %v5045_v15, %v5044_v14  ;;  %v4063_v19 = vpop.f32.mrf.mxu0  ;;  %v4243_v20 = vpop.f32.mrf.mxu1  ;;  %v4826_v22 = vmax.f32 %v4421_v16, %v4601_v17  ;;  %v6144_v15 = vld [vmem:[%s6831_s8 + $0x2e0] sm:$0xff] }
 0x1cd   : > { %v4755_v28 = vmax.f32 %v4063_v19, %v4243_v20  ;;  %v6180_v16 = vld [vmem:[%s6831_s8 + $0x400] sm:$0xff] }
 0x1ce   : > { %6385 = vst [vmem:[%s6925_s17 + $0x40] sm:$0xff] %v6241_v18   ;;  %v4898_v23 = vmax.f32 %v4754_v21, %v4826_v22 }
 0x1d0   : > { %v4974_v34 = vadd.f32 %v6910_v5, %v4898_v23 }
 0x1d2   : > { %v5046_v37 = vmax.f32 %v4974_v34, 0.0 }
 0x1d3   : > { %v4423_v24 = vpop.f32.mrf.mxu2  ;;  %v4603_v25 = vpop.f32.mrf.mxu3 }
 0x1d4   : > { %v4827_v29 = vmax.f32 %v4423_v24, %v4603_v25  ;;  %v4066_v30 = vpop.f32.mrf.mxu0  ;;  %v4246_v31 = vpop.f32.mrf.mxu1 }
 0x1d5   : > { %v4756_v44 = vmax.f32 %v4066_v30, %v4246_v31 }
 0x1d6   : > { %v4899_v35 = vmax.f32 %v4755_v28, %v4827_v29 }
 0x1d7   : > { %5923 = vmatmul.msk.bf16.gmra.mxu0 %vm3567_vm2, %v6070_v26  ;;  %5959 = vmatmul.msk.bf16.gmra.mxu1 %vm3567_vm2, %v6106_v27 }
 0x1d8   : > { %v4975_v36 = vadd.f32 %v6910_v5, %v4899_v35  ;;  %5995 = vmatmul.msk.bf16.gmra.mxu2 %vm3567_vm2, %v6142_v32  ;;  %6031 = vmatmul.msk.bf16.gmra.mxu3 %vm3567_vm2, %v6178_v33  ;;  %v6073_v32 = vld [vmem:[%s6831_s8 + $0xa8] sm:$0xff] }
 0x1d9   : > { %v6109_v33 = vld [vmem:[%s6831_s8 + $0x1c8] sm:$0xff] }
 0x1da   : > { %v5047_v38 = vmax.f32 %v4975_v36, 0.0 }
 0x1db   : > { %v4426_v39 = vpop.f32.mrf.mxu2  ;;  %v4606_v40 = vpop.f32.mrf.mxu3 }
 0x1dc   : > { %v6246_v41 = vpack.c.bf16 %v5047_v38, %v5046_v37  ;;  %v4068_v42 = vpop.f32.mrf.mxu0  ;;  %v4248_v43 = vpop.f32.mrf.mxu1  ;;  %v4828_v45 = vmax.f32 %v4426_v39, %v4606_v40  ;;  %v6145_v38 = vld [vmem:[%s6831_s8 + $0x2e8] sm:$0xff] }
 0x1dd   : > { %v4757_v51 = vmax.f32 %v4068_v42, %v4248_v43  ;;  %v6181_v39 = vld [vmem:[%s6831_s8 + $0x408] sm:$0xff] }
 0x1de   : > { %6386 = vst [vmem:[%s6925_s17 + $0x48] sm:$0xff] %v6246_v41   ;;  %v4900_v46 = vmax.f32 %v4756_v44, %v4828_v45 }
 0x1e0   : > { %v4976_v57 = vadd.f32 %v6910_v5, %v4900_v46 }
 0x1e2   : > { %v5048_v60 = vmax.f32 %v4976_v57, 0.0 }
 0x1e3   : > { %v4428_v47 = vpop.f32.mrf.mxu2  ;;  %v4608_v48 = vpop.f32.mrf.mxu3 }
 0x1e4   : > { %v4829_v52 = vmax.f32 %v4428_v47, %v4608_v48  ;;  %v4071_v53 = vpop.f32.mrf.mxu0  ;;  %v4251_v54 = vpop.f32.mrf.mxu1 }
 0x1e5   : > { %v4758_v3 = vmax.f32 %v4071_v53, %v4251_v54 }
 0x1e6   : > { %v4901_v58 = vmax.f32 %v4757_v51, %v4829_v52 }
 0x1e7   : > { %5924 = vmatmul.msk.bf16.gmra.mxu0 %vm3567_vm2, %v6071_v49  ;;  %5960 = vmatmul.msk.bf16.gmra.mxu1 %vm3567_vm2, %v6107_v50 }
 0x1e8   : > { %v4977_v59 = vadd.f32 %v6910_v5, %v4901_v58  ;;  %5996 = vmatmul.msk.bf16.gmra.mxu2 %vm3567_vm2, %v6143_v55  ;;  %6032 = vmatmul.msk.bf16.gmra.mxu3 %vm3567_vm2, %v6179_v56  ;;  %v6074_v55 = vld [vmem:[%s6831_s8 + $0xb0] sm:$0xff] }
 0x1e9   : > { %v6110_v56 = vld [vmem:[%s6831_s8 + $0x1d0] sm:$0xff] }
 0x1ea   : > { %v5049_v61 = vmax.f32 %v4977_v59, 0.0 }
 0x1eb   : > { %v4431_v62 = vpop.f32.mrf.mxu2  ;;  %v4611_v63 = vpop.f32.mrf.mxu3 }
 0x1ec   : > { %v6251_v0 = vpack.c.bf16 %v5049_v61, %v5048_v60  ;;  %v4073_v1 = vpop.f32.mrf.mxu0  ;;  %v4253_v2 = vpop.f32.mrf.mxu1  ;;  %v4830_v4 = vmax.f32 %v4431_v62, %v4611_v63  ;;  %v6146_v61 = vld [vmem:[%s6831_s8 + $0x2f0] sm:$0xff] }
 0x1ed   : > { %v4759_v11 = vmax.f32 %v4073_v1, %v4253_v2  ;;  %v6182_v62 = vld [vmem:[%s6831_s8 + $0x410] sm:$0xff] }
 0x1ee   : > { %6387 = vst [vmem:[%s6925_s17 + $0x50] sm:$0xff] %v6251_v0   ;;  %v4902_v6 = vmax.f32 %v4758_v3, %v4830_v4 }
 0x1f0   : > { %v4978_v17 = vadd.f32 %v6910_v5, %v4902_v6 }
 0x1f2   : > { %v5050_v20 = vmax.f32 %v4978_v17, 0.0 }
 0x1f3   : > { %v4433_v7 = vpop.f32.mrf.mxu2  ;;  %v4613_v8 = vpop.f32.mrf.mxu3 }
 0x1f4   : > { %v4831_v12 = vmax.f32 %v4433_v7, %v4613_v8  ;;  %v4076_v13 = vpop.f32.mrf.mxu0  ;;  %v4256_v14 = vpop.f32.mrf.mxu1 }
 0x1f5   : > { %v4760_v27 = vmax.f32 %v4076_v13, %v4256_v14 }
 0x1f6   : > { %v4903_v18 = vmax.f32 %v4759_v11, %v4831_v12 }
 0x1f7   : > { %5925 = vmatmul.msk.bf16.gmra.mxu0 %vm3567_vm2, %v6072_v9  ;;  %5961 = vmatmul.msk.bf16.gmra.mxu1 %vm3567_vm2, %v6108_v10 }
 0x1f8   : > { %v4979_v19 = vadd.f32 %v6910_v5, %v4903_v18  ;;  %5997 = vmatmul.msk.bf16.gmra.mxu2 %vm3567_vm2, %v6144_v15  ;;  %6033 = vmatmul.msk.bf16.gmra.mxu3 %vm3567_vm2, %v6180_v16  ;;  %v6075_v15 = vld [vmem:[%s6831_s8 + $0xb8] sm:$0xff] }
 0x1f9   : > { %v6111_v16 = vld [vmem:[%s6831_s8 + $0x1d8] sm:$0xff] }
 0x1fa   : > { %v5051_v21 = vmax.f32 %v4979_v19, 0.0 }
 0x1fb   : > { %v4436_v22 = vpop.f32.mrf.mxu2  ;;  %v4616_v23 = vpop.f32.mrf.mxu3 }
 0x1fc   : > { %v6256_v24 = vpack.c.bf16 %v5051_v21, %v5050_v20  ;;  %v4078_v25 = vpop.f32.mrf.mxu0  ;;  %v4258_v26 = vpop.f32.mrf.mxu1  ;;  %v4832_v28 = vmax.f32 %v4436_v22, %v4616_v23  ;;  %v6147_v21 = vld [vmem:[%s6831_s8 + $0x2f8] sm:$0xff] }
 0x1fd   : > { %v4761_v34 = vmax.f32 %v4078_v25, %v4258_v26  ;;  %v6183_v22 = vld [vmem:[%s6831_s8 + $0x418] sm:$0xff] }
 0x1fe   : > { %6388 = vst [vmem:[%s6925_s17 + $0x58] sm:$0xff] %v6256_v24   ;;  %v4904_v29 = vmax.f32 %v4760_v27, %v4832_v28 }
 0x200   : > { %v4980_v40 = vadd.f32 %v6910_v5, %v4904_v29 }
 0x202   : > { %v5052_v43 = vmax.f32 %v4980_v40, 0.0 }
 0x203   : > { %v4438_v30 = vpop.f32.mrf.mxu2  ;;  %v4618_v31 = vpop.f32.mrf.mxu3 }
 0x204   : > { %v4833_v35 = vmax.f32 %v4438_v30, %v4618_v31  ;;  %v4081_v36 = vpop.f32.mrf.mxu0  ;;  %v4261_v37 = vpop.f32.mrf.mxu1 }
 0x205   : > { %v4762_v50 = vmax.f32 %v4081_v36, %v4261_v37 }
 0x206   : > { %v4905_v41 = vmax.f32 %v4761_v34, %v4833_v35 }
 0x207   : > { %5926 = vmatmul.msk.bf16.gmra.mxu0 %vm3567_vm2, %v6073_v32  ;;  %5962 = vmatmul.msk.bf16.gmra.mxu1 %vm3567_vm2, %v6109_v33 }
 0x208   : > { %v4981_v42 = vadd.f32 %v6910_v5, %v4905_v41  ;;  %5998 = vmatmul.msk.bf16.gmra.mxu2 %vm3567_vm2, %v6145_v38  ;;  %6034 = vmatmul.msk.bf16.gmra.mxu3 %vm3567_vm2, %v6181_v39  ;;  %v6076_v38 = vld [vmem:[%s6831_s8 + $0xc0] sm:$0xff] }
 0x209   : > { %v6112_v39 = vld [vmem:[%s6831_s8 + $0x1e0] sm:$0xff] }
 0x20a   : > { %v5053_v44 = vmax.f32 %v4981_v42, 0.0 }
 0x20b   : > { %v4441_v45 = vpop.f32.mrf.mxu2  ;;  %v4621_v46 = vpop.f32.mrf.mxu3 }
 0x20c   : > { %v6261_v47 = vpack.c.bf16 %v5053_v44, %v5052_v43  ;;  %v4083_v48 = vpop.f32.mrf.mxu0  ;;  %v4263_v49 = vpop.f32.mrf.mxu1  ;;  %v4834_v51 = vmax.f32 %v4441_v45, %v4621_v46  ;;  %v6148_v44 = vld [vmem:[%s6831_s8 + $0x300] sm:$0xff] }
 0x20d   : > { %v4763_v57 = vmax.f32 %v4083_v48, %v4263_v49  ;;  %v6184_v45 = vld [vmem:[%s6831_s8 + $0x420] sm:$0xff] }
 0x20e   : > { %6389 = vst [vmem:[%s6925_s17 + $0x60] sm:$0xff] %v6261_v47   ;;  %v4906_v52 = vmax.f32 %v4762_v50, %v4834_v51 }
 0x210   : > { %v4982_v63 = vadd.f32 %v6910_v5, %v4906_v52 }
 0x212   : > { %v5054_v2 = vmax.f32 %v4982_v63, 0.0 }
 0x213   : > { %v4443_v53 = vpop.f32.mrf.mxu2  ;;  %v4623_v54 = vpop.f32.mrf.mxu3 }
 0x214   : > { %v4835_v58 = vmax.f32 %v4443_v53, %v4623_v54  ;;  %v4086_v59 = vpop.f32.mrf.mxu0  ;;  %v4266_v60 = vpop.f32.mrf.mxu1 }
 0x215   : > { %v4764_v10 = vmax.f32 %v4086_v59, %v4266_v60 }
 0x216   : > { %v4907_v0 = vmax.f32 %v4763_v57, %v4835_v58 }
 0x217   : > { %5927 = vmatmul.msk.bf16.gmra.mxu0 %vm3567_vm2, %v6074_v55  ;;  %5963 = vmatmul.msk.bf16.gmra.mxu1 %vm3567_vm2, %v6110_v56 }
 0x218   : > { %v4983_v1 = vadd.f32 %v6910_v5, %v4907_v0  ;;  %5999 = vmatmul.msk.bf16.gmra.mxu2 %vm3567_vm2, %v6146_v61  ;;  %6035 = vmatmul.msk.bf16.gmra.mxu3 %vm3567_vm2, %v6182_v62  ;;  %v6077_v61 = vld [vmem:[%s6831_s8 + $0xc8] sm:$0xff] }
 0x219   : > { %v6113_v62 = vld [vmem:[%s6831_s8 + $0x1e8] sm:$0xff] }
 0x21a   : > { %v5055_v3 = vmax.f32 %v4983_v1, 0.0 }
 0x21b   : > { %v4446_v4 = vpop.f32.mrf.mxu2  ;;  %v4626_v6 = vpop.f32.mrf.mxu3 }
 0x21c   : > { %v6266_v7 = vpack.c.bf16 %v5055_v3, %v5054_v2  ;;  %v4088_v8 = vpop.f32.mrf.mxu0  ;;  %v4268_v9 = vpop.f32.mrf.mxu1  ;;  %v4836_v11 = vmax.f32 %v4446_v4, %v4626_v6  ;;  %v6149_v3 = vld [vmem:[%s6831_s8 + $0x308] sm:$0xff] }
 0x21d   : > { %v4765_v17 = vmax.f32 %v4088_v8, %v4268_v9  ;;  %v6185_v4 = vld [vmem:[%s6831_s8 + $0x428] sm:$0xff] }
 0x21e   : > { %6390 = vst [vmem:[%s6925_s17 + $0x68] sm:$0xff] %v6266_v7   ;;  %v4908_v12 = vmax.f32 %v4764_v10, %v4836_v11 }
 0x220   : > { %v4984_v23 = vadd.f32 %v6910_v5, %v4908_v12 }
 0x222   : > { %v5056_v26 = vmax.f32 %v4984_v23, 0.0 }
 0x223   : > { %v4448_v13 = vpop.f32.mrf.mxu2  ;;  %v4628_v14 = vpop.f32.mrf.mxu3 }
 0x224   : > { %v4837_v18 = vmax.f32 %v4448_v13, %v4628_v14  ;;  %v4091_v19 = vpop.f32.mrf.mxu0  ;;  %v4271_v20 = vpop.f32.mrf.mxu1 }
 0x225   : > { %v4766_v33 = vmax.f32 %v4091_v19, %v4271_v20 }
 0x226   : > { %v4909_v24 = vmax.f32 %v4765_v17, %v4837_v18 }
 0x227   : > { %5928 = vmatmul.msk.bf16.gmra.mxu0 %vm3567_vm2, %v6075_v15  ;;  %5964 = vmatmul.msk.bf16.gmra.mxu1 %vm3567_vm2, %v6111_v16 }
 0x228   : > { %v4985_v25 = vadd.f32 %v6910_v5, %v4909_v24  ;;  %6000 = vmatmul.msk.bf16.gmra.mxu2 %vm3567_vm2, %v6147_v21  ;;  %6036 = vmatmul.msk.bf16.gmra.mxu3 %vm3567_vm2, %v6183_v22  ;;  %v6078_v21 = vld [vmem:[%s6831_s8 + $0xd0] sm:$0xff] }
 0x229   : > { %v6114_v22 = vld [vmem:[%s6831_s8 + $0x1f0] sm:$0xff] }
 0x22a   : > { %v5057_v27 = vmax.f32 %v4985_v25, 0.0 }
 0x22b   : > { %v4451_v28 = vpop.f32.mrf.mxu2  ;;  %v4631_v29 = vpop.f32.mrf.mxu3 }
 0x22c   : > { %v6271_v30 = vpack.c.bf16 %v5057_v27, %v5056_v26  ;;  %v4093_v31 = vpop.f32.mrf.mxu0  ;;  %v4273_v32 = vpop.f32.mrf.mxu1  ;;  %v4838_v34 = vmax.f32 %v4451_v28, %v4631_v29  ;;  %v6150_v27 = vld [vmem:[%s6831_s8 + $0x310] sm:$0xff] }
 0x22d   : > { %v4767_v40 = vmax.f32 %v4093_v31, %v4273_v32  ;;  %v6186_v28 = vld [vmem:[%s6831_s8 + $0x430] sm:$0xff] }
 0x22e   : > { %6391 = vst [vmem:[%s6925_s17 + $0x70] sm:$0xff] %v6271_v30   ;;  %v4910_v35 = vmax.f32 %v4766_v33, %v4838_v34 }
 0x230   : > { %v4986_v46 = vadd.f32 %v6910_v5, %v4910_v35 }
 0x232   : > { %v5058_v49 = vmax.f32 %v4986_v46, 0.0 }
 0x233   : > { %v4453_v36 = vpop.f32.mrf.mxu2  ;;  %v4633_v37 = vpop.f32.mrf.mxu3 }
 0x234   : > { %v4839_v41 = vmax.f32 %v4453_v36, %v4633_v37  ;;  %v4096_v42 = vpop.f32.mrf.mxu0  ;;  %v4276_v43 = vpop.f32.mrf.mxu1 }
 0x235   : > { %v4768_v56 = vmax.f32 %v4096_v42, %v4276_v43  ;;  %v6079_v43 = vld [vmem:[%s6831_s8 + $0xd8] sm:$0xff] }
 0x236   : > { %v4911_v47 = vmax.f32 %v4767_v40, %v4839_v41 }
 0x237   : > { %5929 = vmatmul.msk.bf16.gmra.mxu0 %vm3567_vm2, %v6076_v38  ;;  %5965 = vmatmul.msk.bf16.gmra.mxu1 %vm3567_vm2, %v6112_v39 }
 0x238   : > { %v4987_v48 = vadd.f32 %v6910_v5, %v4911_v47  ;;  %6001 = vmatmul.msk.bf16.gmra.mxu2 %vm3567_vm2, %v6148_v44  ;;  %6037 = vmatmul.msk.bf16.gmra.mxu3 %vm3567_vm2, %v6184_v45  ;;  %v6115_v44 = vld [vmem:[%s6831_s8 + $0x1f8] sm:$0xff] }
 0x23a   : > { %v5059_v50 = vmax.f32 %v4987_v48, 0.0 }
 0x23b   : > { %v4456_v51 = vpop.f32.mrf.mxu2  ;;  %v4636_v52 = vpop.f32.mrf.mxu3 }
 0x23c   : > { %v6276_v53 = vpack.c.bf16 %v5059_v50, %v5058_v49  ;;  %v4098_v54 = vpop.f32.mrf.mxu0  ;;  %v4278_v55 = vpop.f32.mrf.mxu1  ;;  %v4840_v57 = vmax.f32 %v4456_v51, %v4636_v52  ;;  %v6151_v49 = vld [vmem:[%s6831_s8 + $0x318] sm:$0xff]  ;;  %v7122_v51 = vld [vmem:[%s7258_s2] ss:$0 sm:$0xff] }
 0x23d   : > { %v4769_v63 = vmax.f32 %v4098_v54, %v4278_v55  ;;  %v6187_v50 = vld [vmem:[%s6831_s8 + $0x438] sm:$0xff] }
 0x23e   : > { %6392 = vst [vmem:[%s6925_s17 + $0x78] sm:$0xff] %v6276_v53   ;;  %v4912_v58 = vmax.f32 %v4768_v56, %v4840_v57 }
 0x240   : > { %v4988_v6 = vadd.f32 %v6910_v5, %v4912_v58 }
 0x242   : > { %v5060_v9 = vmax.f32 %v4988_v6, 0.0 }
 0x243   : > { %v4458_v59 = vpop.f32.mrf.mxu2  ;;  %v4638_v60 = vpop.f32.mrf.mxu3 }
 0x244   : > { %v4841_v0 = vmax.f32 %v4458_v59, %v4638_v60  ;;  %v4101_v1 = vpop.f32.mrf.mxu0  ;;  %v4281_v2 = vpop.f32.mrf.mxu1 }
 0x245   : > { %v4770_v16 = vmax.f32 %v4101_v1, %v4281_v2 }
 0x246   : > { %v4913_v7 = vmax.f32 %v4769_v63, %v4841_v0 }
 0x247   : > { %5930 = vmatmul.msk.bf16.gmra.mxu0 %vm3567_vm2, %v6077_v61  ;;  %5966 = vmatmul.msk.bf16.gmra.mxu1 %vm3567_vm2, %v6113_v62 }
 0x248   : > { %v4989_v8 = vadd.f32 %v6910_v5, %v4913_v7  ;;  %6002 = vmatmul.msk.bf16.gmra.mxu2 %vm3567_vm2, %v6149_v3  ;;  %6038 = vmatmul.msk.bf16.gmra.mxu3 %vm3567_vm2, %v6185_v4  ;;  %v6080_v3 = vld [vmem:[%s6831_s8 + $0xe0] sm:$0xff] }
 0x249   : > { %v6116_v4 = vld [vmem:[%s6831_s8 + $0x200] sm:$0xff] }
 0x24a   : > { %v5061_v10 = vmax.f32 %v4989_v8, 0.0 }
 0x24b   : > { %v4461_v11 = vpop.f32.mrf.mxu2  ;;  %v4641_v12 = vpop.f32.mrf.mxu3 }
 0x24c   : > { %v6281_v13 = vpack.c.bf16 %v5061_v10, %v5060_v9  ;;  %v4103_v14 = vpop.f32.mrf.mxu0  ;;  %v4283_v15 = vpop.f32.mrf.mxu1  ;;  %v4842_v17 = vmax.f32 %v4461_v11, %v4641_v12  ;;  %v6152_v10 = vld [vmem:[%s6831_s8 + $0x320] sm:$0xff] }
 0x24d   : > { %v4771_v23 = vmax.f32 %v4103_v14, %v4283_v15  ;;  %v6188_v11 = vld [vmem:[%s6831_s8 + $0x440] sm:$0xff] }
 0x24e   : > { %6393 = vst [vmem:[%s6925_s17 + $0x80] sm:$0xff] %v6281_v13   ;;  %v4914_v18 = vmax.f32 %v4770_v16, %v4842_v17 }
 0x250   : > { %v4990_v29 = vadd.f32 %v6910_v5, %v4914_v18 }
 0x252   : > { %v5062_v32 = vmax.f32 %v4990_v29, 0.0 }
 0x253   : > { %v4463_v19 = vpop.f32.mrf.mxu2  ;;  %v4643_v20 = vpop.f32.mrf.mxu3 }
 0x254   : > { %v4843_v24 = vmax.f32 %v4463_v19, %v4643_v20  ;;  %v4106_v25 = vpop.f32.mrf.mxu0  ;;  %v4286_v26 = vpop.f32.mrf.mxu1 }
 0x255   : > { %v4772_v39 = vmax.f32 %v4106_v25, %v4286_v26 }
 0x256   : > { %v4915_v30 = vmax.f32 %v4771_v23, %v4843_v24 }
 0x257   : > { %5931 = vmatmul.msk.bf16.gmra.mxu0 %vm3567_vm2, %v6078_v21  ;;  %5967 = vmatmul.msk.bf16.gmra.mxu1 %vm3567_vm2, %v6114_v22 }
 0x258   : > { %v4991_v31 = vadd.f32 %v6910_v5, %v4915_v30  ;;  %6003 = vmatmul.msk.bf16.gmra.mxu2 %vm3567_vm2, %v6150_v27  ;;  %6039 = vmatmul.msk.bf16.gmra.mxu3 %vm3567_vm2, %v6186_v28  ;;  %v6081_v27 = vld [vmem:[%s6831_s8 + $0xe8] sm:$0xff] }
 0x259   : > { %v6117_v28 = vld [vmem:[%s6831_s8 + $0x208] sm:$0xff] }
 0x25a   : > { %v5063_v33 = vmax.f32 %v4991_v31, 0.0 }
 0x25b   : > { %v4466_v34 = vpop.f32.mrf.mxu2  ;;  %v4646_v35 = vpop.f32.mrf.mxu3 }
 0x25c   : > { %v6286_v36 = vpack.c.bf16 %v5063_v33, %v5062_v32  ;;  %v4108_v37 = vpop.f32.mrf.mxu0  ;;  %v4288_v38 = vpop.f32.mrf.mxu1  ;;  %v4844_v40 = vmax.f32 %v4466_v34, %v4646_v35  ;;  %v6153_v33 = vld [vmem:[%s6831_s8 + $0x328] sm:$0xff] }
 0x25d   : > { %v4773_v45 = vmax.f32 %v4108_v37, %v4288_v38  ;;  %v6189_v34 = vld [vmem:[%s6831_s8 + $0x448] sm:$0xff] }
 0x25e   : > { %6394 = vst [vmem:[%s6925_s17 + $0x88] sm:$0xff] %v6286_v36   ;;  %v4916_v41 = vmax.f32 %v4772_v39, %v4844_v40 }
 0x260   : > { %v4992_v52 = vadd.f32 %v7122_v51, %v4916_v41 }
 0x262   : > { %v5064_v55 = vmax.f32 %v4992_v52, 0.0 }
 0x263   : > { %v4468_v5 = vpop.f32.mrf.mxu2  ;;  %v4648_v42 = vpop.f32.mrf.mxu3 }
 0x264   : > { %v4845_v46 = vmax.f32 %v4468_v5, %v4648_v42  ;;  %v4111_v47 = vpop.f32.mrf.mxu0  ;;  %v4291_v48 = vpop.f32.mrf.mxu1 }
 0x265   : > { %v4774_v62 = vmax.f32 %v4111_v47, %v4291_v48 }
 0x266   : > { %v4917_v53 = vmax.f32 %v4773_v45, %v4845_v46 }
 0x267   : > { %5932 = vmatmul.msk.bf16.gmra.mxu0 %vm3567_vm2, %v6079_v43  ;;  %5968 = vmatmul.msk.bf16.gmra.mxu1 %vm3567_vm2, %v6115_v44 }
 0x268   : > { %v4993_v54 = vadd.f32 %v7122_v51, %v4917_v53  ;;  %6004 = vmatmul.msk.bf16.gmra.mxu2 %vm3567_vm2, %v6151_v49  ;;  %6040 = vmatmul.msk.bf16.gmra.mxu3 %vm3567_vm2, %v6187_v50  ;;  %v6082_v49 = vld [vmem:[%s6831_s8 + $0xf0] sm:$0xff] }
 0x269   : > { %v6118_v50 = vld [vmem:[%s6831_s8 + $0x210] sm:$0xff] }
 0x26a   : > { %v5065_v56 = vmax.f32 %v4993_v54, 0.0 }
 0x26b   : > { %v4471_v57 = vpop.f32.mrf.mxu2  ;;  %v4651_v58 = vpop.f32.mrf.mxu3 }
 0x26c   : > { %v6291_v59 = vpack.c.bf16 %v5065_v56, %v5064_v55  ;;  %v4113_v60 = vpop.f32.mrf.mxu0  ;;  %v4293_v61 = vpop.f32.mrf.mxu1  ;;  %v4846_v63 = vmax.f32 %v4471_v57, %v4651_v58  ;;  %v6154_v56 = vld [vmem:[%s6831_s8 + $0x330] sm:$0xff] }
 0x26d   : > { %v4775_v6 = vmax.f32 %v4113_v60, %v4293_v61  ;;  %v6190_v57 = vld [vmem:[%s6831_s8 + $0x450] sm:$0xff] }
 0x26e   : > { %6395 = vst [vmem:[%s6925_s17 + $0x90] sm:$0xff] %v6291_v59   ;;  %v4918_v0 = vmax.f32 %v4774_v62, %v4846_v63 }
 0x270   : > { %v4994_v12 = vadd.f32 %v7122_v51, %v4918_v0 }
 0x272   : > { %v5066_v15 = vmax.f32 %v4994_v12, 0.0 }
 0x273   : > { %v4473_v1 = vpop.f32.mrf.mxu2  ;;  %v4653_v2 = vpop.f32.mrf.mxu3 }
 0x274   : > { %v4847_v7 = vmax.f32 %v4473_v1, %v4653_v2  ;;  %v4116_v8 = vpop.f32.mrf.mxu0  ;;  %v4296_v9 = vpop.f32.mrf.mxu1 }
 0x275   : > { %v4776_v22 = vmax.f32 %v4116_v8, %v4296_v9 }
 0x276   : > { %v4919_v13 = vmax.f32 %v4775_v6, %v4847_v7 }
 0x277   : > { %5933 = vmatmul.msk.bf16.gmra.mxu0 %vm3567_vm2, %v6080_v3  ;;  %5969 = vmatmul.msk.bf16.gmra.mxu1 %vm3567_vm2, %v6116_v4 }
 0x278   : > { %v4995_v14 = vadd.f32 %v7122_v51, %v4919_v13  ;;  %6005 = vmatmul.msk.bf16.gmra.mxu2 %vm3567_vm2, %v6152_v10  ;;  %6041 = vmatmul.msk.bf16.gmra.mxu3 %vm3567_vm2, %v6188_v11  ;;  %v6083_v10 = vld [vmem:[%s6831_s8 + $0xf8] sm:$0xff] }
 0x279   : > { %v6119_v11 = vld [vmem:[%s6831_s8 + $0x218] sm:$0xff] }
 0x27a   : > { %v5067_v16 = vmax.f32 %v4995_v14, 0.0 }
 0x27b   : > { %v4476_v17 = vpop.f32.mrf.mxu2  ;;  %v4656_v18 = vpop.f32.mrf.mxu3 }
 0x27c   : > { %v6296_v19 = vpack.c.bf16 %v5067_v16, %v5066_v15  ;;  %v4118_v20 = vpop.f32.mrf.mxu0  ;;  %v4298_v21 = vpop.f32.mrf.mxu1  ;;  %v4848_v23 = vmax.f32 %v4476_v17, %v4656_v18  ;;  %v6155_v16 = vld [vmem:[%s6831_s8 + $0x338] sm:$0xff] }
 0x27d   : > { %v4777_v29 = vmax.f32 %v4118_v20, %v4298_v21  ;;  %v6191_v17 = vld [vmem:[%s6831_s8 + $0x458] sm:$0xff] }
 0x27e   : > { %6396 = vst [vmem:[%s6925_s17 + $0x98] sm:$0xff] %v6296_v19   ;;  %v4920_v24 = vmax.f32 %v4776_v22, %v4848_v23 }
 0x280   : > { %v4996_v35 = vadd.f32 %v7122_v51, %v4920_v24 }
 0x282   : > { %v5068_v38 = vmax.f32 %v4996_v35, 0.0 }
 0x283   : > { %v4478_v25 = vpop.f32.mrf.mxu2  ;;  %v4658_v26 = vpop.f32.mrf.mxu3 }
 0x284   : > { %v4849_v30 = vmax.f32 %v4478_v25, %v4658_v26  ;;  %v4121_v31 = vpop.f32.mrf.mxu0  ;;  %v4301_v32 = vpop.f32.mrf.mxu1 }
 0x285   : > { %v4778_v44 = vmax.f32 %v4121_v31, %v4301_v32 }
 0x286   : > { %v4921_v36 = vmax.f32 %v4777_v29, %v4849_v30 }
 0x287   : > { %5934 = vmatmul.msk.bf16.gmra.mxu0 %vm3567_vm2, %v6081_v27  ;;  %5970 = vmatmul.msk.bf16.gmra.mxu1 %vm3567_vm2, %v6117_v28 }
 0x288   : > { %v4997_v37 = vadd.f32 %v7122_v51, %v4921_v36  ;;  %6006 = vmatmul.msk.bf16.gmra.mxu2 %vm3567_vm2, %v6153_v33  ;;  %6042 = vmatmul.msk.bf16.gmra.mxu3 %vm3567_vm2, %v6189_v34  ;;  %v6084_v33 = vld [vmem:[%s6831_s8 + $0x100] sm:$0xff] }
 0x289   : > { %v6120_v34 = vld [vmem:[%s6831_s8 + $0x220] sm:$0xff] }
 0x28a   : > { %v5069_v39 = vmax.f32 %v4997_v37, 0.0 }
 0x28b   : > { %v4481_v40 = vpop.f32.mrf.mxu2  ;;  %v4661_v41 = vpop.f32.mrf.mxu3 }
 0x28c   : > { %v6301_v5 = vpack.c.bf16 %v5069_v39, %v5068_v38  ;;  %v4123_v42 = vpop.f32.mrf.mxu0  ;;  %v4303_v43 = vpop.f32.mrf.mxu1  ;;  %v4850_v45 = vmax.f32 %v4481_v40, %v4661_v41  ;;  %v6156_v39 = vld [vmem:[%s6831_s8 + $0x340] sm:$0xff] }
 0x28d   : > { %v4779_v52 = vmax.f32 %v4123_v42, %v4303_v43  ;;  %v6192_v40 = vld [vmem:[%s6831_s8 + $0x460] sm:$0xff] }
 0x28e   : > { %6397 = vst [vmem:[%s6925_s17 + $0xa0] sm:$0xff] %v6301_v5   ;;  %v4922_v46 = vmax.f32 %v4778_v44, %v4850_v45 }
 0x290   : > { %v4998_v58 = vadd.f32 %v7122_v51, %v4922_v46 }
 0x292   : > { %v5070_v61 = vmax.f32 %v4998_v58, 0.0 }
 0x293   : > { %v4483_v47 = vpop.f32.mrf.mxu2  ;;  %v4663_v48 = vpop.f32.mrf.mxu3 }
 0x294   : > { %v4851_v53 = vmax.f32 %v4483_v47, %v4663_v48  ;;  %v4126_v54 = vpop.f32.mrf.mxu0  ;;  %v4306_v55 = vpop.f32.mrf.mxu1 }
 0x295   : > { %v4780_v4 = vmax.f32 %v4126_v54, %v4306_v55 }
 0x296   : > { %v4923_v59 = vmax.f32 %v4779_v52, %v4851_v53 }
 0x297   : > { %5935 = vmatmul.msk.bf16.gmra.mxu0 %vm3567_vm2, %v6082_v49  ;;  %5971 = vmatmul.msk.bf16.gmra.mxu1 %vm3567_vm2, %v6118_v50 }
 0x298   : > { %v4999_v60 = vadd.f32 %v7122_v51, %v4923_v59  ;;  %6007 = vmatmul.msk.bf16.gmra.mxu2 %vm3567_vm2, %v6154_v56  ;;  %6043 = vmatmul.msk.bf16.gmra.mxu3 %vm3567_vm2, %v6190_v57  ;;  %v6085_v56 = vld [vmem:[%s6831_s8 + $0x108] sm:$0xff] }
 0x299   : > { %v6121_v57 = vld [vmem:[%s6831_s8 + $0x228] sm:$0xff] }
 0x29a   : > { %v5071_v62 = vmax.f32 %v4999_v60, 0.0 }
 0x29b   : > { %v4486_v63 = vpop.f32.mrf.mxu2  ;;  %v4666_v0 = vpop.f32.mrf.mxu3 }
 0x29c   : > { %v6306_v1 = vpack.c.bf16 %v5071_v62, %v5070_v61  ;;  %v4128_v2 = vpop.f32.mrf.mxu0  ;;  %v4308_v3 = vpop.f32.mrf.mxu1  ;;  %v4852_v6 = vmax.f32 %v4486_v63, %v4666_v0  ;;  %v6157_v62 = vld [vmem:[%s6831_s8 + $0x348] sm:$0xff] }
 0x29d   : > { %v4781_v12 = vmax.f32 %v4128_v2, %v4308_v3  ;;  %v6193_v63 = vld [vmem:[%s6831_s8 + $0x468] sm:$0xff] }
 0x29e   : > { %6398 = vst [vmem:[%s6925_s17 + $0xa8] sm:$0xff] %v6306_v1   ;;  %v4924_v7 = vmax.f32 %v4780_v4, %v4852_v6 }
 0x2a0   : > { %v5000_v18 = vadd.f32 %v7122_v51, %v4924_v7 }
 0x2a2   : > { %v5072_v21 = vmax.f32 %v5000_v18, 0.0 }
 0x2a3   : > { %v4488_v8 = vpop.f32.mrf.mxu2  ;;  %v4668_v9 = vpop.f32.mrf.mxu3 }
 0x2a4   : > { %v4853_v13 = vmax.f32 %v4488_v8, %v4668_v9  ;;  %v4131_v14 = vpop.f32.mrf.mxu0  ;;  %v4311_v15 = vpop.f32.mrf.mxu1 }
 0x2a5   : > { %v4782_v28 = vmax.f32 %v4131_v14, %v4311_v15 }
 0x2a6   : > { %v4925_v19 = vmax.f32 %v4781_v12, %v4853_v13 }
 0x2a7   : > { %5936 = vmatmul.msk.bf16.gmra.mxu0 %vm3567_vm2, %v6083_v10  ;;  %5972 = vmatmul.msk.bf16.gmra.mxu1 %vm3567_vm2, %v6119_v11 }
 0x2a8   : > { %v5001_v20 = vadd.f32 %v7122_v51, %v4925_v19  ;;  %6008 = vmatmul.msk.bf16.gmra.mxu2 %vm3567_vm2, %v6155_v16  ;;  %6044 = vmatmul.msk.bf16.gmra.mxu3 %vm3567_vm2, %v6191_v17  ;;  %v6086_v16 = vld [vmem:[%s6831_s8 + $0x110] sm:$0xff] }
 0x2a9   : > { %v6122_v17 = vld [vmem:[%s6831_s8 + $0x230] sm:$0xff] }
 0x2aa   : > { %v5073_v22 = vmax.f32 %v5001_v20, 0.0 }
 0x2ab   : > { %v4491_v23 = vpop.f32.mrf.mxu2  ;;  %v4671_v24 = vpop.f32.mrf.mxu3 }
 0x2ac   : > { %v6311_v25 = vpack.c.bf16 %v5073_v22, %v5072_v21  ;;  %v4133_v26 = vpop.f32.mrf.mxu0  ;;  %v4313_v27 = vpop.f32.mrf.mxu1  ;;  %v4854_v29 = vmax.f32 %v4491_v23, %v4671_v24  ;;  %v6158_v22 = vld [vmem:[%s6831_s8 + $0x350] sm:$0xff] }
 0x2ad   : > { %v4783_v35 = vmax.f32 %v4133_v26, %v4313_v27  ;;  %v6194_v23 = vld [vmem:[%s6831_s8 + $0x470] sm:$0xff] }
 0x2ae   : > { %6399 = vst [vmem:[%s6925_s17 + $0xb0] sm:$0xff] %v6311_v25   ;;  %v4926_v30 = vmax.f32 %v4782_v28, %v4854_v29 }
 0x2b0   : > { %v5002_v41 = vadd.f32 %v7122_v51, %v4926_v30 }
 0x2b2   : > { %v5074_v43 = vmax.f32 %v5002_v41, 0.0 }
 0x2b3   : > { %v4493_v31 = vpop.f32.mrf.mxu2  ;;  %v4673_v32 = vpop.f32.mrf.mxu3 }
 0x2b4   : > { %v4855_v36 = vmax.f32 %v4493_v31, %v4673_v32  ;;  %v4136_v37 = vpop.f32.mrf.mxu0  ;;  %v4316_v38 = vpop.f32.mrf.mxu1 }
 0x2b5   : > { %v4784_v50 = vmax.f32 %v4136_v37, %v4316_v38 }
 0x2b6   : > { %v4927_v5 = vmax.f32 %v4783_v35, %v4855_v36 }
 0x2b7   : > { %5937 = vmatmul.msk.bf16.gmra.mxu0 %vm3567_vm2, %v6084_v33  ;;  %5973 = vmatmul.msk.bf16.gmra.mxu1 %vm3567_vm2, %v6120_v34 }
 0x2b8   : > { %v5003_v42 = vadd.f32 %v7122_v51, %v4927_v5  ;;  %6009 = vmatmul.msk.bf16.gmra.mxu2 %vm3567_vm2, %v6156_v39  ;;  %6045 = vmatmul.msk.bf16.gmra.mxu3 %vm3567_vm2, %v6192_v40  ;;  %v6087_v39 = vld [vmem:[%s6831_s8 + $0x118] sm:$0xff] }
 0x2b9   : > { %v6123_v40 = vld [vmem:[%s6831_s8 + $0x238] sm:$0xff] }
 0x2ba   : > { %v5075_v44 = vmax.f32 %v5003_v42, 0.0 }
 0x2bb   : > { %v4496_v45 = vpop.f32.mrf.mxu2  ;;  %v4676_v46 = vpop.f32.mrf.mxu3 }
 0x2bc   : > { %v6316_v47 = vpack.c.bf16 %v5075_v44, %v5074_v43  ;;  %v4138_v48 = vpop.f32.mrf.mxu0  ;;  %v4318_v49 = vpop.f32.mrf.mxu1  ;;  %v4856_v52 = vmax.f32 %v4496_v45, %v4676_v46  ;;  %v6159_v44 = vld [vmem:[%s6831_s8 + $0x358] sm:$0xff] }
 0x2bd   : > { %v4785_v58 = vmax.f32 %v4138_v48, %v4318_v49  ;;  %v6195_v45 = vld [vmem:[%s6831_s8 + $0x478] sm:$0xff] }
 0x2be   : > { %6400 = vst [vmem:[%s6925_s17 + $0xb8] sm:$0xff] %v6316_v47   ;;  %v4928_v53 = vmax.f32 %v4784_v50, %v4856_v52 }
 0x2c0   : > { %v5004_v0 = vadd.f32 %v7122_v51, %v4928_v53 }
 0x2c2   : > { %v5076_v3 = vmax.f32 %v5004_v0, 0.0 }
 0x2c3   : > { %v4498_v54 = vpop.f32.mrf.mxu2  ;;  %v4678_v55 = vpop.f32.mrf.mxu3 }
 0x2c4   : > { %v4857_v59 = vmax.f32 %v4498_v54, %v4678_v55  ;;  %v4141_v60 = vpop.f32.mrf.mxu0  ;;  %v4321_v61 = vpop.f32.mrf.mxu1 }
 0x2c5   : > { %v4786_v11 = vmax.f32 %v4141_v60, %v4321_v61 }
 0x2c6   : > { %v4929_v1 = vmax.f32 %v4785_v58, %v4857_v59 }
 0x2c7   : > { %5938 = vmatmul.msk.bf16.gmra.mxu0 %vm3567_vm2, %v6085_v56  ;;  %5974 = vmatmul.msk.bf16.gmra.mxu1 %vm3567_vm2, %v6121_v57 }
 0x2c8   : > { %v5005_v2 = vadd.f32 %v7122_v51, %v4929_v1  ;;  %6010 = vmatmul.msk.bf16.gmra.mxu2 %vm3567_vm2, %v6157_v62  ;;  %6046 = vmatmul.msk.bf16.gmra.mxu3 %vm3567_vm2, %v6193_v63 }
 0x2ca   : > { %v5077_v4 = vmax.f32 %v5005_v2, 0.0 }
 0x2cb   : > { %v4501_v6 = vpop.f32.mrf.mxu2  ;;  %v4681_v7 = vpop.f32.mrf.mxu3 }
 0x2cc   : > { %v6321_v8 = vpack.c.bf16 %v5077_v4, %v5076_v3  ;;  %v4143_v9 = vpop.f32.mrf.mxu0  ;;  %v4323_v10 = vpop.f32.mrf.mxu1  ;;  %v4858_v12 = vmax.f32 %v4501_v6, %v4681_v7 }
 0x2cd   : > { %v4787_v18 = vmax.f32 %v4143_v9, %v4323_v10 }
 0x2ce   : > { %6401 = vst [vmem:[%s6925_s17 + $0xc0] sm:$0xff] %v6321_v8   ;;  %v4930_v13 = vmax.f32 %v4786_v11, %v4858_v12 }
 0x2d0   : > { %v5006_v24 = vadd.f32 %v7122_v51, %v4930_v13 }
 0x2d2   : > { %v5078_v27 = vmax.f32 %v5006_v24, 0.0 }
 0x2d3   : > { %v4503_v14 = vpop.f32.mrf.mxu2  ;;  %v4683_v15 = vpop.f32.mrf.mxu3 }
 0x2d4   : > { %v4859_v19 = vmax.f32 %v4503_v14, %v4683_v15  ;;  %v4146_v20 = vpop.f32.mrf.mxu0  ;;  %v4326_v21 = vpop.f32.mrf.mxu1 }
 0x2d5   : > { %v4788_v34 = vmax.f32 %v4146_v20, %v4326_v21 }
 0x2d6   : > { %v4931_v25 = vmax.f32 %v4787_v18, %v4859_v19 }
 0x2d7   : > { %5939 = vmatmul.msk.bf16.gmra.mxu0 %vm3567_vm2, %v6086_v16  ;;  %5975 = vmatmul.msk.bf16.gmra.mxu1 %vm3567_vm2, %v6122_v17 }
 0x2d8   : > { %v5007_v26 = vadd.f32 %v7122_v51, %v4931_v25  ;;  %6011 = vmatmul.msk.bf16.gmra.mxu2 %vm3567_vm2, %v6158_v22  ;;  %6047 = vmatmul.msk.bf16.gmra.mxu3 %vm3567_vm2, %v6194_v23 }
 0x2da   : > { %v5079_v28 = vmax.f32 %v5007_v26, 0.0 }
 0x2db   : > { %v4506_v29 = vpop.f32.mrf.mxu2  ;;  %v4686_v30 = vpop.f32.mrf.mxu3 }
 0x2dc   : > { %v6326_v31 = vpack.c.bf16 %v5079_v28, %v5078_v27  ;;  %v4148_v32 = vpop.f32.mrf.mxu0  ;;  %v4328_v33 = vpop.f32.mrf.mxu1  ;;  %v4860_v35 = vmax.f32 %v4506_v29, %v4686_v30 }
 0x2dd   : > { %v4789_v41 = vmax.f32 %v4148_v32, %v4328_v33 }
 0x2de   : > { %6402 = vst [vmem:[%s6925_s17 + $0xc8] sm:$0xff] %v6326_v31   ;;  %v4932_v36 = vmax.f32 %v4788_v34, %v4860_v35 }
 0x2e0   : > { %v5008_v46 = vadd.f32 %v7122_v51, %v4932_v36 }
 0x2e2   : > { %v5080_v49 = vmax.f32 %v5008_v46, 0.0 }
 0x2e3   : > { %v4508_v37 = vpop.f32.mrf.mxu2  ;;  %v4688_v38 = vpop.f32.mrf.mxu3 }
 0x2e4   : > { %v4861_v5 = vmax.f32 %v4508_v37, %v4688_v38  ;;  %v4151_v42 = vpop.f32.mrf.mxu0  ;;  %v4331_v43 = vpop.f32.mrf.mxu1 }
 0x2e5   : > { %v4790_v57 = vmax.f32 %v4151_v42, %v4331_v43 }
 0x2e6   : > { %v4933_v47 = vmax.f32 %v4789_v41, %v4861_v5 }
 0x2e7   : > { %5940 = vmatmul.msk.bf16.gmra.mxu0 %vm3567_vm2, %v6087_v39  ;;  %5976 = vmatmul.msk.bf16.gmra.mxu1 %vm3567_vm2, %v6123_v40 }
 0x2e8   : > { %v5009_v48 = vadd.f32 %v7122_v51, %v4933_v47  ;;  %6012 = vmatmul.msk.bf16.gmra.mxu2 %vm3567_vm2, %v6159_v44  ;;  %6048 = vmatmul.msk.bf16.gmra.mxu3 %vm3567_vm2, %v6195_v45 }
 0x2ea   : > { %v5081_v50 = vmax.f32 %v5009_v48, 0.0 }
 0x2eb   : > { %v4511_v52 = vpop.f32.mrf.mxu2  ;;  %v4691_v53 = vpop.f32.mrf.mxu3 }
 0x2ec   : > { %v6331_v54 = vpack.c.bf16 %v5081_v50, %v5080_v49  ;;  %v4153_v55 = vpop.f32.mrf.mxu0  ;;  %v4333_v56 = vpop.f32.mrf.mxu1  ;;  %v4862_v58 = vmax.f32 %v4511_v52, %v4691_v53 }
 0x2ed   : > { %v4791_v62 = vmax.f32 %v4153_v55, %v4333_v56 }
 0x2ee   : > { %6403 = vst [vmem:[%s6925_s17 + $0xd0] sm:$0xff] %v6331_v54   ;;  %v4934_v59 = vmax.f32 %v4790_v57, %v4862_v58 }
 0x2f0   : > { %v5010_v2 = vadd.f32 %v7122_v51, %v4934_v59 }
 0x2f2   : > { %v5082_v6 = vmax.f32 %v5010_v2, 0.0 }
 0x2f3   : > { %v4513_v60 = vpop.f32.mrf.mxu2  ;;  %v4693_v61 = vpop.f32.mrf.mxu3 }
 0x2f4   : > { %v4863_v63 = vmax.f32 %v4513_v60, %v4693_v61  ;;  %v4156_v0 = vpop.f32.mrf.mxu0  ;;  %v4336_v1 = vpop.f32.mrf.mxu1 }
 0x2f5   : > { %v4792_v13 = vmax.f32 %v4156_v0, %v4336_v1 }
 0x2f6   : > { %v4935_v3 = vmax.f32 %v4791_v62, %v4863_v63 }
 0x2f8   : > { %v5011_v4 = vadd.f32 %v7122_v51, %v4935_v3 }
 0x2fa   : > { %v5083_v7 = vmax.f32 %v5011_v4, 0.0 }
 0x2fb   : > { %v4516_v8 = vpop.f32.mrf.mxu2  ;;  %v4696_v9 = vpop.f32.mrf.mxu3 }
 0x2fc   : > { %v6336_v10 = vpack.c.bf16 %v5083_v7, %v5082_v6  ;;  %v4158_v11 = vpop.f32.mrf.mxu0  ;;  %v4338_v12 = vpop.f32.mrf.mxu1  ;;  %v4864_v14 = vmax.f32 %v4516_v8, %v4696_v9 }
 0x2fd   : > { %v4793_v18 = vmax.f32 %v4158_v11, %v4338_v12 }
 0x2fe   : > { %6404 = vst [vmem:[%s6925_s17 + $0xd8] sm:$0xff] %v6336_v10   ;;  %v4936_v15 = vmax.f32 %v4792_v13, %v4864_v14 }
 0x300   : > { %v5012_v22 = vadd.f32 %v7122_v51, %v4936_v15 }
 0x302   : > { %v5084_v25 = vmax.f32 %v5012_v22, 0.0 }
 0x303   : > { %v4518_v16 = vpop.f32.mrf.mxu2  ;;  %v4698_v17 = vpop.f32.mrf.mxu3 }
 0x304   : > { %v4865_v19 = vmax.f32 %v4518_v16, %v4698_v17  ;;  %v4161_v20 = vpop.f32.mrf.mxu0  ;;  %v4341_v21 = vpop.f32.mrf.mxu1 }
 0x305   : > { %v4794_v32 = vmax.f32 %v4161_v20, %v4341_v21 }
 0x306   : > { %v4937_v23 = vmax.f32 %v4793_v18, %v4865_v19 }
 0x308   : > { %v5013_v24 = vadd.f32 %v7122_v51, %v4937_v23 }
 0x30a   : > { %v5085_v26 = vmax.f32 %v5013_v24, 0.0 }
 0x30b   : > { %v4521_v27 = vpop.f32.mrf.mxu2  ;;  %v4701_v28 = vpop.f32.mrf.mxu3 }
 0x30c   : > { %v6341_v29 = vpack.c.bf16 %v5085_v26, %v5084_v25  ;;  %v4163_v30 = vpop.f32.mrf.mxu0  ;;  %v4343_v31 = vpop.f32.mrf.mxu1  ;;  %v4866_v33 = vmax.f32 %v4521_v27, %v4701_v28 }
 0x30d   : > { %v4795_v37 = vmax.f32 %v4163_v30, %v4343_v31 }
 0x30e   : > { %6405 = vst [vmem:[%s6925_s17 + $0xe0] sm:$0xff] %v6341_v29   ;;  %v4938_v34 = vmax.f32 %v4794_v32, %v4866_v33 }
 0x310   : > { %v5014_v41 = vadd.f32 %v7122_v51, %v4938_v34 }
 0x312   : > { %v5086_v43 = vmax.f32 %v5014_v41, 0.0 }
 0x313   : > { %v4523_v35 = vpop.f32.mrf.mxu2  ;;  %v4703_v36 = vpop.f32.mrf.mxu3 }
 0x314   : > { %v4867_v38 = vmax.f32 %v4523_v35, %v4703_v36  ;;  %v4166_v39 = vpop.f32.mrf.mxu0  ;;  %v4346_v40 = vpop.f32.mrf.mxu1 }
 0x315   : > { %v4796_v50 = vmax.f32 %v4166_v39, %v4346_v40 }
 0x316   : > { %v4939_v5 = vmax.f32 %v4795_v37, %v4867_v38 }
 0x318   : > { %v5015_v42 = vadd.f32 %v7122_v51, %v4939_v5 }
 0x31a   : > { %v5087_v44 = vmax.f32 %v5015_v42, 0.0 }
 0x31b   : > { %v4526_v45 = vpop.f32.mrf.mxu2  ;;  %v4706_v46 = vpop.f32.mrf.mxu3 }
 0x31c   : > { %v6346_v47 = vpack.c.bf16 %v5087_v44, %v5086_v43  ;;  %v4168_v48 = vpop.f32.mrf.mxu0  ;;  %v4348_v49 = vpop.f32.mrf.mxu1  ;;  %v4868_v52 = vmax.f32 %v4526_v45, %v4706_v46 }
 0x31d   : > { %v4797_v56 = vmax.f32 %v4168_v48, %v4348_v49 }
 0x31e   : > { %6406 = vst [vmem:[%s6925_s17 + $0xe8] sm:$0xff] %v6346_v47   ;;  %v4940_v53 = vmax.f32 %v4796_v50, %v4868_v52 }
 0x320   : > { %v5016_v60 = vadd.f32 %v7122_v51, %v4940_v53 }
 0x322   : > { %v5088_v63 = vmax.f32 %v5016_v60, 0.0 }
 0x323   : > { %v4528_v54 = vpop.f32.mrf.mxu2  ;;  %v4708_v55 = vpop.f32.mrf.mxu3 }
 0x324   : > { %v4869_v57 = vmax.f32 %v4528_v54, %v4708_v55  ;;  %v4171_v58 = vpop.f32.mrf.mxu0  ;;  %v4351_v59 = vpop.f32.mrf.mxu1 }
 0x325   : > { %v4798_v7 = vmax.f32 %v4171_v58, %v4351_v59 }
 0x326   : > { %v4941_v61 = vmax.f32 %v4797_v56, %v4869_v57 }
 0x328   : > { %v5017_v62 = vadd.f32 %v7122_v51, %v4941_v61 }
 0x32a   : > { %v5089_v0 = vmax.f32 %v5017_v62, 0.0 }
 0x32b   : > { %v4531_v1 = vpop.f32.mrf.mxu2  ;;  %v4711_v2 = vpop.f32.mrf.mxu3 }
 0x32c   : > { %v6351_v3 = vpack.c.bf16 %v5089_v0, %v5088_v63  ;;  %v4173_v4 = vpop.f32.mrf.mxu0  ;;  %v4353_v6 = vpop.f32.mrf.mxu1  ;;  %v4870_v8 = vmax.f32 %v4531_v1, %v4711_v2 }
 0x32d   : > { %v4799_v12 = vmax.f32 %v4173_v4, %v4353_v6 }
 0x32e   : > { %6407 = vst [vmem:[%s6925_s17 + $0xf0] sm:$0xff] %v6351_v3   ;;  %v4942_v9 = vmax.f32 %v4798_v7, %v4870_v8 }
 0x330   : > { %v5018_v16 = vadd.f32 %v7122_v51, %v4942_v9 }
 0x332   : > { %v5090_v19 = vmax.f32 %v5018_v16, 0.0 }
 0x333   : > { %v4533_v10 = vpop.f32.mrf.mxu2  ;;  %v4713_v11 = vpop.f32.mrf.mxu3 }
 0x334   : > { %v4871_v13 = vmax.f32 %v4533_v10, %v4713_v11  ;;  %v4176_v14 = vpop.f32.mrf.mxu0  ;;  %v4356_v15 = vpop.f32.mrf.mxu1 }
 0x335   : > { %v4800_v26 = vmax.f32 %v4176_v14, %v4356_v15 }
 0x336   : > { %v4943_v17 = vmax.f32 %v4799_v12, %v4871_v13 }
 0x338   : > { %v5019_v18 = vadd.f32 %v7122_v51, %v4943_v17 }
 0x33a   : > { %v5091_v20 = vmax.f32 %v5019_v18, 0.0 }
 0x33b   : > { %v4536_v21 = vpop.f32.mrf.mxu2  ;;  %v4716_v22 = vpop.f32.mrf.mxu3 }
 0x33c   : > { %v6356_v23 = vpack.c.bf16 %v5091_v20, %v5090_v19  ;;  %v4178_v24 = vpop.f32.mrf.mxu0  ;;  %v4358_v25 = vpop.f32.mrf.mxu1  ;;  %v4872_v27 = vmax.f32 %v4536_v21, %v4716_v22 }
 0x33d   : > { %v4801_v31 = vmax.f32 %v4178_v24, %v4358_v25 }
 0x33e   : > { %6408 = vst [vmem:[%s6925_s17 + $0xf8] sm:$0xff] %v6356_v23   ;;  %v4944_v28 = vmax.f32 %v4800_v26, %v4872_v27 }
 0x340   : > { %v5020_v35 = vadd.f32 %v7122_v51, %v4944_v28 }
 0x342   : > { %v5092_v38 = vmax.f32 %v5020_v35, 0.0 }
 0x343   : > { %v4538_v29 = vpop.f32.mrf.mxu2  ;;  %v4718_v30 = vpop.f32.mrf.mxu3 }
 0x344   : > { %v4873_v32 = vmax.f32 %v4538_v29, %v4718_v30  ;;  %v4181_v33 = vpop.f32.mrf.mxu0  ;;  %v4361_v34 = vpop.f32.mrf.mxu1 }
 0x345   : > { %v4802_v44 = vmax.f32 %v4181_v33, %v4361_v34 }
 0x346   : > { %v4945_v36 = vmax.f32 %v4801_v31, %v4873_v32 }
 0x348   : > { %v5021_v37 = vadd.f32 %v7122_v51, %v4945_v36 }
 0x34a   : > { %v5093_v39 = vmax.f32 %v5021_v37, 0.0 }
 0x34b   : > { %v4541_v40 = vpop.f32.mrf.mxu2  ;;  %v4721_v41 = vpop.f32.mrf.mxu3 }
 0x34c   : > { %v6361_v5 = vpack.c.bf16 %v5093_v39, %v5092_v38  ;;  %v4183_v42 = vpop.f32.mrf.mxu0  ;;  %v4363_v43 = vpop.f32.mrf.mxu1  ;;  %v4874_v45 = vmax.f32 %v4541_v40, %v4721_v41 }
 0x34d   : > { %v4803_v49 = vmax.f32 %v4183_v42, %v4363_v43 }
 0x34e   : > { %6409 = vst [vmem:[%s6925_s17 + $0x100] sm:$0xff] %v6361_v5   ;;  %v4946_v46 = vmax.f32 %v4802_v44, %v4874_v45 }
 0x350   : > { %v5022_v54 = vadd.f32 %v7122_v51, %v4946_v46 }
 0x352   : > { %v5094_v57 = vmax.f32 %v5022_v54, 0.0 }
 0x353   : > { %v4543_v47 = vpop.f32.mrf.mxu2  ;;  %v4723_v48 = vpop.f32.mrf.mxu3 }
 0x354   : > { %v4875_v50 = vmax.f32 %v4543_v47, %v4723_v48  ;;  %v4186_v52 = vpop.f32.mrf.mxu0  ;;  %v4366_v53 = vpop.f32.mrf.mxu1 }
 0x355   : > { %v4804_v0 = vmax.f32 %v4186_v52, %v4366_v53 }
 0x356   : > { %v4947_v55 = vmax.f32 %v4803_v49, %v4875_v50 }
 0x358   : > { %v5023_v56 = vadd.f32 %v7122_v51, %v4947_v55 }
 0x35a   : > { %v5095_v58 = vmax.f32 %v5023_v56, 0.0 }
 0x35b   : > { %v4546_v59 = vpop.f32.mrf.mxu2  ;;  %v4726_v60 = vpop.f32.mrf.mxu3 }
 0x35c   : > { %v6366_v61 = vpack.c.bf16 %v5095_v58, %v5094_v57  ;;  %v4188_v62 = vpop.f32.mrf.mxu0  ;;  %v4368_v63 = vpop.f32.mrf.mxu1  ;;  %v4876_v1 = vmax.f32 %v4546_v59, %v4726_v60 }
 0x35d   : > { %v4805_v6 = vmax.f32 %v4188_v62, %v4368_v63 }
 0x35e   : > { %6410 = vst [vmem:[%s6925_s17 + $0x108] sm:$0xff] %v6366_v61   ;;  %v4948_v2 = vmax.f32 %v4804_v0, %v4876_v1 }
 0x360   : > { %v5024_v8 = vadd.f32 %v7122_v51, %v4948_v2 }
 0x362   : > { %v5096_v13 = vmax.f32 %v5024_v8, 0.0 }
 0x363   : > { %v4548_v3 = vpop.f32.mrf.mxu2  ;;  %v4728_v4 = vpop.f32.mrf.mxu3 }
 0x364   : > { %v4877_v7 = vmax.f32 %v4548_v3, %v4728_v4  ;;  %v4191_v10 = vpop.f32.mrf.mxu0  ;;  %v4371_v11 = vpop.f32.mrf.mxu1 }
 0x365   : > { %v4806_v18 = vmax.f32 %v4191_v10, %v4371_v11 }
 0x366   : > { %v4949_v9 = vmax.f32 %v4805_v6, %v4877_v7 }
 0x368   : > { %v5025_v12 = vadd.f32 %v7122_v51, %v4949_v9 }
 0x36a   : > { %v5097_v14 = vmax.f32 %v5025_v12, 0.0 }
 0x36b   : > { %v4551_v15 = vpop.f32.mrf.mxu2  ;;  %v4731_v16 = vpop.f32.mrf.mxu3 }
 0x36c   : > { %v6371_v17 = vpack.c.bf16 %v5097_v14, %v5096_v13  ;;  %v4878_v19 = vmax.f32 %v4551_v15, %v4731_v16  ;;  %v4193_v20 = vpop.f32.mrf.mxu0  ;;  %v4373_v21 = vpop.f32.mrf.mxu1 }
 0x36d   : > { %v4807_v25 = vmax.f32 %v4193_v20, %v4373_v21 }
 0x36e   : > { %6411 = vst [vmem:[%s6925_s17 + $0x110] sm:$0xff] %v6371_v17   ;;  %v4950_v22 = vmax.f32 %v4806_v18, %v4878_v19 }
 0x370   : > { %v5026_v27 = vadd.f32 %v7122_v51, %v4950_v22 }
 0x372   : > { %v5098_v30 = vmax.f32 %v5026_v27, 0.0 }
 0x373   : > { %v4553_v23 = vpop.f32.mrf.mxu2  ;;  %v4733_v24 = vpop.f32.mrf.mxu3 }
 0x374   : > { %v4879_v26 = vmax.f32 %v4553_v23, %v4733_v24 }
 0x376   : > { %v4951_v28 = vmax.f32 %v4807_v25, %v4879_v26 }
 0x378   : > { %v5027_v29 = vadd.f32 %v7122_v51, %v4951_v28 }
 0x37a   : > { %v5099_v31 = vmax.f32 %v5027_v29, 0.0 }
 0x37c   : > { %v6376_v32 = vpack.c.bf16 %v5099_v31, %v5098_v30 }
 0x37e   : > { %6412 = vst [vmem:[%s6925_s17 + $0x118] sm:$0xff] %v6376_v32  }
 0x37f PF: > { %p10_p9 = scmp.ge.s32.totalorder %s6510_s16, 10   ;;  %s7260_s12 = smov %s6466_s13 }
 0x380   : > { %s7261_s13 = smov %s6519_s19  ;;  %s7262_s14 = smov %s6510_s16 }
 0x381   :  { %12 = sbr.rel (!%p10_p9) target bundleno = 2 (0x2), region = 123 }

// kernel: cnn_forward.3
= control target key start
LH: loop header
LB: loop body
LE: loop exit
PB: predicated region body
PF: predicated region fallthrough
CT: control target
= control target key end

     0   :  { %s12396_s18 = smov 0   ;;  %s12398_s19 = smov 0   ;;  %s16363_s0 = inlined_call_operand.vmem [shape: bf16[64,32,800], index: 0, kind: input, shape index: {}]   ;;  %s16364_s1 = inlined_call_operand.vmem [shape: bf16[800,128], index: 1, kind: input, shape index: {}]   ;;  %s16365_s2 = inlined_call_operand.vmem [shape: f32[1,128], index: 2, kind: input, shape index: {}]   ;;  %s16366_s3 = inlined_call_operand.vmem [shape: bf16[16,128,128], index: 3, kind: input, shape index: {}]   ;;  %s16367_s4 = inlined_call_operand.vmem [shape: f32[1,128], index: 4, kind: input, shape index: {}]   ;;  %s16368_s5 = inlined_call_operand.vmem [shape: f32[32,128], index: 5, kind: output, shape index: {}]  }
   0x1   :  { %s12400_s20 = smov 0  }
   0x2 LB: > { %s8586_s21 = sadd.s32 4294967295, %s12364_s20   ;;  %s12413_s22 = sadd.s32 1, %s12364_s20   ;;  %s12364_s20 = sphi %s12400_s20, %s16903_s20   ;;  %s12360_s19 = sphi %s12398_s19, %s16902_s19   ;;  %s12356_s18 = sphi %s12396_s18, %s16901_s18  }
   0x3   : > { %s19_s23 = ssub.s32 %s12364_s20, %s12413_s22  ;;  %s22_s24 = sadd.s32 1, %s12360_s19 }
   0x4   : > { %p20_p0 = scmp.eq.s32.totalorder %s19_s23, 0  ;;  %p29_p1 = scmp.ne.s32.totalorder %s12360_s19, %s12356_s18 }
   0x5   : > { %p30_p2 = scmp.eq.s32.totalorder %s12364_s20, 0  ;;  %p8589_p4 = scmp.ge.s32.totalorder %s12364_s20, 2 }
   0x6   : > { %s12422_s25 = scalar_select %p20_p0, %s12360_s19, %s22_s24  }
   0x7   : > { %p31_p3 = por %p30_p2, %p29_p1  ;;  %177 = sbr.rel (%p8589_p4) target bundleno = 529 (0x211), region = 32 }
   0xc   : > { %180 = sbr.rel (!%p31_p3) target bundleno = 529 (0x211), region = 36  ;;  %s182_s26 = sand.u32 (%p31_p3), 1, %s12360_s19  }
   0xd   : > { %s12313_s27 = smul.u32 (%p31_p3), 56, %s12364_s20 }
   0xe   : > { %s12312_s28 = smul.u32 (%p31_p3), 3584, %s182_s26 }
   0xf   : > { %s12430_s6 = scalar_lea.vmem (%p31_p3), %s16363_s0, %s12313_s27 }
  0x10   : > { %v203_v0 = vld [vmem:[%s12430_s6] sm:$0xff] (%p31_p3)  ;;  %v205_v1 = vld [vmem:[%s12430_s6 + $0x8] sm:$0xff] (%p31_p3)  ;;  %v207_v2 = vld [vmem:[%s12430_s6 + $0x10] sm:$0xff] (%p31_p3)  ;;  %s12435_s7 = scalar_lea.vmem (%p31_p3), [#allocation2], %s12312_s28 }
  0x11   : > { %204 = vst [vmem:[%s12435_s7] sm:$0xff] %v203_v0  ;;  %v209_v3 = vld [vmem:[%s12430_s6 + $0x1c] sm:$0xff]  ;;  %v211_v4 = vld [vmem:[%s12430_s6 + $0x24] sm:$0xff]  ;;  %v213_v5 = vld [vmem:[%s12430_s6 + $0x2c] sm:$0xff] }
  0x12   : > { %206 = vst [vmem:[%s12435_s7 + $0x8] sm:$0xff] %v205_v1  ;;  %v215_v6 = vld [vmem:[%s12430_s6 + $0x70] sm:$0xff]  ;;  %v217_v7 = vld [vmem:[%s12430_s6 + $0x78] sm:$0xff]  ;;  %v219_v8 = vld [vmem:[%s12430_s6 + $0x80] sm:$0xff] }
  0x13   : > { %208 = vst [vmem:[%s12435_s7 + $0x10] sm:$0xff] %v207_v2  ;;  %v221_v9 = vld [vmem:[%s12430_s6 + $0x8c] sm:$0xff]  ;;  %v223_v10 = vld [vmem:[%s12430_s6 + $0x94] sm:$0xff]  ;;  %v225_v11 = vld [vmem:[%s12430_s6 + $0x9c] sm:$0xff] }
  0x14   : > { %210 = vst [vmem:[%s12435_s7 + $0x1c] sm:$0xff] %v209_v3  ;;  %v227_v12 = vld [vmem:[%s12430_s6 + $0xe0] sm:$0xff]  ;;  %v229_v13 = vld [vmem:[%s12430_s6 + $0xe8] sm:$0xff]  ;;  %v231_v14 = vld [vmem:[%s12430_s6 + $0xf0] sm:$0xff] }
  0x15   : > { %212 = vst [vmem:[%s12435_s7 + $0x24] sm:$0xff] %v211_v4  ;;  %v233_v15 = vld [vmem:[%s12430_s6 + $0xfc] sm:$0xff]  ;;  %v235_v16 = vld [vmem:[%s12430_s6 + $0x104] sm:$0xff]  ;;  %v237_v17 = vld [vmem:[%s12430_s6 + $0x10c] sm:$0xff] }
  0x16   : > { %214 = vst [vmem:[%s12435_s7 + $0x2c] sm:$0xff] %v213_v5  ;;  %v239_v18 = vld [vmem:[%s12430_s6 + $0x150] sm:$0xff]  ;;  %v241_v19 = vld [vmem:[%s12430_s6 + $0x158] sm:$0xff]  ;;  %v243_v20 = vld [vmem:[%s12430_s6 + $0x160] sm:$0xff] }
  0x17   : > { %216 = vst [vmem:[%s12435_s7 + $0x38] sm:$0xff] %v215_v6  ;;  %v245_v21 = vld [vmem:[%s12430_s6 + $0x16c] sm:$0xff]  ;;  %v247_v22 = vld [vmem:[%s12430_s6 + $0x174] sm:$0xff]  ;;  %v249_v23 = vld [vmem:[%s12430_s6 + $0x17c] sm:$0xff] }
  0x18   : > { %218 = vst [vmem:[%s12435_s7 + $0x40] sm:$0xff] %v217_v7  ;;  %v251_v24 = vld [vmem:[%s12430_s6 + $0x1c0] sm:$0xff]  ;;  %v253_v25 = vld [vmem:[%s12430_s6 + $0x1c8] sm:$0xff]  ;;  %v255_v26 = vld [vmem:[%s12430_s6 + $0x1d0] sm:$0xff] }
  0x19   : > { %220 = vst [vmem:[%s12435_s7 + $0x48] sm:$0xff] %v219_v8  ;;  %v257_v27 = vld [vmem:[%s12430_s6 + $0x1dc] sm:$0xff]  ;;  %v259_v28 = vld [vmem:[%s12430_s6 + $0x1e4] sm:$0xff]  ;;  %v261_v29 = vld [vmem:[%s12430_s6 + $0x1ec] sm:$0xff] }
  0x1a   : > { %222 = vst [vmem:[%s12435_s7 + $0x54] sm:$0xff] %v221_v9  ;;  %v263_v30 = vld [vmem:[%s12430_s6 + $0x230] sm:$0xff]  ;;  %v265_v31 = vld [vmem:[%s12430_s6 + $0x238] sm:$0xff]  ;;  %v267_v32 = vld [vmem:[%s12430_s6 + $0x240] sm:$0xff] }
  0x1b   : > { %224 = vst [vmem:[%s12435_s7 + $0x5c] sm:$0xff] %v223_v10  ;;  %v269_v33 = vld [vmem:[%s12430_s6 + $0x24c] sm:$0xff]  ;;  %v271_v34 = vld [vmem:[%s12430_s6 + $0x254] sm:$0xff]  ;;  %v273_v35 = vld [vmem:[%s12430_s6 + $0x25c] sm:$0xff] }
  0x1c   : > { %226 = vst [vmem:[%s12435_s7 + $0x64] sm:$0xff] %v225_v11  ;;  %v275_v36 = vld [vmem:[%s12430_s6 + $0x2a0] sm:$0xff]  ;;  %v277_v37 = vld [vmem:[%s12430_s6 + $0x2a8] sm:$0xff]  ;;  %v279_v38 = vld [vmem:[%s12430_s6 + $0x2b0] sm:$0xff] }
  0x1d   : > { %228 = vst [vmem:[%s12435_s7 + $0x70] sm:$0xff] %v227_v12  ;;  %v281_v39 = vld [vmem:[%s12430_s6 + $0x2bc] sm:$0xff]  ;;  %v283_v40 = vld [vmem:[%s12430_s6 + $0x2c4] sm:$0xff]  ;;  %v285_v41 = vld [vmem:[%s12430_s6 + $0x2cc] sm:$0xff] }
  0x1e   : > { %230 = vst [vmem:[%s12435_s7 + $0x78] sm:$0xff] %v229_v13  ;;  %v287_v42 = vld [vmem:[%s12430_s6 + $0x310] sm:$0xff]  ;;  %v289_v43 = vld [vmem:[%s12430_s6 + $0x318] sm:$0xff]  ;;  %v291_v44 = vld [vmem:[%s12430_s6 + $0x320] sm:$0xff] }
  0x1f   : > { %232 = vst [vmem:[%s12435_s7 + $0x80] sm:$0xff] %v231_v14  ;;  %v293_v45 = vld [vmem:[%s12430_s6 + $0x32c] sm:$0xff]  ;;  %v295_v46 = vld [vmem:[%s12430_s6 + $0x334] sm:$0xff]  ;;  %v297_v47 = vld [vmem:[%s12430_s6 + $0x33c] sm:$0xff] }
  0x20   : > { %234 = vst [vmem:[%s12435_s7 + $0x8c] sm:$0xff] %v233_v15  ;;  %v299_v48 = vld [vmem:[%s12430_s6 + $0x380] sm:$0xff]  ;;  %v301_v49 = vld [vmem:[%s12430_s6 + $0x388] sm:$0xff]  ;;  %v303_v50 = vld [vmem:[%s12430_s6 + $0x390] sm:$0xff] }
  0x21   : > { %236 = vst [vmem:[%s12435_s7 + $0x94] sm:$0xff] %v235_v16  ;;  %v305_v51 = vld [vmem:[%s12430_s6 + $0x39c] sm:$0xff]  ;;  %v307_v52 = vld [vmem:[%s12430_s6 + $0x3a4] sm:$0xff]  ;;  %v309_v53 = vld [vmem:[%s12430_s6 + $0x3ac] sm:$0xff] }
  0x22   : > { %238 = vst [vmem:[%s12435_s7 + $0x9c] sm:$0xff] %v237_v17  ;;  %v311_v54 = vld [vmem:[%s12430_s6 + $0x3f0] sm:$0xff]  ;;  %v313_v55 = vld [vmem:[%s12430_s6 + $0x3f8] sm:$0xff]  ;;  %v315_v56 = vld [vmem:[%s12430_s6 + $0x400] sm:$0xff] }
  0x23   : > { %240 = vst [vmem:[%s12435_s7 + $0xa8] sm:$0xff] %v239_v18  ;;  %v317_v57 = vld [vmem:[%s12430_s6 + $0x40c] sm:$0xff]  ;;  %v319_v58 = vld [vmem:[%s12430_s6 + $0x414] sm:$0xff]  ;;  %v321_v59 = vld [vmem:[%s12430_s6 + $0x41c] sm:$0xff] }
  0x24   : > { %242 = vst [vmem:[%s12435_s7 + $0xb0] sm:$0xff] %v241_v19  ;;  %v323_v60 = vld [vmem:[%s12430_s6 + $0x460] sm:$0xff]  ;;  %v325_v61 = vld [vmem:[%s12430_s6 + $0x468] sm:$0xff]  ;;  %v327_v62 = vld [vmem:[%s12430_s6 + $0x470] sm:$0xff] }
  0x25   : > { %244 = vst [vmem:[%s12435_s7 + $0xb8] sm:$0xff] %v243_v20  ;;  %v329_v63 = vld [vmem:[%s12430_s6 + $0x47c] sm:$0xff]  ;;  %v331_v0 = vld [vmem:[%s12430_s6 + $0x484] sm:$0xff]  ;;  %v333_v1 = vld [vmem:[%s12430_s6 + $0x48c] sm:$0xff] }
  0x26   : > { %246 = vst [vmem:[%s12435_s7 + $0xc4] sm:$0xff] %v245_v21  ;;  %v335_v2 = vld [vmem:[%s12430_s6 + $0x4d0] sm:$0xff]  ;;  %v337_v3 = vld [vmem:[%s12430_s6 + $0x4d8] sm:$0xff]  ;;  %v339_v4 = vld [vmem:[%s12430_s6 + $0x4e0] sm:$0xff] }
  0x27   : > { %248 = vst [vmem:[%s12435_s7 + $0xcc] sm:$0xff] %v247_v22  ;;  %v341_v5 = vld [vmem:[%s12430_s6 + $0x4ec] sm:$0xff]  ;;  %v343_v6 = vld [vmem:[%s12430_s6 + $0x4f4] sm:$0xff]  ;;  %v345_v7 = vld [vmem:[%s12430_s6 + $0x4fc] sm:$0xff] }
  0x28   : > { %250 = vst [vmem:[%s12435_s7 + $0xd4] sm:$0xff] %v249_v23  ;;  %v347_v8 = vld [vmem:[%s12430_s6 + $0x540] sm:$0xff]  ;;  %v349_v9 = vld [vmem:[%s12430_s6 + $0x548] sm:$0xff]  ;;  %v351_v10 = vld [vmem:[%s12430_s6 + $0x550] sm:$0xff] }
  0x29   : > { %252 = vst [vmem:[%s12435_s7 + $0xe0] sm:$0xff] %v251_v24  ;;  %v353_v11 = vld [vmem:[%s12430_s6 + $0x55c] sm:$0xff]  ;;  %v355_v12 = vld [vmem:[%s12430_s6 + $0x564] sm:$0xff]  ;;  %v357_v13 = vld [vmem:[%s12430_s6 + $0x56c] sm:$0xff] }
  0x2a   : > { %254 = vst [vmem:[%s12435_s7 + $0xe8] sm:$0xff] %v253_v25  ;;  %v359_v14 = vld [vmem:[%s12430_s6 + $0x5b0] sm:$0xff]  ;;  %v361_v15 = vld [vmem:[%s12430_s6 + $0x5b8] sm:$0xff]  ;;  %v363_v16 = vld [vmem:[%s12430_s6 + $0x5c0] sm:$0xff] }
  0x2b   : > { %256 = vst [vmem:[%s12435_s7 + $0xf0] sm:$0xff] %v255_v26  ;;  %v365_v17 = vld [vmem:[%s12430_s6 + $0x5cc] sm:$0xff]  ;;  %v367_v18 = vld [vmem:[%s12430_s6 + $0x5d4] sm:$0xff]  ;;  %v369_v19 = vld [vmem:[%s12430_s6 + $0x5dc] sm:$0xff] }
  0x2c   : > { %258 = vst [vmem:[%s12435_s7 + $0xfc] sm:$0xff] %v257_v27  ;;  %v371_v20 = vld [vmem:[%s12430_s6 + $0x620] sm:$0xff]  ;;  %v373_v21 = vld [vmem:[%s12430_s6 + $0x628] sm:$0xff]  ;;  %v375_v22 = vld [vmem:[%s12430_s6 + $0x630] sm:$0xff] }
  0x2d   : > { %260 = vst [vmem:[%s12435_s7 + $0x104] sm:$0xff] %v259_v28  ;;  %v377_v23 = vld [vmem:[%s12430_s6 + $0x63c] sm:$0xff]  ;;  %v379_v24 = vld [vmem:[%s12430_s6 + $0x644] sm:$0xff]  ;;  %v381_v25 = vld [vmem:[%s12430_s6 + $0x64c] sm:$0xff] }
  0x2e   : > { %262 = vst [vmem:[%s12435_s7 + $0x10c] sm:$0xff] %v261_v29  ;;  %v383_v26 = vld [vmem:[%s12430_s6 + $0x690] sm:$0xff]  ;;  %v385_v27 = vld [vmem:[%s12430_s6 + $0x698] sm:$0xff]  ;;  %v387_v28 = vld [vmem:[%s12430_s6 + $0x6a0] sm:$0xff] }
  0x2f   : > { %264 = vst [vmem:[%s12435_s7 + $0x118] sm:$0xff] %v263_v30  ;;  %v389_v29 = vld [vmem:[%s12430_s6 + $0x6ac] sm:$0xff]  ;;  %v391_v30 = vld [vmem:[%s12430_s6 + $0x6b4] sm:$0xff] }
  0x30   : > { %266 = vst [vmem:[%s12435_s7 + $0x120] sm:$0xff] %v265_v31  ;;  %v393_v31 = vld [vmem:[%s12430_s6 + $0x6bc] sm:$0xff] }
  0x31   : > { %268 = vst [vmem:[%s12435_s7 + $0x128] sm:$0xff] %v267_v32  ;;  %v395_v32 = vld [vmem:[%s12430_s6 + $0x700] sm:$0xff] }
  0x32   : > { %270 = vst [vmem:[%s12435_s7 + $0x134] sm:$0xff] %v269_v33  ;;  %v397_v33 = vld [vmem:[%s12430_s6 + $0x708] sm:$0xff] }
  0x33   : > { %272 = vst [vmem:[%s12435_s7 + $0x13c] sm:$0xff] %v271_v34  ;;  %v399_v34 = vld [vmem:[%s12430_s6 + $0x710] sm:$0xff] }
  0x34   : > { %274 = vst [vmem:[%s12435_s7 + $0x144] sm:$0xff] %v273_v35  ;;  %v401_v35 = vld [vmem:[%s12430_s6 + $0x71c] sm:$0xff] }
  0x35   : > { %276 = vst [vmem:[%s12435_s7 + $0x150] sm:$0xff] %v275_v36  ;;  %v403_v36 = vld [vmem:[%s12430_s6 + $0x724] sm:$0xff] }
  0x36   : > { %278 = vst [vmem:[%s12435_s7 + $0x158] sm:$0xff] %v277_v37  ;;  %v405_v37 = vld [vmem:[%s12430_s6 + $0x72c] sm:$0xff] }
  0x37   : > { %280 = vst [vmem:[%s12435_s7 + $0x160] sm:$0xff] %v279_v38  ;;  %v407_v38 = vld [vmem:[%s12430_s6 + $0x770] sm:$0xff] }
  0x38   : > { %282 = vst [vmem:[%s12435_s7 + $0x16c] sm:$0xff] %v281_v39  ;;  %v409_v39 = vld [vmem:[%s12430_s6 + $0x778] sm:$0xff] }
  0x39   : > { %284 = vst [vmem:[%s12435_s7 + $0x174] sm:$0xff] %v283_v40  ;;  %v411_v40 = vld [vmem:[%s12430_s6 + $0x780] sm:$0xff] }
  0x3a   : > { %286 = vst [vmem:[%s12435_s7 + $0x17c] sm:$0xff] %v285_v41  ;;  %v413_v41 = vld [vmem:[%s12430_s6 + $0x78c] sm:$0xff] }
  0x3b   : > { %288 = vst [vmem:[%s12435_s7 + $0x188] sm:$0xff] %v287_v42  ;;  %v415_v42 = vld [vmem:[%s12430_s6 + $0x794] sm:$0xff] }
  0x3c   : > { %290 = vst [vmem:[%s12435_s7 + $0x190] sm:$0xff] %v289_v43  ;;  %v417_v43 = vld [vmem:[%s12430_s6 + $0x79c] sm:$0xff] }
  0x3d   : > { %292 = vst [vmem:[%s12435_s7 + $0x198] sm:$0xff] %v291_v44  ;;  %v419_v44 = vld [vmem:[%s12430_s6 + $0x7e0] sm:$0xff] }
  0x3e   : > { %294 = vst [vmem:[%s12435_s7 + $0x1a4] sm:$0xff] %v293_v45  ;;  %v421_v45 = vld [vmem:[%s12430_s6 + $0x7e8] sm:$0xff] }
  0x3f   : > { %296 = vst [vmem:[%s12435_s7 + $0x1ac] sm:$0xff] %v295_v46  ;;  %v423_v46 = vld [vmem:[%s12430_s6 + $0x7f0] sm:$0xff] }
  0x40   : > { %298 = vst [vmem:[%s12435_s7 + $0x1b4] sm:$0xff] %v297_v47  ;;  %v425_v47 = vld [vmem:[%s12430_s6 + $0x7fc] sm:$0xff] }
  0x41   : > { %300 = vst [vmem:[%s12435_s7 + $0x1c0] sm:$0xff] %v299_v48  ;;  %v427_v48 = vld [vmem:[%s12430_s6 + $0x804] sm:$0xff] }
  0x42   : > { %302 = vst [vmem:[%s12435_s7 + $0x1c8] sm:$0xff] %v301_v49  ;;  %v429_v49 = vld [vmem:[%s12430_s6 + $0x80c] sm:$0xff] }
  0x43   : > { %304 = vst [vmem:[%s12435_s7 + $0x1d0] sm:$0xff] %v303_v50  ;;  %v431_v50 = vld [vmem:[%s12430_s6 + $0x850] sm:$0xff] }
  0x44   : > { %306 = vst [vmem:[%s12435_s7 + $0x1dc] sm:$0xff] %v305_v51  ;;  %v433_v51 = vld [vmem:[%s12430_s6 + $0x858] sm:$0xff] }
  0x45   : > { %308 = vst [vmem:[%s12435_s7 + $0x1e4] sm:$0xff] %v307_v52  ;;  %v435_v52 = vld [vmem:[%s12430_s6 + $0x860] sm:$0xff] }
  0x46   : > { %310 = vst [vmem:[%s12435_s7 + $0x1ec] sm:$0xff] %v309_v53  ;;  %v437_v53 = vld [vmem:[%s12430_s6 + $0x86c] sm:$0xff] }
  0x47   : > { %312 = vst [vmem:[%s12435_s7 + $0x1f8] sm:$0xff] %v311_v54  ;;  %v439_v54 = vld [vmem:[%s12430_s6 + $0x874] sm:$0xff] }
  0x48   : > { %314 = vst [vmem:[%s12435_s7 + $0x200] sm:$0xff] %v313_v55  ;;  %v441_v55 = vld [vmem:[%s12430_s6 + $0x87c] sm:$0xff] }
  0x49   : > { %316 = vst [vmem:[%s12435_s7 + $0x208] sm:$0xff] %v315_v56  ;;  %v443_v56 = vld [vmem:[%s12430_s6 + $0x8c0] sm:$0xff] }
  0x4a   : > { %318 = vst [vmem:[%s12435_s7 + $0x214] sm:$0xff] %v317_v57  ;;  %v445_v57 = vld [vmem:[%s12430_s6 + $0x8c8] sm:$0xff] }
  0x4b   : > { %320 = vst [vmem:[%s12435_s7 + $0x21c] sm:$0xff] %v319_v58  ;;  %v447_v58 = vld [vmem:[%s12430_s6 + $0x8d0] sm:$0xff] }
  0x4c   : > { %322 = vst [vmem:[%s12435_s7 + $0x224] sm:$0xff] %v321_v59  ;;  %v449_v59 = vld [vmem:[%s12430_s6 + $0x8dc] sm:$0xff] }
  0x4d   : > { %324 = vst [vmem:[%s12435_s7 + $0x230] sm:$0xff] %v323_v60  ;;  %v451_v60 = vld [vmem:[%s12430_s6 + $0x8e4] sm:$0xff] }
  0x4e   : > { %326 = vst [vmem:[%s12435_s7 + $0x238] sm:$0xff] %v325_v61  ;;  %v453_v61 = vld [vmem:[%s12430_s6 + $0x8ec] sm:$0xff] }
  0x4f   : > { %328 = vst [vmem:[%s12435_s7 + $0x240] sm:$0xff] %v327_v62  ;;  %v455_v62 = vld [vmem:[%s12430_s6 + $0x930] sm:$0xff] }
  0x50   : > { %330 = vst [vmem:[%s12435_s7 + $0x24c] sm:$0xff] %v329_v63  ;;  %v457_v63 = vld [vmem:[%s12430_s6 + $0x938] sm:$0xff] }
  0x51   : > { %332 = vst [vmem:[%s12435_s7 + $0x254] sm:$0xff] %v331_v0  ;;  %v459_v0 = vld [vmem:[%s12430_s6 + $0x940] sm:$0xff] }
  0x52   : > { %334 = vst [vmem:[%s12435_s7 + $0x25c] sm:$0xff] %v333_v1  ;;  %v461_v1 = vld [vmem:[%s12430_s6 + $0x94c] sm:$0xff] }
  0x53   : > { %336 = vst [vmem:[%s12435_s7 + $0x268] sm:$0xff] %v335_v2  ;;  %v463_v2 = vld [vmem:[%s12430_s6 + $0x954] sm:$0xff] }
  0x54   : > { %338 = vst [vmem:[%s12435_s7 + $0x270] sm:$0xff] %v337_v3  ;;  %v465_v3 = vld [vmem:[%s12430_s6 + $0x95c] sm:$0xff] }
  0x55   : > { %340 = vst [vmem:[%s12435_s7 + $0x278] sm:$0xff] %v339_v4  ;;  %v467_v4 = vld [vmem:[%s12430_s6 + $0x9a0] sm:$0xff] }
  0x56   : > { %342 = vst [vmem:[%s12435_s7 + $0x284] sm:$0xff] %v341_v5  ;;  %v469_v5 = vld [vmem:[%s12430_s6 + $0x9a8] sm:$0xff] }
  0x57   : > { %344 = vst [vmem:[%s12435_s7 + $0x28c] sm:$0xff] %v343_v6  ;;  %v471_v6 = vld [vmem:[%s12430_s6 + $0x9b0] sm:$0xff] }
  0x58   : > { %346 = vst [vmem:[%s12435_s7 + $0x294] sm:$0xff] %v345_v7  ;;  %v473_v7 = vld [vmem:[%s12430_s6 + $0x9bc] sm:$0xff] }
  0x59   : > { %348 = vst [vmem:[%s12435_s7 + $0x2a0] sm:$0xff] %v347_v8  ;;  %v475_v8 = vld [vmem:[%s12430_s6 + $0x9c4] sm:$0xff] }
  0x5a   : > { %350 = vst [vmem:[%s12435_s7 + $0x2a8] sm:$0xff] %v349_v9  ;;  %v477_v9 = vld [vmem:[%s12430_s6 + $0x9cc] sm:$0xff] }
  0x5b   : > { %352 = vst [vmem:[%s12435_s7 + $0x2b0] sm:$0xff] %v351_v10  ;;  %v479_v10 = vld [vmem:[%s12430_s6 + $0xa10] sm:$0xff] }
  0x5c   : > { %354 = vst [vmem:[%s12435_s7 + $0x2bc] sm:$0xff] %v353_v11  ;;  %v481_v11 = vld [vmem:[%s12430_s6 + $0xa18] sm:$0xff] }
  0x5d   : > { %356 = vst [vmem:[%s12435_s7 + $0x2c4] sm:$0xff] %v355_v12  ;;  %v483_v12 = vld [vmem:[%s12430_s6 + $0xa20] sm:$0xff] }
  0x5e   : > { %358 = vst [vmem:[%s12435_s7 + $0x2cc] sm:$0xff] %v357_v13  ;;  %v485_v13 = vld [vmem:[%s12430_s6 + $0xa2c] sm:$0xff] }
  0x5f   : > { %360 = vst [vmem:[%s12435_s7 + $0x2d8] sm:$0xff] %v359_v14  ;;  %v487_v14 = vld [vmem:[%s12430_s6 + $0xa34] sm:$0xff] }
  0x60   : > { %362 = vst [vmem:[%s12435_s7 + $0x2e0] sm:$0xff] %v361_v15  ;;  %v489_v15 = vld [vmem:[%s12430_s6 + $0xa3c] sm:$0xff] }
  0x61   : > { %364 = vst [vmem:[%s12435_s7 + $0x2e8] sm:$0xff] %v363_v16  ;;  %v491_v16 = vld [vmem:[%s12430_s6 + $0xa80] sm:$0xff] }
  0x62   : > { %366 = vst [vmem:[%s12435_s7 + $0x2f4] sm:$0xff] %v365_v17  ;;  %v493_v17 = vld [vmem:[%s12430_s6 + $0xa88] sm:$0xff] }
  0x63   : > { %368 = vst [vmem:[%s12435_s7 + $0x2fc] sm:$0xff] %v367_v18  ;;  %v495_v18 = vld [vmem:[%s12430_s6 + $0xa90] sm:$0xff] }
  0x64   : > { %370 = vst [vmem:[%s12435_s7 + $0x304] sm:$0xff] %v369_v19  ;;  %v497_v19 = vld [vmem:[%s12430_s6 + $0xa9c] sm:$0xff] }
  0x65   : > { %372 = vst [vmem:[%s12435_s7 + $0x310] sm:$0xff] %v371_v20  ;;  %v499_v20 = vld [vmem:[%s12430_s6 + $0xaa4] sm:$0xff] }
  0x66   : > { %374 = vst [vmem:[%s12435_s7 + $0x318] sm:$0xff] %v373_v21  ;;  %v501_v21 = vld [vmem:[%s12430_s6 + $0xaac] sm:$0xff] }
  0x67   : > { %376 = vst [vmem:[%s12435_s7 + $0x320] sm:$0xff] %v375_v22  ;;  %v503_v22 = vld [vmem:[%s12430_s6 + $0xaf0] sm:$0xff] }
  0x68   : > { %378 = vst [vmem:[%s12435_s7 + $0x32c] sm:$0xff] %v377_v23  ;;  %v505_v23 = vld [vmem:[%s12430_s6 + $0xaf8] sm:$0xff] }
  0x69   : > { %380 = vst [vmem:[%s12435_s7 + $0x334] sm:$0xff] %v379_v24  ;;  %v507_v24 = vld [vmem:[%s12430_s6 + $0xb00] sm:$0xff] }
  0x6a   : > { %382 = vst [vmem:[%s12435_s7 + $0x33c] sm:$0xff] %v381_v25  ;;  %v509_v25 = vld [vmem:[%s12430_s6 + $0xb0c] sm:$0xff] }
  0x6b   : > { %384 = vst [vmem:[%s12435_s7 + $0x348] sm:$0xff] %v383_v26  ;;  %v511_v26 = vld [vmem:[%s12430_s6 + $0xb14] sm:$0xff] }
  0x6c   : > { %386 = vst [vmem:[%s12435_s7 + $0x350] sm:$0xff] %v385_v27  ;;  %v513_v27 = vld [vmem:[%s12430_s6 + $0xb1c] sm:$0xff] }
  0x6d   : > { %388 = vst [vmem:[%s12435_s7 + $0x358] sm:$0xff] %v387_v28  ;;  %v515_v28 = vld [vmem:[%s12430_s6 + $0xb60] sm:$0xff] }
  0x6e   : > { %390 = vst [vmem:[%s12435_s7 + $0x364] sm:$0xff] %v389_v29  ;;  %v517_v29 = vld [vmem:[%s12430_s6 + $0xb68] sm:$0xff] }
  0x6f   : > { %392 = vst [vmem:[%s12435_s7 + $0x36c] sm:$0xff] %v391_v30  ;;  %v519_v30 = vld [vmem:[%s12430_s6 + $0xb70] sm:$0xff] }
  0x70   : > { %394 = vst [vmem:[%s12435_s7 + $0x374] sm:$0xff] %v393_v31  ;;  %v521_v31 = vld [vmem:[%s12430_s6 + $0xb7c] sm:$0xff] }
  0x71   : > { %396 = vst [vmem:[%s12435_s7 + $0x380] sm:$0xff] %v395_v32  ;;  %v523_v32 = vld [vmem:[%s12430_s6 + $0xb84] sm:$0xff] }
  0x72   : > { %398 = vst [vmem:[%s12435_s7 + $0x388] sm:$0xff] %v397_v33  ;;  %v525_v33 = vld [vmem:[%s12430_s6 + $0xb8c] sm:$0xff] }
  0x73   : > { %400 = vst [vmem:[%s12435_s7 + $0x390] sm:$0xff] %v399_v34  ;;  %v527_v34 = vld [vmem:[%s12430_s6 + $0xbd0] sm:$0xff] }
  0x74   : > { %402 = vst [vmem:[%s12435_s7 + $0x39c] sm:$0xff] %v401_v35  ;;  %v529_v35 = vld [vmem:[%s12430_s6 + $0xbd8] sm:$0xff] }
  0x75   : > { %404 = vst [vmem:[%s12435_s7 + $0x3a4] sm:$0xff] %v403_v36  ;;  %v531_v36 = vld [vmem:[%s12430_s6 + $0xbe0] sm:$0xff] }
  0x76   : > { %406 = vst [vmem:[%s12435_s7 + $0x3ac] sm:$0xff] %v405_v37  ;;  %v533_v37 = vld [vmem:[%s12430_s6 + $0xbec] sm:$0xff] }
  0x77   : > { %408 = vst [vmem:[%s12435_s7 + $0x3b8] sm:$0xff] %v407_v38  ;;  %v535_v38 = vld [vmem:[%s12430_s6 + $0xbf4] sm:$0xff] }
  0x78   : > { %410 = vst [vmem:[%s12435_s7 + $0x3c0] sm:$0xff] %v409_v39  ;;  %v537_v39 = vld [vmem:[%s12430_s6 + $0xbfc] sm:$0xff] }
  0x79   : > { %412 = vst [vmem:[%s12435_s7 + $0x3c8] sm:$0xff] %v411_v40  ;;  %v539_v40 = vld [vmem:[%s12430_s6 + $0xc40] sm:$0xff] }
  0x7a   : > { %414 = vst [vmem:[%s12435_s7 + $0x3d4] sm:$0xff] %v413_v41  ;;  %v541_v41 = vld [vmem:[%s12430_s6 + $0xc48] sm:$0xff] }
  0x7b   : > { %416 = vst [vmem:[%s12435_s7 + $0x3dc] sm:$0xff] %v415_v42  ;;  %v543_v42 = vld [vmem:[%s12430_s6 + $0xc50] sm:$0xff] }
  0x7c   : > { %418 = vst [vmem:[%s12435_s7 + $0x3e4] sm:$0xff] %v417_v43  ;;  %v545_v43 = vld [vmem:[%s12430_s6 + $0xc5c] sm:$0xff] }
  0x7d   : > { %420 = vst [vmem:[%s12435_s7 + $0x3f0] sm:$0xff] %v419_v44  ;;  %v547_v44 = vld [vmem:[%s12430_s6 + $0xc64] sm:$0xff] }
  0x7e   : > { %422 = vst [vmem:[%s12435_s7 + $0x3f8] sm:$0xff] %v421_v45  ;;  %v549_v45 = vld [vmem:[%s12430_s6 + $0xc6c] sm:$0xff] }
  0x7f   : > { %424 = vst [vmem:[%s12435_s7 + $0x400] sm:$0xff] %v423_v46  ;;  %v551_v46 = vld [vmem:[%s12430_s6 + $0xcb0] sm:$0xff] }
  0x80   : > { %426 = vst [vmem:[%s12435_s7 + $0x40c] sm:$0xff] %v425_v47  ;;  %v553_v47 = vld [vmem:[%s12430_s6 + $0xcb8] sm:$0xff] }
  0x81   : > { %428 = vst [vmem:[%s12435_s7 + $0x414] sm:$0xff] %v427_v48  ;;  %v555_v48 = vld [vmem:[%s12430_s6 + $0xcc0] sm:$0xff] }
  0x82   : > { %430 = vst [vmem:[%s12435_s7 + $0x41c] sm:$0xff] %v429_v49  ;;  %v557_v49 = vld [vmem:[%s12430_s6 + $0xccc] sm:$0xff] }
  0x83   : > { %432 = vst [vmem:[%s12435_s7 + $0x428] sm:$0xff] %v431_v50  ;;  %v559_v50 = vld [vmem:[%s12430_s6 + $0xcd4] sm:$0xff] }
  0x84   : > { %434 = vst [vmem:[%s12435_s7 + $0x430] sm:$0xff] %v433_v51  ;;  %v561_v51 = vld [vmem:[%s12430_s6 + $0xcdc] sm:$0xff] }
  0x85   : > { %436 = vst [vmem:[%s12435_s7 + $0x438] sm:$0xff] %v435_v52  ;;  %v563_v52 = vld [vmem:[%s12430_s6 + $0xd20] sm:$0xff] }
  0x86   : > { %438 = vst [vmem:[%s12435_s7 + $0x444] sm:$0xff] %v437_v53  ;;  %v565_v53 = vld [vmem:[%s12430_s6 + $0xd28] sm:$0xff] }
  0x87   : > { %440 = vst [vmem:[%s12435_s7 + $0x44c] sm:$0xff] %v439_v54  ;;  %v567_v54 = vld [vmem:[%s12430_s6 + $0xd30] sm:$0xff] }
  0x88   : > { %442 = vst [vmem:[%s12435_s7 + $0x454] sm:$0xff] %v441_v55  ;;  %v569_v55 = vld [vmem:[%s12430_s6 + $0xd3c] sm:$0xff] }
  0x89   : > { %444 = vst [vmem:[%s12435_s7 + $0x460] sm:$0xff] %v443_v56  ;;  %v571_v56 = vld [vmem:[%s12430_s6 + $0xd44] sm:$0xff] }
  0x8a   : > { %446 = vst [vmem:[%s12435_s7 + $0x468] sm:$0xff] %v445_v57  ;;  %v573_v57 = vld [vmem:[%s12430_s6 + $0xd4c] sm:$0xff] }
  0x8b   : > { %448 = vst [vmem:[%s12435_s7 + $0x470] sm:$0xff] %v447_v58  ;;  %v575_v58 = vld [vmem:[%s12430_s6 + $0xd90] sm:$0xff] }
  0x8c   : > { %450 = vst [vmem:[%s12435_s7 + $0x47c] sm:$0xff] %v449_v59  ;;  %v577_v59 = vld [vmem:[%s12430_s6 + $0xd98] sm:$0xff] }
  0x8d   : > { %452 = vst [vmem:[%s12435_s7 + $0x484] sm:$0xff] %v451_v60  ;;  %v579_v60 = vld [vmem:[%s12430_s6 + $0xda0] sm:$0xff] }
  0x8e   : > { %454 = vst [vmem:[%s12435_s7 + $0x48c] sm:$0xff] %v453_v61  ;;  %v581_v61 = vld [vmem:[%s12430_s6 + $0xdac] sm:$0xff] }
  0x8f   : > { %456 = vst [vmem:[%s12435_s7 + $0x498] sm:$0xff] %v455_v62  ;;  %v583_v62 = vld [vmem:[%s12430_s6 + $0xdb4] sm:$0xff] }
  0x90   : > { %458 = vst [vmem:[%s12435_s7 + $0x4a0] sm:$0xff] %v457_v63  ;;  %v585_v63 = vld [vmem:[%s12430_s6 + $0xdbc] sm:$0xff] }
  0x91   : > { %460 = vst [vmem:[%s12435_s7 + $0x4a8] sm:$0xff] %v459_v0  ;;  %v587_v0 = vld [vmem:[%s12430_s6 + $0xe00] sm:$0xff] }
  0x92   : > { %462 = vst [vmem:[%s12435_s7 + $0x4b4] sm:$0xff] %v461_v1  ;;  %v589_v1 = vld [vmem:[%s12430_s6 + $0xe08] sm:$0xff] }
  0x93   : > { %464 = vst [vmem:[%s12435_s7 + $0x4bc] sm:$0xff] %v463_v2  ;;  %v591_v2 = vld [vmem:[%s12430_s6 + $0xe10] sm:$0xff] }
  0x94   : > { %466 = vst [vmem:[%s12435_s7 + $0x4c4] sm:$0xff] %v465_v3  ;;  %v593_v3 = vld [vmem:[%s12430_s6 + $0xe1c] sm:$0xff] }
  0x95   : > { %468 = vst [vmem:[%s12435_s7 + $0x4d0] sm:$0xff] %v467_v4  ;;  %v595_v4 = vld [vmem:[%s12430_s6 + $0xe24] sm:$0xff] }
  0x96   : > { %470 = vst [vmem:[%s12435_s7 + $0x4d8] sm:$0xff] %v469_v5  ;;  %v597_v5 = vld [vmem:[%s12430_s6 + $0xe2c] sm:$0xff] }
  0x97   : > { %472 = vst [vmem:[%s12435_s7 + $0x4e0] sm:$0xff] %v471_v6  ;;  %v599_v6 = vld [vmem:[%s12430_s6 + $0xe70] sm:$0xff] }
  0x98   : > { %474 = vst [vmem:[%s12435_s7 + $0x4ec] sm:$0xff] %v473_v7  ;;  %v601_v7 = vld [vmem:[%s12430_s6 + $0xe78] sm:$0xff] }
  0x99   : > { %476 = vst [vmem:[%s12435_s7 + $0x4f4] sm:$0xff] %v475_v8  ;;  %v603_v8 = vld [vmem:[%s12430_s6 + $0xe80] sm:$0xff] }
  0x9a   : > { %478 = vst [vmem:[%s12435_s7 + $0x4fc] sm:$0xff] %v477_v9  ;;  %v605_v9 = vld [vmem:[%s12430_s6 + $0xe8c] sm:$0xff] }
  0x9b   : > { %480 = vst [vmem:[%s12435_s7 + $0x508] sm:$0xff] %v479_v10  ;;  %v607_v10 = vld [vmem:[%s12430_s6 + $0xe94] sm:$0xff] }
  0x9c   : > { %482 = vst [vmem:[%s12435_s7 + $0x510] sm:$0xff] %v481_v11  ;;  %v609_v11 = vld [vmem:[%s12430_s6 + $0xe9c] sm:$0xff] }
  0x9d   : > { %484 = vst [vmem:[%s12435_s7 + $0x518] sm:$0xff] %v483_v12  ;;  %v611_v12 = vld [vmem:[%s12430_s6 + $0xee0] sm:$0xff] }
  0x9e   : > { %486 = vst [vmem:[%s12435_s7 + $0x524] sm:$0xff] %v485_v13  ;;  %v613_v13 = vld [vmem:[%s12430_s6 + $0xee8] sm:$0xff] }
  0x9f   : > { %488 = vst [vmem:[%s12435_s7 + $0x52c] sm:$0xff] %v487_v14  ;;  %v615_v14 = vld [vmem:[%s12430_s6 + $0xef0] sm:$0xff] }
  0xa0   : > { %490 = vst [vmem:[%s12435_s7 + $0x534] sm:$0xff] %v489_v15  ;;  %v617_v15 = vld [vmem:[%s12430_s6 + $0xefc] sm:$0xff] }
  0xa1   : > { %492 = vst [vmem:[%s12435_s7 + $0x540] sm:$0xff] %v491_v16  ;;  %v619_v16 = vld [vmem:[%s12430_s6 + $0xf04] sm:$0xff] }
  0xa2   : > { %494 = vst [vmem:[%s12435_s7 + $0x548] sm:$0xff] %v493_v17  ;;  %v621_v17 = vld [vmem:[%s12430_s6 + $0xf0c] sm:$0xff] }
  0xa3   : > { %496 = vst [vmem:[%s12435_s7 + $0x550] sm:$0xff] %v495_v18  ;;  %v623_v18 = vld [vmem:[%s12430_s6 + $0xf50] sm:$0xff] }
  0xa4   : > { %498 = vst [vmem:[%s12435_s7 + $0x55c] sm:$0xff] %v497_v19  ;;  %v625_v19 = vld [vmem:[%s12430_s6 + $0xf58] sm:$0xff] }
  0xa5   : > { %500 = vst [vmem:[%s12435_s7 + $0x564] sm:$0xff] %v499_v20  ;;  %v627_v20 = vld [vmem:[%s12430_s6 + $0xf60] sm:$0xff] }
  0xa6   : > { %502 = vst [vmem:[%s12435_s7 + $0x56c] sm:$0xff] %v501_v21  ;;  %v629_v21 = vld [vmem:[%s12430_s6 + $0xf6c] sm:$0xff] }
  0xa7   : > { %504 = vst [vmem:[%s12435_s7 + $0x578] sm:$0xff] %v503_v22  ;;  %v631_v22 = vld [vmem:[%s12430_s6 + $0xf74] sm:$0xff] }
  0xa8   : > { %506 = vst [vmem:[%s12435_s7 + $0x580] sm:$0xff] %v505_v23  ;;  %v633_v23 = vld [vmem:[%s12430_s6 + $0xf7c] sm:$0xff] }
  0xa9   : > { %508 = vst [vmem:[%s12435_s7 + $0x588] sm:$0xff] %v507_v24  ;;  %v635_v24 = vld [vmem:[%s12430_s6 + $0xfc0] sm:$0xff] }
  0xaa   : > { %510 = vst [vmem:[%s12435_s7 + $0x594] sm:$0xff] %v509_v25  ;;  %v637_v25 = vld [vmem:[%s12430_s6 + $0xfc8] sm:$0xff] }
  0xab   : > { %512 = vst [vmem:[%s12435_s7 + $0x59c] sm:$0xff] %v511_v26  ;;  %v639_v26 = vld [vmem:[%s12430_s6 + $0xfd0] sm:$0xff] }
  0xac   : > { %514 = vst [vmem:[%s12435_s7 + $0x5a4] sm:$0xff] %v513_v27  ;;  %v641_v27 = vld [vmem:[%s12430_s6 + $0xfdc] sm:$0xff] }
  0xad   : > { %516 = vst [vmem:[%s12435_s7 + $0x5b0] sm:$0xff] %v515_v28  ;;  %v643_v28 = vld [vmem:[%s12430_s6 + $0xfe4] sm:$0xff] }
  0xae   : > { %518 = vst [vmem:[%s12435_s7 + $0x5b8] sm:$0xff] %v517_v29  ;;  %v645_v29 = vld [vmem:[%s12430_s6 + $0xfec] sm:$0xff] }
  0xaf   : > { %520 = vst [vmem:[%s12435_s7 + $0x5c0] sm:$0xff] %v519_v30  ;;  %v647_v30 = vld [vmem:[%s12430_s6 + $0x1030] sm:$0xff] }
  0xb0   : > { %522 = vst [vmem:[%s12435_s7 + $0x5cc] sm:$0xff] %v521_v31  ;;  %v649_v31 = vld [vmem:[%s12430_s6 + $0x1038] sm:$0xff] }
  0xb1   : > { %524 = vst [vmem:[%s12435_s7 + $0x5d4] sm:$0xff] %v523_v32  ;;  %v651_v32 = vld [vmem:[%s12430_s6 + $0x1040] sm:$0xff] }
  0xb2   : > { %526 = vst [vmem:[%s12435_s7 + $0x5dc] sm:$0xff] %v525_v33  ;;  %v653_v33 = vld [vmem:[%s12430_s6 + $0x104c] sm:$0xff] }
  0xb3   : > { %528 = vst [vmem:[%s12435_s7 + $0x5e8] sm:$0xff] %v527_v34  ;;  %v655_v34 = vld [vmem:[%s12430_s6 + $0x1054] sm:$0xff] }
  0xb4   : > { %530 = vst [vmem:[%s12435_s7 + $0x5f0] sm:$0xff] %v529_v35  ;;  %v657_v35 = vld [vmem:[%s12430_s6 + $0x105c] sm:$0xff] }
  0xb5   : > { %532 = vst [vmem:[%s12435_s7 + $0x5f8] sm:$0xff] %v531_v36  ;;  %v659_v36 = vld [vmem:[%s12430_s6 + $0x10a0] sm:$0xff] }
  0xb6   : > { %534 = vst [vmem:[%s12435_s7 + $0x604] sm:$0xff] %v533_v37  ;;  %v661_v37 = vld [vmem:[%s12430_s6 + $0x10a8] sm:$0xff] }
  0xb7   : > { %536 = vst [vmem:[%s12435_s7 + $0x60c] sm:$0xff] %v535_v38  ;;  %v663_v38 = vld [vmem:[%s12430_s6 + $0x10b0] sm:$0xff] }
  0xb8   : > { %538 = vst [vmem:[%s12435_s7 + $0x614] sm:$0xff] %v537_v39  ;;  %v665_v39 = vld [vmem:[%s12430_s6 + $0x10bc] sm:$0xff] }
  0xb9   : > { %540 = vst [vmem:[%s12435_s7 + $0x620] sm:$0xff] %v539_v40  ;;  %v667_v40 = vld [vmem:[%s12430_s6 + $0x10c4] sm:$0xff] }
  0xba   : > { %542 = vst [vmem:[%s12435_s7 + $0x628] sm:$0xff] %v541_v41  ;;  %v669_v41 = vld [vmem:[%s12430_s6 + $0x10cc] sm:$0xff] }
  0xbb   : > { %544 = vst [vmem:[%s12435_s7 + $0x630] sm:$0xff] %v543_v42  ;;  %v671_v42 = vld [vmem:[%s12430_s6 + $0x1110] sm:$0xff] }
  0xbc   : > { %546 = vst [vmem:[%s12435_s7 + $0x63c] sm:$0xff] %v545_v43  ;;  %v673_v43 = vld [vmem:[%s12430_s6 + $0x1118] sm:$0xff] }
  0xbd   : > { %548 = vst [vmem:[%s12435_s7 + $0x644] sm:$0xff] %v547_v44  ;;  %v675_v44 = vld [vmem:[%s12430_s6 + $0x1120] sm:$0xff] }
  0xbe   : > { %550 = vst [vmem:[%s12435_s7 + $0x64c] sm:$0xff] %v549_v45  ;;  %v677_v45 = vld [vmem:[%s12430_s6 + $0x112c] sm:$0xff] }
  0xbf   : > { %552 = vst [vmem:[%s12435_s7 + $0x658] sm:$0xff] %v551_v46  ;;  %v679_v46 = vld [vmem:[%s12430_s6 + $0x1134] sm:$0xff] }
  0xc0   : > { %554 = vst [vmem:[%s12435_s7 + $0x660] sm:$0xff] %v553_v47  ;;  %v681_v47 = vld [vmem:[%s12430_s6 + $0x113c] sm:$0xff] }
  0xc1   : > { %556 = vst [vmem:[%s12435_s7 + $0x668] sm:$0xff] %v555_v48  ;;  %v683_v48 = vld [vmem:[%s12430_s6 + $0x1180] sm:$0xff] }
  0xc2   : > { %558 = vst [vmem:[%s12435_s7 + $0x674] sm:$0xff] %v557_v49  ;;  %v685_v49 = vld [vmem:[%s12430_s6 + $0x1188] sm:$0xff] }
  0xc3   : > { %560 = vst [vmem:[%s12435_s7 + $0x67c] sm:$0xff] %v559_v50  ;;  %v687_v50 = vld [vmem:[%s12430_s6 + $0x1190] sm:$0xff] }
  0xc4   : > { %562 = vst [vmem:[%s12435_s7 + $0x684] sm:$0xff] %v561_v51  ;;  %v689_v51 = vld [vmem:[%s12430_s6 + $0x119c] sm:$0xff] }
  0xc5   : > { %564 = vst [vmem:[%s12435_s7 + $0x690] sm:$0xff] %v563_v52  ;;  %v691_v52 = vld [vmem:[%s12430_s6 + $0x11a4] sm:$0xff] }
  0xc6   : > { %566 = vst [vmem:[%s12435_s7 + $0x698] sm:$0xff] %v565_v53  ;;  %v693_v53 = vld [vmem:[%s12430_s6 + $0x11ac] sm:$0xff] }
  0xc7   : > { %568 = vst [vmem:[%s12435_s7 + $0x6a0] sm:$0xff] %v567_v54  ;;  %v695_v54 = vld [vmem:[%s12430_s6 + $0x11f0] sm:$0xff] }
  0xc8   : > { %570 = vst [vmem:[%s12435_s7 + $0x6ac] sm:$0xff] %v569_v55  ;;  %v697_v55 = vld [vmem:[%s12430_s6 + $0x11f8] sm:$0xff] }
  0xc9   : > { %572 = vst [vmem:[%s12435_s7 + $0x6b4] sm:$0xff] %v571_v56  ;;  %v699_v56 = vld [vmem:[%s12430_s6 + $0x1200] sm:$0xff] }
  0xca   : > { %574 = vst [vmem:[%s12435_s7 + $0x6bc] sm:$0xff] %v573_v57  ;;  %v701_v57 = vld [vmem:[%s12430_s6 + $0x120c] sm:$0xff] }
  0xcb   : > { %576 = vst [vmem:[%s12435_s7 + $0x6c8] sm:$0xff] %v575_v58  ;;  %v703_v58 = vld [vmem:[%s12430_s6 + $0x1214] sm:$0xff] }
  0xcc   : > { %578 = vst [vmem:[%s12435_s7 + $0x6d0] sm:$0xff] %v577_v59  ;;  %v705_v59 = vld [vmem:[%s12430_s6 + $0x121c] sm:$0xff] }
  0xcd   : > { %580 = vst [vmem:[%s12435_s7 + $0x6d8] sm:$0xff] %v579_v60  ;;  %v707_v60 = vld [vmem:[%s12430_s6 + $0x1260] sm:$0xff] }
  0xce   : > { %582 = vst [vmem:[%s12435_s7 + $0x6e4] sm:$0xff] %v581_v61  ;;  %v709_v61 = vld [vmem:[%s12430_s6 + $0x1268] sm:$0xff] }
  0xcf   : > { %584 = vst [vmem:[%s12435_s7 + $0x6ec] sm:$0xff] %v583_v62  ;;  %v711_v62 = vld [vmem:[%s12430_s6 + $0x1270] sm:$0xff] }
  0xd0   : > { %586 = vst [vmem:[%s12435_s7 + $0x6f4] sm:$0xff] %v585_v63  ;;  %v713_v63 = vld [vmem:[%s12430_s6 + $0x127c] sm:$0xff] }
  0xd1   : > { %588 = vst [vmem:[%s12435_s7 + $0x700] sm:$0xff] %v587_v0  ;;  %v715_v0 = vld [vmem:[%s12430_s6 + $0x1284] sm:$0xff] }
  0xd2   : > { %590 = vst [vmem:[%s12435_s7 + $0x708] sm:$0xff] %v589_v1  ;;  %v717_v1 = vld [vmem:[%s12430_s6 + $0x128c] sm:$0xff] }
  0xd3   : > { %592 = vst [vmem:[%s12435_s7 + $0x710] sm:$0xff] %v591_v2  ;;  %v719_v2 = vld [vmem:[%s12430_s6 + $0x12d0] sm:$0xff] }
  0xd4   : > { %594 = vst [vmem:[%s12435_s7 + $0x71c] sm:$0xff] %v593_v3  ;;  %v721_v3 = vld [vmem:[%s12430_s6 + $0x12d8] sm:$0xff] }
  0xd5   : > { %596 = vst [vmem:[%s12435_s7 + $0x724] sm:$0xff] %v595_v4  ;;  %v723_v4 = vld [vmem:[%s12430_s6 + $0x12e0] sm:$0xff] }
  0xd6   : > { %598 = vst [vmem:[%s12435_s7 + $0x72c] sm:$0xff] %v597_v5  ;;  %v725_v5 = vld [vmem:[%s12430_s6 + $0x12ec] sm:$0xff] }
  0xd7   : > { %600 = vst [vmem:[%s12435_s7 + $0x738] sm:$0xff] %v599_v6  ;;  %v727_v6 = vld [vmem:[%s12430_s6 + $0x12f4] sm:$0xff] }
  0xd8   : > { %602 = vst [vmem:[%s12435_s7 + $0x740] sm:$0xff] %v601_v7  ;;  %v729_v7 = vld [vmem:[%s12430_s6 + $0x12fc] sm:$0xff] }
  0xd9   : > { %604 = vst [vmem:[%s12435_s7 + $0x748] sm:$0xff] %v603_v8  ;;  %v731_v8 = vld [vmem:[%s12430_s6 + $0x1340] sm:$0xff] }
  0xda   : > { %606 = vst [vmem:[%s12435_s7 + $0x754] sm:$0xff] %v605_v9  ;;  %v733_v9 = vld [vmem:[%s12430_s6 + $0x1348] sm:$0xff] }
  0xdb   : > { %608 = vst [vmem:[%s12435_s7 + $0x75c] sm:$0xff] %v607_v10  ;;  %v735_v10 = vld [vmem:[%s12430_s6 + $0x1350] sm:$0xff] }
  0xdc   : > { %610 = vst [vmem:[%s12435_s7 + $0x764] sm:$0xff] %v609_v11  ;;  %v737_v11 = vld [vmem:[%s12430_s6 + $0x135c] sm:$0xff] }
  0xdd   : > { %612 = vst [vmem:[%s12435_s7 + $0x770] sm:$0xff] %v611_v12  ;;  %v739_v12 = vld [vmem:[%s12430_s6 + $0x1364] sm:$0xff] }
  0xde   : > { %614 = vst [vmem:[%s12435_s7 + $0x778] sm:$0xff] %v613_v13  ;;  %v741_v13 = vld [vmem:[%s12430_s6 + $0x136c] sm:$0xff] }
  0xdf   : > { %616 = vst [vmem:[%s12435_s7 + $0x780] sm:$0xff] %v615_v14  ;;  %v743_v14 = vld [vmem:[%s12430_s6 + $0x13b0] sm:$0xff] }
  0xe0   : > { %618 = vst [vmem:[%s12435_s7 + $0x78c] sm:$0xff] %v617_v15  ;;  %v745_v15 = vld [vmem:[%s12430_s6 + $0x13b8] sm:$0xff] }
  0xe1   : > { %620 = vst [vmem:[%s12435_s7 + $0x794] sm:$0xff] %v619_v16  ;;  %v747_v16 = vld [vmem:[%s12430_s6 + $0x13c0] sm:$0xff] }
  0xe2   : > { %622 = vst [vmem:[%s12435_s7 + $0x79c] sm:$0xff] %v621_v17  ;;  %v749_v17 = vld [vmem:[%s12430_s6 + $0x13cc] sm:$0xff] }
  0xe3   : > { %624 = vst [vmem:[%s12435_s7 + $0x7a8] sm:$0xff] %v623_v18  ;;  %v751_v18 = vld [vmem:[%s12430_s6 + $0x13d4] sm:$0xff] }
  0xe4   : > { %626 = vst [vmem:[%s12435_s7 + $0x7b0] sm:$0xff] %v625_v19  ;;  %v753_v19 = vld [vmem:[%s12430_s6 + $0x13dc] sm:$0xff] }
  0xe5   : > { %628 = vst [vmem:[%s12435_s7 + $0x7b8] sm:$0xff] %v627_v20  ;;  %v755_v20 = vld [vmem:[%s12430_s6 + $0x1420] sm:$0xff] }
  0xe6   : > { %630 = vst [vmem:[%s12435_s7 + $0x7c4] sm:$0xff] %v629_v21  ;;  %v757_v21 = vld [vmem:[%s12430_s6 + $0x1428] sm:$0xff] }
  0xe7   : > { %632 = vst [vmem:[%s12435_s7 + $0x7cc] sm:$0xff] %v631_v22  ;;  %v759_v22 = vld [vmem:[%s12430_s6 + $0x1430] sm:$0xff] }
  0xe8   : > { %634 = vst [vmem:[%s12435_s7 + $0x7d4] sm:$0xff] %v633_v23  ;;  %v761_v23 = vld [vmem:[%s12430_s6 + $0x143c] sm:$0xff] }
  0xe9   : > { %636 = vst [vmem:[%s12435_s7 + $0x7e0] sm:$0xff] %v635_v24  ;;  %v763_v24 = vld [vmem:[%s12430_s6 + $0x1444] sm:$0xff] }
  0xea   : > { %638 = vst [vmem:[%s12435_s7 + $0x7e8] sm:$0xff] %v637_v25  ;;  %v765_v25 = vld [vmem:[%s12430_s6 + $0x144c] sm:$0xff] }
  0xeb   : > { %640 = vst [vmem:[%s12435_s7 + $0x7f0] sm:$0xff] %v639_v26  ;;  %v767_v26 = vld [vmem:[%s12430_s6 + $0x1490] sm:$0xff] }
  0xec   : > { %642 = vst [vmem:[%s12435_s7 + $0x7fc] sm:$0xff] %v641_v27  ;;  %v769_v27 = vld [vmem:[%s12430_s6 + $0x1498] sm:$0xff] }
  0xed   : > { %644 = vst [vmem:[%s12435_s7 + $0x804] sm:$0xff] %v643_v28  ;;  %v771_v28 = vld [vmem:[%s12430_s6 + $0x14a0] sm:$0xff] }
  0xee   : > { %646 = vst [vmem:[%s12435_s7 + $0x80c] sm:$0xff] %v645_v29  ;;  %v773_v29 = vld [vmem:[%s12430_s6 + $0x14ac] sm:$0xff] }
  0xef   : > { %648 = vst [vmem:[%s12435_s7 + $0x818] sm:$0xff] %v647_v30  ;;  %v775_v30 = vld [vmem:[%s12430_s6 + $0x14b4] sm:$0xff] }
  0xf0   : > { %650 = vst [vmem:[%s12435_s7 + $0x820] sm:$0xff] %v649_v31  ;;  %v777_v31 = vld [vmem:[%s12430_s6 + $0x14bc] sm:$0xff] }
  0xf1   : > { %652 = vst [vmem:[%s12435_s7 + $0x828] sm:$0xff] %v651_v32  ;;  %v779_v32 = vld [vmem:[%s12430_s6 + $0x1500] sm:$0xff] }
  0xf2   : > { %654 = vst [vmem:[%s12435_s7 + $0x834] sm:$0xff] %v653_v33  ;;  %v781_v33 = vld [vmem:[%s12430_s6 + $0x1508] sm:$0xff] }
  0xf3   : > { %656 = vst [vmem:[%s12435_s7 + $0x83c] sm:$0xff] %v655_v34  ;;  %v783_v34 = vld [vmem:[%s12430_s6 + $0x1510] sm:$0xff] }
  0xf4   : > { %658 = vst [vmem:[%s12435_s7 + $0x844] sm:$0xff] %v657_v35  ;;  %v785_v35 = vld [vmem:[%s12430_s6 + $0x151c] sm:$0xff] }
  0xf5   : > { %660 = vst [vmem:[%s12435_s7 + $0x850] sm:$0xff] %v659_v36  ;;  %v787_v36 = vld [vmem:[%s12430_s6 + $0x1524] sm:$0xff] }
  0xf6   : > { %662 = vst [vmem:[%s12435_s7 + $0x858] sm:$0xff] %v661_v37  ;;  %v789_v37 = vld [vmem:[%s12430_s6 + $0x152c] sm:$0xff] }
  0xf7   : > { %664 = vst [vmem:[%s12435_s7 + $0x860] sm:$0xff] %v663_v38  ;;  %v791_v38 = vld [vmem:[%s12430_s6 + $0x1570] sm:$0xff] }
  0xf8   : > { %666 = vst [vmem:[%s12435_s7 + $0x86c] sm:$0xff] %v665_v39  ;;  %v793_v39 = vld [vmem:[%s12430_s6 + $0x1578] sm:$0xff] }
  0xf9   : > { %668 = vst [vmem:[%s12435_s7 + $0x874] sm:$0xff] %v667_v40  ;;  %v795_v40 = vld [vmem:[%s12430_s6 + $0x1580] sm:$0xff] }
  0xfa   : > { %670 = vst [vmem:[%s12435_s7 + $0x87c] sm:$0xff] %v669_v41  ;;  %v797_v41 = vld [vmem:[%s12430_s6 + $0x158c] sm:$0xff] }
  0xfb   : > { %672 = vst [vmem:[%s12435_s7 + $0x888] sm:$0xff] %v671_v42  ;;  %v799_v42 = vld [vmem:[%s12430_s6 + $0x1594] sm:$0xff] }
  0xfc   : > { %674 = vst [vmem:[%s12435_s7 + $0x890] sm:$0xff] %v673_v43  ;;  %v801_v43 = vld [vmem:[%s12430_s6 + $0x159c] sm:$0xff] }
  0xfd   : > { %676 = vst [vmem:[%s12435_s7 + $0x898] sm:$0xff] %v675_v44  ;;  %v803_v44 = vld [vmem:[%s12430_s6 + $0x15e0] sm:$0xff] }
  0xfe   : > { %678 = vst [vmem:[%s12435_s7 + $0x8a4] sm:$0xff] %v677_v45  ;;  %v805_v45 = vld [vmem:[%s12430_s6 + $0x15e8] sm:$0xff] }
  0xff   : > { %680 = vst [vmem:[%s12435_s7 + $0x8ac] sm:$0xff] %v679_v46  ;;  %v807_v46 = vld [vmem:[%s12430_s6 + $0x15f0] sm:$0xff] }
 0x100   : > { %682 = vst [vmem:[%s12435_s7 + $0x8b4] sm:$0xff] %v681_v47  ;;  %v809_v47 = vld [vmem:[%s12430_s6 + $0x15fc] sm:$0xff] }
 0x101   : > { %684 = vst [vmem:[%s12435_s7 + $0x8c0] sm:$0xff] %v683_v48  ;;  %v811_v48 = vld [vmem:[%s12430_s6 + $0x1604] sm:$0xff] }
 0x102   : > { %686 = vst [vmem:[%s12435_s7 + $0x8c8] sm:$0xff] %v685_v49  ;;  %v813_v49 = vld [vmem:[%s12430_s6 + $0x160c] sm:$0xff] }
 0x103   : > { %688 = vst [vmem:[%s12435_s7 + $0x8d0] sm:$0xff] %v687_v50  ;;  %v815_v50 = vld [vmem:[%s12430_s6 + $0x1650] sm:$0xff] }
 0x104   : > { %690 = vst [vmem:[%s12435_s7 + $0x8dc] sm:$0xff] %v689_v51  ;;  %v817_v51 = vld [vmem:[%s12430_s6 + $0x1658] sm:$0xff] }
 0x105   : > { %692 = vst [vmem:[%s12435_s7 + $0x8e4] sm:$0xff] %v691_v52  ;;  %v819_v52 = vld [vmem:[%s12430_s6 + $0x1660] sm:$0xff] }
 0x106   : > { %694 = vst [vmem:[%s12435_s7 + $0x8ec] sm:$0xff] %v693_v53  ;;  %v821_v53 = vld [vmem:[%s12430_s6 + $0x166c] sm:$0xff] }
 0x107   : > { %696 = vst [vmem:[%s12435_s7 + $0x8f8] sm:$0xff] %v695_v54  ;;  %v823_v54 = vld [vmem:[%s12430_s6 + $0x1674] sm:$0xff] }
 0x108   : > { %698 = vst [vmem:[%s12435_s7 + $0x900] sm:$0xff] %v697_v55  ;;  %v825_v55 = vld [vmem:[%s12430_s6 + $0x167c] sm:$0xff] }
 0x109   : > { %700 = vst [vmem:[%s12435_s7 + $0x908] sm:$0xff] %v699_v56  ;;  %v827_v56 = vld [vmem:[%s12430_s6 + $0x16c0] sm:$0xff] }
 0x10a   : > { %702 = vst [vmem:[%s12435_s7 + $0x914] sm:$0xff] %v701_v57  ;;  %v829_v57 = vld [vmem:[%s12430_s6 + $0x16c8] sm:$0xff] }
 0x10b   : > { %704 = vst [vmem:[%s12435_s7 + $0x91c] sm:$0xff] %v703_v58  ;;  %v831_v58 = vld [vmem:[%s12430_s6 + $0x16d0] sm:$0xff] }
 0x10c   : > { %706 = vst [vmem:[%s12435_s7 + $0x924] sm:$0xff] %v705_v59  ;;  %v833_v59 = vld [vmem:[%s12430_s6 + $0x16dc] sm:$0xff] }
 0x10d   : > { %708 = vst [vmem:[%s12435_s7 + $0x930] sm:$0xff] %v707_v60  ;;  %v835_v60 = vld [vmem:[%s12430_s6 + $0x16e4] sm:$0xff] }
 0x10e   : > { %710 = vst [vmem:[%s12435_s7 + $0x938] sm:$0xff] %v709_v61  ;;  %v837_v61 = vld [vmem:[%s12430_s6 + $0x16ec] sm:$0xff] }
 0x10f   : > { %712 = vst [vmem:[%s12435_s7 + $0x940] sm:$0xff] %v711_v62  ;;  %v839_v62 = vld [vmem:[%s12430_s6 + $0x1730] sm:$0xff] }
 0x110   : > { %714 = vst [vmem:[%s12435_s7 + $0x94c] sm:$0xff] %v713_v63  ;;  %v841_v63 = vld [vmem:[%s12430_s6 + $0x1738] sm:$0xff] }
 0x111   : > { %716 = vst [vmem:[%s12435_s7 + $0x954] sm:$0xff] %v715_v0  ;;  %v843_v0 = vld [vmem:[%s12430_s6 + $0x1740] sm:$0xff] }
 0x112   : > { %718 = vst [vmem:[%s12435_s7 + $0x95c] sm:$0xff] %v717_v1  ;;  %v845_v1 = vld [vmem:[%s12430_s6 + $0x174c] sm:$0xff] }
 0x113   : > { %720 = vst [vmem:[%s12435_s7 + $0x968] sm:$0xff] %v719_v2  ;;  %v847_v2 = vld [vmem:[%s12430_s6 + $0x1754] sm:$0xff] }
 0x114   : > { %722 = vst [vmem:[%s12435_s7 + $0x970] sm:$0xff] %v721_v3  ;;  %v849_v3 = vld [vmem:[%s12430_s6 + $0x175c] sm:$0xff] }
 0x115   : > { %724 = vst [vmem:[%s12435_s7 + $0x978] sm:$0xff] %v723_v4  ;;  %v851_v4 = vld [vmem:[%s12430_s6 + $0x17a0] sm:$0xff] }
 0x116   : > { %726 = vst [vmem:[%s12435_s7 + $0x984] sm:$0xff] %v725_v5  ;;  %v853_v5 = vld [vmem:[%s12430_s6 + $0x17a8] sm:$0xff] }
 0x117   : > { %728 = vst [vmem:[%s12435_s7 + $0x98c] sm:$0xff] %v727_v6  ;;  %v855_v6 = vld [vmem:[%s12430_s6 + $0x17b0] sm:$0xff] }
 0x118   : > { %730 = vst [vmem:[%s12435_s7 + $0x994] sm:$0xff] %v729_v7  ;;  %v857_v7 = vld [vmem:[%s12430_s6 + $0x17bc] sm:$0xff] }
 0x119   : > { %732 = vst [vmem:[%s12435_s7 + $0x9a0] sm:$0xff] %v731_v8  ;;  %v859_v8 = vld [vmem:[%s12430_s6 + $0x17c4] sm:$0xff] }
 0x11a   : > { %734 = vst [vmem:[%s12435_s7 + $0x9a8] sm:$0xff] %v733_v9  ;;  %v861_v9 = vld [vmem:[%s12430_s6 + $0x17cc] sm:$0xff] }
 0x11b   : > { %736 = vst [vmem:[%s12435_s7 + $0x9b0] sm:$0xff] %v735_v10  ;;  %v863_v10 = vld [vmem:[%s12430_s6 + $0x1810] sm:$0xff] }
 0x11c   : > { %738 = vst [vmem:[%s12435_s7 + $0x9bc] sm:$0xff] %v737_v11  ;;  %v865_v11 = vld [vmem:[%s12430_s6 + $0x1818] sm:$0xff] }
 0x11d   : > { %740 = vst [vmem:[%s12435_s7 + $0x9c4] sm:$0xff] %v739_v12  ;;  %v867_v12 = vld [vmem:[%s12430_s6 + $0x1820] sm:$0xff] }
 0x11e   : > { %742 = vst [vmem:[%s12435_s7 + $0x9cc] sm:$0xff] %v741_v13  ;;  %v869_v13 = vld [vmem:[%s12430_s6 + $0x182c] sm:$0xff] }
 0x11f   : > { %744 = vst [vmem:[%s12435_s7 + $0x9d8] sm:$0xff] %v743_v14  ;;  %v871_v14 = vld [vmem:[%s12430_s6 + $0x1834] sm:$0xff] }
 0x120   : > { %746 = vst [vmem:[%s12435_s7 + $0x9e0] sm:$0xff] %v745_v15  ;;  %v873_v15 = vld [vmem:[%s12430_s6 + $0x183c] sm:$0xff] }
 0x121   : > { %748 = vst [vmem:[%s12435_s7 + $0x9e8] sm:$0xff] %v747_v16  ;;  %v875_v16 = vld [vmem:[%s12430_s6 + $0x1880] sm:$0xff] }
 0x122   : > { %750 = vst [vmem:[%s12435_s7 + $0x9f4] sm:$0xff] %v749_v17  ;;  %v877_v17 = vld [vmem:[%s12430_s6 + $0x1888] sm:$0xff] }
 0x123   : > { %752 = vst [vmem:[%s12435_s7 + $0x9fc] sm:$0xff] %v751_v18  ;;  %v879_v18 = vld [vmem:[%s12430_s6 + $0x1890] sm:$0xff] }
 0x124   : > { %754 = vst [vmem:[%s12435_s7 + $0xa04] sm:$0xff] %v753_v19  ;;  %v881_v19 = vld [vmem:[%s12430_s6 + $0x189c] sm:$0xff] }
 0x125   : > { %756 = vst [vmem:[%s12435_s7 + $0xa10] sm:$0xff] %v755_v20  ;;  %v883_v20 = vld [vmem:[%s12430_s6 + $0x18a4] sm:$0xff] }
 0x126   : > { %758 = vst [vmem:[%s12435_s7 + $0xa18] sm:$0xff] %v757_v21  ;;  %v885_v21 = vld [vmem:[%s12430_s6 + $0x18ac] sm:$0xff] }
 0x127   : > { %760 = vst [vmem:[%s12435_s7 + $0xa20] sm:$0xff] %v759_v22  ;;  %v887_v22 = vld [vmem:[%s12430_s6 + $0x18f0] sm:$0xff] }
 0x128   : > { %762 = vst [vmem:[%s12435_s7 + $0xa2c] sm:$0xff] %v761_v23  ;;  %v889_v23 = vld [vmem:[%s12430_s6 + $0x18f8] sm:$0xff] }
 0x129   : > { %764 = vst [vmem:[%s12435_s7 + $0xa34] sm:$0xff] %v763_v24  ;;  %v891_v24 = vld [vmem:[%s12430_s6 + $0x1900] sm:$0xff] }
 0x12a   : > { %766 = vst [vmem:[%s12435_s7 + $0xa3c] sm:$0xff] %v765_v25  ;;  %v893_v25 = vld [vmem:[%s12430_s6 + $0x190c] sm:$0xff] }
 0x12b   : > { %768 = vst [vmem:[%s12435_s7 + $0xa48] sm:$0xff] %v767_v26  ;;  %v895_v26 = vld [vmem:[%s12430_s6 + $0x1914] sm:$0xff] }
 0x12c   : > { %770 = vst [vmem:[%s12435_s7 + $0xa50] sm:$0xff] %v769_v27  ;;  %v897_v27 = vld [vmem:[%s12430_s6 + $0x191c] sm:$0xff] }
 0x12d   : > { %772 = vst [vmem:[%s12435_s7 + $0xa58] sm:$0xff] %v771_v28  ;;  %v899_v28 = vld [vmem:[%s12430_s6 + $0x1960] sm:$0xff] }
 0x12e   : > { %774 = vst [vmem:[%s12435_s7 + $0xa64] sm:$0xff] %v773_v29  ;;  %v901_v29 = vld [vmem:[%s12430_s6 + $0x1968] sm:$0xff] }
 0x12f   : > { %776 = vst [vmem:[%s12435_s7 + $0xa6c] sm:$0xff] %v775_v30  ;;  %v903_v30 = vld [vmem:[%s12430_s6 + $0x1970] sm:$0xff] }
 0x130   : > { %778 = vst [vmem:[%s12435_s7 + $0xa74] sm:$0xff] %v777_v31  ;;  %v905_v31 = vld [vmem:[%s12430_s6 + $0x197c] sm:$0xff] }
 0x131   : > { %780 = vst [vmem:[%s12435_s7 + $0xa80] sm:$0xff] %v779_v32  ;;  %v907_v32 = vld [vmem:[%s12430_s6 + $0x1984] sm:$0xff] }
 0x132   : > { %782 = vst [vmem:[%s12435_s7 + $0xa88] sm:$0xff] %v781_v33  ;;  %v909_v33 = vld [vmem:[%s12430_s6 + $0x198c] sm:$0xff] }
 0x133   : > { %784 = vst [vmem:[%s12435_s7 + $0xa90] sm:$0xff] %v783_v34  ;;  %v911_v34 = vld [vmem:[%s12430_s6 + $0x19d0] sm:$0xff] }
 0x134   : > { %786 = vst [vmem:[%s12435_s7 + $0xa9c] sm:$0xff] %v785_v35  ;;  %v913_v35 = vld [vmem:[%s12430_s6 + $0x19d8] sm:$0xff] }
 0x135   : > { %788 = vst [vmem:[%s12435_s7 + $0xaa4] sm:$0xff] %v787_v36  ;;  %v915_v36 = vld [vmem:[%s12430_s6 + $0x19e0] sm:$0xff] }
 0x136   : > { %790 = vst [vmem:[%s12435_s7 + $0xaac] sm:$0xff] %v789_v37  ;;  %v917_v37 = vld [vmem:[%s12430_s6 + $0x19ec] sm:$0xff] }
 0x137   : > { %792 = vst [vmem:[%s12435_s7 + $0xab8] sm:$0xff] %v791_v38  ;;  %v919_v38 = vld [vmem:[%s12430_s6 + $0x19f4] sm:$0xff] }
 0x138   : > { %794 = vst [vmem:[%s12435_s7 + $0xac0] sm:$0xff] %v793_v39  ;;  %v921_v39 = vld [vmem:[%s12430_s6 + $0x19fc] sm:$0xff] }
 0x139   : > { %796 = vst [vmem:[%s12435_s7 + $0xac8] sm:$0xff] %v795_v40  ;;  %v923_v40 = vld [vmem:[%s12430_s6 + $0x1a40] sm:$0xff] }
 0x13a   : > { %798 = vst [vmem:[%s12435_s7 + $0xad4] sm:$0xff] %v797_v41  ;;  %v925_v41 = vld [vmem:[%s12430_s6 + $0x1a48] sm:$0xff] }
 0x13b   : > { %800 = vst [vmem:[%s12435_s7 + $0xadc] sm:$0xff] %v799_v42  ;;  %v927_v42 = vld [vmem:[%s12430_s6 + $0x1a50] sm:$0xff] }
 0x13c   : > { %802 = vst [vmem:[%s12435_s7 + $0xae4] sm:$0xff] %v801_v43  ;;  %v929_v43 = vld [vmem:[%s12430_s6 + $0x1a5c] sm:$0xff] }
 0x13d   : > { %804 = vst [vmem:[%s12435_s7 + $0xaf0] sm:$0xff] %v803_v44  ;;  %v931_v44 = vld [vmem:[%s12430_s6 + $0x1a64] sm:$0xff] }
 0x13e   : > { %806 = vst [vmem:[%s12435_s7 + $0xaf8] sm:$0xff] %v805_v45  ;;  %v933_v45 = vld [vmem:[%s12430_s6 + $0x1a6c] sm:$0xff] }
 0x13f   : > { %808 = vst [vmem:[%s12435_s7 + $0xb00] sm:$0xff] %v807_v46  ;;  %v935_v46 = vld [vmem:[%s12430_s6 + $0x1ab0] sm:$0xff] }
 0x140   : > { %810 = vst [vmem:[%s12435_s7 + $0xb0c] sm:$0xff] %v809_v47  ;;  %v937_v47 = vld [vmem:[%s12430_s6 + $0x1ab8] sm:$0xff] }
 0x141   : > { %812 = vst [vmem:[%s12435_s7 + $0xb14] sm:$0xff] %v811_v48  ;;  %v939_v48 = vld [vmem:[%s12430_s6 + $0x1ac0] sm:$0xff] }
 0x142   : > { %814 = vst [vmem:[%s12435_s7 + $0xb1c] sm:$0xff] %v813_v49  ;;  %v941_v49 = vld [vmem:[%s12430_s6 + $0x1acc] sm:$0xff] }
 0x143   : > { %816 = vst [vmem:[%s12435_s7 + $0xb28] sm:$0xff] %v815_v50  ;;  %v943_v50 = vld [vmem:[%s12430_s6 + $0x1ad4] sm:$0xff] }
 0x144   : > { %818 = vst [vmem:[%s12435_s7 + $0xb30] sm:$0xff] %v817_v51  ;;  %v945_v51 = vld [vmem:[%s12430_s6 + $0x1adc] sm:$0xff] }
 0x145   : > { %820 = vst [vmem:[%s12435_s7 + $0xb38] sm:$0xff] %v819_v52  ;;  %v947_v52 = vld [vmem:[%s12430_s6 + $0x1b20] sm:$0xff] }
 0x146   : > { %822 = vst [vmem:[%s12435_s7 + $0xb44] sm:$0xff] %v821_v53  ;;  %v949_v53 = vld [vmem:[%s12430_s6 + $0x1b28] sm:$0xff] }
 0x147   : > { %824 = vst [vmem:[%s12435_s7 + $0xb4c] sm:$0xff] %v823_v54  ;;  %v951_v54 = vld [vmem:[%s12430_s6 + $0x1b30] sm:$0xff] }
 0x148   : > { %826 = vst [vmem:[%s12435_s7 + $0xb54] sm:$0xff] %v825_v55  ;;  %v953_v55 = vld [vmem:[%s12430_s6 + $0x1b3c] sm:$0xff] }
 0x149   : > { %828 = vst [vmem:[%s12435_s7 + $0xb60] sm:$0xff] %v827_v56  ;;  %v955_v56 = vld [vmem:[%s12430_s6 + $0x1b44] sm:$0xff] }
 0x14a   : > { %830 = vst [vmem:[%s12435_s7 + $0xb68] sm:$0xff] %v829_v57  ;;  %v957_v57 = vld [vmem:[%s12430_s6 + $0x1b4c] sm:$0xff] }
 0x14b   : > { %832 = vst [vmem:[%s12435_s7 + $0xb70] sm:$0xff] %v831_v58  ;;  %v959_v58 = vld [vmem:[%s12430_s6 + $0x1b90] sm:$0xff] }
 0x14c   : > { %834 = vst [vmem:[%s12435_s7 + $0xb7c] sm:$0xff] %v833_v59  ;;  %v961_v59 = vld [vmem:[%s12430_s6 + $0x1b98] sm:$0xff] }
 0x14d   : > { %836 = vst [vmem:[%s12435_s7 + $0xb84] sm:$0xff] %v835_v60  ;;  %v963_v60 = vld [vmem:[%s12430_s6 + $0x1ba0] sm:$0xff] }
 0x14e   : > { %838 = vst [vmem:[%s12435_s7 + $0xb8c] sm:$0xff] %v837_v61  ;;  %v965_v61 = vld [vmem:[%s12430_s6 + $0x1bac] sm:$0xff] }
 0x14f   : > { %840 = vst [vmem:[%s12435_s7 + $0xb98] sm:$0xff] %v839_v62  ;;  %v967_v62 = vld [vmem:[%s12430_s6 + $0x1bb4] sm:$0xff] }
 0x150   : > { %842 = vst [vmem:[%s12435_s7 + $0xba0] sm:$0xff] %v841_v63  ;;  %v969_v63 = vld [vmem:[%s12430_s6 + $0x1bbc] sm:$0xff] }
 0x151   : > { %844 = vst [vmem:[%s12435_s7 + $0xba8] sm:$0xff] %v843_v0  ;;  %v8593_v0 = vld [vmem:[%s12430_s6 + $0x18] sm:$0xf] }
 0x152   : > { %846 = vst [vmem:[%s12435_s7 + $0xbb4] sm:$0xff] %v845_v1  ;;  %v8595_v1 = vld [vmem:[%s12430_s6 + $0x34] sm:$0xf] }
 0x153   : > { %848 = vst [vmem:[%s12435_s7 + $0xbbc] sm:$0xff] %v847_v2  ;;  %v8597_v2 = vld [vmem:[%s12430_s6 + $0x88] sm:$0xf] }
 0x154   : > { %850 = vst [vmem:[%s12435_s7 + $0xbc4] sm:$0xff] %v849_v3  ;;  %v8599_v3 = vld [vmem:[%s12430_s6 + $0xa4] sm:$0xf] }
 0x155   : > { %852 = vst [vmem:[%s12435_s7 + $0xbd0] sm:$0xff] %v851_v4  ;;  %v8601_v4 = vld [vmem:[%s12430_s6 + $0xf8] sm:$0xf] }
 0x156   : > { %854 = vst [vmem:[%s12435_s7 + $0xbd8] sm:$0xff] %v853_v5  ;;  %v8603_v5 = vld [vmem:[%s12430_s6 + $0x114] sm:$0xf] }
 0x157   : > { %856 = vst [vmem:[%s12435_s7 + $0xbe0] sm:$0xff] %v855_v6  ;;  %v8605_v6 = vld [vmem:[%s12430_s6 + $0x168] sm:$0xf] }
 0x158   : > { %858 = vst [vmem:[%s12435_s7 + $0xbec] sm:$0xff] %v857_v7  ;;  %v8607_v7 = vld [vmem:[%s12430_s6 + $0x184] sm:$0xf] }
 0x159   : > { %860 = vst [vmem:[%s12435_s7 + $0xbf4] sm:$0xff] %v859_v8  ;;  %v8609_v8 = vld [vmem:[%s12430_s6 + $0x1d8] sm:$0xf] }
 0x15a   : > { %862 = vst [vmem:[%s12435_s7 + $0xbfc] sm:$0xff] %v861_v9  ;;  %v8611_v9 = vld [vmem:[%s12430_s6 + $0x1f4] sm:$0xf] }
 0x15b   : > { %864 = vst [vmem:[%s12435_s7 + $0xc08] sm:$0xff] %v863_v10  ;;  %v8613_v10 = vld [vmem:[%s12430_s6 + $0x248] sm:$0xf] }
 0x15c   : > { %866 = vst [vmem:[%s12435_s7 + $0xc10] sm:$0xff] %v865_v11  ;;  %v8615_v11 = vld [vmem:[%s12430_s6 + $0x264] sm:$0xf] }
 0x15d   : > { %868 = vst [vmem:[%s12435_s7 + $0xc18] sm:$0xff] %v867_v12  ;;  %v8617_v12 = vld [vmem:[%s12430_s6 + $0x2b8] sm:$0xf] }
 0x15e   : > { %870 = vst [vmem:[%s12435_s7 + $0xc24] sm:$0xff] %v869_v13  ;;  %v8619_v13 = vld [vmem:[%s12430_s6 + $0x2d4] sm:$0xf] }
 0x15f   : > { %872 = vst [vmem:[%s12435_s7 + $0xc2c] sm:$0xff] %v871_v14  ;;  %v8621_v14 = vld [vmem:[%s12430_s6 + $0x328] sm:$0xf] }
 0x160   : > { %874 = vst [vmem:[%s12435_s7 + $0xc34] sm:$0xff] %v873_v15  ;;  %v8623_v15 = vld [vmem:[%s12430_s6 + $0x344] sm:$0xf] }
 0x161   : > { %876 = vst [vmem:[%s12435_s7 + $0xc40] sm:$0xff] %v875_v16  ;;  %v8625_v16 = vld [vmem:[%s12430_s6 + $0x398] sm:$0xf] }
 0x162   : > { %878 = vst [vmem:[%s12435_s7 + $0xc48] sm:$0xff] %v877_v17  ;;  %v8627_v17 = vld [vmem:[%s12430_s6 + $0x3b4] sm:$0xf] }
 0x163   : > { %880 = vst [vmem:[%s12435_s7 + $0xc50] sm:$0xff] %v879_v18  ;;  %v8629_v18 = vld [vmem:[%s12430_s6 + $0x408] sm:$0xf] }
 0x164   : > { %882 = vst [vmem:[%s12435_s7 + $0xc5c] sm:$0xff] %v881_v19  ;;  %v8631_v19 = vld [vmem:[%s12430_s6 + $0x424] sm:$0xf] }
 0x165   : > { %884 = vst [vmem:[%s12435_s7 + $0xc64] sm:$0xff] %v883_v20  ;;  %v8633_v20 = vld [vmem:[%s12430_s6 + $0x478] sm:$0xf] }
 0x166   : > { %886 = vst [vmem:[%s12435_s7 + $0xc6c] sm:$0xff] %v885_v21  ;;  %v8635_v21 = vld [vmem:[%s12430_s6 + $0x494] sm:$0xf] }
 0x167   : > { %888 = vst [vmem:[%s12435_s7 + $0xc78] sm:$0xff] %v887_v22  ;;  %v8637_v22 = vld [vmem:[%s12430_s6 + $0x4e8] sm:$0xf] }
 0x168   : > { %890 = vst [vmem:[%s12435_s7 + $0xc80] sm:$0xff] %v889_v23  ;;  %v8639_v23 = vld [vmem:[%s12430_s6 + $0x504] sm:$0xf] }
 0x169   : > { %892 = vst [vmem:[%s12435_s7 + $0xc88] sm:$0xff] %v891_v24  ;;  %v8641_v24 = vld [vmem:[%s12430_s6 + $0x558] sm:$0xf] }
 0x16a   : > { %894 = vst [vmem:[%s12435_s7 + $0xc94] sm:$0xff] %v893_v25  ;;  %v8643_v25 = vld [vmem:[%s12430_s6 + $0x574] sm:$0xf] }
 0x16b   : > { %896 = vst [vmem:[%s12435_s7 + $0xc9c] sm:$0xff] %v895_v26  ;;  %v8645_v26 = vld [vmem:[%s12430_s6 + $0x5c8] sm:$0xf] }
 0x16c   : > { %898 = vst [vmem:[%s12435_s7 + $0xca4] sm:$0xff] %v897_v27  ;;  %v8647_v27 = vld [vmem:[%s12430_s6 + $0x5e4] sm:$0xf] }
 0x16d   : > { %900 = vst [vmem:[%s12435_s7 + $0xcb0] sm:$0xff] %v899_v28  ;;  %v8649_v28 = vld [vmem:[%s12430_s6 + $0x638] sm:$0xf] }
 0x16e   : > { %902 = vst [vmem:[%s12435_s7 + $0xcb8] sm:$0xff] %v901_v29  ;;  %v8651_v29 = vld [vmem:[%s12430_s6 + $0x654] sm:$0xf] }
 0x16f   : > { %904 = vst [vmem:[%s12435_s7 + $0xcc0] sm:$0xff] %v903_v30  ;;  %v8653_v30 = vld [vmem:[%s12430_s6 + $0x6a8] sm:$0xf] }
 0x170   : > { %906 = vst [vmem:[%s12435_s7 + $0xccc] sm:$0xff] %v905_v31  ;;  %v8655_v31 = vld [vmem:[%s12430_s6 + $0x6c4] sm:$0xf] }
 0x171   : > { %908 = vst [vmem:[%s12435_s7 + $0xcd4] sm:$0xff] %v907_v32  ;;  %v8657_v32 = vld [vmem:[%s12430_s6 + $0x718] sm:$0xf] }
 0x172   : > { %910 = vst [vmem:[%s12435_s7 + $0xcdc] sm:$0xff] %v909_v33  ;;  %v8659_v33 = vld [vmem:[%s12430_s6 + $0x734] sm:$0xf] }
 0x173   : > { %912 = vst [vmem:[%s12435_s7 + $0xce8] sm:$0xff] %v911_v34  ;;  %v8661_v34 = vld [vmem:[%s12430_s6 + $0x788] sm:$0xf] }
 0x174   : > { %914 = vst [vmem:[%s12435_s7 + $0xcf0] sm:$0xff] %v913_v35  ;;  %v8663_v35 = vld [vmem:[%s12430_s6 + $0x7a4] sm:$0xf] }
 0x175   : > { %916 = vst [vmem:[%s12435_s7 + $0xcf8] sm:$0xff] %v915_v36  ;;  %v8665_v36 = vld [vmem:[%s12430_s6 + $0x7f8] sm:$0xf] }
 0x176   : > { %918 = vst [vmem:[%s12435_s7 + $0xd04] sm:$0xff] %v917_v37  ;;  %v8667_v37 = vld [vmem:[%s12430_s6 + $0x814] sm:$0xf] }
 0x177   : > { %920 = vst [vmem:[%s12435_s7 + $0xd0c] sm:$0xff] %v919_v38  ;;  %v8669_v38 = vld [vmem:[%s12430_s6 + $0x868] sm:$0xf] }
 0x178   : > { %922 = vst [vmem:[%s12435_s7 + $0xd14] sm:$0xff] %v921_v39  ;;  %v8671_v39 = vld [vmem:[%s12430_s6 + $0x884] sm:$0xf] }
 0x179   : > { %924 = vst [vmem:[%s12435_s7 + $0xd20] sm:$0xff] %v923_v40  ;;  %v8673_v40 = vld [vmem:[%s12430_s6 + $0x8d8] sm:$0xf] }
 0x17a   : > { %926 = vst [vmem:[%s12435_s7 + $0xd28] sm:$0xff] %v925_v41  ;;  %v8675_v41 = vld [vmem:[%s12430_s6 + $0x8f4] sm:$0xf] }
 0x17b   : > { %928 = vst [vmem:[%s12435_s7 + $0xd30] sm:$0xff] %v927_v42  ;;  %v8677_v42 = vld [vmem:[%s12430_s6 + $0x948] sm:$0xf] }
 0x17c   : > { %930 = vst [vmem:[%s12435_s7 + $0xd3c] sm:$0xff] %v929_v43  ;;  %v8679_v43 = vld [vmem:[%s12430_s6 + $0x964] sm:$0xf] }
 0x17d   : > { %932 = vst [vmem:[%s12435_s7 + $0xd44] sm:$0xff] %v931_v44  ;;  %v8681_v44 = vld [vmem:[%s12430_s6 + $0x9b8] sm:$0xf] }
 0x17e   : > { %934 = vst [vmem:[%s12435_s7 + $0xd4c] sm:$0xff] %v933_v45  ;;  %v8683_v45 = vld [vmem:[%s12430_s6 + $0x9d4] sm:$0xf] }
 0x17f   : > { %936 = vst [vmem:[%s12435_s7 + $0xd58] sm:$0xff] %v935_v46  ;;  %v8685_v46 = vld [vmem:[%s12430_s6 + $0xa28] sm:$0xf] }
 0x180   : > { %938 = vst [vmem:[%s12435_s7 + $0xd60] sm:$0xff] %v937_v47  ;;  %v8687_v47 = vld [vmem:[%s12430_s6 + $0xa44] sm:$0xf] }
 0x181   : > { %940 = vst [vmem:[%s12435_s7 + $0xd68] sm:$0xff] %v939_v48  ;;  %v8689_v48 = vld [vmem:[%s12430_s6 + $0xa98] sm:$0xf] }
 0x182   : > { %942 = vst [vmem:[%s12435_s7 + $0xd74] sm:$0xff] %v941_v49  ;;  %v8691_v49 = vld [vmem:[%s12430_s6 + $0xab4] sm:$0xf] }
 0x183   : > { %944 = vst [vmem:[%s12435_s7 + $0xd7c] sm:$0xff] %v943_v50  ;;  %v8693_v50 = vld [vmem:[%s12430_s6 + $0xb08] sm:$0xf] }
 0x184   : > { %946 = vst [vmem:[%s12435_s7 + $0xd84] sm:$0xff] %v945_v51  ;;  %v8695_v51 = vld [vmem:[%s12430_s6 + $0xb24] sm:$0xf] }
 0x185   : > { %948 = vst [vmem:[%s12435_s7 + $0xd90] sm:$0xff] %v947_v52  ;;  %v8697_v52 = vld [vmem:[%s12430_s6 + $0xb78] sm:$0xf] }
 0x186   : > { %950 = vst [vmem:[%s12435_s7 + $0xd98] sm:$0xff] %v949_v53  ;;  %v8699_v53 = vld [vmem:[%s12430_s6 + $0xb94] sm:$0xf] }
 0x187   : > { %952 = vst [vmem:[%s12435_s7 + $0xda0] sm:$0xff] %v951_v54  ;;  %v8701_v54 = vld [vmem:[%s12430_s6 + $0xbe8] sm:$0xf] }
 0x188   : > { %954 = vst [vmem:[%s12435_s7 + $0xdac] sm:$0xff] %v953_v55  ;;  %v8703_v55 = vld [vmem:[%s12430_s6 + $0xc04] sm:$0xf] }
 0x189   : > { %956 = vst [vmem:[%s12435_s7 + $0xdb4] sm:$0xff] %v955_v56  ;;  %v8705_v56 = vld [vmem:[%s12430_s6 + $0xc58] sm:$0xf] }
 0x18a   : > { %958 = vst [vmem:[%s12435_s7 + $0xdbc] sm:$0xff] %v957_v57  ;;  %v8707_v57 = vld [vmem:[%s12430_s6 + $0xc74] sm:$0xf] }
 0x18b   : > { %960 = vst [vmem:[%s12435_s7 + $0xdc8] sm:$0xff] %v959_v58  ;;  %v8709_v58 = vld [vmem:[%s12430_s6 + $0xcc8] sm:$0xf] }
 0x18c   : > { %962 = vst [vmem:[%s12435_s7 + $0xdd0] sm:$0xff] %v961_v59  ;;  %v8711_v59 = vld [vmem:[%s12430_s6 + $0xce4] sm:$0xf] }
 0x18d   : > { %964 = vst [vmem:[%s12435_s7 + $0xdd8] sm:$0xff] %v963_v60  ;;  %v8713_v60 = vld [vmem:[%s12430_s6 + $0xd38] sm:$0xf] }
 0x18e   : > { %966 = vst [vmem:[%s12435_s7 + $0xde4] sm:$0xff] %v965_v61  ;;  %v8715_v61 = vld [vmem:[%s12430_s6 + $0xd54] sm:$0xf] }
 0x18f   : > { %968 = vst [vmem:[%s12435_s7 + $0xdec] sm:$0xff] %v967_v62  ;;  %v8717_v62 = vld [vmem:[%s12430_s6 + $0xda8] sm:$0xf] }
 0x190   : > { %970 = vst [vmem:[%s12435_s7 + $0xdf4] sm:$0xff] %v969_v63  ;;  %v8719_v63 = vld [vmem:[%s12430_s6 + $0xdc4] sm:$0xf] }
 0x191   : > { %8594 = vst [vmem:[%s12435_s7 + $0x18] sm:$0xf] %v8593_v0  ;;  %v8721_v0 = vld [vmem:[%s12430_s6 + $0xe18] sm:$0xf] }
 0x192   : > { %8596 = vst [vmem:[%s12435_s7 + $0x34] sm:$0xf] %v8595_v1  ;;  %v8723_v1 = vld [vmem:[%s12430_s6 + $0xe34] sm:$0xf] }
 0x193   : > { %8598 = vst [vmem:[%s12435_s7 + $0x50] sm:$0xf] %v8597_v2  ;;  %v8725_v2 = vld [vmem:[%s12430_s6 + $0xe88] sm:$0xf] }
 0x194   : > { %8600 = vst [vmem:[%s12435_s7 + $0x6c] sm:$0xf] %v8599_v3  ;;  %v8727_v3 = vld [vmem:[%s12430_s6 + $0xea4] sm:$0xf] }
 0x195   : > { %8602 = vst [vmem:[%s12435_s7 + $0x88] sm:$0xf] %v8601_v4  ;;  %v8729_v4 = vld [vmem:[%s12430_s6 + $0xef8] sm:$0xf] }
 0x196   : > { %8604 = vst [vmem:[%s12435_s7 + $0xa4] sm:$0xf] %v8603_v5  ;;  %v8731_v5 = vld [vmem:[%s12430_s6 + $0xf14] sm:$0xf] }
 0x197   : > { %8606 = vst [vmem:[%s12435_s7 + $0xc0] sm:$0xf] %v8605_v6  ;;  %v8733_v6 = vld [vmem:[%s12430_s6 + $0xf68] sm:$0xf] }
 0x198   : > { %8608 = vst [vmem:[%s12435_s7 + $0xdc] sm:$0xf] %v8607_v7  ;;  %v8735_v7 = vld [vmem:[%s12430_s6 + $0xf84] sm:$0xf] }
 0x199   : > { %8610 = vst [vmem:[%s12435_s7 + $0xf8] sm:$0xf] %v8609_v8  ;;  %v8737_v8 = vld [vmem:[%s12430_s6 + $0xfd8] sm:$0xf] }
 0x19a   : > { %8612 = vst [vmem:[%s12435_s7 + $0x114] sm:$0xf] %v8611_v9  ;;  %v8739_v9 = vld [vmem:[%s12430_s6 + $0xff4] sm:$0xf] }
 0x19b   : > { %8614 = vst [vmem:[%s12435_s7 + $0x130] sm:$0xf] %v8613_v10  ;;  %v8741_v10 = vld [vmem:[%s12430_s6 + $0x1048] sm:$0xf] }
 0x19c   : > { %8616 = vst [vmem:[%s12435_s7 + $0x14c] sm:$0xf] %v8615_v11  ;;  %v8743_v11 = vld [vmem:[%s12430_s6 + $0x1064] sm:$0xf] }
 0x19d   : > { %8618 = vst [vmem:[%s12435_s7 + $0x168] sm:$0xf] %v8617_v12  ;;  %v8745_v12 = vld [vmem:[%s12430_s6 + $0x10b8] sm:$0xf] }
 0x19e   : > { %8620 = vst [vmem:[%s12435_s7 + $0x184] sm:$0xf] %v8619_v13  ;;  %v8747_v13 = vld [vmem:[%s12430_s6 + $0x10d4] sm:$0xf] }
 0x19f   : > { %8622 = vst [vmem:[%s12435_s7 + $0x1a0] sm:$0xf] %v8621_v14  ;;  %v8749_v14 = vld [vmem:[%s12430_s6 + $0x1128] sm:$0xf] }
 0x1a0   : > { %8624 = vst [vmem:[%s12435_s7 + $0x1bc] sm:$0xf] %v8623_v15  ;;  %v8751_v15 = vld [vmem:[%s12430_s6 + $0x1144] sm:$0xf] }
 0x1a1   : > { %8626 = vst [vmem:[%s12435_s7 + $0x1d8] sm:$0xf] %v8625_v16  ;;  %v8753_v16 = vld [vmem:[%s12430_s6 + $0x1198] sm:$0xf] }
 0x1a2   : > { %8628 = vst [vmem:[%s12435_s7 + $0x1f4] sm:$0xf] %v8627_v17  ;;  %v8755_v17 = vld [vmem:[%s12430_s6 + $0x11b4] sm:$0xf] }
 0x1a3   : > { %8630 = vst [vmem:[%s12435_s7 + $0x210] sm:$0xf] %v8629_v18  ;;  %v8757_v18 = vld [vmem:[%s12430_s6 + $0x1208] sm:$0xf] }
 0x1a4   : > { %8632 = vst [vmem:[%s12435_s7 + $0x22c] sm:$0xf] %v8631_v19  ;;  %v8759_v19 = vld [vmem:[%s12430_s6 + $0x1224] sm:$0xf] }
 0x1a5   : > { %8634 = vst [vmem:[%s12435_s7 + $0x248] sm:$0xf] %v8633_v20  ;;  %v8761_v20 = vld [vmem:[%s12430_s6 + $0x1278] sm:$0xf] }
 0x1a6   : > { %8636 = vst [vmem:[%s12435_s7 + $0x264] sm:$0xf] %v8635_v21  ;;  %v8763_v21 = vld [vmem:[%s12430_s6 + $0x1294] sm:$0xf] }
 0x1a7   : > { %8638 = vst [vmem:[%s12435_s7 + $0x280] sm:$0xf] %v8637_v22  ;;  %v8765_v22 = vld [vmem:[%s12430_s6 + $0x12e8] sm:$0xf] }
 0x1a8   : > { %8640 = vst [vmem:[%s12435_s7 + $0x29c] sm:$0xf] %v8639_v23  ;;  %v8767_v23 = vld [vmem:[%s12430_s6 + $0x1304] sm:$0xf] }
 0x1a9   : > { %8642 = vst [vmem:[%s12435_s7 + $0x2b8] sm:$0xf] %v8641_v24  ;;  %v8769_v24 = vld [vmem:[%s12430_s6 + $0x1358] sm:$0xf] }
 0x1aa   : > { %8644 = vst [vmem:[%s12435_s7 + $0x2d4] sm:$0xf] %v8643_v25  ;;  %v8771_v25 = vld [vmem:[%s12430_s6 + $0x1374] sm:$0xf] }
 0x1ab   : > { %8646 = vst [vmem:[%s12435_s7 + $0x2f0] sm:$0xf] %v8645_v26  ;;  %v8773_v26 = vld [vmem:[%s12430_s6 + $0x13c8] sm:$0xf] }
 0x1ac   : > { %8648 = vst [vmem:[%s12435_s7 + $0x30c] sm:$0xf] %v8647_v27  ;;  %v8775_v27 = vld [vmem:[%s12430_s6 + $0x13e4] sm:$0xf] }
 0x1ad   : > { %8650 = vst [vmem:[%s12435_s7 + $0x328] sm:$0xf] %v8649_v28  ;;  %v8777_v28 = vld [vmem:[%s12430_s6 + $0x1438] sm:$0xf] }
 0x1ae   : > { %8652 = vst [vmem:[%s12435_s7 + $0x344] sm:$0xf] %v8651_v29  ;;  %v8779_v29 = vld [vmem:[%s12430_s6 + $0x1454] sm:$0xf] }
 0x1af   : > { %8654 = vst [vmem:[%s12435_s7 + $0x360] sm:$0xf] %v8653_v30  ;;  %v8781_v30 = vld [vmem:[%s12430_s6 + $0x14a8] sm:$0xf] }
 0x1b0   : > { %8656 = vst [vmem:[%s12435_s7 + $0x37c] sm:$0xf] %v8655_v31  ;;  %v8783_v31 = vld [vmem:[%s12430_s6 + $0x14c4] sm:$0xf] }
 0x1b1   : > { %8658 = vst [vmem:[%s12435_s7 + $0x398] sm:$0xf] %v8657_v32  ;;  %v8785_v32 = vld [vmem:[%s12430_s6 + $0x1518] sm:$0xf] }
 0x1b2   : > { %8660 = vst [vmem:[%s12435_s7 + $0x3b4] sm:$0xf] %v8659_v33  ;;  %v8787_v33 = vld [vmem:[%s12430_s6 + $0x1534] sm:$0xf] }
 0x1b3   : > { %8662 = vst [vmem:[%s12435_s7 + $0x3d0] sm:$0xf] %v8661_v34  ;;  %v8789_v34 = vld [vmem:[%s12430_s6 + $0x1588] sm:$0xf] }
 0x1b4   : > { %8664 = vst [vmem:[%s12435_s7 + $0x3ec] sm:$0xf] %v8663_v35  ;;  %v8791_v35 = vld [vmem:[%s12430_s6 + $0x15a4] sm:$0xf] }
 0x1b5   : > { %8666 = vst [vmem:[%s12435_s7 + $0x408] sm:$0xf] %v8665_v36  ;;  %v8793_v36 = vld [vmem:[%s12430_s6 + $0x15f8] sm:$0xf] }
 0x1b6   : > { %8668 = vst [vmem:[%s12435_s7 + $0x424] sm:$0xf] %v8667_v37  ;;  %v8795_v37 = vld [vmem:[%s12430_s6 + $0x1614] sm:$0xf] }
 0x1b7   : > { %8670 = vst [vmem:[%s12435_s7 + $0x440] sm:$0xf] %v8669_v38  ;;  %v8797_v38 = vld [vmem:[%s12430_s6 + $0x1668] sm:$0xf] }
 0x1b8   : > { %8672 = vst [vmem:[%s12435_s7 + $0x45c] sm:$0xf] %v8671_v39  ;;  %v8799_v39 = vld [vmem:[%s12430_s6 + $0x1684] sm:$0xf] }
 0x1b9   : > { %8674 = vst [vmem:[%s12435_s7 + $0x478] sm:$0xf] %v8673_v40  ;;  %v8801_v40 = vld [vmem:[%s12430_s6 + $0x16d8] sm:$0xf] }
 0x1ba   : > { %8676 = vst [vmem:[%s12435_s7 + $0x494] sm:$0xf] %v8675_v41  ;;  %v8803_v41 = vld [vmem:[%s12430_s6 + $0x16f4] sm:$0xf] }
 0x1bb   : > { %8678 = vst [vmem:[%s12435_s7 + $0x4b0] sm:$0xf] %v8677_v42  ;;  %v8805_v42 = vld [vmem:[%s12430_s6 + $0x1748] sm:$0xf] }
 0x1bc   : > { %8680 = vst [vmem:[%s12435_s7 + $0x4cc] sm:$0xf] %v8679_v43  ;;  %v8807_v43 = vld [vmem:[%s12430_s6 + $0x1764] sm:$0xf] }
 0x1bd   : > { %8682 = vst [vmem:[%s12435_s7 + $0x4e8] sm:$0xf] %v8681_v44  ;;  %v8809_v44 = vld [vmem:[%s12430_s6 + $0x17b8] sm:$0xf] }
 0x1be   : > { %8684 = vst [vmem:[%s12435_s7 + $0x504] sm:$0xf] %v8683_v45  ;;  %v8811_v45 = vld [vmem:[%s12430_s6 + $0x17d4] sm:$0xf] }
 0x1bf   : > { %8686 = vst [vmem:[%s12435_s7 + $0x520] sm:$0xf] %v8685_v46  ;;  %v8813_v46 = vld [vmem:[%s12430_s6 + $0x1828] sm:$0xf] }
 0x1c0   : > { %8688 = vst [vmem:[%s12435_s7 + $0x53c] sm:$0xf] %v8687_v47  ;;  %v8815_v47 = vld [vmem:[%s12430_s6 + $0x1844] sm:$0xf] }
 0x1c1   : > { %8690 = vst [vmem:[%s12435_s7 + $0x558] sm:$0xf] %v8689_v48  ;;  %v8817_v48 = vld [vmem:[%s12430_s6 + $0x1898] sm:$0xf] }
 0x1c2   : > { %8692 = vst [vmem:[%s12435_s7 + $0x574] sm:$0xf] %v8691_v49  ;;  %v8819_v49 = vld [vmem:[%s12430_s6 + $0x18b4] sm:$0xf] }
 0x1c3   : > { %8694 = vst [vmem:[%s12435_s7 + $0x590] sm:$0xf] %v8693_v50  ;;  %v8821_v50 = vld [vmem:[%s12430_s6 + $0x1908] sm:$0xf] }
 0x1c4   : > { %8696 = vst [vmem:[%s12435_s7 + $0x5ac] sm:$0xf] %v8695_v51  ;;  %v8823_v51 = vld [vmem:[%s12430_s6 + $0x1924] sm:$0xf] }
 0x1c5   : > { %8698 = vst [vmem:[%s12435_s7 + $0x5c8] sm:$0xf] %v8697_v52  ;;  %v8825_v52 = vld [vmem:[%s12430_s6 + $0x1978] sm:$0xf] }
 0x1c6   : > { %8700 = vst [vmem:[%s12435_s7 + $0x5e4] sm:$0xf] %v8699_v53  ;;  %v8827_v53 = vld [vmem:[%s12430_s6 + $0x1994] sm:$0xf] }
 0x1c7   : > { %8702 = vst [vmem:[%s12435_s7 + $0x600] sm:$0xf] %v8701_v54  ;;  %v8829_v54 = vld [vmem:[%s12430_s6 + $0x19e8] sm:$0xf] }
 0x1c8   : > { %8704 = vst [vmem:[%s12435_s7 + $0x61c] sm:$0xf] %v8703_v55  ;;  %v8831_v55 = vld [vmem:[%s12430_s6 + $0x1a04] sm:$0xf] }
 0x1c9   : > { %8706 = vst [vmem:[%s12435_s7 + $0x638] sm:$0xf] %v8705_v56  ;;  %v8833_v56 = vld [vmem:[%s12430_s6 + $0x1a58] sm:$0xf] }
 0x1ca   : > { %8708 = vst [vmem:[%s12435_s7 + $0x654] sm:$0xf] %v8707_v57  ;;  %v8835_v57 = vld [vmem:[%s12430_s6 + $0x1a74] sm:$0xf] }
 0x1cb   : > { %8710 = vst [vmem:[%s12435_s7 + $0x670] sm:$0xf] %v8709_v58  ;;  %v8837_v58 = vld [vmem:[%s12430_s6 + $0x1ac8] sm:$0xf] }
 0x1cc   : > { %8712 = vst [vmem:[%s12435_s7 + $0x68c] sm:$0xf] %v8711_v59  ;;  %v8839_v59 = vld [vmem:[%s12430_s6 + $0x1ae4] sm:$0xf] }
 0x1cd   : > { %8714 = vst [vmem:[%s12435_s7 + $0x6a8] sm:$0xf] %v8713_v60  ;;  %v8841_v60 = vld [vmem:[%s12430_s6 + $0x1b38] sm:$0xf] }
 0x1ce   : > { %8716 = vst [vmem:[%s12435_s7 + $0x6c4] sm:$0xf] %v8715_v61  ;;  %v8843_v61 = vld [vmem:[%s12430_s6 + $0x1b54] sm:$0xf] }
 0x1cf   : > { %8718 = vst [vmem:[%s12435_s7 + $0x6e0] sm:$0xf] %v8717_v62  ;;  %v8845_v62 = vld [vmem:[%s12430_s6 + $0x1ba8] sm:$0xf] }
 0x1d0   : > { %8720 = vst [vmem:[%s12435_s7 + $0x6fc] sm:$0xf] %v8719_v63  ;;  %v8847_v63 = vld [vmem:[%s12430_s6 + $0x1bc4] sm:$0xf] }
 0x1d1   : > { %8722 = vst [vmem:[%s12435_s7 + $0x718] sm:$0xf] %v8721_v0 }
 0x1d2   : > { %8724 = vst [vmem:[%s12435_s7 + $0x734] sm:$0xf] %v8723_v1 }
 0x1d3   : > { %8726 = vst [vmem:[%s12435_s7 + $0x750] sm:$0xf] %v8725_v2 }
 0x1d4   : > { %8728 = vst [vmem:[%s12435_s7 + $0x76c] sm:$0xf] %v8727_v3 }
 0x1d5   : > { %8730 = vst [vmem:[%s12435_s7 + $0x788] sm:$0xf] %v8729_v4 }
 0x1d6   : > { %8732 = vst [vmem:[%s12435_s7 + $0x7a4] sm:$0xf] %v8731_v5 }
 0x1d7   : > { %8734 = vst [vmem:[%s12435_s7 + $0x7c0] sm:$0xf] %v8733_v6 }
 0x1d8   : > { %8736 = vst [vmem:[%s12435_s7 + $0x7dc] sm:$0xf] %v8735_v7 }
 0x1d9   : > { %8738 = vst [vmem:[%s12435_s7 + $0x7f8] sm:$0xf] %v8737_v8 }
 0x1da   : > { %8740 = vst [vmem:[%s12435_s7 + $0x814] sm:$0xf] %v8739_v9 }
 0x1db   : > { %8742 = vst [vmem:[%s12435_s7 + $0x830] sm:$0xf] %v8741_v10 }
 0x1dc   : > { %8744 = vst [vmem:[%s12435_s7 + $0x84c] sm:$0xf] %v8743_v11 }
 0x1dd   : > { %8746 = vst [vmem:[%s12435_s7 + $0x868] sm:$0xf] %v8745_v12 }
 0x1de   : > { %8748 = vst [vmem:[%s12435_s7 + $0x884] sm:$0xf] %v8747_v13 }
 0x1df   : > { %8750 = vst [vmem:[%s12435_s7 + $0x8a0] sm:$0xf] %v8749_v14 }
 0x1e0   : > { %8752 = vst [vmem:[%s12435_s7 + $0x8bc] sm:$0xf] %v8751_v15 }
 0x1e1   : > { %8754 = vst [vmem:[%s12435_s7 + $0x8d8] sm:$0xf] %v8753_v16 }
 0x1e2   : > { %8756 = vst [vmem:[%s12435_s7 + $0x8f4] sm:$0xf] %v8755_v17 }
 0x1e3   : > { %8758 = vst [vmem:[%s12435_s7 + $0x910] sm:$0xf] %v8757_v18 }
 0x1e4   : > { %8760 = vst [vmem:[%s12435_s7 + $0x92c] sm:$0xf] %v8759_v19 }
 0x1e5   : > { %8762 = vst [vmem:[%s12435_s7 + $0x948] sm:$0xf] %v8761_v20 }
 0x1e6   : > { %8764 = vst [vmem:[%s12435_s7 + $0x964] sm:$0xf] %v8763_v21 }
 0x1e7   : > { %8766 = vst [vmem:[%s12435_s7 + $0x980] sm:$0xf] %v8765_v22 }
 0x1e8   : > { %8768 = vst [vmem:[%s12435_s7 + $0x99c] sm:$0xf] %v8767_v23 }
 0x1e9   : > { %8770 = vst [vmem:[%s12435_s7 + $0x9b8] sm:$0xf] %v8769_v24 }
 0x1ea   : > { %8772 = vst [vmem:[%s12435_s7 + $0x9d4] sm:$0xf] %v8771_v25 }
 0x1eb   : > { %8774 = vst [vmem:[%s12435_s7 + $0x9f0] sm:$0xf] %v8773_v26 }
 0x1ec   : > { %8776 = vst [vmem:[%s12435_s7 + $0xa0c] sm:$0xf] %v8775_v27 }
 0x1ed   : > { %8778 = vst [vmem:[%s12435_s7 + $0xa28] sm:$0xf] %v8777_v28 }
 0x1ee   : > { %8780 = vst [vmem:[%s12435_s7 + $0xa44] sm:$0xf] %v8779_v29 }
 0x1ef   : > { %8782 = vst [vmem:[%s12435_s7 + $0xa60] sm:$0xf] %v8781_v30 }
 0x1f0   : > { %8784 = vst [vmem:[%s12435_s7 + $0xa7c] sm:$0xf] %v8783_v31 }
 0x1f1   : > { %8786 = vst [vmem:[%s12435_s7 + $0xa98] sm:$0xf] %v8785_v32 }
 0x1f2   : > { %8788 = vst [vmem:[%s12435_s7 + $0xab4] sm:$0xf] %v8787_v33 }
 0x1f3   : > { %8790 = vst [vmem:[%s12435_s7 + $0xad0] sm:$0xf] %v8789_v34 }
 0x1f4   : > { %8792 = vst [vmem:[%s12435_s7 + $0xaec] sm:$0xf] %v8791_v35 }
 0x1f5   : > { %8794 = vst [vmem:[%s12435_s7 + $0xb08] sm:$0xf] %v8793_v36 }
 0x1f6   : > { %8796 = vst [vmem:[%s12435_s7 + $0xb24] sm:$0xf] %v8795_v37 }
 0x1f7   : > { %8798 = vst [vmem:[%s12435_s7 + $0xb40] sm:$0xf] %v8797_v38 }
 0x1f8   : > { %8800 = vst [vmem:[%s12435_s7 + $0xb5c] sm:$0xf] %v8799_v39 }
 0x1f9   : > { %8802 = vst [vmem:[%s12435_s7 + $0xb78] sm:$0xf] %v8801_v40 }
 0x1fa   : > { %8804 = vst [vmem:[%s12435_s7 + $0xb94] sm:$0xf] %v8803_v41 }
 0x1fb   : > { %8806 = vst [vmem:[%s12435_s7 + $0xbb0] sm:$0xf] %v8805_v42 }
 0x1fc   : > { %8808 = vst [vmem:[%s12435_s7 + $0xbcc] sm:$0xf] %v8807_v43 }
 0x1fd   : > { %8810 = vst [vmem:[%s12435_s7 + $0xbe8] sm:$0xf] %v8809_v44 }
 0x1fe   : > { %8812 = vst [vmem:[%s12435_s7 + $0xc04] sm:$0xf] %v8811_v45 }
 0x1ff   : > { %8814 = vst [vmem:[%s12435_s7 + $0xc20] sm:$0xf] %v8813_v46 }
 0x200   : > { %8816 = vst [vmem:[%s12435_s7 + $0xc3c] sm:$0xf] %v8815_v47 }
 0x201   : > { %8818 = vst [vmem:[%s12435_s7 + $0xc58] sm:$0xf] %v8817_v48 }
 0x202   : > { %8820 = vst [vmem:[%s12435_s7 + $0xc74] sm:$0xf] %v8819_v49 }
 0x203   : > { %8822 = vst [vmem:[%s12435_s7 + $0xc90] sm:$0xf] %v8821_v50 }
 0x204   : > { %8824 = vst [vmem:[%s12435_s7 + $0xcac] sm:$0xf] %v8823_v51 }
 0x205   : > { %8826 = vst [vmem:[%s12435_s7 + $0xcc8] sm:$0xf] %v8825_v52 }
 0x206   : > { %8828 = vst [vmem:[%s12435_s7 + $0xce4] sm:$0xf] %v8827_v53 }
 0x207   : > { %8830 = vst [vmem:[%s12435_s7 + $0xd00] sm:$0xf] %v8829_v54 }
 0x208   : > { %8832 = vst [vmem:[%s12435_s7 + $0xd1c] sm:$0xf] %v8831_v55 }
 0x209   : > { %8834 = vst [vmem:[%s12435_s7 + $0xd38] sm:$0xf] %v8833_v56 }
 0x20a   : > { %8836 = vst [vmem:[%s12435_s7 + $0xd54] sm:$0xf] %v8835_v57 }
 0x20b   : > { %8838 = vst [vmem:[%s12435_s7 + $0xd70] sm:$0xf] %v8837_v58 }
 0x20c   : > { %8840 = vst [vmem:[%s12435_s7 + $0xd8c] sm:$0xf] %v8839_v59 }
 0x20d   : > { %8842 = vst [vmem:[%s12435_s7 + $0xda8] sm:$0xf] %v8841_v60 }
 0x20e   : > { %8844 = vst [vmem:[%s12435_s7 + $0xdc4] sm:$0xf] %v8843_v61 }
 0x20f   : > { %8846 = vst [vmem:[%s12435_s7 + $0xde0] sm:$0xf] %v8845_v62 }
 0x210   : > { %8848 = vst [vmem:[%s12435_s7 + $0xdfc] sm:$0xf] %v8847_v63 }
 0x211 PF: > { %p8849_p5 = scmp.ge.s32.totalorder %s12364_s20, 1  ;;  %p1239_p6 = scmp.lt.s32.totalorder %s12364_s20, 3 }
 0x213   : > { %p1240_p7 = pnand %p8849_p5, %p1239_p6 }
 0x215   : > { %1243 = sbr.rel (%p1240_p7) target bundleno = 3001 (0xbb9), region = 62 }
 0x21a   : > { %v12117_v0 = vld [vmem:[%s16364_s1 + $0x38] sm:$0xff]  ;;  %v12116_v3 = vld [vmem:[%s16364_s1 + $0x30] sm:$0xff]  ;;  %v12115_v6 = vld [vmem:[%s16364_s1 + $0x28] sm:$0xff]  ;;  %s1246_s24 = sand.u32 1, %s12356_s18   ;;  %vm4433_vm0 = vcmask 261120   ;;  %s8850_s17 = sshll.u32 %s8586_s21, 1 }
 0x21b   : > { %v13466_v1 = vld [vmem:[%s16364_s1 + $0x78] sm:$0xff]  ;;  %4626 = vmatpush.bf16.msra.mxu0 %v12117_v0  ;;  %12288 = vmatpush.bf16.msra.mxu3 %v12117_v0  ;;  %v13481_v4 = vld [vmem:[%s16364_s1 + $0x70] sm:$0xff]  ;;  %v12123_v7 = vld [vmem:[%s16364_s1 + $0x68] sm:$0xff]  ;;  %s12314_s28 = smul.u32 3584, %s1246_s24  ;;  %p1275_p8 = scmp.lt.s32.totalorder %s8850_s17, 3 }
 0x21c   : > { %v13471_v2 = vld [vmem:[%s16364_s1 + $0xb8] sm:$0xff]  ;;  %4955 = vmatpush.bf16.msra.mxu1 %v13466_v1  ;;  %v13486_v5 = vld [vmem:[%s16364_s1 + $0xb0] sm:$0xff]  ;;  %v13499_v8 = vld [vmem:[%s16364_s1 + $0xa8] sm:$0xff] }
 0x21d   : > { %5284 = vmatpush.bf16.msra.mxu2 %v13471_v2  ;;  %v12114_v9 = vld [vmem:[%s16364_s1 + $0x20] sm:$0xff]  ;;  %v12113_v12 = vld [vmem:[%s16364_s1 + $0x18] sm:$0xff]  ;;  %v12112_v15 = vld [vmem:[%s16364_s1 + $0x10] sm:$0xff]  ;;  %s13564_s24 = scalar_lea.vmem [#allocation2], %s12314_s28  ;;  %s16905_s17 = smov (!%p1275_p8, %s8850_s17), 3 }
 0x21e   : > { %v13507_v10 = vld [vmem:[%s16364_s1 + $0x60] sm:$0xff]  ;;  %v12121_v13 = vld [vmem:[%s16364_s1 + $0x58] sm:$0xff]  ;;  %v12120_v16 = vld [vmem:[%s16364_s1 + $0x50] sm:$0xff]  ;;  %s8851_s23 = sshll.u32 %s16905_s17, 3 }
 0x21f   : > { %4627 = vmatpush.bf16.msra.mxu0 %v12116_v3  ;;  %12289 = vmatpush.bf16.msra.mxu3 %v12116_v3  ;;  %v13513_v11 = vld [vmem:[%s16364_s1 + $0xa0] sm:$0xff]  ;;  %v13526_v14 = vld [vmem:[%s16364_s1 + $0x98] sm:$0xff]  ;;  %v13539_v17 = vld [vmem:[%s16364_s1 + $0x90] sm:$0xff]  ;;  %s1278_s20 = scalar_lea.vmem %s16368_s5, %s8851_s23 }
 0x220   : > { %4956 = vmatpush.bf16.msra.mxu1 %v13481_v4  ;;  %v12111_v18 = vld [vmem:[%s16364_s1 + $0x8] sm:$0xff]  ;;  %v12110_v21 = vld [vmem:[%s16364_s1] sm:$0xff]  ;;  %v11665_v25 = vld [vmem:[%s13564_s24 + $0x18] sm:$0xf0] }
 0x221   : > { %5285 = vmatpush.bf16.msra.mxu2 %v13486_v5  ;;  %v12119_v19 = vld [vmem:[%s16364_s1 + $0x48] sm:$0xff]  ;;  %v12118_v22 = vld [vmem:[%s16364_s1 + $0x40] sm:$0xff]  ;;  %v12057_v27 = vld [vmem:[%s13564_s24 + $0xc58] sm:$0xf0] }
 0x222   : > { %v13551_v20 = vld [vmem:[%s16364_s1 + $0x88] sm:$0xff]  ;;  %v13562_v23 = vld [vmem:[%s16364_s1 + $0x80] sm:$0xff]  ;;  %v8882_v36 = vld [vmem:[%s13564_s24 + $0x38] sm:$0xf] }
 0x223   : > { %4628 = vmatpush.bf16.msra.mxu0 %v12115_v6  ;;  %12290 = vmatpush.bf16.msra.mxu3 %v12115_v6  ;;  %v8854_v24 = vld [vmem:[%s13564_s24] sm:$0xf]  ;;  %v11662_v28 = vld [vmem:[%s13564_s24 + $0x4] sm:$0xf]  ;;  %v8862_v30 = vld [vmem:[%s13564_s24 + $0x8] sm:$0xf] }
 0x224   : > { %4957 = vmatpush.bf16.msra.mxu1 %v12123_v7  ;;  %v10422_v26 = vld [vmem:[%s13564_s24 + $0xc40] sm:$0xf]  ;;  %v11666_v31 = vld [vmem:[%s13564_s24 + $0x20] sm:$0xf0]  ;;  %v8855_v32 = vor.u32 %v11665_v25, %v8854_v24  ;;  %v11672_v37 = vld [vmem:[%s13564_s24 + $0x50] sm:$0xf0] }
 0x225   : > { %5286 = vmatpush.bf16.msra.mxu2 %v13499_v8  ;;  %v8856_v29 = vld [vmem:[%s13564_s24 + $0x1c] sm:$0xf0]  ;;  %v10423_v33 = vor.u32 %v12057_v27, %v10422_v26  ;;  %v8863_v35 = vor.u32 %v11666_v31, %v8862_v30  ;;  %v10450_v38 = vld [vmem:[%s13564_s24 + $0xc78] sm:$0xf]  ;;  %v12064_v39 = vld [vmem:[%s13564_s24 + $0xc90] sm:$0xf0]  ;;  %v8883_v44 = vor.u32 %v11672_v37, %v8882_v36 }
 0x226   : > { %v8859_v34 = vor.u32 %v11662_v28, %v8856_v29  ;;  %v11669_v40 = vld [vmem:[%s13564_s24 + $0x3c] sm:$0xf]  ;;  %v8884_v41 = vld [vmem:[%s13564_s24 + $0x54] sm:$0xf0]  ;;  %v8890_v42 = vld [vmem:[%s13564_s24 + $0x40] sm:$0xf]  ;;  %v10451_v45 = vor.u32 %v12064_v39, %v10450_v38 }
 0x227   : > { %4629 = vmatpush.bf16.msra.mxu0 %v12114_v9  ;;  %12291 = vmatpush.bf16.msra.mxu3 %v12114_v9  ;;  %v11673_v43 = vld [vmem:[%s13564_s24 + $0x58] sm:$0xf0]  ;;  %v8887_v46 = vor.u32 %v11669_v40, %v8884_v41  ;;  %v8910_v48 = vld [vmem:[%s13564_s24 + $0x70] sm:$0xf]  ;;  %v11679_v49 = vld [vmem:[%s13564_s24 + $0x88] sm:$0xf0] }
 0x228   : > { %4958 = vmatpush.bf16.msra.mxu1 %v13507_v10  ;;  %v8891_v47 = vor.u32 %v11673_v43, %v8890_v42  ;;  %v10478_v50 = vld [vmem:[%s13564_s24 + $0xcb0] sm:$0xf]  ;;  %v12071_v51 = vld [vmem:[%s13564_s24 + $0xcc8] sm:$0xf0]  ;;  %v11676_v52 = vld [vmem:[%s13564_s24 + $0x74] sm:$0xf]  ;;  %v8911_v56 = vor.u32 %v11679_v49, %v8910_v48 }
 0x229   : > { %5287 = vmatpush.bf16.msra.mxu2 %v13513_v11  ;;  %v8912_v53 = vld [vmem:[%s13564_s24 + $0x8c] sm:$0xf0]  ;;  %v8918_v54 = vld [vmem:[%s13564_s24 + $0x78] sm:$0xf]  ;;  %v11680_v55 = vld [vmem:[%s13564_s24 + $0x90] sm:$0xf0]  ;;  %v10479_v57 = vor.u32 %v12071_v51, %v10478_v50 }
 0x22a   : > { %v8915_v58 = vor.u32 %v11676_v52, %v8912_v53  ;;  %v8919_v59 = vor.u32 %v11680_v55, %v8918_v54  ;;  %v8938_v60 = vld [vmem:[%s13564_s24 + $0xa8] sm:$0xf]  ;;  %v11686_v61 = vld [vmem:[%s13564_s24 + $0xc0] sm:$0xf0]  ;;  %v11683_v0 = vld [vmem:[%s13564_s24 + $0xac] sm:$0xf] }
 0x22b   : > { %4630 = vmatpush.bf16.msra.mxu0 %v12113_v12  ;;  %12292 = vmatpush.bf16.msra.mxu3 %v12113_v12  ;;  %v10506_v62 = vld [vmem:[%s13564_s24 + $0xce8] sm:$0xf]  ;;  %v12078_v63 = vld [vmem:[%s13564_s24 + $0xd00] sm:$0xf0]  ;;  %v11687_v3 = vld [vmem:[%s13564_s24 + $0xc8] sm:$0xf0] }
 0x22c   : > { %4959 = vmatpush.bf16.msra.mxu1 %v12121_v13  ;;  %v11693_v9 = vld [vmem:[%s13564_s24 + $0xf8] sm:$0xf0]  ;;  %v11690_v12 = vld [vmem:[%s13564_s24 + $0xe4] sm:$0xf]  ;;  %v12092_v24 = vld [vmem:[%s13564_s24 + $0xd70] sm:$0xf0] }
 0x22d   : > { %5288 = vmatpush.bf16.msra.mxu2 %v13526_v14  ;;  %v11697_v25 = vld [vmem:[%s13564_s24 + $0x11c] sm:$0xf]  ;;  %v9002_v26 = vld [vmem:[%s13564_s24 + $0x120] sm:$0xf]  ;;  %v11704_v36 = vld [vmem:[%s13564_s24 + $0x154] sm:$0xf] }
 0x22e   : > { %v11701_v27 = vld [vmem:[%s13564_s24 + $0x138] sm:$0xf0]  ;;  %v9024_v37 = vld [vmem:[%s13564_s24 + $0x16c] sm:$0xf0]  ;;  %v9030_v38 = vld [vmem:[%s13564_s24 + $0x158] sm:$0xf] }
 0x22f   : > { %4631 = vmatpush.bf16.msra.mxu0 %v12112_v15  ;;  %12293 = vmatpush.bf16.msra.mxu3 %v12112_v15  ;;  %v11694_v15 = vld [vmem:[%s13564_s24 + $0x100] sm:$0xf0]  ;;  %v9003_v31 = vor.u32 %v11701_v27, %v9002_v26  ;;  %v11708_v39 = vld [vmem:[%s13564_s24 + $0x170] sm:$0xf0]  ;;  %v9027_v42 = vor.u32 %v11704_v36, %v9024_v37  ;;  %v11711_v48 = vld [vmem:[%s13564_s24 + $0x18c] sm:$0xf] }
 0x230   : > { %4960 = vmatpush.bf16.msra.mxu1 %v12120_v16  ;;  %v9031_v43 = vor.u32 %v11708_v39, %v9030_v38  ;;  %v9052_v49 = vld [vmem:[%s13564_s24 + $0x1a4] sm:$0xf0]  ;;  %v9058_v50 = vld [vmem:[%s13564_s24 + $0x190] sm:$0xf]  ;;  %v11715_v51 = vld [vmem:[%s13564_s24 + $0x1a8] sm:$0xf0] }
 0x231   : > { %5289 = vmatpush.bf16.msra.mxu2 %v13539_v17  ;;  %v9055_v54 = vor.u32 %v11711_v48, %v9052_v49  ;;  %v9059_v55 = vor.u32 %v11715_v51, %v9058_v50 }
 0x233   : > { %4632 = vmatpush.bf16.msra.mxu0 %v12111_v18  ;;  %12294 = vmatpush.bf16.msra.mxu3 %v12111_v18 }
 0x234   : > { %4961 = vmatpush.bf16.msra.mxu1 %v12119_v19 }
 0x235   : > { %5290 = vmatpush.bf16.msra.mxu2 %v13551_v20 }
 0x237   : > { %4633 = vmatpush.bf16.msra.mxu0 %v12110_v21  ;;  %12295 = vmatpush.bf16.msra.mxu3 %v12110_v21  ;;  %v11700_v21 = vld [vmem:[%s13564_s24 + $0x130] sm:$0xf0] }
 0x238   : > { %4962 = vmatpush.bf16.msra.mxu1 %v12118_v22 }
 0x239   : > { %5291 = vmatpush.bf16.msra.mxu2 %v13562_v23 }
 0x23a   : > { %4634 = vmatmul.bf16.vlgmr.msra.gmra.mxu0 %v8855_v32  ;;  %4914 = vmatmul.bf16.vlgmr.msra.gmra.mxu3 %v10423_v33  ;;  %v9022_v32 = vld [vmem:[%s13564_s24 + $0x150] sm:$0xf]  ;;  %v11707_v33 = vld [vmem:[%s13564_s24 + $0x168] sm:$0xf0] }
 0x23b   : > { %12296 = vmatpush.bf16.msrb.mxu3 %v13466_v1  ;;  %4963 = vmatmul.bf16.vlgmr.msra.gmra.mxu1 %v8859_v34  ;;  %v8940_v1 = vld [vmem:[%s13564_s24 + $0xc4] sm:$0xf0]  ;;  %v10590_v34 = vld [vmem:[%s13564_s24 + $0xd90] sm:$0xf]  ;;  %v9023_v40 = vor.u32 %v11707_v33, %v9022_v32 }
 0x23c   : > { %5292 = vmatmul.bf16.vlgmr.msra.gmra.mxu2 %v8863_v35  ;;  %v8943_v6 = vor.u32 %v11683_v0, %v8940_v1  ;;  %v12099_v35 = vld [vmem:[%s13564_s24 + $0xda8] sm:$0xf0] }
 0x23d   : > { %v10591_v41 = vor.u32 %v12099_v35, %v10590_v34 }
 0x23f   : > { %12297 = vmatpush.bf16.msrb.mxu3 %v13481_v4  ;;  %v8939_v4 = vor.u32 %v11686_v61, %v8938_v60  ;;  %v10424_v60 = vld [vmem:[%s13564_s24 + $0xc5c] sm:$0xf0] }
 0x240   : > { %v9080_v61 = vld [vmem:[%s13564_s24 + $0x1dc] sm:$0xf0] }
 0x243   : > { %12298 = vmatpush.bf16.msrb.mxu3 %v12123_v7 }
 0x247   : > { %12299 = vmatpush.bf16.msrb.mxu3 %v13507_v10  ;;  %v10534_v10 = vld [vmem:[%s13564_s24 + $0xd20] sm:$0xf] }
 0x24a   : > { %4639 = vmatmul.bf16.gmra.mxu0 %v8883_v44  ;;  %4919 = vmatmul.bf16.gmra.mxu3 %v10451_v45  ;;  %v9050_v44 = vld [vmem:[%s13564_s24 + $0x188] sm:$0xf]  ;;  %v11714_v45 = vld [vmem:[%s13564_s24 + $0x1a0] sm:$0xf0] }
 0x24b   : > { %12300 = vmatpush.bf16.msrb.mxu3 %v12121_v13  ;;  %4968 = vmatmul.bf16.gmra.mxu1 %v8887_v46  ;;  %v8968_v13 = vld [vmem:[%s13564_s24 + $0xfc] sm:$0xf0]  ;;  %v10618_v46 = vld [vmem:[%s13564_s24 + $0xdc8] sm:$0xf]  ;;  %v9051_v52 = vor.u32 %v11714_v45, %v9050_v44  ;;  %v10480_v44 = vld [vmem:[%s13564_s24 + $0xccc] sm:$0xf0] }
 0x24c   : > { %5297 = vmatmul.bf16.gmra.mxu2 %v8891_v47  ;;  %v8971_v18 = vor.u32 %v11690_v12, %v8968_v13  ;;  %v12106_v47 = vld [vmem:[%s13564_s24 + $0xde0] sm:$0xf0]  ;;  %v12159_v13 = vld [vmem:[%s16364_s1 + $0x188] sm:$0xff]  ;;  %v9136_v45 = vld [vmem:[%s13564_s24 + $0x24c] sm:$0xf0] }
 0x24d   : > { %v10619_v53 = vor.u32 %v12106_v47, %v10618_v46  ;;  %6606 = vmatpush.bf16.msrb.mxu2 %v12159_v13  ;;  %v9142_v46 = vld [vmem:[%s13564_s24 + $0x238] sm:$0xf]  ;;  %v11736_v47 = vld [vmem:[%s13564_s24 + $0x250] sm:$0xf0] }
 0x24f   : > { %12301 = vmatpush.bf16.msrb.mxu3 %v12120_v16 }
 0x253   : > { %12302 = vmatpush.bf16.msrb.mxu3 %v12119_v19 }
 0x257   : > { %12303 = vmatpush.bf16.msrb.mxu3 %v12118_v22  ;;  %v10562_v22 = vld [vmem:[%s13564_s24 + $0xd58] sm:$0xf] }
 0x258   : > { %v10563_v29 = vor.u32 %v12092_v24, %v10562_v22  ;;  %v11729_v22 = vld [vmem:[%s13564_s24 + $0x218] sm:$0xf0] }
 0x25a   : > { %4644 = vmatmul.bf16.gmra.mxu0 %v8911_v56  ;;  %4924 = vmatmul.bf16.gmra.mxu3 %v10479_v57  ;;  %v9078_v56 = vld [vmem:[%s13564_s24 + $0x1c0] sm:$0xf]  ;;  %v11721_v57 = vld [vmem:[%s13564_s24 + $0x1d8] sm:$0xf0] }
 0x25b   : > { %12304 = vmatpush.bf16.msra.mxu3 %v13471_v2  ;;  %4973 = vmatmul.bf16.gmra.mxu1 %v8915_v58  ;;  %v8946_v2 = vld [vmem:[%s13564_s24 + $0xb0] sm:$0xf]  ;;  %v11718_v58 = vld [vmem:[%s13564_s24 + $0x1c4] sm:$0xf]  ;;  %v9079_v0 = vor.u32 %v11721_v57, %v9078_v56 }
 0x25c   : > { %5302 = vmatmul.bf16.gmra.mxu2 %v8919_v59  ;;  %v8947_v7 = vor.u32 %v11687_v3, %v8946_v2  ;;  %v12054_v59 = vld [vmem:[%s13564_s24 + $0xc44] sm:$0xf]  ;;  %v9083_v3 = vor.u32 %v11718_v58, %v9080_v61 }
 0x25d   : > { %v10427_v1 = vor.u32 %v12054_v59, %v10424_v60 }
 0x25f   : > { %12305 = vmatpush.bf16.msra.mxu3 %v13486_v5  ;;  %v10507_v5 = vor.u32 %v12078_v63, %v10506_v62  ;;  %v9086_v62 = vld [vmem:[%s13564_s24 + $0x1c8] sm:$0xf]  ;;  %v11722_v63 = vld [vmem:[%s13564_s24 + $0x1e0] sm:$0xf0] }
 0x263   : > { %12306 = vmatpush.bf16.msra.mxu3 %v13499_v8  ;;  %v8966_v8 = vld [vmem:[%s13564_s24 + $0xe0] sm:$0xf] }
 0x264   : > { %v8967_v16 = vor.u32 %v11693_v9, %v8966_v8 }
 0x267   : > { %12307 = vmatpush.bf16.msra.mxu3 %v13513_v11  ;;  %v12085_v11 = vld [vmem:[%s13564_s24 + $0xd38] sm:$0xf0] }
 0x26a   : > { %4649 = vmatmul.bf16.gmra.mxu0 %v8939_v4  ;;  %4929 = vmatmul.bf16.gmra.mxu3 %v10507_v5  ;;  %v9087_v4 = vor.u32 %v11722_v63, %v9086_v62 }
 0x26b   : > { %12308 = vmatpush.bf16.msra.mxu3 %v13526_v14  ;;  %4978 = vmatmul.bf16.gmra.mxu1 %v8943_v6  ;;  %v8974_v14 = vld [vmem:[%s13564_s24 + $0xe8] sm:$0xf] }
 0x26c   : > { %5307 = vmatmul.bf16.gmra.mxu2 %v8947_v7  ;;  %v8975_v19 = vor.u32 %v11694_v15, %v8974_v14  ;;  %v12149_v14 = vld [vmem:[%s16364_s1 + $0x138] sm:$0xff] }
 0x26d   : > { %v9106_v15 = vld [vmem:[%s13564_s24 + $0x1f8] sm:$0xf]  ;;  %5942 = vmatpush.bf16.msrb.mxu0 %v12149_v14 }
 0x26f   : > { %12309 = vmatpush.bf16.msra.mxu3 %v13539_v17  ;;  %v10535_v17 = vor.u32 %v12085_v11, %v10534_v10 }
 0x273   : > { %12310 = vmatpush.bf16.msra.mxu3 %v13551_v20  ;;  %v8994_v20 = vld [vmem:[%s13564_s24 + $0x118] sm:$0xf] }
 0x274   : > { %v8995_v28 = vor.u32 %v11700_v21, %v8994_v20  ;;  %v9108_v20 = vld [vmem:[%s13564_s24 + $0x214] sm:$0xf0]  ;;  %v9114_v21 = vld [vmem:[%s13564_s24 + $0x200] sm:$0xf] }
 0x277   : > { %12311 = vmatpush.bf16.msra.mxu3 %v13562_v23  ;;  %v8996_v23 = vld [vmem:[%s13564_s24 + $0x134] sm:$0xf0] }
 0x278   : > { %v8999_v30 = vor.u32 %v11697_v25, %v8996_v23 }
 0x27a   : > { %4654 = vmatmul.bf16.gmra.mxu0 %v8967_v16  ;;  %4934 = vmatmul.bf16.gmra.mxu3 %v10535_v17  ;;  %v11728_v16 = vld [vmem:[%s13564_s24 + $0x210] sm:$0xf0]  ;;  %v11725_v17 = vld [vmem:[%s13564_s24 + $0x1fc] sm:$0xf] }
 0x27b   : > { %4983 = vmatmul.bf16.gmra.mxu1 %v8971_v18  ;;  %v12061_v18 = vld [vmem:[%s13564_s24 + $0xc7c] sm:$0xf]  ;;  %v9107_v23 = vor.u32 %v11728_v16, %v9106_v15 }
 0x27c   : > { %5312 = vmatmul.bf16.gmra.mxu2 %v8975_v19  ;;  %v10452_v19 = vld [vmem:[%s13564_s24 + $0xc94] sm:$0xf0] }
 0x27d   : > { %v10455_v26 = vor.u32 %v12061_v18, %v10452_v19 }
 0x28a   : > { %4659 = vmatmul.bf16.gmra.mxu0 %v8995_v28  ;;  %4939 = vmatmul.bf16.gmra.mxu3 %v10563_v29  ;;  %v9111_v29 = vor.u32 %v11725_v17, %v9108_v20 }
 0x28b   : > { %4988 = vmatmul.bf16.gmra.mxu1 %v8999_v30  ;;  %v9115_v30 = vor.u32 %v11729_v22, %v9114_v21 }
 0x28c   : > { %5317 = vmatmul.bf16.gmra.mxu2 %v9003_v31  ;;  %v12157_v31 = vld [vmem:[%s16364_s1 + $0x178] sm:$0xff] }
 0x28d   : > { %6271 = vmatpush.bf16.msrb.mxu1 %v12157_v31  ;;  %v12082_v31 = vld [vmem:[%s13564_s24 + $0xd24] sm:$0xf] }
 0x29a   : > { %4664 = vmatmul.bf16.gmra.mxu0 %v9023_v40  ;;  %4944 = vmatmul.bf16.gmra.mxu3 %v10591_v41  ;;  %v9134_v40 = vld [vmem:[%s13564_s24 + $0x230] sm:$0xf]  ;;  %v11735_v41 = vld [vmem:[%s13564_s24 + $0x248] sm:$0xf0] }
 0x29b   : > { %4993 = vmatmul.bf16.gmra.mxu1 %v9027_v42  ;;  %v11732_v42 = vld [vmem:[%s13564_s24 + $0x234] sm:$0xf]  ;;  %v9135_v50 = vor.u32 %v11735_v41, %v9134_v40 }
 0x29c   : > { %5322 = vmatmul.bf16.gmra.mxu2 %v9031_v43  ;;  %v12068_v43 = vld [vmem:[%s13564_s24 + $0xcb4] sm:$0xf] }
 0x29d   : > { %v10483_v51 = vor.u32 %v12068_v43, %v10480_v44 }
 0x2aa   : > { %4669 = vmatmul.bf16.gmra.mxu0 %v9051_v52  ;;  %4949 = vmatmul.bf16.gmra.mxu3 %v10619_v53 }
 0x2ab   : > { %4998 = vmatmul.bf16.gmra.mxu1 %v9055_v54  ;;  %v9139_v54 = vor.u32 %v11732_v42, %v9136_v45 }
 0x2ac   : > { %5327 = vmatmul.bf16.gmra.mxu2 %v9059_v55  ;;  %v9143_v55 = vor.u32 %v11736_v47, %v9142_v46 }
 0x2b7   : > { %v4635_v2 = vpop.f32.mrf.mxu0 }
 0x2b8   : > { %v4964_v5 = vpop.f32.mrf.mxu1 }
 0x2b9   : > { %v4965_v6 = vadd.f32 %v4964_v5, %v4635_v2  ;;  %v11739_v2 = vld [vmem:[%s13564_s24 + $0x26c] sm:$0xf]  ;;  %v9164_v5 = vld [vmem:[%s13564_s24 + $0x284] sm:$0xf0] }
 0x2ba   : > { %4674 = vmatmul.bf16.gmra.mxu0 %v9079_v0  ;;  %5243 = vmatmul.bf16.vlgmr.msrb.gmra.mxu3 %v10427_v1  ;;  %v9162_v0 = vld [vmem:[%s13564_s24 + $0x268] sm:$0xf]  ;;  %v11742_v1 = vld [vmem:[%s13564_s24 + $0x280] sm:$0xf0]  ;;  %v9167_v16 = vor.u32 %v11739_v2, %v9164_v5 }
 0x2bb   : > { %5003 = vmatmul.bf16.gmra.mxu1 %v9083_v3  ;;  %v12075_v3 = vld [vmem:[%s13564_s24 + $0xcec] sm:$0xf] }
 0x2bc   : > { %5332 = vmatmul.bf16.gmra.mxu2 %v9087_v4  ;;  %v10508_v4 = vld [vmem:[%s13564_s24 + $0xd04] sm:$0xf0] }
 0x2bd   : > { %v13651_v7 = vpop.f32.mrf.mxu3  ;;  %v10511_v13 = vor.u32 %v12075_v3, %v10508_v4 }
 0x2bf   : > { %v5293_v8 = vpop.f32.mrf.mxu2  ;;  %v4637_v10 = vpop.f32.mrf.mxu0 }
 0x2c0   : > { %v13653_v9 = vadd.f32 %v5293_v8, %v4965_v6  ;;  %v4966_v11 = vpop.f32.mrf.mxu1  ;;  %v9170_v6 = vld [vmem:[%s13564_s24 + $0x270] sm:$0xf]  ;;  %v11743_v8 = vld [vmem:[%s13564_s24 + $0x288] sm:$0xf0] }
 0x2c1   : > { %v4967_v12 = vadd.f32 %v4966_v11, %v4637_v10  ;;  %v9171_v17 = vor.u32 %v11743_v8, %v9170_v6 }
 0x2c5   : > { %v13669_v24 = vpop.f32.mrf.mxu3 }
 0x2c7   : > { %v5295_v25 = vpop.f32.mrf.mxu2  ;;  %v4640_v28 = vpop.f32.mrf.mxu0 }
 0x2c8   : > { %v13671_v27 = vadd.f32 %v5295_v25, %v4967_v12  ;;  %v4969_v32 = vpop.f32.mrf.mxu1  ;;  %v9163_v12 = vor.u32 %v11742_v1, %v9162_v0  ;;  %v9226_v0 = vld [vmem:[%s13564_s24 + $0x2e0] sm:$0xf]  ;;  %v11757_v1 = vld [vmem:[%s13564_s24 + $0x2f8] sm:$0xf0] }
 0x2c9   : > { %v4970_v33 = vadd.f32 %v4969_v32, %v4640_v28  ;;  %v9190_v28 = vld [vmem:[%s13564_s24 + $0x2a0] sm:$0xf] }
 0x2ca   : > { %4679 = vmatmul.bf16.gmra.mxu0 %v9107_v23  ;;  %5248 = vmatmul.bf16.gmra.mxu3 %v10455_v26  ;;  %v10536_v32 = vld [vmem:[%s13564_s24 + $0xd3c] sm:$0xf0] }
 0x2cb   : > { %5008 = vmatmul.bf16.gmra.mxu1 %v9111_v29  ;;  %v11749_v29 = vld [vmem:[%s13564_s24 + $0x2b8] sm:$0xf0]  ;;  %v10539_v41 = vor.u32 %v12082_v31, %v10536_v32  ;;  %v9248_v31 = vld [vmem:[%s13564_s24 + $0x32c] sm:$0xf0]  ;;  %v9254_v32 = vld [vmem:[%s13564_s24 + $0x318] sm:$0xf] }
 0x2cc   : > { %5337 = vmatmul.bf16.gmra.mxu2 %v9115_v30  ;;  %v11746_v30 = vld [vmem:[%s13564_s24 + $0x2a4] sm:$0xf]  ;;  %v9191_v40 = vor.u32 %v11749_v29, %v9190_v28  ;;  %v11760_v28 = vld [vmem:[%s13564_s24 + $0x314] sm:$0xf] }
 0x2cd   : > { %v13676_v34 = vpop.f32.mrf.mxu3  ;;  %v12096_v29 = vld [vmem:[%s13564_s24 + $0xd94] sm:$0xf] }
 0x2cf   : > { %v5298_v35 = vpop.f32.mrf.mxu2  ;;  %v4642_v37 = vpop.f32.mrf.mxu0 }
 0x2d0   : > { %v13678_v36 = vadd.f32 %v5298_v35, %v4970_v33  ;;  %v4971_v38 = vpop.f32.mrf.mxu1  ;;  %v9192_v33 = vld [vmem:[%s13564_s24 + $0x2bc] sm:$0xf0]  ;;  %v9198_v35 = vld [vmem:[%s13564_s24 + $0x2a8] sm:$0xf] }
 0x2d1   : > { %v4972_v39 = vadd.f32 %v4971_v38, %v4642_v37  ;;  %v11750_v37 = vld [vmem:[%s13564_s24 + $0x2c0] sm:$0xf0]  ;;  %v9195_v44 = vor.u32 %v11746_v30, %v9192_v33  ;;  %v10592_v30 = vld [vmem:[%s13564_s24 + $0xdac] sm:$0xf0]  ;;  %v11764_v33 = vld [vmem:[%s13564_s24 + $0x330] sm:$0xf0] }
 0x2d2   : > { %v9199_v45 = vor.u32 %v11750_v37, %v9198_v35 }
 0x2d5   : > { %v13688_v48 = vpop.f32.mrf.mxu3 }
 0x2d7   : > { %v5300_v49 = vpop.f32.mrf.mxu2  ;;  %v4645_v53 = vpop.f32.mrf.mxu0 }
 0x2d8   : > { %v13690_v52 = vadd.f32 %v5300_v49, %v4972_v39  ;;  %v4974_v56 = vpop.f32.mrf.mxu1 }
 0x2d9   : > { %v4975_v57 = vadd.f32 %v4974_v56, %v4645_v53  ;;  %v9218_v56 = vld [vmem:[%s13564_s24 + $0x2d8] sm:$0xf] }
 0x2da   : > { %4684 = vmatmul.bf16.gmra.mxu0 %v9135_v50  ;;  %5253 = vmatmul.bf16.gmra.mxu3 %v10483_v51 }
 0x2db   : > { %5013 = vmatmul.bf16.gmra.mxu1 %v9139_v54 }
 0x2dc   : > { %5342 = vmatmul.bf16.gmra.mxu2 %v9143_v55 }
 0x2dd   : > { %v13692_v58 = vpop.f32.mrf.mxu3 }
 0x2df   : > { %v5303_v59 = vpop.f32.mrf.mxu2  ;;  %v4647_v61 = vpop.f32.mrf.mxu0 }
 0x2e0   : > { %v13694_v60 = vadd.f32 %v5303_v59, %v4975_v57  ;;  %v4976_v62 = vpop.f32.mrf.mxu1  ;;  %v11756_v57 = vld [vmem:[%s13564_s24 + $0x2f0] sm:$0xf0]  ;;  %v11753_v59 = vld [vmem:[%s13564_s24 + $0x2dc] sm:$0xf] }
 0x2e1   : > { %v4977_v63 = vadd.f32 %v4976_v62, %v4647_v61  ;;  %v12089_v61 = vld [vmem:[%s13564_s24 + $0xd5c] sm:$0xf]  ;;  %v10564_v62 = vld [vmem:[%s13564_s24 + $0xd74] sm:$0xf0]  ;;  %v9219_v4 = vor.u32 %v11756_v57, %v9218_v56 }
 0x2e2   : > { %v10567_v5 = vor.u32 %v12089_v61, %v10564_v62  ;;  %v11770_v61 = vld [vmem:[%s13564_s24 + $0x360] sm:$0xf0]  ;;  %v11767_v62 = vld [vmem:[%s13564_s24 + $0x34c] sm:$0xf] }
 0x2e5   : > { %v13704_v10 = vpop.f32.mrf.mxu3 }
 0x2e7   : > { %v5305_v11 = vpop.f32.mrf.mxu2  ;;  %v4650_v15 = vpop.f32.mrf.mxu0 }
 0x2e8   : > { %v13706_v14 = vadd.f32 %v5305_v11, %v4977_v63  ;;  %v4979_v18 = vpop.f32.mrf.mxu1  ;;  %v9220_v63 = vld [vmem:[%s13564_s24 + $0x2f4] sm:$0xf0] }
 0x2e9   : > { %v4980_v19 = vadd.f32 %v4979_v18, %v4650_v15  ;;  %v9223_v11 = vor.u32 %v11753_v59, %v9220_v63  ;;  %v9274_v59 = vld [vmem:[%s13564_s24 + $0x348] sm:$0xf]  ;;  %v12103_v63 = vld [vmem:[%s13564_s24 + $0xdcc] sm:$0xf] }
 0x2ea   : > { %4689 = vmatmul.bf16.gmra.mxu0 %v9163_v12  ;;  %5258 = vmatmul.bf16.gmra.mxu3 %v10511_v13  ;;  %v9227_v12 = vor.u32 %v11757_v1, %v9226_v0  ;;  %v10620_v0 = vld [vmem:[%s13564_s24 + $0xde4] sm:$0xf0] }
 0x2eb   : > { %5018 = vmatmul.bf16.gmra.mxu1 %v9167_v16  ;;  %v9276_v1 = vld [vmem:[%s13564_s24 + $0x364] sm:$0xf0] }
 0x2ec   : > { %5347 = vmatmul.bf16.gmra.mxu2 %v9171_v17 }
 0x2ed   : > { %v13708_v20 = vpop.f32.mrf.mxu3 }
 0x2ef   : > { %v5308_v21 = vpop.f32.mrf.mxu2  ;;  %v4652_v25 = vpop.f32.mrf.mxu0 }
 0x2f0   : > { %v13710_v22 = vadd.f32 %v5308_v21, %v4980_v19  ;;  %v4981_v23 = vpop.f32.mrf.mxu1 }
 0x2f1   : > { %v4982_v26 = vadd.f32 %v4981_v23, %v4652_v25  ;;  %v9246_v23 = vld [vmem:[%s13564_s24 + $0x310] sm:$0xf] }
 0x2f5   : > { %v13720_v38 = vpop.f32.mrf.mxu3 }
 0x2f7   : > { %v5310_v39 = vpop.f32.mrf.mxu2  ;;  %v4655_v43 = vpop.f32.mrf.mxu0 }
 0x2f8   : > { %v13722_v42 = vadd.f32 %v5310_v39, %v4982_v26  ;;  %v4984_v46 = vpop.f32.mrf.mxu1  ;;  %v11763_v26 = vld [vmem:[%s13564_s24 + $0x328] sm:$0xf0] }
 0x2f9   : > { %v4985_v47 = vadd.f32 %v4984_v46, %v4655_v43  ;;  %v9247_v39 = vor.u32 %v11763_v26, %v9246_v23 }
 0x2fa   : > { %4694 = vmatmul.bf16.gmra.mxu0 %v9191_v40  ;;  %5263 = vmatmul.bf16.gmra.mxu3 %v10539_v41  ;;  %v10595_v40 = vor.u32 %v12096_v29, %v10592_v30 }
 0x2fb   : > { %5023 = vmatmul.bf16.gmra.mxu1 %v9195_v44  ;;  %v9251_v44 = vor.u32 %v11760_v28, %v9248_v31 }
 0x2fc   : > { %5352 = vmatmul.bf16.gmra.mxu2 %v9199_v45  ;;  %v9255_v45 = vor.u32 %v11764_v33, %v9254_v32  ;;  %v12148_v32 = vld [vmem:[%s16364_s1 + $0x130] sm:$0xff]  ;;  %v9302_v33 = vld [vmem:[%s13564_s24 + $0x380] sm:$0xf] }
 0x2fd   : > { %v13724_v49 = vpop.f32.mrf.mxu3  ;;  %5943 = vmatpush.bf16.msrb.mxu0 %v12148_v32 }
 0x2ff   : > { %v5313_v50 = vpop.f32.mrf.mxu2  ;;  %v4657_v53 = vpop.f32.mrf.mxu0 }
 0x300   : > { %v13726_v51 = vadd.f32 %v5313_v50, %v4985_v47  ;;  %v4986_v54 = vpop.f32.mrf.mxu1 }
 0x301   : > { %v4987_v55 = vadd.f32 %v4986_v54, %v4657_v53 }
 0x305   : > { %v13736_v2 = vpop.f32.mrf.mxu3 }
 0x307   : > { %v5315_v3 = vpop.f32.mrf.mxu2  ;;  %v4660_v8 = vpop.f32.mrf.mxu0 }
 0x308   : > { %v13738_v6 = vadd.f32 %v5315_v3, %v4987_v55  ;;  %v4989_v13 = vpop.f32.mrf.mxu1  ;;  %v9282_v3 = vld [vmem:[%s13564_s24 + $0x350] sm:$0xf] }
 0x309   : > { %v4990_v15 = vadd.f32 %v4989_v13, %v4660_v8 }
 0x30a   : > { %4699 = vmatmul.bf16.gmra.mxu0 %v9219_v4  ;;  %5268 = vmatmul.bf16.gmra.mxu3 %v10567_v5  ;;  %v11771_v4 = vld [vmem:[%s13564_s24 + $0x368] sm:$0xf0] }
 0x30b   : > { %5028 = vmatmul.bf16.gmra.mxu1 %v9223_v11  ;;  %v9275_v11 = vor.u32 %v11770_v61, %v9274_v59 }
 0x30c   : > { %5357 = vmatmul.bf16.gmra.mxu2 %v9227_v12  ;;  %v10623_v12 = vor.u32 %v12103_v63, %v10620_v0  ;;  %v12156_v63 = vld [vmem:[%s16364_s1 + $0x170] sm:$0xff] }
 0x30d   : > { %v13740_v16 = vpop.f32.mrf.mxu3  ;;  %6272 = vmatpush.bf16.msrb.mxu1 %v12156_v63 }
 0x30f   : > { %v5318_v17 = vpop.f32.mrf.mxu2  ;;  %v4662_v19 = vpop.f32.mrf.mxu0 }
 0x310   : > { %v13742_v18 = vadd.f32 %v5318_v17, %v4990_v15  ;;  %v4991_v21 = vpop.f32.mrf.mxu1  ;;  %v9279_v17 = vor.u32 %v11767_v62, %v9276_v1 }
 0x311   : > { %v4992_v25 = vadd.f32 %v4991_v21, %v4662_v19  ;;  %v9283_v19 = vor.u32 %v11771_v4, %v9282_v3 }
 0x315   : > { %v13752_v35 = vpop.f32.mrf.mxu3 }
 0x317   : > { %v5320_v37 = vpop.f32.mrf.mxu2  ;;  %v4665_v43 = vpop.f32.mrf.mxu0 }
 0x318   : > { %v13754_v41 = vadd.f32 %v5320_v37, %v4992_v25  ;;  %v4994_v46 = vpop.f32.mrf.mxu1  ;;  %v11777_v37 = vld [vmem:[%s13564_s24 + $0x398] sm:$0xf0] }
 0x319   : > { %v4995_v47 = vadd.f32 %v4994_v46, %v4665_v43  ;;  %v12058_v43 = vld [vmem:[%s13564_s24 + $0xc60] sm:$0xf0] }
 0x31a   : > { %4704 = vmatmul.bf16.gmra.mxu0 %v9247_v39  ;;  %5273 = vmatmul.bf16.gmra.mxu3 %v10595_v40  ;;  %v11774_v39 = vld [vmem:[%s13564_s24 + $0x384] sm:$0xf]  ;;  %v10430_v40 = vld [vmem:[%s13564_s24 + $0xc48] sm:$0xf] }
 0x31b   : > { %5033 = vmatmul.bf16.gmra.mxu1 %v9251_v44  ;;  %v9304_v44 = vld [vmem:[%s13564_s24 + $0x39c] sm:$0xf0]  ;;  %v11778_v46 = vld [vmem:[%s13564_s24 + $0x3a0] sm:$0xf0] }
 0x31c   : > { %5362 = vmatmul.bf16.gmra.mxu2 %v9255_v45  ;;  %v9310_v45 = vld [vmem:[%s13564_s24 + $0x388] sm:$0xf]  ;;  %v9307_v61 = vor.u32 %v11774_v39, %v9304_v44 }
 0x31d   : > { %v13756_v50 = vpop.f32.mrf.mxu3  ;;  %v9311_v62 = vor.u32 %v11778_v46, %v9310_v45 }
 0x31f   : > { %v5323_v53 = vpop.f32.mrf.mxu2  ;;  %v4667_v55 = vpop.f32.mrf.mxu0 }
 0x320   : > { %v13758_v54 = vadd.f32 %v5323_v53, %v4995_v47  ;;  %v4996_v56 = vpop.f32.mrf.mxu1 }
 0x321   : > { %v4997_v57 = vadd.f32 %v4996_v56, %v4667_v55  ;;  %v9303_v55 = vor.u32 %v11777_v37, %v9302_v33  ;;  %v10431_v56 = vor.u32 %v12058_v43, %v10430_v40 }
 0x325   : > { %v13768_v5 = vpop.f32.mrf.mxu3 }
 0x327   : > { %v5325_v8 = vpop.f32.mrf.mxu2  ;;  %v4670_v15 = vpop.f32.mrf.mxu0 }
 0x328   : > { %v13770_v13 = vadd.f32 %v5325_v8, %v4997_v57  ;;  %v4999_v21 = vpop.f32.mrf.mxu1 }
 0x329   : > { %v5000_v25 = vadd.f32 %v4999_v21, %v4670_v15  ;;  %v11781_v21 = vld [vmem:[%s13564_s24 + $0x3bc] sm:$0xf] }
 0x32a   : > { %16420 = vst [vmem:[#allocation3_spill] sm:$0xff] %v13770_v13  ;;  %4709 = vmatmul.bf16.gmra.mxu0 %v9275_v11  ;;  %5278 = vmatmul.bf16.gmra.mxu3 %v10623_v12 }
 0x32b   : > { %5038 = vmatmul.bf16.gmra.mxu1 %v9279_v17  ;;  %v9330_v17 = vld [vmem:[%s13564_s24 + $0x3b8] sm:$0xf] }
 0x32c   : > { %5367 = vmatmul.bf16.gmra.mxu2 %v9283_v19  ;;  %v11784_v19 = vld [vmem:[%s13564_s24 + $0x3d0] sm:$0xf0] }
 0x32d   : > { %v13772_v23 = vpop.f32.mrf.mxu3  ;;  %v9331_v37 = vor.u32 %v11784_v19, %v9330_v17  ;;  %v9366_v17 = vld [vmem:[%s13564_s24 + $0x3f8] sm:$0xf]  ;;  %v11792_v19 = vld [vmem:[%s13564_s24 + $0x410] sm:$0xf0] }
 0x32f   : > { %v5328_v26 = vpop.f32.mrf.mxu2  ;;  %v4672_v29 = vpop.f32.mrf.mxu0 }
 0x330   : > { %v13774_v28 = vadd.f32 %v5328_v26, %v5000_v25  ;;  %v5001_v30 = vpop.f32.mrf.mxu1  ;;  %v10458_v25 = vld [vmem:[%s13564_s24 + $0xc80] sm:$0xf]  ;;  %v12065_v26 = vld [vmem:[%s13564_s24 + $0xc98] sm:$0xf0] }
 0x331   : > { %v5002_v31 = vadd.f32 %v5001_v30, %v4672_v29  ;;  %v9332_v29 = vld [vmem:[%s13564_s24 + $0x3d4] sm:$0xf0]  ;;  %v9338_v30 = vld [vmem:[%s13564_s24 + $0x3c0] sm:$0xf]  ;;  %v10459_v39 = vor.u32 %v12065_v26, %v10458_v25 }
 0x332   : > { %16421 = vst [vmem:[#allocation4_spill] sm:$0xff] %v13774_v28  ;;  %v9335_v44 = vor.u32 %v11781_v21, %v9332_v29 }
 0x335   : > { %v13787_v47 = vpop.f32.mrf.mxu3 }
 0x337   : > { %v5330_v53 = vpop.f32.mrf.mxu2  ;;  %v4675_v59 = vpop.f32.mrf.mxu0 }
 0x338   : > { %v13789_v57 = vadd.f32 %v5330_v53, %v5002_v31  ;;  %v5004_v0 = vpop.f32.mrf.mxu1  ;;  %v11785_v31 = vld [vmem:[%s13564_s24 + $0x3d8] sm:$0xf0] }
 0x339   : > { %v5005_v1 = vadd.f32 %v5004_v0, %v4675_v59  ;;  %v9339_v45 = vor.u32 %v11785_v31, %v9338_v30  ;;  %v9358_v0 = vld [vmem:[%s13564_s24 + $0x3f0] sm:$0xf] }
 0x33a   : > { %16422 = vst [vmem:[#allocation5_spill] sm:$0xff] %v13789_v57  ;;  %4714 = vmatmul.bf16.gmra.mxu0 %v9303_v55  ;;  %5572 = vmatmul.bf16.vlgmr.msra.gmra.mxu3 %v10431_v56 }
 0x33b   : > { %5043 = vmatmul.bf16.gmra.mxu1 %v9307_v61 }
 0x33c   : > { %5372 = vmatmul.bf16.gmra.mxu2 %v9311_v62 }
 0x33d   : > { %v13794_v3 = vpop.f32.mrf.mxu3 }
 0x33e   : > { %v5245_v13 = vadd.f32 %v13794_v3, %v13651_v7  ;;  %v9554_v3 = vld [vmem:[%s13564_s24 + $0x578] sm:$0xf] }
 0x33f   : > { %v5333_v4 = vpop.f32.mrf.mxu2  ;;  %v4677_v11 = vpop.f32.mrf.mxu0 }
 0x340   : > { %v13796_v8 = vadd.f32 %v5333_v4, %v5005_v1  ;;  %v5006_v12 = vpop.f32.mrf.mxu1  ;;  %v11791_v1 = vld [vmem:[%s13564_s24 + $0x408] sm:$0xf0]  ;;  %v11788_v4 = vld [vmem:[%s13564_s24 + $0x3f4] sm:$0xf] }
 0x341   : > { %v5007_v15 = vadd.f32 %v5006_v12, %v4677_v11  ;;  %v10486_v11 = vld [vmem:[%s13564_s24 + $0xcb8] sm:$0xf]  ;;  %v12072_v12 = vld [vmem:[%s13564_s24 + $0xcd0] sm:$0xf0]  ;;  %v9359_v26 = vor.u32 %v11791_v1, %v9358_v0  ;;  %v11795_v0 = vld [vmem:[%s13564_s24 + $0x42c] sm:$0xf] }
 0x342   : > { %16423 = vst [vmem:[#allocation6_spill] sm:$0xff] %v13796_v8  ;;  %v10487_v29 = vor.u32 %v12072_v12, %v10486_v11  ;;  %v10514_v1 = vld [vmem:[%s13564_s24 + $0xcf0] sm:$0xf]  ;;  %v9388_v11 = vld [vmem:[%s13564_s24 + $0x444] sm:$0xf0] }
 0x343   : > { %v9394_v12 = vld [vmem:[%s13564_s24 + $0x430] sm:$0xf]  ;;  %v12155_v8 = vld [vmem:[%s16364_s1 + $0x168] sm:$0xff] }
 0x344   : > { %6273 = vmatpush.bf16.msrb.mxu1 %v12155_v8  ;;  %v8864_v8 = vld [vmem:[%s13564_s24 + $0x24] sm:$0xf0] }
 0x345   : > { %v13806_v32 = vpop.f32.mrf.mxu3 }
 0x346   : > { %v5247_v7 = vadd.f32 %v13806_v32, %v13669_v24 }
 0x347   : > { %v5335_v33 = vpop.f32.mrf.mxu2  ;;  %v4680_v43 = vpop.f32.mrf.mxu0 }
 0x348   : > { %v13808_v40 = vadd.f32 %v5335_v33, %v5007_v15  ;;  %v5009_v46 = vpop.f32.mrf.mxu1  ;;  %v9360_v15 = vld [vmem:[%s13564_s24 + $0x40c] sm:$0xf0] }
 0x349   : > { %v5010_v53 = vadd.f32 %v5009_v46, %v4680_v43  ;;  %v9363_v33 = vor.u32 %v11788_v4, %v9360_v15  ;;  %v12079_v4 = vld [vmem:[%s13564_s24 + $0xd08] sm:$0xf0] }
 0x34a   : > { %16424 = vst [vmem:[#allocation7_spill] sm:$0xff] %v13808_v40  ;;  %4719 = vmatmul.bf16.gmra.mxu0 %v9331_v37  ;;  %5577 = vmatmul.bf16.gmra.mxu3 %v10459_v39  ;;  %v9367_v37 = vor.u32 %v11792_v19, %v9366_v17  ;;  %v11799_v15 = vld [vmem:[%s13564_s24 + $0x448] sm:$0xf0] }
 0x34b   : > { %5048 = vmatmul.bf16.gmra.mxu1 %v9335_v44 }
 0x34c   : > { %5377 = vmatmul.bf16.gmra.mxu2 %v9339_v45 }
 0x34d   : > { %v13810_v55 = vpop.f32.mrf.mxu3 }
 0x34f   : > { %v5338_v56 = vpop.f32.mrf.mxu2  ;;  %v4682_v61 = vpop.f32.mrf.mxu0 }
 0x350   : > { %v13812_v59 = vadd.f32 %v5338_v56, %v5010_v53  ;;  %v5011_v62 = vpop.f32.mrf.mxu1 }
 0x351   : > { %v5012_v63 = vadd.f32 %v5011_v62, %v4682_v61  ;;  %v9386_v62 = vld [vmem:[%s13564_s24 + $0x428] sm:$0xf] }
 0x352   : > { %16425 = vst [vmem:[#allocation8_spill] sm:$0xff] %v13812_v59 }
 0x355   : > { %v13822_v21 = vpop.f32.mrf.mxu3 }
 0x357   : > { %v5340_v25 = vpop.f32.mrf.mxu2  ;;  %v4685_v31 = vpop.f32.mrf.mxu0 }
 0x358   : > { %v13824_v30 = vadd.f32 %v5340_v25, %v5012_v63  ;;  %v5014_v39 = vpop.f32.mrf.mxu1  ;;  %v11798_v63 = vld [vmem:[%s13564_s24 + $0x440] sm:$0xf0] }
 0x359   : > { %v5015_v43 = vadd.f32 %v5014_v39, %v4685_v31  ;;  %v9387_v25 = vor.u32 %v11798_v63, %v9386_v62 }
 0x35a   : > { %16426 = vst [vmem:[#allocation9_spill] sm:$0xff] %v13824_v30  ;;  %4724 = vmatmul.bf16.gmra.mxu0 %v9359_v26  ;;  %5582 = vmatmul.bf16.gmra.mxu3 %v10487_v29  ;;  %v10515_v26 = vor.u32 %v12079_v4, %v10514_v1  ;;  %v11805_v1 = vld [vmem:[%s13564_s24 + $0x478] sm:$0xf0]  ;;  %v11802_v4 = vld [vmem:[%s13564_s24 + $0x464] sm:$0xf] }
 0x35b   : > { %5053 = vmatmul.bf16.gmra.mxu1 %v9363_v33  ;;  %v9391_v33 = vor.u32 %v11795_v0, %v9388_v11  ;;  %v9414_v0 = vld [vmem:[%s13564_s24 + $0x460] sm:$0xf]  ;;  %v10542_v11 = vld [vmem:[%s13564_s24 + $0xd28] sm:$0xf] }
 0x35c   : > { %5382 = vmatmul.bf16.gmra.mxu2 %v9367_v37  ;;  %v9395_v37 = vor.u32 %v11799_v15, %v9394_v12  ;;  %v12086_v12 = vld [vmem:[%s13564_s24 + $0xd40] sm:$0xf0]  ;;  %v9416_v15 = vld [vmem:[%s13564_s24 + $0x47c] sm:$0xf0] }
 0x35d   : > { %v13826_v44 = vpop.f32.mrf.mxu3 }
 0x35f   : > { %v5343_v45 = vpop.f32.mrf.mxu2  ;;  %v4687_v53 = vpop.f32.mrf.mxu0 }
 0x360   : > { %v13828_v46 = vadd.f32 %v5343_v45, %v5015_v43  ;;  %v5016_v56 = vpop.f32.mrf.mxu1 }
 0x361   : > { %v5017_v61 = vadd.f32 %v5016_v56, %v4687_v53 }
 0x362   : > { %16427 = vst [vmem:[#allocation10_spill] sm:$0xff] %v13828_v46 }
 0x365   : > { %v13838_v17 = vpop.f32.mrf.mxu3 }
 0x367   : > { %v5345_v19 = vpop.f32.mrf.mxu2  ;;  %v4690_v31 = vpop.f32.mrf.mxu0 }
 0x368   : > { %v13840_v29 = vadd.f32 %v5345_v19, %v5017_v61  ;;  %v5019_v39 = vpop.f32.mrf.mxu1  ;;  %v9422_v19 = vld [vmem:[%s13564_s24 + $0x468] sm:$0xf] }
 0x369   : > { %v5020_v43 = vadd.f32 %v5019_v39, %v4690_v31 }
 0x36a   : > { %16428 = vst [vmem:[#allocation11_spill] sm:$0xff] %v13840_v29  ;;  %4729 = vmatmul.bf16.gmra.mxu0 %v9387_v25  ;;  %5587 = vmatmul.bf16.gmra.mxu3 %v10515_v26  ;;  %v11806_v25 = vld [vmem:[%s13564_s24 + $0x480] sm:$0xf0] }
 0x36b   : > { %5058 = vmatmul.bf16.gmra.mxu1 %v9391_v33  ;;  %v9415_v33 = vor.u32 %v11805_v1, %v9414_v0  ;;  %v12140_v0 = vld [vmem:[%s16364_s1 + $0xf0] sm:$0xff] }
 0x36c   : > { %5387 = vmatmul.bf16.gmra.mxu2 %v9395_v37  ;;  %v10543_v37 = vor.u32 %v12086_v12, %v10542_v11 }
 0x36d   : > { %v13842_v45 = vpop.f32.mrf.mxu3 }
 0x36f   : > { %v5348_v53 = vpop.f32.mrf.mxu2  ;;  %v4692_v61 = vpop.f32.mrf.mxu0 }
 0x370   : > { %v13844_v56 = vadd.f32 %v5348_v53, %v5020_v43  ;;  %v5021_v62 = vpop.f32.mrf.mxu1  ;;  %v9419_v53 = vor.u32 %v11802_v4, %v9416_v15  ;;  %v9442_v15 = vld [vmem:[%s13564_s24 + $0x498] sm:$0xf] }
 0x371   : > { %v5022_v63 = vadd.f32 %v5021_v62, %v4692_v61  ;;  %v12141_v62 = vld [vmem:[%s16364_s1 + $0xf8] sm:$0xff] }
 0x372   : > { %16429 = vst [vmem:[#allocation12_spill] sm:$0xff] %v13844_v56  ;;  %v9423_v56 = vor.u32 %v11806_v25, %v9422_v19  ;;  %5613 = vmatpush.bf16.msrb.mxu3 %v12141_v62  ;;  %v11812_v19 = vld [vmem:[%s13564_s24 + $0x4b0] sm:$0xf0]  ;;  %v11809_v25 = vld [vmem:[%s13564_s24 + $0x49c] sm:$0xf] }
 0x375   : > { %v13854_v26 = vpop.f32.mrf.mxu3 }
 0x376   : > { %5614 = vmatpush.bf16.msrb.mxu3 %v12140_v0  ;;  %v12138_v0 = vld [vmem:[%s16364_s1 + $0xe0] sm:$0xff] }
 0x377   : > { %v5350_v31 = vpop.f32.mrf.mxu2  ;;  %v4695_v43 = vpop.f32.mrf.mxu0 }
 0x378   : > { %v13856_v39 = vadd.f32 %v5350_v31, %v5022_v63  ;;  %v5024_v29 = vpop.f32.mrf.mxu1  ;;  %v10570_v31 = vld [vmem:[%s13564_s24 + $0xd60] sm:$0xf] }
 0x379   : > { %v5025_v61 = vadd.f32 %v5024_v29, %v4695_v43  ;;  %v9450_v43 = vld [vmem:[%s13564_s24 + $0x4a0] sm:$0xf] }
 0x37a   : > { %16430 = vst [vmem:[#allocation13_spill] sm:$0xff] %v13856_v39  ;;  %4734 = vmatmul.bf16.gmra.mxu0 %v9415_v33  ;;  %5592 = vmatmul.bf16.gmra.mxu3 %v10543_v37  ;;  %v12093_v33 = vld [vmem:[%s13564_s24 + $0xd78] sm:$0xf0]  ;;  %v9444_v37 = vld [vmem:[%s13564_s24 + $0x4b4] sm:$0xf0] }
 0x37b   : > { %5063 = vmatmul.bf16.gmra.mxu1 %v9419_v53  ;;  %v11813_v53 = vld [vmem:[%s13564_s24 + $0x4b8] sm:$0xf0]  ;;  %v9447_v39 = vor.u32 %v11809_v25, %v9444_v37  ;;  %v11816_v37 = vld [vmem:[%s13564_s24 + $0x4d4] sm:$0xf] }
 0x37c   : > { %5392 = vmatmul.bf16.gmra.mxu2 %v9423_v56  ;;  %v12139_v56 = vld [vmem:[%s16364_s1 + $0xe8] sm:$0xff]  ;;  %v9451_v46 = vor.u32 %v11813_v53, %v9450_v43  ;;  %v10598_v43 = vld [vmem:[%s13564_s24 + $0xd98] sm:$0xf]  ;;  %v12100_v53 = vld [vmem:[%s13564_s24 + $0xdb0] sm:$0xf0] }
 0x37d   : > { %v13861_v63 = vpop.f32.mrf.mxu3  ;;  %5615 = vmatpush.bf16.msrb.mxu3 %v12139_v56  ;;  %v12137_v56 = vld [vmem:[%s16364_s1 + $0xd8] sm:$0xff] }
 0x37f   : > { %v5353_v29 = vpop.f32.mrf.mxu2  ;;  %v4697_v4 = vpop.f32.mrf.mxu0 }
 0x380   : > { %v13866_v1 = vadd.f32 %v5353_v29, %v5025_v61  ;;  %v5026_v11 = vpop.f32.mrf.mxu1  ;;  %v9443_v29 = vor.u32 %v11812_v19, %v9442_v15 }
 0x381   : > { %v5027_v12 = vadd.f32 %v5026_v11, %v4697_v4  ;;  %5616 = vmatpush.bf16.msrb.mxu3 %v12138_v0  ;;  %v11820_v0 = vld [vmem:[%s13564_s24 + $0x4f0] sm:$0xf0] }
 0x382   : > { %16431 = vst [vmem:[#allocation14_spill] sm:$0xff] %v13866_v1  ;;  %v10571_v1 = vor.u32 %v12093_v33, %v10570_v31  ;;  %v11819_v33 = vld [vmem:[%s13564_s24 + $0x4e8] sm:$0xf0] }
 0x385   : > { %v13879_v62 = vpop.f32.mrf.mxu3  ;;  %5617 = vmatpush.bf16.msrb.mxu3 %v12137_v56 }
 0x387   : > { %v5355_v61 = vpop.f32.mrf.mxu2  ;;  %v4700_v11 = vpop.f32.mrf.mxu0 }
 0x388   : > { %v13884_v4 = vadd.f32 %v5355_v61, %v5027_v12  ;;  %v5029_v30 = vpop.f32.mrf.mxu1  ;;  %v9472_v61 = vld [vmem:[%s13564_s24 + $0x4ec] sm:$0xf0] }
 0x389   : > { %v5030_v59 = vadd.f32 %v5029_v30, %v4700_v11 }
 0x38a   : > { %16432 = vst [vmem:[#allocation15_spill] sm:$0xff] %v13884_v4  ;;  %4739 = vmatmul.bf16.gmra.mxu0 %v9443_v29  ;;  %5597 = vmatmul.bf16.gmra.mxu3 %v10571_v1  ;;  %v12136_v1 = vld [vmem:[%s16364_s1 + $0xd0] sm:$0xff]  ;;  %v9478_v29 = vld [vmem:[%s13564_s24 + $0x4d8] sm:$0xf] }
 0x38b   : > { %5068 = vmatmul.bf16.gmra.mxu1 %v9447_v39  ;;  %5618 = vmatpush.bf16.msrb.mxu3 %v12136_v1  ;;  %v9470_v39 = vld [vmem:[%s13564_s24 + $0x4d0] sm:$0xf]  ;;  %v12134_v1 = vld [vmem:[%s16364_s1 + $0xc0] sm:$0xff]  ;;  %v9479_v4 = vor.u32 %v11820_v0, %v9478_v29  ;;  %v11823_v0 = vld [vmem:[%s13564_s24 + $0x50c] sm:$0xf] }
 0x38c   : > { %5397 = vmatmul.bf16.gmra.mxu2 %v9451_v46  ;;  %v12135_v46 = vld [vmem:[%s16364_s1 + $0xc8] sm:$0xff]  ;;  %v9471_v56 = vor.u32 %v11819_v33, %v9470_v39  ;;  %v11826_v29 = vld [vmem:[%s13564_s24 + $0x520] sm:$0xf0] }
 0x38d   : > { %v13889_v12 = vpop.f32.mrf.mxu3 }
 0x38f   : > { %v5358_v30 = vpop.f32.mrf.mxu2  ;;  %v4702_v19 = vpop.f32.mrf.mxu0  ;;  %5619 = vmatpush.bf16.msrb.mxu3 %v12135_v46 }
 0x390   : > { %v13894_v15 = vadd.f32 %v5358_v30, %v5030_v59  ;;  %v5031_v25 = vpop.f32.mrf.mxu1  ;;  %v10599_v30 = vor.u32 %v12100_v53, %v10598_v43 }
 0x391   : > { %v5032_v31 = vadd.f32 %v5031_v25, %v4702_v19 }
 0x392   : > { %16433 = vst [vmem:[#allocation16_spill] sm:$0xff] %v13894_v15  ;;  %v9475_v15 = vor.u32 %v11816_v37, %v9472_v61  ;;  %v9498_v61 = vld [vmem:[%s13564_s24 + $0x508] sm:$0xf] }
 0x393   : > { %5620 = vmatpush.bf16.msrb.mxu3 %v12134_v1 }
 0x395   : > { %v13907_v11 = vpop.f32.mrf.mxu3 }
 0x397   : > { %v5360_v59 = vpop.f32.mrf.mxu2  ;;  %v4705_v25 = vpop.f32.mrf.mxu0 }
 0x398   : > { %v13912_v19 = vadd.f32 %v5360_v59, %v5032_v31  ;;  %v5034_v40 = vpop.f32.mrf.mxu1  ;;  %v10626_v59 = vld [vmem:[%s13564_s24 + $0xdd0] sm:$0xf] }
 0x399   : > { %v5035_v46 = vadd.f32 %v5034_v40, %v4705_v25  ;;  %v12147_v40 = vld [vmem:[%s16364_s1 + $0x128] sm:$0xff] }
 0x39a   : > { %16434 = vst [vmem:[#allocation17_spill] sm:$0xff] %v13912_v19  ;;  %4744 = vmatmul.bf16.gmra.mxu0 %v9471_v56  ;;  %5602 = vmatmul.bf16.gmra.mxu3 %v10599_v30  ;;  %v9506_v56 = vld [vmem:[%s13564_s24 + $0x510] sm:$0xf]  ;;  %v11827_v30 = vld [vmem:[%s13564_s24 + $0x528] sm:$0xf0] }
 0x39b   : > { %5073 = vmatmul.bf16.gmra.mxu1 %v9475_v15  ;;  %v12107_v15 = vld [vmem:[%s13564_s24 + $0xde8] sm:$0xf0]  ;;  %5944 = vmatpush.bf16.msrb.mxu0 %v12147_v40  ;;  %v9507_v19 = vor.u32 %v11827_v30, %v9506_v56  ;;  %v11833_v56 = vld [vmem:[%s13564_s24 + $0x558] sm:$0xf0]  ;;  %v11830_v30 = vld [vmem:[%s13564_s24 + $0x544] sm:$0xf] }
 0x39c   : > { %5402 = vmatmul.bf16.gmra.mxu2 %v9479_v4  ;;  %v9500_v4 = vld [vmem:[%s13564_s24 + $0x524] sm:$0xf0] }
 0x39d   : > { %v13914_v31 = vpop.f32.mrf.mxu3 }
 0x39f   : > { %v5363_v39 = vpop.f32.mrf.mxu2  ;;  %v4707_v37 = vpop.f32.mrf.mxu0 }
 0x3a0   : > { %v13916_v33 = vadd.f32 %v5363_v39, %v5035_v46  ;;  %v5036_v43 = vpop.f32.mrf.mxu1  ;;  %v9499_v46 = vor.u32 %v11826_v29, %v9498_v61  ;;  %v10627_v39 = vor.u32 %v12107_v15, %v10626_v59 }
 0x3a1   : > { %v5037_v53 = vadd.f32 %v5036_v43, %v4707_v37  ;;  %v9503_v43 = vor.u32 %v11823_v0, %v9500_v4  ;;  %v9526_v4 = vld [vmem:[%s13564_s24 + $0x540] sm:$0xf] }
 0x3a2   : > { %16435 = vst [vmem:[#allocation18_spill] sm:$0xff] %v13916_v33 }
 0x3a5   : > { %v13929_v1 = vpop.f32.mrf.mxu3 }
 0x3a7   : > { %v5365_v25 = vpop.f32.mrf.mxu2  ;;  %v4710_v37 = vpop.f32.mrf.mxu0 }
 0x3a8   : > { %v13931_v33 = vadd.f32 %v5365_v25, %v5037_v53  ;;  %v5039_v40 = vpop.f32.mrf.mxu1  ;;  %v11663_v25 = vld [vmem:[%s13564_s24 + $0xc] sm:$0xf] }
 0x3a9   : > { %v5040_v57 = vadd.f32 %v5039_v40, %v4710_v37  ;;  %v9528_v37 = vld [vmem:[%s13564_s24 + $0x55c] sm:$0xf0]  ;;  %v11834_v40 = vld [vmem:[%s13564_s24 + $0x560] sm:$0xf0] }
 0x3aa   : > { %16436 = vst [vmem:[#allocation19_spill] sm:$0xff] %v13931_v33  ;;  %4749 = vmatmul.bf16.gmra.mxu0 %v9499_v46  ;;  %5607 = vmatmul.bf16.gmra.mxu3 %v10627_v39  ;;  %v9534_v46 = vld [vmem:[%s13564_s24 + $0x548] sm:$0xf]  ;;  %v8867_v33 = vor.u32 %v11663_v25, %v8864_v8 }
 0x3ab   : > { %5078 = vmatmul.bf16.gmra.mxu1 %v9503_v43 }
 0x3ac   : > { %5407 = vmatmul.bf16.gmra.mxu2 %v9507_v19  ;;  %v9527_v19 = vor.u32 %v11833_v56, %v9526_v4 }
 0x3ad   : > { %v13936_v53 = vpop.f32.mrf.mxu3 }
 0x3af   : > { %v5368_v61 = vpop.f32.mrf.mxu2  ;;  %v4712_v0 = vpop.f32.mrf.mxu0 }
 0x3b0   : > { %v13938_v29 = vadd.f32 %v5368_v61, %v5040_v57  ;;  %v5041_v59 = vpop.f32.mrf.mxu1  ;;  %v9531_v61 = vor.u32 %v11830_v30, %v9528_v37 }
 0x3b1   : > { %v5042_v15 = vadd.f32 %v5041_v59, %v4712_v0 }
 0x3b2   : > { %16437 = vst [vmem:[#allocation20_spill] sm:$0xff] %v13938_v29  ;;  %v9535_v29 = vor.u32 %v11834_v40, %v9534_v46  ;;  %v11840_v46 = vld [vmem:[%s13564_s24 + $0x590] sm:$0xf0]  ;;  %v11670_v40 = vld [vmem:[%s13564_s24 + $0x44] sm:$0xf] }
 0x3b5   : > { %v13948_v39 = vpop.f32.mrf.mxu3 }
 0x3b7   : > { %v5370_v43 = vpop.f32.mrf.mxu2  ;;  %v4715_v57 = vpop.f32.mrf.mxu0 }
 0x3b8   : > { %v13950_v28 = vadd.f32 %v5370_v43, %v5042_v15  ;;  %v5044_v0 = vpop.f32.mrf.mxu1  ;;  %v8892_v43 = vld [vmem:[%s13564_s24 + $0x5c] sm:$0xf0] }
 0x3b9   : > { %v5045_v59 = vadd.f32 %v5044_v0, %v4715_v57  ;;  %v11841_v57 = vld [vmem:[%s13564_s24 + $0x598] sm:$0xf0] }
 0x3ba   : > { %4754 = vmatmul.bf16.gmra.mxu0 %v9527_v19  ;;  %5621 = vmatmul.bf16.vlgmr.msrb.gmra.mxu3 %v8867_v33  ;;  %v11837_v33 = vld [vmem:[%s13564_s24 + $0x57c] sm:$0xf]  ;;  %v9556_v19 = vld [vmem:[%s13564_s24 + $0x594] sm:$0xf0] }
 0x3bb   : > { %5083 = vmatmul.bf16.gmra.mxu1 %v9531_v61 }
 0x3bc   : > { %5412 = vmatmul.bf16.gmra.mxu2 %v9535_v29  ;;  %v9562_v29 = vld [vmem:[%s13564_s24 + $0x580] sm:$0xf] }
 0x3bd   : > { %v5573_v15 = vpop.f32.mrf.mxu3 }
 0x3be   : > { %v13954_v56 = vadd.f32 %v5573_v15, %v5245_v13  ;;  %v8895_v15 = vor.u32 %v11670_v40, %v8892_v43 }
 0x3bf   : > { %v5373_v4 = vpop.f32.mrf.mxu2  ;;  %v4717_v25 = vpop.f32.mrf.mxu0 }
 0x3c0   : > { %16438 = vst [vmem:[#allocation21_spill] sm:$0xff] %v13954_v56  ;;  %v13956_v30 = vadd.f32 %v5373_v4, %v5045_v59  ;;  %v5046_v8 = vpop.f32.mrf.mxu1  ;;  %v9555_v59 = vor.u32 %v11840_v46, %v9554_v3  ;;  %v9563_v56 = vor.u32 %v11841_v57, %v9562_v29  ;;  %v11844_v29 = vld [vmem:[%s13564_s24 + $0x5b4] sm:$0xf]  ;;  %v11677_v57 = vld [vmem:[%s13564_s24 + $0x7c] sm:$0xf] }
 0x3c1   : > { %v5047_v37 = vadd.f32 %v5046_v8, %v4717_v25  ;;  %v9559_v8 = vor.u32 %v11837_v33, %v9556_v19  ;;  %v11847_v19 = vld [vmem:[%s13564_s24 + $0x5c8] sm:$0xf0] }
 0x3c2   : > { %16439 = vst [vmem:[#allocation22_spill] sm:$0xff] %v13956_v30  ;;  %v5250_v30 = vadd.f32 %v13810_v55, %v13676_v34  ;;  %v5252_v34 = vadd.f32 %v13822_v21, %v13688_v48  ;;  %v9582_v55 = vld [vmem:[%s13564_s24 + $0x5b0] sm:$0xf] }
 0x3c5   : > { %v5575_v61 = vpop.f32.mrf.mxu3 }
 0x3c6   : > { %v13968_v13 = vadd.f32 %v5575_v61, %v5247_v7  ;;  %v8920_v61 = vld [vmem:[%s13564_s24 + $0x94] sm:$0xf0] }
 0x3c7   : > { %v5375_v0 = vpop.f32.mrf.mxu2  ;;  %v4720_v25 = vpop.f32.mrf.mxu0 }
 0x3c8   : > { %16440 = vst [vmem:[#allocation23_spill] sm:$0xff] %v13968_v13  ;;  %v13970_v4 = vadd.f32 %v5375_v0, %v5047_v37  ;;  %v5049_v24 = vpop.f32.mrf.mxu1  ;;  %v9584_v0 = vld [vmem:[%s13564_s24 + $0x5cc] sm:$0xf0] }
 0x3c9   : > { %v5050_v32 = vadd.f32 %v5049_v24, %v4720_v25  ;;  %v8923_v24 = vor.u32 %v11677_v57, %v8920_v61 }
 0x3ca   : > { %4759 = vmatmul.bf16.gmra.mxu0 %v9555_v59  ;;  %5626 = vmatmul.bf16.gmra.mxu3 %v8895_v15  ;;  %v11848_v59 = vld [vmem:[%s13564_s24 + $0x5d0] sm:$0xf0] }
 0x3cb   : > { %5088 = vmatmul.bf16.gmra.mxu1 %v9559_v8  ;;  %v9583_v8 = vor.u32 %v11847_v19, %v9582_v55 }
 0x3cc   : > { %5417 = vmatmul.bf16.gmra.mxu2 %v9563_v56  ;;  %v9590_v56 = vld [vmem:[%s13564_s24 + $0x5b8] sm:$0xf] }
 0x3cd   : > { %v5578_v37 = vpop.f32.mrf.mxu3 }
 0x3ce   : > { %v13974_v3 = vadd.f32 %v5578_v37, %v5250_v30 }
 0x3cf   : > { %v5378_v7 = vpop.f32.mrf.mxu2  ;;  %v4722_v33 = vpop.f32.mrf.mxu0 }
 0x3d0   : > { %16441 = vst [vmem:[#allocation24_spill] sm:$0xff] %v13974_v3  ;;  %v13976_v46 = vadd.f32 %v5378_v7, %v5050_v32  ;;  %v5051_v40 = vpop.f32.mrf.mxu1  ;;  %v9587_v7 = vor.u32 %v11844_v29, %v9584_v0  ;;  %v11854_v0 = vld [vmem:[%s13564_s24 + $0x600] sm:$0xf0]  ;;  %v16467_v3 = vld [vmem:[#allocation5_spill] sm:$0xff] }
 0x3d1   : > { %v5052_v43 = vadd.f32 %v5051_v40, %v4722_v33  ;;  %v9591_v33 = vor.u32 %v11848_v59, %v9590_v56  ;;  %v5255_v40 = vadd.f32 %v13826_v44, %v13692_v58  ;;  %v5257_v58 = vadd.f32 %v13838_v17, %v13704_v10  ;;  %v9610_v44 = vld [vmem:[%s13564_s24 + $0x5e8] sm:$0xf]  ;;  %v11851_v56 = vld [vmem:[%s13564_s24 + $0x5ec] sm:$0xf]  ;;  %v11684_v59 = vld [vmem:[%s13564_s24 + $0xb4] sm:$0xf] }
 0x3d5   : > { %v5580_v15 = vpop.f32.mrf.mxu3 }
 0x3d6   : > { %v13988_v30 = vadd.f32 %v5580_v15, %v5252_v34  ;;  %v8948_v15 = vld [vmem:[%s13564_s24 + $0xcc] sm:$0xf0] }
 0x3d7   : > { %v5380_v25 = vpop.f32.mrf.mxu2  ;;  %v4725_v37 = vpop.f32.mrf.mxu0 }
 0x3d8   : > { %16442 = vst [vmem:[#allocation25_spill] sm:$0xff] %v13988_v30  ;;  %v13990_v32 = vadd.f32 %v5380_v25, %v5052_v43  ;;  %v5054_v48 = vpop.f32.mrf.mxu1  ;;  %v9612_v25 = vld [vmem:[%s13564_s24 + $0x604] sm:$0xf0] }
 0x3d9   : > { %v5055_v21 = vadd.f32 %v5054_v48, %v4725_v37  ;;  %v9611_v48 = vor.u32 %v11854_v0, %v9610_v44 }
 0x3da   : > { %4764 = vmatmul.bf16.gmra.mxu0 %v9583_v8  ;;  %5631 = vmatmul.bf16.gmra.mxu3 %v8923_v24  ;;  %v9618_v8 = vld [vmem:[%s13564_s24 + $0x5f0] sm:$0xf]  ;;  %v11855_v24 = vld [vmem:[%s13564_s24 + $0x608] sm:$0xf0] }
 0x3db   : > { %5093 = vmatmul.bf16.gmra.mxu1 %v9587_v7 }
 0x3dc   : > { %5422 = vmatmul.bf16.gmra.mxu2 %v9591_v33 }
 0x3dd   : > { %v5583_v43 = vpop.f32.mrf.mxu3 }
 0x3de   : > { %v13994_v55 = vadd.f32 %v5583_v43, %v5255_v40 }
 0x3df   : > { %v5383_v34 = vpop.f32.mrf.mxu2  ;;  %v4727_v29 = vpop.f32.mrf.mxu0 }
 0x3e0   : > { %16443 = vst [vmem:[#allocation26_spill] sm:$0xff] %v13994_v55  ;;  %v13996_v19 = vadd.f32 %v5383_v34, %v5055_v21  ;;  %v5056_v57 = vpop.f32.mrf.mxu1  ;;  %v8951_v21 = vor.u32 %v11684_v59, %v8948_v15  ;;  %v9615_v34 = vor.u32 %v11851_v56, %v9612_v25  ;;  %v11861_v25 = vld [vmem:[%s13564_s24 + $0x638] sm:$0xf0] }
 0x3e1   : > { %v5057_v61 = vadd.f32 %v5056_v57, %v4727_v29  ;;  %v9619_v29 = vor.u32 %v11855_v24, %v9618_v8  ;;  %v5260_v57 = vadd.f32 %v13842_v45, %v13708_v20  ;;  %v5262_v20 = vadd.f32 %v13854_v26, %v13720_v38  ;;  %v9638_v45 = vld [vmem:[%s13564_s24 + $0x620] sm:$0xf]  ;;  %v11858_v8 = vld [vmem:[%s13564_s24 + $0x624] sm:$0xf]  ;;  %v11691_v24 = vld [vmem:[%s13564_s24 + $0xec] sm:$0xf] }
 0x3e5   : > { %v5585_v37 = vpop.f32.mrf.mxu3 }
 0x3e6   : > { %v14008_v33 = vadd.f32 %v5585_v37, %v5257_v58  ;;  %v8976_v37 = vld [vmem:[%s13564_s24 + $0x104] sm:$0xf0] }
 0x3e7   : > { %v5385_v7 = vpop.f32.mrf.mxu2  ;;  %v4730_v43 = vpop.f32.mrf.mxu0 }
 0x3e8   : > { %16444 = vst [vmem:[#allocation27_spill] sm:$0xff] %v14008_v33  ;;  %v14010_v40 = vadd.f32 %v5385_v7, %v5057_v61  ;;  %v5059_v10 = vpop.f32.mrf.mxu1  ;;  %v9640_v7 = vld [vmem:[%s13564_s24 + $0x63c] sm:$0xf0] }
 0x3e9   : > { %v5060_v17 = vadd.f32 %v5059_v10, %v4730_v43  ;;  %v9639_v10 = vor.u32 %v11861_v25, %v9638_v45 }
 0x3ea   : > { %4769 = vmatmul.bf16.gmra.mxu0 %v9611_v48  ;;  %5636 = vmatmul.bf16.gmra.mxu3 %v8951_v21  ;;  %v9646_v48 = vld [vmem:[%s13564_s24 + $0x628] sm:$0xf]  ;;  %v11862_v21 = vld [vmem:[%s13564_s24 + $0x640] sm:$0xf0] }
 0x3eb   : > { %5098 = vmatmul.bf16.gmra.mxu1 %v9615_v34 }
 0x3ec   : > { %5427 = vmatmul.bf16.gmra.mxu2 %v9619_v29 }
 0x3ed   : > { %v5588_v61 = vpop.f32.mrf.mxu3 }
 0x3ee   : > { %v14014_v44 = vadd.f32 %v5588_v61, %v5260_v57 }
 0x3ef   : > { %v5388_v58 = vpop.f32.mrf.mxu2  ;;  %v4732_v56 = vpop.f32.mrf.mxu0 }
 0x3f0   : > { %16445 = vst [vmem:[#allocation28_spill] sm:$0xff] %v14014_v44  ;;  %v14016_v0 = vadd.f32 %v5388_v58, %v5060_v17  ;;  %v5061_v59 = vpop.f32.mrf.mxu1  ;;  %v8979_v17 = vor.u32 %v11691_v24, %v8976_v37  ;;  %v9643_v58 = vor.u32 %v11858_v8, %v9640_v7  ;;  %v11868_v7 = vld [vmem:[%s13564_s24 + $0x670] sm:$0xf0] }
 0x3f1   : > { %v5062_v15 = vadd.f32 %v5061_v59, %v4732_v56  ;;  %v9647_v56 = vor.u32 %v11862_v21, %v9646_v48  ;;  %v5265_v59 = vadd.f32 %v13861_v63, %v13724_v49  ;;  %v5267_v49 = vadd.f32 %v13879_v62, %v13736_v2  ;;  %v9666_v63 = vld [vmem:[%s13564_s24 + $0x658] sm:$0xf]  ;;  %v11865_v48 = vld [vmem:[%s13564_s24 + $0x65c] sm:$0xf]  ;;  %v11698_v21 = vld [vmem:[%s13564_s24 + $0x124] sm:$0xf] }
 0x3f5   : > { %v5590_v43 = vpop.f32.mrf.mxu3 }
 0x3f6   : > { %v14028_v29 = vadd.f32 %v5590_v43, %v5262_v20  ;;  %v9004_v43 = vld [vmem:[%s13564_s24 + $0x13c] sm:$0xf0] }
 0x3f7   : > { %v5390_v34 = vpop.f32.mrf.mxu2  ;;  %v4735_v61 = vpop.f32.mrf.mxu0 }
 0x3f8   : > { %16446 = vst [vmem:[#allocation29_spill] sm:$0xff] %v14028_v29  ;;  %v14030_v57 = vadd.f32 %v5390_v34, %v5062_v15  ;;  %v5064_v38 = vpop.f32.mrf.mxu1  ;;  %v9668_v34 = vld [vmem:[%s13564_s24 + $0x674] sm:$0xf0] }
 0x3f9   : > { %v5065_v26 = vadd.f32 %v5064_v38, %v4735_v61  ;;  %v9667_v38 = vor.u32 %v11868_v7, %v9666_v63 }
 0x3fa   : > { %4774 = vmatmul.bf16.gmra.mxu0 %v9639_v10  ;;  %5641 = vmatmul.bf16.gmra.mxu3 %v8979_v17  ;;  %v9674_v10 = vld [vmem:[%s13564_s24 + $0x660] sm:$0xf]  ;;  %v11869_v17 = vld [vmem:[%s13564_s24 + $0x678] sm:$0xf0] }
 0x3fb   : > { %5103 = vmatmul.bf16.gmra.mxu1 %v9643_v58 }
 0x3fc   : > { %5432 = vmatmul.bf16.gmra.mxu2 %v9647_v56 }
 0x3fd   : > { %v5593_v15 = vpop.f32.mrf.mxu3 }
 0x3fe   : > { %v14034_v45 = vadd.f32 %v5593_v15, %v5265_v59 }
 0x3ff   : > { %v5393_v20 = vpop.f32.mrf.mxu2  ;;  %v4737_v8 = vpop.f32.mrf.mxu0 }
 0x400   : > { %16447 = vst [vmem:[#allocation30_spill] sm:$0xff] %v14034_v45  ;;  %v14036_v25 = vadd.f32 %v5393_v20, %v5065_v26  ;;  %v5066_v24 = vpop.f32.mrf.mxu1  ;;  %v9007_v26 = vor.u32 %v11698_v21, %v9004_v43  ;;  %v9671_v20 = vor.u32 %v11865_v48, %v9668_v34  ;;  %v9694_v34 = vld [vmem:[%s13564_s24 + $0x690] sm:$0xf] }
 0x401   : > { %v5067_v37 = vadd.f32 %v5066_v24, %v4737_v8  ;;  %v9675_v8 = vor.u32 %v11869_v17, %v9674_v10  ;;  %v5270_v24 = vadd.f32 %v13889_v12, %v13740_v16  ;;  %v12146_v16 = vld [vmem:[%s16364_s1 + $0x120] sm:$0xff]  ;;  %v5272_v12 = vadd.f32 %v13907_v11, %v13752_v35  ;;  %v11875_v10 = vld [vmem:[%s13564_s24 + $0x6a8] sm:$0xf0]  ;;  %v11872_v17 = vld [vmem:[%s13564_s24 + $0x694] sm:$0xf] }
 0x402   : > { %5945 = vmatpush.bf16.msrb.mxu0 %v12146_v16  ;;  %v12154_v11 = vld [vmem:[%s16364_s1 + $0x160] sm:$0xff] }
 0x403   : > { %6274 = vmatpush.bf16.msrb.mxu1 %v12154_v11 }
 0x405   : > { %v5595_v61 = vpop.f32.mrf.mxu3 }
 0x406   : > { %v14048_v56 = vadd.f32 %v5595_v61, %v5267_v49  ;;  %v11705_v61 = vld [vmem:[%s13564_s24 + $0x15c] sm:$0xf] }
 0x407   : > { %v5395_v58 = vpop.f32.mrf.mxu2  ;;  %v4740_v15 = vpop.f32.mrf.mxu0 }
 0x408   : > { %16448 = vst [vmem:[#allocation31_spill] sm:$0xff] %v14048_v56  ;;  %v14050_v59 = vadd.f32 %v5395_v58, %v5067_v37  ;;  %v5069_v2 = vpop.f32.mrf.mxu1  ;;  %v9032_v58 = vld [vmem:[%s13564_s24 + $0x174] sm:$0xf0] }
 0x409   : > { %v5070_v62 = vadd.f32 %v5069_v2, %v4740_v15  ;;  %v11876_v15 = vld [vmem:[%s13564_s24 + $0x6b0] sm:$0xf0] }
 0x40a   : > { %4779 = vmatmul.bf16.gmra.mxu0 %v9667_v38  ;;  %5646 = vmatmul.bf16.gmra.mxu3 %v9007_v26  ;;  %v9696_v38 = vld [vmem:[%s13564_s24 + $0x6ac] sm:$0xf0]  ;;  %v9702_v26 = vld [vmem:[%s13564_s24 + $0x698] sm:$0xf] }
 0x40b   : > { %5108 = vmatmul.bf16.gmra.mxu1 %v9671_v20  ;;  %v9703_v35 = vor.u32 %v11876_v15, %v9702_v26  ;;  %v11882_v26 = vld [vmem:[%s13564_s24 + $0x6e0] sm:$0xf0]  ;;  %v11879_v15 = vld [vmem:[%s13564_s24 + $0x6cc] sm:$0xf] }
 0x40c   : > { %5437 = vmatmul.bf16.gmra.mxu2 %v9675_v8 }
 0x40d   : > { %v5598_v37 = vpop.f32.mrf.mxu3 }
 0x40e   : > { %v14054_v63 = vadd.f32 %v5598_v37, %v5270_v24  ;;  %v9035_v24 = vor.u32 %v11705_v61, %v9032_v58 }
 0x40f   : > { %v5398_v49 = vpop.f32.mrf.mxu2  ;;  %v4742_v48 = vpop.f32.mrf.mxu0 }
 0x410   : > { %16449 = vst [vmem:[#allocation32_spill] sm:$0xff] %v14054_v63  ;;  %v14056_v7 = vadd.f32 %v5398_v49, %v5070_v62  ;;  %v5071_v21 = vpop.f32.mrf.mxu1  ;;  %v9695_v62 = vor.u32 %v11875_v10, %v9694_v34 }
 0x411   : > { %v5072_v43 = vadd.f32 %v5071_v21, %v4742_v48  ;;  %v9699_v48 = vor.u32 %v11872_v17, %v9696_v38 }
 0x415   : > { %v5600_v20 = vpop.f32.mrf.mxu3 }
 0x416   : > { %v14071_v2 = vadd.f32 %v5600_v20, %v5272_v12  ;;  %v5275_v12 = vadd.f32 %v13914_v31, %v13756_v50  ;;  %v5277_v50 = vadd.f32 %v13929_v1, %v13768_v5  ;;  %v9722_v31 = vld [vmem:[%s13564_s24 + $0x6c8] sm:$0xf]  ;;  %v11712_v20 = vld [vmem:[%s13564_s24 + $0x194] sm:$0xf] }
 0x417   : > { %v5400_v8 = vpop.f32.mrf.mxu2  ;;  %v4745_v49 = vpop.f32.mrf.mxu0 }
 0x418   : > { %16450 = vst [vmem:[#allocation33_spill] sm:$0xff] %v14071_v2  ;;  %v14073_v37 = vadd.f32 %v5400_v8, %v5072_v43  ;;  %v5074_v21 = vpop.f32.mrf.mxu1  ;;  %v9060_v8 = vld [vmem:[%s13564_s24 + $0x1ac] sm:$0xf0] }
 0x419   : > { %v5075_v16 = vadd.f32 %v5074_v21, %v4745_v49  ;;  %v11883_v49 = vld [vmem:[%s13564_s24 + $0x6e8] sm:$0xf0]  ;;  %v9723_v21 = vor.u32 %v11882_v26, %v9722_v31 }
 0x41a   : > { %4784 = vmatmul.bf16.gmra.mxu0 %v9695_v62  ;;  %5651 = vmatmul.bf16.gmra.mxu3 %v9035_v24  ;;  %v9724_v62 = vld [vmem:[%s13564_s24 + $0x6e4] sm:$0xf0]  ;;  %v9730_v24 = vld [vmem:[%s13564_s24 + $0x6d0] sm:$0xf] }
 0x41b   : > { %5113 = vmatmul.bf16.gmra.mxu1 %v9699_v48 }
 0x41c   : > { %5442 = vmatmul.bf16.gmra.mxu2 %v9703_v35 }
 0x41d   : > { %v5603_v43 = vpop.f32.mrf.mxu3 }
 0x41e   : > { %v14080_v10 = vadd.f32 %v5603_v43, %v5275_v12 }
 0x41f   : > { %v5403_v34 = vpop.f32.mrf.mxu2  ;;  %v4747_v61 = vpop.f32.mrf.mxu0 }
 0x420   : > { %16451 = vst [vmem:[#allocation34_spill] sm:$0xff] %v14080_v10  ;;  %v14082_v17 = vadd.f32 %v5403_v34, %v5075_v16  ;;  %v5076_v58 = vpop.f32.mrf.mxu1  ;;  %v9063_v16 = vor.u32 %v11712_v20, %v9060_v8  ;;  %v9727_v34 = vor.u32 %v11879_v15, %v9724_v62  ;;  %v11889_v62 = vld [vmem:[%s13564_s24 + $0x718] sm:$0xf0] }
 0x421   : > { %v5077_v38 = vadd.f32 %v5076_v58, %v4747_v61  ;;  %v9731_v61 = vor.u32 %v11883_v49, %v9730_v24  ;;  %v5280_v58 = vadd.f32 %v13936_v53, %v13772_v23  ;;  %v5282_v23 = vadd.f32 %v13948_v39, %v13787_v47  ;;  %v9750_v53 = vld [vmem:[%s13564_s24 + $0x700] sm:$0xf]  ;;  %v11886_v24 = vld [vmem:[%s13564_s24 + $0x704] sm:$0xf]  ;;  %v11719_v49 = vld [vmem:[%s13564_s24 + $0x1cc] sm:$0xf] }
 0x425   : > { %v5605_v48 = vpop.f32.mrf.mxu3 }
 0x426   : > { %v14094_v11 = vadd.f32 %v5605_v48, %v5277_v50  ;;  %v9088_v48 = vld [vmem:[%s13564_s24 + $0x1e4] sm:$0xf0] }
 0x427   : > { %v5405_v35 = vpop.f32.mrf.mxu2  ;;  %v4750_v43 = vpop.f32.mrf.mxu0 }
 0x428   : > { %16452 = vst [vmem:[#allocation35_spill] sm:$0xff] %v14094_v11  ;;  %v14096_v12 = vadd.f32 %v5405_v35, %v5077_v38  ;;  %v5079_v5 = vpop.f32.mrf.mxu1  ;;  %v9752_v35 = vld [vmem:[%s13564_s24 + $0x71c] sm:$0xf0] }
 0x429   : > { %v5080_v1 = vadd.f32 %v5079_v5, %v4750_v43  ;;  %v9751_v5 = vor.u32 %v11889_v62, %v9750_v53 }
 0x42a   : > { %4789 = vmatmul.bf16.gmra.mxu0 %v9723_v21  ;;  %5656 = vmatmul.bf16.gmra.mxu3 %v9063_v16  ;;  %v9758_v21 = vld [vmem:[%s13564_s24 + $0x708] sm:$0xf]  ;;  %v11890_v16 = vld [vmem:[%s13564_s24 + $0x720] sm:$0xf0] }
 0x42b   : > { %5118 = vmatmul.bf16.gmra.mxu1 %v9727_v34  ;;  %v9759_v47 = vor.u32 %v11890_v16, %v9758_v21  ;;  %v11893_v21 = vld [vmem:[%s13564_s24 + $0x73c] sm:$0xf]  ;;  %v11726_v16 = vld [vmem:[%s13564_s24 + $0x204] sm:$0xf] }
 0x42c   : > { %5447 = vmatmul.bf16.gmra.mxu2 %v9731_v61 }
 0x42d   : > { %v5608_v38 = vpop.f32.mrf.mxu3 }
 0x42e   : > { %v14100_v31 = vadd.f32 %v5608_v38, %v5280_v58 }
 0x42f   : > { %v5408_v50 = vpop.f32.mrf.mxu2  ;;  %v4752_v15 = vpop.f32.mrf.mxu0 }
 0x430   : > { %16453 = vst [vmem:[#allocation36_spill] sm:$0xff] %v14100_v31  ;;  %v14102_v26 = vadd.f32 %v5408_v50, %v5080_v1  ;;  %v5081_v20 = vpop.f32.mrf.mxu1  ;;  %v9091_v1 = vor.u32 %v11719_v49, %v9088_v48  ;;  %v9755_v50 = vor.u32 %v11886_v24, %v9752_v35  ;;  %v9778_v48 = vld [vmem:[%s13564_s24 + $0x738] sm:$0xf]  ;;  %v11896_v35 = vld [vmem:[%s13564_s24 + $0x750] sm:$0xf0] }
 0x431   : > { %v5082_v8 = vadd.f32 %v5081_v20, %v4752_v15 }
 0x435   : > { %v5610_v43 = vpop.f32.mrf.mxu3 }
 0x436   : > { %v14114_v61 = vadd.f32 %v5610_v43, %v5282_v23  ;;  %v9116_v43 = vld [vmem:[%s13564_s24 + $0x21c] sm:$0xf0] }
 0x437   : > { %v5410_v34 = vpop.f32.mrf.mxu2  ;;  %v4755_v38 = vpop.f32.mrf.mxu0 }
 0x438   : > { %16454 = vst [vmem:[#allocation37_spill] sm:$0xff] %v14114_v61  ;;  %v14116_v58 = vadd.f32 %v5410_v34, %v5082_v8  ;;  %v5084_v39 = vpop.f32.mrf.mxu1  ;;  %v9780_v34 = vld [vmem:[%s13564_s24 + $0x754] sm:$0xf0] }
 0x439   : > { %v5085_v15 = vadd.f32 %v5084_v39, %v4755_v38  ;;  %v9119_v39 = vor.u32 %v11726_v16, %v9116_v43 }
 0x43a   : > { %4794 = vmatmul.bf16.gmra.mxu0 %v9751_v5  ;;  %5661 = vmatmul.bf16.gmra.mxu3 %v9091_v1  ;;  %v9786_v5 = vld [vmem:[%s13564_s24 + $0x740] sm:$0xf]  ;;  %v11897_v1 = vld [vmem:[%s13564_s24 + $0x758] sm:$0xf0] }
 0x43b   : > { %5123 = vmatmul.bf16.gmra.mxu1 %v9755_v50 }
 0x43c   : > { %5452 = vmatmul.bf16.gmra.mxu2 %v9759_v47 }
 0x43d   : > { %v5622_v20 = vpop.f32.mrf.mxu3 }
 0x43e   : > { %v14119_v23 = vadd.f32 %v5622_v20, %v13653_v9  ;;  %v9779_v9 = vor.u32 %v11896_v35, %v9778_v48 }
 0x43f   : > { %v5413_v8 = vpop.f32.mrf.mxu2  ;;  %v4757_v62 = vpop.f32.mrf.mxu0 }
 0x440   : > { %v14121_v53 = vadd.f32 %v5413_v8, %v5085_v15  ;;  %v5086_v24 = vpop.f32.mrf.mxu1  ;;  %v9783_v8 = vor.u32 %v11893_v21, %v9780_v34  ;;  %v9806_v34 = vld [vmem:[%s13564_s24 + $0x770] sm:$0xf] }
 0x441   : > { %v5087_v49 = vadd.f32 %v5086_v24, %v4757_v62  ;;  %v9787_v62 = vor.u32 %v11897_v1, %v9786_v5  ;;  %v11903_v5 = vld [vmem:[%s13564_s24 + $0x788] sm:$0xf0]  ;;  %v11900_v1 = vld [vmem:[%s13564_s24 + $0x774] sm:$0xf] }
 0x445   : > { %v5624_v38 = vpop.f32.mrf.mxu3 }
 0x446   : > { %v14132_v47 = vadd.f32 %v5624_v38, %v13671_v27  ;;  %v11733_v38 = vld [vmem:[%s13564_s24 + $0x23c] sm:$0xf] }
 0x447   : > { %v5415_v50 = vpop.f32.mrf.mxu2  ;;  %v4760_v20 = vpop.f32.mrf.mxu0 }
 0x448   : > { %v14134_v15 = vadd.f32 %v5415_v50, %v5087_v49  ;;  %v5089_v24 = vpop.f32.mrf.mxu1  ;;  %v9144_v50 = vld [vmem:[%s13564_s24 + $0x254] sm:$0xf0] }
 0x449   : > { %v5090_v61 = vadd.f32 %v5089_v24, %v4760_v20  ;;  %v11904_v20 = vld [vmem:[%s13564_s24 + $0x790] sm:$0xf0] }
 0x44a   : > { %4799 = vmatmul.bf16.gmra.mxu0 %v9779_v9  ;;  %5666 = vmatmul.bf16.gmra.mxu3 %v9119_v39  ;;  %v9808_v9 = vld [vmem:[%s13564_s24 + $0x78c] sm:$0xf0]  ;;  %v9814_v39 = vld [vmem:[%s13564_s24 + $0x778] sm:$0xf] }
 0x44b   : > { %5128 = vmatmul.bf16.gmra.mxu1 %v9783_v8 }
 0x44c   : > { %5457 = vmatmul.bf16.gmra.mxu2 %v9787_v62 }
 0x44d   : > { %v5627_v27 = vpop.f32.mrf.mxu3 }
 0x44e   : > { %v14137_v48 = vadd.f32 %v5627_v27, %v13678_v36  ;;  %v9807_v36 = vor.u32 %v11903_v5, %v9806_v34  ;;  %v9147_v27 = vor.u32 %v11733_v38, %v9144_v50 }
 0x44f   : > { %v5418_v49 = vpop.f32.mrf.mxu2  ;;  %v4762_v21 = vpop.f32.mrf.mxu0 }
 0x450   : > { %v14139_v35 = vadd.f32 %v5418_v49, %v5090_v61  ;;  %v5091_v16 = vpop.f32.mrf.mxu1 }
 0x451   : > { %v5092_v43 = vadd.f32 %v5091_v16, %v4762_v21  ;;  %v9811_v21 = vor.u32 %v11900_v1, %v9808_v9  ;;  %v9815_v16 = vor.u32 %v11904_v20, %v9814_v39  ;;  %v9834_v9 = vld [vmem:[%s13564_s24 + $0x7a8] sm:$0xf]  ;;  %v11907_v39 = vld [vmem:[%s13564_s24 + $0x7ac] sm:$0xf]  ;;  %v11740_v20 = vld [vmem:[%s13564_s24 + $0x274] sm:$0xf] }
 0x455   : > { %v5629_v8 = vpop.f32.mrf.mxu3 }
 0x456   : > { %v14150_v24 = vadd.f32 %v5629_v8, %v13690_v52  ;;  %v9172_v8 = vld [vmem:[%s13564_s24 + $0x28c] sm:$0xf0] }
 0x457   : > { %v5420_v62 = vpop.f32.mrf.mxu2  ;;  %v4765_v49 = vpop.f32.mrf.mxu0 }
 0x458   : > { %v14152_v61 = vadd.f32 %v5420_v62, %v5092_v43  ;;  %v5094_v11 = vpop.f32.mrf.mxu1  ;;  %v9836_v62 = vld [vmem:[%s13564_s24 + $0x7c4] sm:$0xf0] }
 0x459   : > { %v5095_v2 = vadd.f32 %v5094_v11, %v4765_v49  ;;  %v11910_v11 = vld [vmem:[%s13564_s24 + $0x7c0] sm:$0xf0] }
 0x45a   : > { %4804 = vmatmul.bf16.gmra.mxu0 %v9807_v36  ;;  %5671 = vmatmul.bf16.gmra.mxu3 %v9147_v27  ;;  %v9842_v36 = vld [vmem:[%s13564_s24 + $0x7b0] sm:$0xf]  ;;  %v11911_v27 = vld [vmem:[%s13564_s24 + $0x7c8] sm:$0xf0] }
 0x45b   : > { %5133 = vmatmul.bf16.gmra.mxu1 %v9811_v21 }
 0x45c   : > { %5462 = vmatmul.bf16.gmra.mxu2 %v9815_v16 }
 0x45d   : > { %v5632_v52 = vpop.f32.mrf.mxu3 }
 0x45e   : > { %v14155_v34 = vadd.f32 %v5632_v52, %v13694_v60  ;;  %v9835_v60 = vor.u32 %v11910_v11, %v9834_v9  ;;  %v9175_v52 = vor.u32 %v11740_v20, %v9172_v8 }
 0x45f   : > { %v5423_v43 = vpop.f32.mrf.mxu2  ;;  %v4767_v1 = vpop.f32.mrf.mxu0 }
 0x460   : > { %v14157_v5 = vadd.f32 %v5423_v43, %v5095_v2  ;;  %v5096_v38 = vpop.f32.mrf.mxu1 }
 0x461   : > { %v5097_v50 = vadd.f32 %v5096_v38, %v4767_v1  ;;  %v9839_v1 = vor.u32 %v11907_v39, %v9836_v62  ;;  %v9843_v38 = vor.u32 %v11911_v27, %v9842_v36  ;;  %v9862_v62 = vld [vmem:[%s13564_s24 + $0x7e0] sm:$0xf]  ;;  %v11914_v36 = vld [vmem:[%s13564_s24 + $0x7e4] sm:$0xf]  ;;  %v11747_v27 = vld [vmem:[%s13564_s24 + $0x2ac] sm:$0xf] }
 0x465   : > { %v5634_v49 = vpop.f32.mrf.mxu3 }
 0x466   : > { %v14168_v16 = vadd.f32 %v5634_v49, %v13706_v14  ;;  %v9200_v49 = vld [vmem:[%s13564_s24 + $0x2c4] sm:$0xf0] }
 0x467   : > { %v5425_v21 = vpop.f32.mrf.mxu2  ;;  %v4770_v43 = vpop.f32.mrf.mxu0 }
 0x468   : > { %16455 = vst [vmem:[#allocation38_spill] sm:$0xff] %v14168_v16  ;;  %v14170_v2 = vadd.f32 %v5425_v21, %v5097_v50  ;;  %v5099_v56 = vpop.f32.mrf.mxu1  ;;  %v9864_v21 = vld [vmem:[%s13564_s24 + $0x7fc] sm:$0xf0] }
 0x469   : > { %v5100_v29 = vadd.f32 %v5099_v56, %v4770_v43  ;;  %v11917_v56 = vld [vmem:[%s13564_s24 + $0x7f8] sm:$0xf0]  ;;  %v9867_v33 = vor.u32 %v11914_v36, %v9864_v21  ;;  %v12158_v21 = vld [vmem:[%s16364_s1 + $0x180] sm:$0xff] }
 0x46a   : > { %4809 = vmatmul.bf16.gmra.mxu0 %v9835_v60  ;;  %5676 = vmatmul.bf16.gmra.mxu3 %v9175_v52  ;;  %v9870_v60 = vld [vmem:[%s13564_s24 + $0x7e8] sm:$0xf]  ;;  %v11918_v52 = vld [vmem:[%s13564_s24 + $0x800] sm:$0xf0] }
 0x46b   : > { %5138 = vmatmul.bf16.gmra.mxu1 %v9839_v1  ;;  %6607 = vmatpush.bf16.msrb.mxu2 %v12158_v21  ;;  %v12153_v21 = vld [vmem:[%s16364_s1 + $0x158] sm:$0xff] }
 0x46c   : > { %5467 = vmatmul.bf16.gmra.mxu2 %v9843_v38  ;;  %6275 = vmatpush.bf16.msrb.mxu1 %v12153_v21 }
 0x46d   : > { %v5637_v14 = vpop.f32.mrf.mxu3 }
 0x46e   : > { %v14173_v9 = vadd.f32 %v5637_v14, %v13710_v22  ;;  %v9863_v22 = vor.u32 %v11917_v56, %v9862_v62  ;;  %v9203_v14 = vor.u32 %v11747_v27, %v9200_v49 }
 0x46f   : > { %v5428_v50 = vpop.f32.mrf.mxu2  ;;  %v4772_v39 = vpop.f32.mrf.mxu0 }
 0x470   : > { %16456 = vst [vmem:[#allocation39_spill] sm:$0xff] %v14173_v9  ;;  %v14175_v11 = vadd.f32 %v5428_v50, %v5100_v29  ;;  %v5101_v20 = vpop.f32.mrf.mxu1 }
 0x471   : > { %v5102_v8 = vadd.f32 %v5101_v20, %v4772_v39  ;;  %v9871_v39 = vor.u32 %v11918_v52, %v9870_v60  ;;  %v9890_v60 = vld [vmem:[%s13564_s24 + $0x818] sm:$0xf]  ;;  %v11924_v52 = vld [vmem:[%s13564_s24 + $0x830] sm:$0xf0] }
 0x475   : > { %v5639_v43 = vpop.f32.mrf.mxu3 }
 0x476   : > { %v14186_v38 = vadd.f32 %v5639_v43, %v13722_v42  ;;  %v11921_v43 = vld [vmem:[%s13564_s24 + $0x81c] sm:$0xf] }
 0x477   : > { %v5430_v1 = vpop.f32.mrf.mxu2  ;;  %v4775_v50 = vpop.f32.mrf.mxu0 }
 0x478   : > { %16457 = vst [vmem:[#allocation40_spill] sm:$0xff] %v14186_v38  ;;  %v14188_v29 = vadd.f32 %v5430_v1, %v5102_v8  ;;  %v5104_v20 = vpop.f32.mrf.mxu1  ;;  %v11754_v1 = vld [vmem:[%s13564_s24 + $0x2e4] sm:$0xf] }
 0x479   : > { %v5105_v30 = vadd.f32 %v5104_v20, %v4775_v50 }
 0x47a   : > { %4814 = vmatmul.bf16.gmra.mxu0 %v9863_v22  ;;  %5681 = vmatmul.bf16.gmra.mxu3 %v9203_v14  ;;  %v9898_v22 = vld [vmem:[%s13564_s24 + $0x820] sm:$0xf]  ;;  %v11925_v14 = vld [vmem:[%s13564_s24 + $0x838] sm:$0xf0] }
 0x47b   : > { %5143 = vmatmul.bf16.gmra.mxu1 %v9867_v33  ;;  %v12145_v33 = vld [vmem:[%s16364_s1 + $0x118] sm:$0xff]  ;;  %v9899_v31 = vor.u32 %v11925_v14, %v9898_v22  ;;  %v11931_v22 = vld [vmem:[%s13564_s24 + $0x868] sm:$0xf0]  ;;  %v11928_v14 = vld [vmem:[%s13564_s24 + $0x854] sm:$0xf] }
 0x47c   : > { %5472 = vmatmul.bf16.gmra.mxu2 %v9871_v39  ;;  %5946 = vmatpush.bf16.msrb.mxu0 %v12145_v33 }
 0x47d   : > { %v5642_v42 = vpop.f32.mrf.mxu3 }
 0x47e   : > { %v14191_v8 = vadd.f32 %v5642_v42, %v13726_v51  ;;  %v9228_v51 = vld [vmem:[%s13564_s24 + $0x2fc] sm:$0xf0]  ;;  %v9891_v42 = vor.u32 %v11924_v52, %v9890_v60 }
 0x47f   : > { %v5433_v62 = vpop.f32.mrf.mxu2  ;;  %v4777_v36 = vpop.f32.mrf.mxu0 }
 0x480   : > { %16458 = vst [vmem:[#allocation41_spill] sm:$0xff] %v14191_v8  ;;  %v14193_v56 = vadd.f32 %v5433_v62, %v5105_v30  ;;  %v5106_v27 = vpop.f32.mrf.mxu1  ;;  %v9892_v30 = vld [vmem:[%s13564_s24 + $0x834] sm:$0xf0]  ;;  %v9231_v62 = vor.u32 %v11754_v1, %v9228_v51 }
 0x481   : > { %v5107_v49 = vadd.f32 %v5106_v27, %v4777_v36  ;;  %v9895_v13 = vor.u32 %v11921_v43, %v9892_v30  ;;  %v9918_v30 = vld [vmem:[%s13564_s24 + $0x850] sm:$0xf] }
 0x485   : > { %v5644_v50 = vpop.f32.mrf.mxu3 }
 0x486   : > { %v14210_v20 = vadd.f32 %v5644_v50, %v13738_v6  ;;  %v11761_v50 = vld [vmem:[%s13564_s24 + $0x31c] sm:$0xf] }
 0x487   : > { %v5435_v39 = vpop.f32.mrf.mxu2  ;;  %v4780_v27 = vpop.f32.mrf.mxu0 }
 0x488   : > { %16459 = vst [vmem:[#allocation42_spill] sm:$0xff] %v14210_v20  ;;  %v14212_v36 = vadd.f32 %v5435_v39, %v5107_v49  ;;  %v5109_v33 = vpop.f32.mrf.mxu1  ;;  %v9256_v39 = vld [vmem:[%s13564_s24 + $0x334] sm:$0xf0] }
 0x489   : > { %v5110_v10 = vadd.f32 %v5109_v33, %v4780_v27  ;;  %v9259_v33 = vor.u32 %v11761_v50, %v9256_v39 }
 0x48a   : > { %4819 = vmatmul.bf16.gmra.mxu0 %v9891_v42  ;;  %5686 = vmatmul.bf16.gmra.mxu3 %v9231_v62  ;;  %v9920_v42 = vld [vmem:[%s13564_s24 + $0x86c] sm:$0xf0]  ;;  %v9926_v62 = vld [vmem:[%s13564_s24 + $0x858] sm:$0xf] }
 0x48b   : > { %5148 = vmatmul.bf16.gmra.mxu1 %v9895_v13  ;;  %v11932_v13 = vld [vmem:[%s13564_s24 + $0x870] sm:$0xf0] }
 0x48c   : > { %5477 = vmatmul.bf16.gmra.mxu2 %v9899_v31 }
 0x48d   : > { %v5647_v6 = vpop.f32.mrf.mxu3 }
 0x48e   : > { %v14218_v60 = vadd.f32 %v5647_v6, %v13742_v18  ;;  %v9919_v18 = vor.u32 %v11931_v22, %v9918_v30 }
 0x48f   : > { %v5438_v49 = vpop.f32.mrf.mxu2  ;;  %v4782_v43 = vpop.f32.mrf.mxu0 }
 0x490   : > { %16460 = vst [vmem:[#allocation43_spill] sm:$0xff] %v14218_v60  ;;  %v14220_v52 = vadd.f32 %v5438_v49, %v5110_v10  ;;  %v5111_v1 = vpop.f32.mrf.mxu1  ;;  %v9923_v49 = vor.u32 %v11928_v14, %v9920_v42  ;;  %v9946_v42 = vld [vmem:[%s13564_s24 + $0x888] sm:$0xf] }
 0x491   : > { %v5112_v51 = vadd.f32 %v5111_v1, %v4782_v43  ;;  %v9927_v43 = vor.u32 %v11932_v13, %v9926_v62  ;;  %v11938_v62 = vld [vmem:[%s13564_s24 + $0x8a0] sm:$0xf0]  ;;  %v11935_v13 = vld [vmem:[%s13564_s24 + $0x88c] sm:$0xf] }
 0x495   : > { %v5649_v27 = vpop.f32.mrf.mxu3 }
 0x496   : > { %v14231_v21 = vadd.f32 %v5649_v27, %v13754_v41  ;;  %v11768_v27 = vld [vmem:[%s13564_s24 + $0x354] sm:$0xf] }
 0x497   : > { %v5440_v31 = vpop.f32.mrf.mxu2  ;;  %v4785_v6 = vpop.f32.mrf.mxu0 }
 0x498   : > { %16461 = vst [vmem:[#allocation44_spill] sm:$0xff] %v14231_v21  ;;  %v14233_v10 = vadd.f32 %v5440_v31, %v5112_v51  ;;  %v5114_v1 = vpop.f32.mrf.mxu1  ;;  %v9284_v31 = vld [vmem:[%s13564_s24 + $0x36c] sm:$0xf0] }
 0x499   : > { %v5115_v63 = vadd.f32 %v5114_v1, %v4785_v6  ;;  %v11939_v6 = vld [vmem:[%s13564_s24 + $0x8a8] sm:$0xf0]  ;;  %v16463_v1 = vld [vmem:[#allocation3_spill] sm:$0xff] }
 0x49a   : > { %4824 = vmatmul.bf16.gmra.mxu0 %v9919_v18  ;;  %5691 = vmatmul.bf16.gmra.mxu3 %v9259_v33  ;;  %v9948_v18 = vld [vmem:[%s13564_s24 + $0x8a4] sm:$0xf0]  ;;  %v9954_v33 = vld [vmem:[%s13564_s24 + $0x890] sm:$0xf] }
 0x49b   : > { %5153 = vmatmul.bf16.gmra.mxu1 %v9923_v49 }
 0x49c   : > { %5482 = vmatmul.bf16.gmra.mxu2 %v9927_v43 }
 0x49d   : > { %v5652_v41 = vpop.f32.mrf.mxu3 }
 0x49e   : > { %v14236_v30 = vadd.f32 %v5652_v41, %v13758_v54  ;;  %v9947_v54 = vor.u32 %v11938_v62, %v9946_v42  ;;  %v9287_v41 = vor.u32 %v11768_v27, %v9284_v31  ;;  %v16465_v62 = vld [vmem:[#allocation4_spill] sm:$0xff] }
 0x49f   : > { %v5443_v51 = vpop.f32.mrf.mxu2  ;;  %v4787_v14 = vpop.f32.mrf.mxu0 }
 0x4a0   : > { %16462 = vst [vmem:[#allocation45_spill] sm:$0xff] %v14236_v30  ;;  %v14238_v22 = vadd.f32 %v5443_v51, %v5115_v63  ;;  %v5116_v50 = vpop.f32.mrf.mxu1 }
 0x4a1   : > { %v5117_v39 = vadd.f32 %v5116_v50, %v4787_v14  ;;  %v9951_v14 = vor.u32 %v11935_v13, %v9948_v18  ;;  %v9955_v50 = vor.u32 %v11939_v6, %v9954_v33  ;;  %v9974_v6 = vld [vmem:[%s13564_s24 + $0x8c0] sm:$0xf] }
 0x4a5   : > { %v5654_v49 = vpop.f32.mrf.mxu3 }
 0x4a6   : > { %v14249_v45 = vadd.f32 %v5654_v49, %v16463_v1  ;;  %v11942_v49 = vld [vmem:[%s13564_s24 + $0x8c4] sm:$0xf]  ;;  %v9312_v1 = vld [vmem:[%s13564_s24 + $0x3a4] sm:$0xf0] }
 0x4a7   : > { %v5445_v43 = vpop.f32.mrf.mxu2  ;;  %v4790_v51 = vpop.f32.mrf.mxu0 }
 0x4a8   : > { %16464 = vst [vmem:[#allocation3_spill] sm:$0xff] %v14249_v45  ;;  %v14251_v63 = vadd.f32 %v5445_v43, %v5117_v39  ;;  %v5119_v44 = vpop.f32.mrf.mxu1  ;;  %v11775_v43 = vld [vmem:[%s13564_s24 + $0x38c] sm:$0xf] }
 0x4a9   : > { %v5120_v55 = vadd.f32 %v5119_v44, %v4790_v51  ;;  %v11945_v44 = vld [vmem:[%s13564_s24 + $0x8d8] sm:$0xf0]  ;;  %v11946_v51 = vld [vmem:[%s13564_s24 + $0x8e0] sm:$0xf0] }
 0x4aa   : > { %4829 = vmatmul.bf16.gmra.mxu0 %v9947_v54  ;;  %5696 = vmatmul.bf16.gmra.mxu3 %v9287_v41  ;;  %v9976_v54 = vld [vmem:[%s13564_s24 + $0x8dc] sm:$0xf0]  ;;  %v9982_v41 = vld [vmem:[%s13564_s24 + $0x8c8] sm:$0xf] }
 0x4ab   : > { %5158 = vmatmul.bf16.gmra.mxu1 %v9951_v14 }
 0x4ac   : > { %5487 = vmatmul.bf16.gmra.mxu2 %v9955_v50 }
 0x4ad   : > { %v5657_v42 = vpop.f32.mrf.mxu3 }
 0x4ae   : > { %v14254_v27 = vadd.f32 %v5657_v42, %v16465_v62  ;;  %v9975_v42 = vor.u32 %v11945_v44, %v9974_v6  ;;  %v9315_v62 = vor.u32 %v11775_v43, %v9312_v1  ;;  %v16469_v6 = vld [vmem:[#allocation6_spill] sm:$0xff] }
 0x4af   : > { %v5448_v39 = vpop.f32.mrf.mxu2  ;;  %v4792_v31 = vpop.f32.mrf.mxu0 }
 0x4b0   : > { %16466 = vst [vmem:[#allocation4_spill] sm:$0xff] %v14254_v27  ;;  %v14256_v13 = vadd.f32 %v5448_v39, %v5120_v55  ;;  %v5121_v18 = vpop.f32.mrf.mxu1 }
 0x4b1   : > { %v5122_v33 = vadd.f32 %v5121_v18, %v4792_v31  ;;  %v9979_v31 = vor.u32 %v11942_v49, %v9976_v54  ;;  %v9983_v18 = vor.u32 %v11946_v51, %v9982_v41  ;;  %v10002_v41 = vld [vmem:[%s13564_s24 + $0x8f8] sm:$0xf]  ;;  %v11949_v51 = vld [vmem:[%s13564_s24 + $0x8fc] sm:$0xf] }
 0x4b5   : > { %v5659_v14 = vpop.f32.mrf.mxu3 }
 0x4b6   : > { %v14267_v45 = vadd.f32 %v5659_v14, %v16467_v3  ;;  %v11782_v14 = vld [vmem:[%s13564_s24 + $0x3c4] sm:$0xf] }
 0x4b7   : > { %v5450_v50 = vpop.f32.mrf.mxu2  ;;  %v4795_v39 = vpop.f32.mrf.mxu0 }
 0x4b8   : > { %16468 = vst [vmem:[#allocation5_spill] sm:$0xff] %v14267_v45  ;;  %v14269_v55 = vadd.f32 %v5450_v50, %v5122_v33  ;;  %v5124_v27 = vpop.f32.mrf.mxu1  ;;  %v9340_v50 = vld [vmem:[%s13564_s24 + $0x3dc] sm:$0xf0] }
 0x4b9   : > { %v5125_v30 = vadd.f32 %v5124_v27, %v4795_v39  ;;  %v11952_v27 = vld [vmem:[%s13564_s24 + $0x910] sm:$0xf0]  ;;  %v11953_v39 = vld [vmem:[%s13564_s24 + $0x918] sm:$0xf0]  ;;  %v16471_v45 = vld [vmem:[#allocation7_spill] sm:$0xff] }
 0x4ba   : > { %4834 = vmatmul.bf16.gmra.mxu0 %v9975_v42  ;;  %5701 = vmatmul.bf16.gmra.mxu3 %v9315_v62  ;;  %v10004_v42 = vld [vmem:[%s13564_s24 + $0x914] sm:$0xf0]  ;;  %v10010_v62 = vld [vmem:[%s13564_s24 + $0x900] sm:$0xf] }
 0x4bb   : > { %5163 = vmatmul.bf16.gmra.mxu1 %v9979_v31 }
 0x4bc   : > { %5492 = vmatmul.bf16.gmra.mxu2 %v9983_v18 }
 0x4bd   : > { %v5662_v3 = vpop.f32.mrf.mxu3 }
 0x4be   : > { %v14272_v44 = vadd.f32 %v5662_v3, %v16469_v6  ;;  %v10003_v3 = vor.u32 %v11952_v27, %v10002_v41  ;;  %v9343_v6 = vor.u32 %v11782_v14, %v9340_v50  ;;  %v16473_v41 = vld [vmem:[#allocation8_spill] sm:$0xff] }
 0x4bf   : > { %v5453_v33 = vpop.f32.mrf.mxu2  ;;  %v4797_v43 = vpop.f32.mrf.mxu0 }
 0x4c0   : > { %16470 = vst [vmem:[#allocation6_spill] sm:$0xff] %v14272_v44  ;;  %v14274_v49 = vadd.f32 %v5453_v33, %v5125_v30  ;;  %v5126_v1 = vpop.f32.mrf.mxu1 }
 0x4c1   : > { %v5127_v54 = vadd.f32 %v5126_v1, %v4797_v43  ;;  %v10007_v43 = vor.u32 %v11949_v51, %v10004_v42  ;;  %v10011_v1 = vor.u32 %v11953_v39, %v10010_v62  ;;  %v10030_v62 = vld [vmem:[%s13564_s24 + $0x930] sm:$0xf]  ;;  %v11956_v39 = vld [vmem:[%s13564_s24 + $0x934] sm:$0xf] }
 0x4c5   : > { %v5664_v31 = vpop.f32.mrf.mxu3 }
 0x4c6   : > { %v14285_v21 = vadd.f32 %v5664_v31, %v16471_v45  ;;  %v11789_v31 = vld [vmem:[%s13564_s24 + $0x3fc] sm:$0xf] }
 0x4c7   : > { %v5455_v18 = vpop.f32.mrf.mxu2  ;;  %v4800_v33 = vpop.f32.mrf.mxu0 }
 0x4c8   : > { %16472 = vst [vmem:[#allocation7_spill] sm:$0xff] %v14285_v21  ;;  %v14287_v30 = vadd.f32 %v5455_v18, %v5127_v54  ;;  %v5129_v44 = vpop.f32.mrf.mxu1  ;;  %v9368_v18 = vld [vmem:[%s13564_s24 + $0x414] sm:$0xf0]  ;;  %v16475_v21 = vld [vmem:[#allocation9_spill] sm:$0xff] }
 0x4c9   : > { %v5130_v60 = vadd.f32 %v5129_v44, %v4800_v33  ;;  %v11959_v44 = vld [vmem:[%s13564_s24 + $0x948] sm:$0xf0]  ;;  %v11960_v33 = vld [vmem:[%s13564_s24 + $0x950] sm:$0xf0] }
 0x4ca   : > { %4839 = vmatmul.bf16.gmra.mxu0 %v10003_v3  ;;  %5706 = vmatmul.bf16.gmra.mxu3 %v9343_v6  ;;  %v10032_v3 = vld [vmem:[%s13564_s24 + $0x94c] sm:$0xf0]  ;;  %v10038_v6 = vld [vmem:[%s13564_s24 + $0x938] sm:$0xf] }
 0x4cb   : > { %5168 = vmatmul.bf16.gmra.mxu1 %v10007_v43 }
 0x4cc   : > { %5497 = vmatmul.bf16.gmra.mxu2 %v10011_v1 }
 0x4cd   : > { %v5667_v45 = vpop.f32.mrf.mxu3 }
 0x4ce   : > { %v14290_v27 = vadd.f32 %v5667_v45, %v16473_v41  ;;  %v10031_v45 = vor.u32 %v11959_v44, %v10030_v62  ;;  %v9371_v41 = vor.u32 %v11789_v31, %v9368_v18  ;;  %v16477_v62 = vld [vmem:[#allocation10_spill] sm:$0xff] }
 0x4cf   : > { %v5458_v54 = vpop.f32.mrf.mxu2  ;;  %v4802_v14 = vpop.f32.mrf.mxu0 }
 0x4d0   : > { %16474 = vst [vmem:[#allocation8_spill] sm:$0xff] %v14290_v27  ;;  %v14292_v51 = vadd.f32 %v5458_v54, %v5130_v60  ;;  %v5131_v50 = vpop.f32.mrf.mxu1 }
 0x4d1   : > { %v5132_v42 = vadd.f32 %v5131_v50, %v4802_v14  ;;  %v10035_v14 = vor.u32 %v11956_v39, %v10032_v3  ;;  %v10039_v50 = vor.u32 %v11960_v33, %v10038_v6  ;;  %v10058_v6 = vld [vmem:[%s13564_s24 + $0x968] sm:$0xf]  ;;  %v11963_v33 = vld [vmem:[%s13564_s24 + $0x96c] sm:$0xf] }
 0x4d5   : > { %v5669_v43 = vpop.f32.mrf.mxu3 }
 0x4d6   : > { %v14303_v20 = vadd.f32 %v5669_v43, %v16475_v21  ;;  %v11796_v43 = vld [vmem:[%s13564_s24 + $0x434] sm:$0xf] }
 0x4d7   : > { %v5460_v1 = vpop.f32.mrf.mxu2  ;;  %v4805_v54 = vpop.f32.mrf.mxu0 }
 0x4d8   : > { %16476 = vst [vmem:[#allocation9_spill] sm:$0xff] %v14303_v20  ;;  %v14305_v60 = vadd.f32 %v5460_v1, %v5132_v42  ;;  %v5134_v27 = vpop.f32.mrf.mxu1  ;;  %v9396_v1 = vld [vmem:[%s13564_s24 + $0x44c] sm:$0xf0]  ;;  %v16479_v20 = vld [vmem:[#allocation11_spill] sm:$0xff] }
 0x4d9   : > { %v5135_v8 = vadd.f32 %v5134_v27, %v4805_v54  ;;  %v11966_v27 = vld [vmem:[%s13564_s24 + $0x980] sm:$0xf0]  ;;  %v11967_v54 = vld [vmem:[%s13564_s24 + $0x988] sm:$0xf0] }
 0x4da   : > { %4844 = vmatmul.bf16.gmra.mxu0 %v10031_v45  ;;  %5711 = vmatmul.bf16.gmra.mxu3 %v9371_v41  ;;  %v10060_v45 = vld [vmem:[%s13564_s24 + $0x984] sm:$0xf0]  ;;  %v10066_v41 = vld [vmem:[%s13564_s24 + $0x970] sm:$0xf] }
 0x4db   : > { %5173 = vmatmul.bf16.gmra.mxu1 %v10035_v14 }
 0x4dc   : > { %5502 = vmatmul.bf16.gmra.mxu2 %v10039_v50 }
 0x4dd   : > { %v5672_v21 = vpop.f32.mrf.mxu3 }
 0x4de   : > { %v14308_v44 = vadd.f32 %v5672_v21, %v16477_v62  ;;  %v10059_v21 = vor.u32 %v11966_v27, %v10058_v6  ;;  %v9399_v62 = vor.u32 %v11796_v43, %v9396_v1  ;;  %v16482_v6 = vld [vmem:[#allocation12_spill] sm:$0xff] }
 0x4df   : > { %v5463_v42 = vpop.f32.mrf.mxu2  ;;  %v4807_v31 = vpop.f32.mrf.mxu0 }
 0x4e0   : > { %16478 = vst [vmem:[#allocation10_spill] sm:$0xff] %v14308_v44  ;;  %v14310_v39 = vadd.f32 %v5463_v42, %v5135_v8  ;;  %v5136_v18 = vpop.f32.mrf.mxu1  ;;  %v10063_v44 = vor.u32 %v11963_v33, %v10060_v45 }
 0x4e1   : > { %v5137_v3 = vadd.f32 %v5136_v18, %v4807_v31  ;;  %v10067_v31 = vor.u32 %v11967_v54, %v10066_v41  ;;  %v12144_v41 = vld [vmem:[%s16364_s1 + $0x110] sm:$0xff]  ;;  %v10086_v54 = vld [vmem:[%s13564_s24 + $0x9a0] sm:$0xf] }
 0x4e2   : > { %5947 = vmatpush.bf16.msrb.mxu0 %v12144_v41  ;;  %v12152_v41 = vld [vmem:[%s16364_s1 + $0x150] sm:$0xff] }
 0x4e3   : > { %6276 = vmatpush.bf16.msrb.mxu1 %v12152_v41  ;;  %v16490_v41 = vld [vmem:[#allocation15_spill] sm:$0xff] }
 0x4e5   : > { %v5674_v14 = vpop.f32.mrf.mxu3 }
 0x4e6   : > { %v14321_v38 = vadd.f32 %v5674_v14, %v16479_v20  ;;  %v11970_v14 = vld [vmem:[%s13564_s24 + $0x9a4] sm:$0xf] }
 0x4e7   : > { %v5465_v50 = vpop.f32.mrf.mxu2  ;;  %v4810_v42 = vpop.f32.mrf.mxu0 }
 0x4e8   : > { %16480 = vst [vmem:[#allocation11_spill] sm:$0xff] %v14321_v38  ;;  %v14323_v8 = vadd.f32 %v5465_v50, %v5137_v3  ;;  %v5139_v18 = vpop.f32.mrf.mxu1  ;;  %v11803_v50 = vld [vmem:[%s13564_s24 + $0x46c] sm:$0xf] }
 0x4e9   : > { %v5140_v9 = vadd.f32 %v5139_v18, %v4810_v42  ;;  %v10094_v42 = vld [vmem:[%s13564_s24 + $0x9a8] sm:$0xf] }
 0x4ea   : > { %16481 = vst [vmem:[#allocation46_spill] sm:$0xff] %v14323_v8  ;;  %4849 = vmatmul.bf16.gmra.mxu0 %v10059_v21  ;;  %5716 = vmatmul.bf16.gmra.mxu3 %v9399_v62  ;;  %v9424_v21 = vld [vmem:[%s13564_s24 + $0x484] sm:$0xf0]  ;;  %v10088_v62 = vld [vmem:[%s13564_s24 + $0x9bc] sm:$0xf0] }
 0x4eb   : > { %5178 = vmatmul.bf16.gmra.mxu1 %v10063_v44  ;;  %v11973_v44 = vld [vmem:[%s13564_s24 + $0x9b8] sm:$0xf0]  ;;  %v10091_v38 = vor.u32 %v11970_v14, %v10088_v62 }
 0x4ec   : > { %5507 = vmatmul.bf16.gmra.mxu2 %v10067_v31  ;;  %v11974_v31 = vld [vmem:[%s13564_s24 + $0x9c0] sm:$0xf0] }
 0x4ed   : > { %v5677_v20 = vpop.f32.mrf.mxu3 }
 0x4ee   : > { %v14326_v27 = vadd.f32 %v5677_v20, %v16482_v6  ;;  %v10087_v6 = vor.u32 %v11973_v44, %v10086_v54  ;;  %v16487_v44 = vld [vmem:[#allocation14_spill] sm:$0xff] }
 0x4ef   : > { %v5468_v3 = vpop.f32.mrf.mxu2  ;;  %v4812_v43 = vpop.f32.mrf.mxu0 }
 0x4f0   : > { %16483 = vst [vmem:[#allocation12_spill] sm:$0xff] %v14326_v27  ;;  %v14328_v33 = vadd.f32 %v5468_v3, %v5140_v9  ;;  %v5141_v1 = vpop.f32.mrf.mxu1  ;;  %v16485_v9 = vld [vmem:[#allocation13_spill] sm:$0xff] }
 0x4f1   : > { %v5142_v45 = vadd.f32 %v5141_v1, %v4812_v43  ;;  %v9427_v43 = vor.u32 %v11803_v50, %v9424_v21 }
 0x4f2   : > { %16484 = vst [vmem:[#allocation47_spill] sm:$0xff] %v14328_v33  ;;  %v10095_v33 = vor.u32 %v11974_v31, %v10094_v42  ;;  %v11980_v42 = vld [vmem:[%s13564_s24 + $0x9f0] sm:$0xf0]  ;;  %v11977_v31 = vld [vmem:[%s13564_s24 + $0x9dc] sm:$0xf] }
 0x4f5   : > { %v5679_v18 = vpop.f32.mrf.mxu3 }
 0x4f6   : > { %v14342_v3 = vadd.f32 %v5679_v18, %v16485_v9  ;;  %v11810_v18 = vld [vmem:[%s13564_s24 + $0x4a4] sm:$0xf]  ;;  %v10116_v9 = vld [vmem:[%s13564_s24 + $0x9f4] sm:$0xf0] }
 0x4f7   : > { %v5470_v20 = vpop.f32.mrf.mxu2  ;;  %v4815_v27 = vpop.f32.mrf.mxu0 }
 0x4f8   : > { %16486 = vst [vmem:[#allocation13_spill] sm:$0xff] %v14342_v3  ;;  %v14344_v1 = vadd.f32 %v5470_v20, %v5142_v45  ;;  %v5144_v8 = vpop.f32.mrf.mxu1  ;;  %v9452_v20 = vld [vmem:[%s13564_s24 + $0x4bc] sm:$0xf0] }
 0x4f9   : > { %v5145_v16 = vadd.f32 %v5144_v8, %v4815_v27  ;;  %v10114_v27 = vld [vmem:[%s13564_s24 + $0x9d8] sm:$0xf] }
 0x4fa   : > { %4854 = vmatmul.bf16.gmra.mxu0 %v10087_v6  ;;  %5721 = vmatmul.bf16.gmra.mxu3 %v9427_v43  ;;  %v10122_v6 = vld [vmem:[%s13564_s24 + $0x9e0] sm:$0xf] }
 0x4fb   : > { %5183 = vmatmul.bf16.gmra.mxu1 %v10091_v38  ;;  %v11981_v38 = vld [vmem:[%s13564_s24 + $0x9f8] sm:$0xf0] }
 0x4fc   : > { %5512 = vmatmul.bf16.gmra.mxu2 %v10095_v33 }
 0x4fd   : > { %v5682_v45 = vpop.f32.mrf.mxu3 }
 0x4fe   : > { %v14350_v14 = vadd.f32 %v5682_v45, %v16487_v44  ;;  %v10115_v45 = vor.u32 %v11980_v42, %v10114_v27  ;;  %v9455_v44 = vor.u32 %v11810_v18, %v9452_v20  ;;  %v16493_v42 = vld [vmem:[#allocation16_spill] sm:$0xff] }
 0x4ff   : > { %v5473_v54 = vpop.f32.mrf.mxu2  ;;  %v4817_v21 = vpop.f32.mrf.mxu0 }
 0x500   : > { %16488 = vst [vmem:[#allocation14_spill] sm:$0xff] %v14350_v14  ;;  %v14352_v50 = vadd.f32 %v5473_v54, %v5145_v16  ;;  %v5146_v62 = vpop.f32.mrf.mxu1 }
 0x501   : > { %v5147_v8 = vadd.f32 %v5146_v62, %v4817_v21  ;;  %v10119_v21 = vor.u32 %v11977_v31, %v10116_v9  ;;  %v10123_v62 = vor.u32 %v11981_v38, %v10122_v6  ;;  %v10142_v38 = vld [vmem:[%s13564_s24 + $0xa10] sm:$0xf] }
 0x502   : > { %16489 = vst [vmem:[#allocation48_spill] sm:$0xff] %v14352_v50 }
 0x505   : > { %v5684_v43 = vpop.f32.mrf.mxu3 }
 0x506   : > { %v14363_v3 = vadd.f32 %v5684_v43, %v16490_v41  ;;  %v11984_v43 = vld [vmem:[%s13564_s24 + $0xa14] sm:$0xf]  ;;  %v9480_v41 = vld [vmem:[%s13564_s24 + $0x4f4] sm:$0xf0] }
 0x507   : > { %v5475_v33 = vpop.f32.mrf.mxu2  ;;  %v4820_v54 = vpop.f32.mrf.mxu0 }
 0x508   : > { %16491 = vst [vmem:[#allocation15_spill] sm:$0xff] %v14363_v3  ;;  %v14365_v16 = vadd.f32 %v5475_v33, %v5147_v8  ;;  %v5149_v14 = vpop.f32.mrf.mxu1  ;;  %v11817_v33 = vld [vmem:[%s13564_s24 + $0x4dc] sm:$0xf]  ;;  %v16496_v3 = vld [vmem:[#allocation17_spill] sm:$0xff] }
 0x509   : > { %v5150_v50 = vadd.f32 %v5149_v14, %v4820_v54  ;;  %v11987_v14 = vld [vmem:[%s13564_s24 + $0xa28] sm:$0xf0]  ;;  %v11988_v54 = vld [vmem:[%s13564_s24 + $0xa30] sm:$0xf0] }
 0x50a   : > { %16492 = vst [vmem:[#allocation49_spill] sm:$0xff] %v14365_v16  ;;  %4859 = vmatmul.bf16.gmra.mxu0 %v10115_v45  ;;  %5726 = vmatmul.bf16.gmra.mxu3 %v9455_v44  ;;  %v10144_v45 = vld [vmem:[%s13564_s24 + $0xa2c] sm:$0xf0]  ;;  %v10150_v44 = vld [vmem:[%s13564_s24 + $0xa18] sm:$0xf] }
 0x50b   : > { %5188 = vmatmul.bf16.gmra.mxu1 %v10119_v21 }
 0x50c   : > { %5517 = vmatmul.bf16.gmra.mxu2 %v10123_v62 }
 0x50d   : > { %v5687_v27 = vpop.f32.mrf.mxu3 }
 0x50e   : > { %v14368_v18 = vadd.f32 %v5687_v27, %v16493_v42  ;;  %v10143_v27 = vor.u32 %v11987_v14, %v10142_v38  ;;  %v9483_v42 = vor.u32 %v11817_v33, %v9480_v41  ;;  %v16499_v38 = vld [vmem:[#allocation18_spill] sm:$0xff] }
 0x50f   : > { %v5478_v8 = vpop.f32.mrf.mxu2  ;;  %v4822_v20 = vpop.f32.mrf.mxu0 }
 0x510   : > { %16494 = vst [vmem:[#allocation16_spill] sm:$0xff] %v14368_v18  ;;  %v14370_v31 = vadd.f32 %v5478_v8, %v5150_v50  ;;  %v5151_v9 = vpop.f32.mrf.mxu1 }
 0x511   : > { %v5152_v6 = vadd.f32 %v5151_v9, %v4822_v20  ;;  %v10147_v20 = vor.u32 %v11984_v43, %v10144_v45  ;;  %v10151_v9 = vor.u32 %v11988_v54, %v10150_v44  ;;  %v10170_v44 = vld [vmem:[%s13564_s24 + $0xa48] sm:$0xf]  ;;  %v11991_v54 = vld [vmem:[%s13564_s24 + $0xa4c] sm:$0xf] }
 0x512   : > { %16495 = vst [vmem:[#allocation50_spill] sm:$0xff] %v14370_v31 }
 0x515   : > { %v5689_v21 = vpop.f32.mrf.mxu3 }
 0x516   : > { %v14381_v16 = vadd.f32 %v5689_v21, %v16496_v3  ;;  %v11824_v21 = vld [vmem:[%s13564_s24 + $0x514] sm:$0xf] }
 0x517   : > { %v5480_v62 = vpop.f32.mrf.mxu2  ;;  %v4825_v8 = vpop.f32.mrf.mxu0 }
 0x518   : > { %16497 = vst [vmem:[#allocation17_spill] sm:$0xff] %v14381_v16  ;;  %v14383_v50 = vadd.f32 %v5480_v62, %v5152_v6  ;;  %v5154_v18 = vpop.f32.mrf.mxu1  ;;  %v9508_v62 = vld [vmem:[%s13564_s24 + $0x52c] sm:$0xf0]  ;;  %v16502_v16 = vld [vmem:[#allocation19_spill] sm:$0xff] }
 0x519   : > { %v5155_v31 = vadd.f32 %v5154_v18, %v4825_v8  ;;  %v11994_v18 = vld [vmem:[%s13564_s24 + $0xa60] sm:$0xf0]  ;;  %v11995_v8 = vld [vmem:[%s13564_s24 + $0xa68] sm:$0xf0] }
 0x51a   : > { %16498 = vst [vmem:[#allocation51_spill] sm:$0xff] %v14383_v50  ;;  %4864 = vmatmul.bf16.gmra.mxu0 %v10143_v27  ;;  %5731 = vmatmul.bf16.gmra.mxu3 %v9483_v42  ;;  %v10172_v27 = vld [vmem:[%s13564_s24 + $0xa64] sm:$0xf0]  ;;  %v10178_v42 = vld [vmem:[%s13564_s24 + $0xa50] sm:$0xf] }
 0x51b   : > { %5193 = vmatmul.bf16.gmra.mxu1 %v10147_v20 }
 0x51c   : > { %5522 = vmatmul.bf16.gmra.mxu2 %v10151_v9 }
 0x51d   : > { %v5692_v3 = vpop.f32.mrf.mxu3 }
 0x51e   : > { %v14386_v14 = vadd.f32 %v5692_v3, %v16499_v38  ;;  %v10171_v3 = vor.u32 %v11994_v18, %v10170_v44  ;;  %v9511_v38 = vor.u32 %v11824_v21, %v9508_v62  ;;  %v16504_v44 = vld [vmem:[#allocation20_spill] sm:$0xff] }
 0x51f   : > { %v5483_v6 = vpop.f32.mrf.mxu2  ;;  %v4827_v33 = vpop.f32.mrf.mxu0 }
 0x520   : > { %16500 = vst [vmem:[#allocation18_spill] sm:$0xff] %v14386_v14  ;;  %v14388_v43 = vadd.f32 %v5483_v6, %v5155_v31  ;;  %v5156_v41 = vpop.f32.mrf.mxu1 }
 0x521   : > { %v5157_v45 = vadd.f32 %v5156_v41, %v4827_v33  ;;  %v10175_v33 = vor.u32 %v11991_v54, %v10172_v27  ;;  %v10179_v41 = vor.u32 %v11995_v8, %v10178_v42  ;;  %v10198_v42 = vld [vmem:[%s13564_s24 + $0xa80] sm:$0xf]  ;;  %v11998_v8 = vld [vmem:[%s13564_s24 + $0xa84] sm:$0xf] }
 0x522   : > { %16501 = vst [vmem:[#allocation52_spill] sm:$0xff] %v14388_v43 }
 0x525   : > { %v5694_v20 = vpop.f32.mrf.mxu3 }
 0x526   : > { %v14399_v50 = vadd.f32 %v5694_v20, %v16502_v16  ;;  %v11831_v20 = vld [vmem:[%s13564_s24 + $0x54c] sm:$0xf] }
 0x527   : > { %v5485_v9 = vpop.f32.mrf.mxu2  ;;  %v4830_v6 = vpop.f32.mrf.mxu0 }
 0x528   : > { %16503 = vst [vmem:[#allocation19_spill] sm:$0xff] %v14399_v50  ;;  %v14401_v31 = vadd.f32 %v5485_v9, %v5157_v45  ;;  %v5159_v14 = vpop.f32.mrf.mxu1  ;;  %v9536_v9 = vld [vmem:[%s13564_s24 + $0x564] sm:$0xf0] }
 0x529   : > { %v5160_v43 = vadd.f32 %v5159_v14, %v4830_v6  ;;  %v12001_v14 = vld [vmem:[%s13564_s24 + $0xa98] sm:$0xf0]  ;;  %v12002_v6 = vld [vmem:[%s13564_s24 + $0xaa0] sm:$0xf0] }
 0x52a   : > { %4869 = vmatmul.bf16.gmra.mxu0 %v10171_v3  ;;  %5736 = vmatmul.bf16.gmra.mxu3 %v9511_v38  ;;  %v10200_v3 = vld [vmem:[%s13564_s24 + $0xa9c] sm:$0xf0]  ;;  %v10206_v38 = vld [vmem:[%s13564_s24 + $0xa88] sm:$0xf] }
 0x52b   : > { %5198 = vmatmul.bf16.gmra.mxu1 %v10175_v33 }
 0x52c   : > { %5527 = vmatmul.bf16.gmra.mxu2 %v10179_v41 }
 0x52d   : > { %v5697_v16 = vpop.f32.mrf.mxu3 }
 0x52e   : > { %v14404_v18 = vadd.f32 %v5697_v16, %v16504_v44  ;;  %v10199_v16 = vor.u32 %v12001_v14, %v10198_v42  ;;  %v9539_v44 = vor.u32 %v11831_v20, %v9536_v9  ;;  %v16508_v42 = vld [vmem:[#allocation22_spill] sm:$0xff] }
 0x52f   : > { %v5488_v45 = vpop.f32.mrf.mxu2  ;;  %v4832_v21 = vpop.f32.mrf.mxu0 }
 0x530   : > { %16505 = vst [vmem:[#allocation20_spill] sm:$0xff] %v14404_v18  ;;  %v14406_v54 = vadd.f32 %v5488_v45, %v5160_v43  ;;  %v5161_v62 = vpop.f32.mrf.mxu1 }
 0x531   : > { %v5162_v27 = vadd.f32 %v5161_v62, %v4832_v21  ;;  %v10203_v21 = vor.u32 %v11998_v8, %v10200_v3  ;;  %v10207_v62 = vor.u32 %v12002_v6, %v10206_v38  ;;  %v10226_v38 = vld [vmem:[%s13564_s24 + $0xab8] sm:$0xf]  ;;  %v12005_v6 = vld [vmem:[%s13564_s24 + $0xabc] sm:$0xf] }
 0x532   : > { %16506 = vst [vmem:[#allocation53_spill] sm:$0xff] %v14406_v54 }
 0x535   : > { %v5699_v33 = vpop.f32.mrf.mxu3 }
 0x536   : > { %v14417_v50 = vadd.f32 %v5699_v33, %v13950_v28  ;;  %v11838_v33 = vld [vmem:[%s13564_s24 + $0x584] sm:$0xf] }
 0x537   : > { %v5490_v41 = vpop.f32.mrf.mxu2  ;;  %v4835_v45 = vpop.f32.mrf.mxu0 }
 0x538   : > { %16507 = vst [vmem:[#allocation54_spill] sm:$0xff] %v14417_v50  ;;  %v14419_v43 = vadd.f32 %v5490_v41, %v5162_v27  ;;  %v5164_v18 = vpop.f32.mrf.mxu1  ;;  %v9564_v41 = vld [vmem:[%s13564_s24 + $0x59c] sm:$0xf0] }
 0x539   : > { %v5165_v54 = vadd.f32 %v5164_v18, %v4835_v45  ;;  %v12008_v18 = vld [vmem:[%s13564_s24 + $0xad0] sm:$0xf0]  ;;  %v12009_v45 = vld [vmem:[%s13564_s24 + $0xad8] sm:$0xf0] }
 0x53a   : > { %4874 = vmatmul.bf16.gmra.mxu0 %v10199_v16  ;;  %5741 = vmatmul.bf16.gmra.mxu3 %v9539_v44  ;;  %v10228_v16 = vld [vmem:[%s13564_s24 + $0xad4] sm:$0xf0]  ;;  %v10234_v44 = vld [vmem:[%s13564_s24 + $0xac0] sm:$0xf] }
 0x53b   : > { %5203 = vmatmul.bf16.gmra.mxu1 %v10203_v21 }
 0x53c   : > { %5532 = vmatmul.bf16.gmra.mxu2 %v10207_v62 }
 0x53d   : > { %v5702_v28 = vpop.f32.mrf.mxu3 }
 0x53e   : > { %v14422_v14 = vadd.f32 %v5702_v28, %v16508_v42  ;;  %v10227_v28 = vor.u32 %v12008_v18, %v10226_v38  ;;  %v9567_v42 = vor.u32 %v11838_v33, %v9564_v41 }
 0x53f   : > { %v5493_v27 = vpop.f32.mrf.mxu2  ;;  %v4837_v20 = vpop.f32.mrf.mxu0 }
 0x540   : > { %16509 = vst [vmem:[#allocation22_spill] sm:$0xff] %v14422_v14  ;;  %v14424_v8 = vadd.f32 %v5493_v27, %v5165_v54  ;;  %v5166_v9 = vpop.f32.mrf.mxu1 }
 0x541   : > { %v5167_v3 = vadd.f32 %v5166_v9, %v4837_v20  ;;  %v10231_v20 = vor.u32 %v12005_v6, %v10228_v16  ;;  %v10235_v9 = vor.u32 %v12009_v45, %v10234_v44  ;;  %v10254_v16 = vld [vmem:[%s13564_s24 + $0xaf0] sm:$0xf]  ;;  %v12012_v44 = vld [vmem:[%s13564_s24 + $0xaf4] sm:$0xf]  ;;  %v11845_v45 = vld [vmem:[%s13564_s24 + $0x5bc] sm:$0xf] }
 0x542   : > { %16510 = vst [vmem:[#allocation55_spill] sm:$0xff] %v14424_v8 }
 0x545   : > { %v5704_v21 = vpop.f32.mrf.mxu3 }
 0x546   : > { %v14435_v50 = vadd.f32 %v5704_v21, %v13970_v4  ;;  %v9592_v21 = vld [vmem:[%s13564_s24 + $0x5d4] sm:$0xf0] }
 0x547   : > { %v5495_v62 = vpop.f32.mrf.mxu2  ;;  %v4840_v27 = vpop.f32.mrf.mxu0 }
 0x548   : > { %16511 = vst [vmem:[#allocation56_spill] sm:$0xff] %v14435_v50  ;;  %v14437_v54 = vadd.f32 %v5495_v62, %v5167_v3  ;;  %v5169_v14 = vpop.f32.mrf.mxu1  ;;  %v10256_v62 = vld [vmem:[%s13564_s24 + $0xb0c] sm:$0xf0] }
 0x549   : > { %v5170_v8 = vadd.f32 %v5169_v14, %v4840_v27  ;;  %v12015_v14 = vld [vmem:[%s13564_s24 + $0xb08] sm:$0xf0] }
 0x54a   : > { %4879 = vmatmul.bf16.gmra.mxu0 %v10227_v28  ;;  %5746 = vmatmul.bf16.gmra.mxu3 %v9567_v42  ;;  %v10262_v28 = vld [vmem:[%s13564_s24 + $0xaf8] sm:$0xf]  ;;  %v12016_v42 = vld [vmem:[%s13564_s24 + $0xb10] sm:$0xf0] }
 0x54b   : > { %5208 = vmatmul.bf16.gmra.mxu1 %v10231_v20 }
 0x54c   : > { %5537 = vmatmul.bf16.gmra.mxu2 %v10235_v9 }
 0x54d   : > { %v5707_v4 = vpop.f32.mrf.mxu3 }
 0x54e   : > { %v14440_v38 = vadd.f32 %v5707_v4, %v13976_v46  ;;  %v10255_v46 = vor.u32 %v12015_v14, %v10254_v16  ;;  %v9595_v4 = vor.u32 %v11845_v45, %v9592_v21 }
 0x54f   : > { %v5498_v3 = vpop.f32.mrf.mxu2  ;;  %v4842_v6 = vpop.f32.mrf.mxu0 }
 0x550   : > { %16512 = vst [vmem:[#allocation57_spill] sm:$0xff] %v14440_v38  ;;  %v14442_v18 = vadd.f32 %v5498_v3, %v5170_v8  ;;  %v5171_v33 = vpop.f32.mrf.mxu1  ;;  %v10259_v38 = vor.u32 %v12012_v44, %v10256_v62  ;;  %v12143_v62 = vld [vmem:[%s16364_s1 + $0x108] sm:$0xff] }
 0x551   : > { %v5172_v41 = vadd.f32 %v5171_v33, %v4842_v6  ;;  %v10263_v6 = vor.u32 %v12016_v42, %v10262_v28  ;;  %v10282_v28 = vld [vmem:[%s13564_s24 + $0xb28] sm:$0xf]  ;;  %v12019_v42 = vld [vmem:[%s13564_s24 + $0xb2c] sm:$0xf]  ;;  %5948 = vmatpush.bf16.msrb.mxu0 %v12143_v62 }
 0x552   : > { %v12151_v62 = vld [vmem:[%s16364_s1 + $0x148] sm:$0xff] }
 0x553   : > { %6277 = vmatpush.bf16.msrb.mxu1 %v12151_v62 }
 0x555   : > { %v5709_v27 = vpop.f32.mrf.mxu3 }
 0x556   : > { %v14453_v9 = vadd.f32 %v5709_v27, %v13990_v32  ;;  %v11852_v27 = vld [vmem:[%s13564_s24 + $0x5f4] sm:$0xf] }
 0x557   : > { %v5500_v20 = vpop.f32.mrf.mxu2  ;;  %v4845_v3 = vpop.f32.mrf.mxu0 }
 0x558   : > { %16513 = vst [vmem:[#allocation58_spill] sm:$0xff] %v14453_v9  ;;  %v14455_v8 = vadd.f32 %v5500_v20, %v5172_v41  ;;  %v5174_v33 = vpop.f32.mrf.mxu1  ;;  %v9620_v20 = vld [vmem:[%s13564_s24 + $0x60c] sm:$0xf0] }
 0x559   : > { %v5175_v50 = vadd.f32 %v5174_v33, %v4845_v3  ;;  %v12023_v3 = vld [vmem:[%s13564_s24 + $0xb48] sm:$0xf0] }
 0x55a   : > { %4884 = vmatmul.bf16.gmra.mxu0 %v10255_v46  ;;  %5751 = vmatmul.bf16.gmra.mxu3 %v9595_v4  ;;  %v10284_v46 = vld [vmem:[%s13564_s24 + $0xb44] sm:$0xf0]  ;;  %v10290_v4 = vld [vmem:[%s13564_s24 + $0xb30] sm:$0xf] }
 0x55b   : > { %5213 = vmatmul.bf16.gmra.mxu1 %v10259_v38  ;;  %v12022_v38 = vld [vmem:[%s13564_s24 + $0xb40] sm:$0xf0] }
 0x55c   : > { %5542 = vmatmul.bf16.gmra.mxu2 %v10263_v6  ;;  %v10283_v33 = vor.u32 %v12022_v38, %v10282_v28 }
 0x55d   : > { %v5712_v32 = vpop.f32.mrf.mxu3 }
 0x55e   : > { %v14458_v16 = vadd.f32 %v5712_v32, %v13996_v19  ;;  %v9623_v32 = vor.u32 %v11852_v27, %v9620_v20  ;;  %v10310_v20 = vld [vmem:[%s13564_s24 + $0xb60] sm:$0xf] }
 0x55f   : > { %v5503_v41 = vpop.f32.mrf.mxu2  ;;  %v4847_v44 = vpop.f32.mrf.mxu0 }
 0x560   : > { %16514 = vst [vmem:[#allocation59_spill] sm:$0xff] %v14458_v16  ;;  %v14460_v14 = vadd.f32 %v5503_v41, %v5175_v50  ;;  %v5176_v45 = vpop.f32.mrf.mxu1  ;;  %v10291_v16 = vor.u32 %v12023_v3, %v10290_v4  ;;  %v12026_v4 = vld [vmem:[%s13564_s24 + $0xb64] sm:$0xf]  ;;  %v11859_v3 = vld [vmem:[%s13564_s24 + $0x62c] sm:$0xf] }
 0x561   : > { %v5177_v21 = vadd.f32 %v5176_v45, %v4847_v44  ;;  %v10287_v45 = vor.u32 %v12019_v42, %v10284_v46  ;;  %v12029_v46 = vld [vmem:[%s13564_s24 + $0xb78] sm:$0xf0] }
 0x562   : > { %16515 = vst [vmem:[#allocation60_spill] sm:$0xff] %v14460_v14 }
 0x565   : > { %v5714_v19 = vpop.f32.mrf.mxu3 }
 0x566   : > { %v14474_v50 = vadd.f32 %v5714_v19, %v14010_v40  ;;  %v9648_v19 = vld [vmem:[%s13564_s24 + $0x644] sm:$0xf0] }
 0x567   : > { %v5505_v6 = vpop.f32.mrf.mxu2  ;;  %v4850_v44 = vpop.f32.mrf.mxu0  ;;  %v9651_v62 = vor.u32 %v11859_v3, %v9648_v19 }
 0x568   : > { %16516 = vst [vmem:[#allocation61_spill] sm:$0xff] %v14474_v50  ;;  %v14476_v41 = vadd.f32 %v5505_v6, %v5177_v21  ;;  %v5179_v9 = vpop.f32.mrf.mxu1  ;;  %v10312_v6 = vld [vmem:[%s13564_s24 + $0xb7c] sm:$0xf0] }
 0x569   : > { %v5180_v14 = vadd.f32 %v5179_v9, %v4850_v44 }
 0x56a   : > { %4889 = vmatmul.bf16.gmra.mxu0 %v10283_v33  ;;  %5756 = vmatmul.bf16.gmra.mxu3 %v9623_v32  ;;  %v10318_v33 = vld [vmem:[%s13564_s24 + $0xb68] sm:$0xf]  ;;  %v12030_v32 = vld [vmem:[%s13564_s24 + $0xb80] sm:$0xf0] }
 0x56b   : > { %5218 = vmatmul.bf16.gmra.mxu1 %v10287_v45 }
 0x56c   : > { %5547 = vmatmul.bf16.gmra.mxu2 %v10291_v16 }
 0x56d   : > { %v5717_v40 = vpop.f32.mrf.mxu3 }
 0x56e   : > { %v14482_v28 = vadd.f32 %v5717_v40, %v14016_v0  ;;  %v10311_v0 = vor.u32 %v12029_v46, %v10310_v20 }
 0x56f   : > { %v5508_v21 = vpop.f32.mrf.mxu2  ;;  %v4852_v42 = vpop.f32.mrf.mxu0 }
 0x570   : > { %16517 = vst [vmem:[#allocation62_spill] sm:$0xff] %v14482_v28  ;;  %v14484_v38 = vadd.f32 %v5508_v21, %v5180_v14  ;;  %v5181_v27 = vpop.f32.mrf.mxu1  ;;  %v10315_v21 = vor.u32 %v12026_v4, %v10312_v6  ;;  %v10338_v6 = vld [vmem:[%s13564_s24 + $0xb98] sm:$0xf] }
 0x571   : > { %v5182_v9 = vadd.f32 %v5181_v27, %v4852_v42  ;;  %v10319_v42 = vor.u32 %v12030_v32, %v10318_v33  ;;  %v12036_v33 = vld [vmem:[%s13564_s24 + $0xbb0] sm:$0xf0]  ;;  %v12033_v32 = vld [vmem:[%s13564_s24 + $0xb9c] sm:$0xf] }
 0x575   : > { %v5719_v44 = vpop.f32.mrf.mxu3 }
 0x576   : > { %v14495_v45 = vadd.f32 %v5719_v44, %v14030_v57  ;;  %v11866_v44 = vld [vmem:[%s13564_s24 + $0x664] sm:$0xf] }
 0x577   : > { %v5510_v16 = vpop.f32.mrf.mxu2  ;;  %v4855_v40 = vpop.f32.mrf.mxu0 }
 0x578   : > { %16518 = vst [vmem:[#allocation63_spill] sm:$0xff] %v14495_v45  ;;  %v14497_v14 = vadd.f32 %v5510_v16, %v5182_v9  ;;  %v5184_v27 = vpop.f32.mrf.mxu1  ;;  %v9676_v16 = vld [vmem:[%s13564_s24 + $0x67c] sm:$0xf0] }
 0x579   : > { %v5185_v28 = vadd.f32 %v5184_v27, %v4855_v40  ;;  %v12037_v40 = vld [vmem:[%s13564_s24 + $0xbb8] sm:$0xf0] }
 0x57a   : > { %4894 = vmatmul.bf16.gmra.mxu0 %v10311_v0  ;;  %5761 = vmatmul.bf16.gmra.mxu3 %v9651_v62  ;;  %v10340_v0 = vld [vmem:[%s13564_s24 + $0xbb4] sm:$0xf0]  ;;  %v10346_v62 = vld [vmem:[%s13564_s24 + $0xba0] sm:$0xf] }
 0x57b   : > { %5223 = vmatmul.bf16.gmra.mxu1 %v10315_v21 }
 0x57c   : > { %5552 = vmatmul.bf16.gmra.mxu2 %v10319_v42 }
 0x57d   : > { %v5722_v57 = vpop.f32.mrf.mxu3 }
 0x57e   : > { %v14500_v20 = vadd.f32 %v5722_v57, %v14036_v25  ;;  %v10339_v25 = vor.u32 %v12036_v33, %v10338_v6  ;;  %v9679_v57 = vor.u32 %v11866_v44, %v9676_v16 }
 0x57f   : > { %v5513_v9 = vpop.f32.mrf.mxu2  ;;  %v4857_v4 = vpop.f32.mrf.mxu0 }
 0x580   : > { %16519 = vst [vmem:[#allocation64_spill] sm:$0xff] %v14500_v20  ;;  %v14502_v46 = vadd.f32 %v5513_v9, %v5185_v28  ;;  %v5186_v3 = vpop.f32.mrf.mxu1 }
 0x581   : > { %v5187_v19 = vadd.f32 %v5186_v3, %v4857_v4  ;;  %v10343_v4 = vor.u32 %v12033_v32, %v10340_v0  ;;  %v10347_v3 = vor.u32 %v12037_v40, %v10346_v62  ;;  %v10366_v0 = vld [vmem:[%s13564_s24 + $0xbd0] sm:$0xf]  ;;  %v12040_v62 = vld [vmem:[%s13564_s24 + $0xbd4] sm:$0xf]  ;;  %v11873_v40 = vld [vmem:[%s13564_s24 + $0x69c] sm:$0xf] }
 0x585   : > { %v5724_v21 = vpop.f32.mrf.mxu3 }
 0x586   : > { %v14513_v27 = vadd.f32 %v5724_v21, %v14050_v59  ;;  %v9704_v21 = vld [vmem:[%s13564_s24 + $0x6b4] sm:$0xf0] }
 0x587   : > { %v5515_v42 = vpop.f32.mrf.mxu2  ;;  %v4860_v9 = vpop.f32.mrf.mxu0 }
 0x588   : > { %16520 = vst [vmem:[#allocation65_spill] sm:$0xff] %v14513_v27  ;;  %v14515_v28 = vadd.f32 %v5515_v42, %v5187_v19  ;;  %v5189_v20 = vpop.f32.mrf.mxu1  ;;  %v10368_v42 = vld [vmem:[%s13564_s24 + $0xbec] sm:$0xf0] }
 0x589   : > { %v5190_v45 = vadd.f32 %v5189_v20, %v4860_v9  ;;  %v12043_v20 = vld [vmem:[%s13564_s24 + $0xbe8] sm:$0xf0] }
 0x58a   : > { %4899 = vmatmul.bf16.gmra.mxu0 %v10339_v25  ;;  %5766 = vmatmul.bf16.gmra.mxu3 %v9679_v57  ;;  %v10374_v25 = vld [vmem:[%s13564_s24 + $0xbd8] sm:$0xf]  ;;  %v12044_v57 = vld [vmem:[%s13564_s24 + $0xbf0] sm:$0xf0] }
 0x58b   : > { %5228 = vmatmul.bf16.gmra.mxu1 %v10343_v4  ;;  %v10375_v27 = vor.u32 %v12044_v57, %v10374_v25  ;;  %v10394_v25 = vld [vmem:[%s13564_s24 + $0xc08] sm:$0xf]  ;;  %v12047_v57 = vld [vmem:[%s13564_s24 + $0xc0c] sm:$0xf] }
 0x58c   : > { %5557 = vmatmul.bf16.gmra.mxu2 %v10347_v3 }
 0x58d   : > { %v5727_v59 = vpop.f32.mrf.mxu3 }
 0x58e   : > { %v14518_v6 = vadd.f32 %v5727_v59, %v14056_v7  ;;  %v10367_v7 = vor.u32 %v12043_v20, %v10366_v0  ;;  %v9707_v59 = vor.u32 %v11873_v40, %v9704_v21 }
 0x58f   : > { %v5518_v19 = vpop.f32.mrf.mxu2  ;;  %v4862_v32 = vpop.f32.mrf.mxu0 }
 0x590   : > { %16521 = vst [vmem:[#allocation66_spill] sm:$0xff] %v14518_v6  ;;  %v14520_v33 = vadd.f32 %v5518_v19, %v5190_v45  ;;  %v5191_v44 = vpop.f32.mrf.mxu1  ;;  %v12142_v45 = vld [vmem:[%s16364_s1 + $0x100] sm:$0xff]  ;;  %v10371_v6 = vor.u32 %v12040_v62, %v10368_v42 }
 0x591   : > { %v5192_v16 = vadd.f32 %v5191_v44, %v4862_v32  ;;  %v12150_v19 = vld [vmem:[%s16364_s1 + $0x140] sm:$0xff]  ;;  %5949 = vmatpush.bf16.msrb.mxu0 %v12142_v45 }
 0x592   : > { %6278 = vmatpush.bf16.msrb.mxu1 %v12150_v19 }
 0x595   : > { %v5729_v9 = vpop.f32.mrf.mxu3 }
 0x596   : > { %v14531_v3 = vadd.f32 %v5729_v9, %v14073_v37  ;;  %v11880_v9 = vld [vmem:[%s13564_s24 + $0x6d4] sm:$0xf] }
 0x597   : > { %v5520_v4 = vpop.f32.mrf.mxu2  ;;  %v4865_v44 = vpop.f32.mrf.mxu0 }
 0x598   : > { %v14539_v32 = vadd.f32 %v5520_v4, %v5192_v16  ;;  %v5194_v50 = vpop.f32.mrf.mxu1  ;;  %v9732_v4 = vld [vmem:[%s13564_s24 + $0x6ec] sm:$0xf0] }
 0x599   : > { %v5195_v37 = vadd.f32 %v5194_v50, %v4865_v44  ;;  %v12050_v50 = vld [vmem:[%s13564_s24 + $0xc20] sm:$0xf0]  ;;  %v9735_v44 = vor.u32 %v11880_v9, %v9732_v4 }
 0x59a   : > { %4904 = vmatmul.bf16.gmra.mxu0 %v10367_v7  ;;  %5771 = vmatmul.bf16.gmra.mxu3 %v9707_v59  ;;  %v10396_v7 = vld [vmem:[%s13564_s24 + $0xc24] sm:$0xf0]  ;;  %v10402_v59 = vld [vmem:[%s13564_s24 + $0xc10] sm:$0xf] }
 0x59b   : > { %5233 = vmatmul.bf16.gmra.mxu1 %v10371_v6  ;;  %v12051_v6 = vld [vmem:[%s13564_s24 + $0xc28] sm:$0xf0] }
 0x59c   : > { %5562 = vmatmul.bf16.gmra.mxu2 %v10375_v27 }
 0x59d   : > { %v5732_v16 = vpop.f32.mrf.mxu3 }
 0x59e   : > { %v14542_v20 = vadd.f32 %v5732_v16, %v14082_v17  ;;  %v10395_v17 = vor.u32 %v12050_v50, %v10394_v25 }
 0x59f   : > { %v5523_v0 = vpop.f32.mrf.mxu2  ;;  %v4867_v40 = vpop.f32.mrf.mxu0 }
 0x5a0   : > { %16522 = vst [vmem:[#allocation67_spill] sm:$0xff] %v14542_v20  ;;  %v14544_v62 = vadd.f32 %v5523_v0, %v5195_v37  ;;  %v5196_v21 = vpop.f32.mrf.mxu1  ;;  %v10399_v0 = vor.u32 %v12047_v57, %v10396_v7  ;;  %v11887_v7 = vld [vmem:[%s13564_s24 + $0x70c] sm:$0xf] }
 0x5a1   : > { %v5197_v42 = vadd.f32 %v5196_v21, %v4867_v40  ;;  %v10403_v40 = vor.u32 %v12051_v6, %v10402_v59  ;;  %v9760_v59 = vld [vmem:[%s13564_s24 + $0x724] sm:$0xf0]  ;;  %v8870_v6 = vld [vmem:[%s13564_s24 + $0x10] sm:$0xf] }
 0x5a5   : > { %v5734_v45 = vpop.f32.mrf.mxu3 }
 0x5a6   : > { %v14555_v19 = vadd.f32 %v5734_v45, %v14096_v12  ;;  %v11667_v45 = vld [vmem:[%s13564_s24 + $0x28] sm:$0xf0] }
 0x5a7   : > { %v5525_v27 = vpop.f32.mrf.mxu2  ;;  %v4870_v16 = vpop.f32.mrf.mxu0 }
 0x5a8   : > { %16523 = vst [vmem:[#allocation68_spill] sm:$0xff] %v14555_v19  ;;  %v14557_v37 = vadd.f32 %v5525_v27, %v5197_v42  ;;  %v5199_v21 = vpop.f32.mrf.mxu1  ;;  %v11664_v27 = vld [vmem:[%s13564_s24 + $0x14] sm:$0xf] }
 0x5a9   : > { %v5200_v20 = vadd.f32 %v5199_v21, %v4870_v16  ;;  %v11668_v16 = vld [vmem:[%s13564_s24 + $0x30] sm:$0xf0] }
 0x5aa   : > { %4909 = vmatmul.bf16.gmra.mxu0 %v10395_v17  ;;  %5776 = vmatmul.bf16.gmra.mxu3 %v9735_v44  ;;  %v8872_v17 = vld [vmem:[%s13564_s24 + $0x2c] sm:$0xf0]  ;;  %v8878_v44 = vld [vmem:[%s13564_s24 + $0x18] sm:$0xf] }
 0x5ab   : > { %5238 = vmatmul.bf16.gmra.mxu1 %v10399_v0 }
 0x5ac   : > { %5567 = vmatmul.bf16.gmra.mxu2 %v10403_v40 }
 0x5ad   : > { %v5737_v12 = vpop.f32.mrf.mxu3 }
 0x5ae   : > { %v14560_v25 = vadd.f32 %v5737_v12, %v14102_v26  ;;  %v9763_v26 = vor.u32 %v11887_v7, %v9760_v59  ;;  %v8871_v12 = vor.u32 %v11667_v45, %v8870_v6 }
 0x5af   : > { %v5528_v42 = vpop.f32.mrf.mxu2  ;;  %v4872_v57 = vpop.f32.mrf.mxu0 }
 0x5b0   : > { %16524 = vst [vmem:[#allocation69_spill] sm:$0xff] %v14560_v25  ;;  %v14562_v50 = vadd.f32 %v5528_v42, %v5200_v20  ;;  %v5201_v9 = vpop.f32.mrf.mxu1  ;;  %v8875_v25 = vor.u32 %v11664_v27, %v8872_v17  ;;  %v11894_v17 = vld [vmem:[%s13564_s24 + $0x744] sm:$0xf] }
 0x5b1   : > { %v5202_v4 = vadd.f32 %v5201_v9, %v4872_v57  ;;  %v8879_v57 = vor.u32 %v11668_v16, %v8878_v44  ;;  %v9788_v44 = vld [vmem:[%s13564_s24 + $0x75c] sm:$0xf0]  ;;  %v8898_v16 = vld [vmem:[%s13564_s24 + $0x48] sm:$0xf] }
 0x5b5   : > { %v5739_v0 = vpop.f32.mrf.mxu3 }
 0x5b6   : > { %v14573_v21 = vadd.f32 %v5739_v0, %v14116_v58  ;;  %v11674_v0 = vld [vmem:[%s13564_s24 + $0x60] sm:$0xf0] }
 0x5b7   : > { %v5530_v40 = vpop.f32.mrf.mxu2  ;;  %v4875_v42 = vpop.f32.mrf.mxu0 }
 0x5b8   : > { %16525 = vst [vmem:[#allocation70_spill] sm:$0xff] %v14573_v21  ;;  %v14575_v20 = vadd.f32 %v5530_v40, %v5202_v4  ;;  %v5204_v9 = vpop.f32.mrf.mxu1  ;;  %v11671_v40 = vld [vmem:[%s13564_s24 + $0x4c] sm:$0xf] }
 0x5b9   : > { %v5205_v19 = vadd.f32 %v5204_v9, %v4875_v42 }
 0x5ba   : > { %5781 = vmatmul.bf16.gmra.mxu3 %v9763_v26  ;;  %5950 = vmatmul.bf16.vlgmr.msrb.gmra.mxu0 %v8871_v12  ;;  %v8900_v26 = vld [vmem:[%s13564_s24 + $0x64] sm:$0xf0]  ;;  %v11675_v12 = vld [vmem:[%s13564_s24 + $0x68] sm:$0xf0] }
 0x5bb   : > { %6279 = vmatmul.bf16.vlgmr.msrb.gmra.mxu1 %v8875_v25  ;;  %v8906_v25 = vld [vmem:[%s13564_s24 + $0x50] sm:$0xf] }
 0x5bc   : > { %10844 = vmatmul.msk.bf16.vlgmr.msrb.gmra.mxu2 %vm4433_vm0, %v8879_v57 }
 0x5bd   : > { %v5742_v58 = vpop.f32.mrf.mxu3 }
 0x5be   : > { %v14579_v7 = vadd.f32 %v5742_v58, %v14121_v53  ;;  %v9791_v53 = vor.u32 %v11894_v17, %v9788_v44  ;;  %v8899_v58 = vor.u32 %v11674_v0, %v8898_v16 }
 0x5bf   : > { %v5533_v4 = vpop.f32.mrf.mxu2  ;;  %v4877_v6 = vpop.f32.mrf.mxu0 }
 0x5c0   : > { %16526 = vst [vmem:[#allocation71_spill] sm:$0xff] %v14579_v7  ;;  %v14581_v59 = vadd.f32 %v5533_v4, %v5205_v19  ;;  %v5206_v45 = vpop.f32.mrf.mxu1 }
 0x5c1   : > { %v5207_v27 = vadd.f32 %v5206_v45, %v4877_v6  ;;  %v8903_v6 = vor.u32 %v11671_v40, %v8900_v26  ;;  %v8907_v45 = vor.u32 %v11675_v12, %v8906_v25  ;;  %v9816_v26 = vld [vmem:[%s13564_s24 + $0x794] sm:$0xf0]  ;;  %v8926_v25 = vld [vmem:[%s13564_s24 + $0x80] sm:$0xf]  ;;  %v11681_v12 = vld [vmem:[%s13564_s24 + $0x98] sm:$0xf0] }
 0x5c5   : > { %v5744_v42 = vpop.f32.mrf.mxu3 }
 0x5c6   : > { %v14592_v9 = vadd.f32 %v5744_v42, %v14134_v15  ;;  %v11678_v42 = vld [vmem:[%s13564_s24 + $0x84] sm:$0xf] }
 0x5c7   : > { %v5535_v57 = vpop.f32.mrf.mxu2  ;;  %v4880_v4 = vpop.f32.mrf.mxu0 }
 0x5c8   : > { %16527 = vst [vmem:[#allocation72_spill] sm:$0xff] %v14592_v9  ;;  %v14594_v19 = vadd.f32 %v5535_v57, %v5207_v27  ;;  %v5209_v7 = vpop.f32.mrf.mxu1  ;;  %v8928_v57 = vld [vmem:[%s13564_s24 + $0x9c] sm:$0xf0] }
 0x5c9   : > { %v5210_v21 = vadd.f32 %v5209_v7, %v4880_v4  ;;  %v11901_v7 = vld [vmem:[%s13564_s24 + $0x77c] sm:$0xf] }
 0x5ca   : > { %5786 = vmatmul.bf16.gmra.mxu3 %v9791_v53  ;;  %5955 = vmatmul.bf16.gmra.mxu0 %v8899_v58  ;;  %v8934_v53 = vld [vmem:[%s13564_s24 + $0x88] sm:$0xf]  ;;  %v11682_v58 = vld [vmem:[%s13564_s24 + $0xa0] sm:$0xf0] }
 0x5cb   : > { %6284 = vmatmul.bf16.gmra.mxu1 %v8903_v6 }
 0x5cc   : > { %10845 = vmatmul.msk.bf16.gmra.mxu2 %vm4433_vm0, %v8907_v45 }
 0x5cd   : > { %v5747_v15 = vpop.f32.mrf.mxu3 }
 0x5ce   : > { %v14598_v17 = vadd.f32 %v5747_v15, %v14139_v35  ;;  %v9819_v35 = vor.u32 %v11901_v7, %v9816_v26  ;;  %v8927_v15 = vor.u32 %v11681_v12, %v8926_v25 }
 0x5cf   : > { %v5538_v27 = vpop.f32.mrf.mxu2  ;;  %v4882_v16 = vpop.f32.mrf.mxu0 }
 0x5d0   : > { %16528 = vst [vmem:[#allocation73_spill] sm:$0xff] %v14598_v17  ;;  %v14600_v44 = vadd.f32 %v5538_v27, %v5210_v21  ;;  %v5211_v0 = vpop.f32.mrf.mxu1 }
 0x5d1   : > { %v5212_v40 = vadd.f32 %v5211_v0, %v4882_v16  ;;  %v8931_v16 = vor.u32 %v11678_v42, %v8928_v57  ;;  %v8935_v0 = vor.u32 %v11682_v58, %v8934_v53  ;;  %v9844_v57 = vld [vmem:[%s13564_s24 + $0x7cc] sm:$0xf0]  ;;  %v8954_v53 = vld [vmem:[%s13564_s24 + $0xb8] sm:$0xf]  ;;  %v11688_v58 = vld [vmem:[%s13564_s24 + $0xd0] sm:$0xf0] }
 0x5d5   : > { %v5749_v4 = vpop.f32.mrf.mxu3 }
 0x5d6   : > { %v14611_v45 = vadd.f32 %v5749_v4, %v14152_v61  ;;  %v11685_v4 = vld [vmem:[%s13564_s24 + $0xbc] sm:$0xf] }
 0x5d7   : > { %v5540_v6 = vpop.f32.mrf.mxu2  ;;  %v4885_v27 = vpop.f32.mrf.mxu0 }
 0x5d8   : > { %16529 = vst [vmem:[#allocation74_spill] sm:$0xff] %v14611_v45  ;;  %v14613_v21 = vadd.f32 %v5540_v6, %v5212_v40  ;;  %v5214_v17 = vpop.f32.mrf.mxu1  ;;  %v8956_v6 = vld [vmem:[%s13564_s24 + $0xd4] sm:$0xf0] }
 0x5d9   : > { %v5215_v9 = vadd.f32 %v5214_v17, %v4885_v27  ;;  %v11908_v17 = vld [vmem:[%s13564_s24 + $0x7b4] sm:$0xf] }
 0x5da   : > { %5791 = vmatmul.bf16.gmra.mxu3 %v9819_v35  ;;  %5960 = vmatmul.bf16.gmra.mxu0 %v8927_v15  ;;  %v8962_v35 = vld [vmem:[%s13564_s24 + $0xc0] sm:$0xf]  ;;  %v11689_v15 = vld [vmem:[%s13564_s24 + $0xd8] sm:$0xf0] }
 0x5db   : > { %6289 = vmatmul.bf16.gmra.mxu1 %v8931_v16 }
 0x5dc   : > { %10846 = vmatmul.msk.bf16.gmra.mxu2 %vm4433_vm0, %v8935_v0 }
 0x5dd   : > { %v5752_v61 = vpop.f32.mrf.mxu3 }
 0x5de   : > { %v14617_v7 = vadd.f32 %v5752_v61, %v14157_v5  ;;  %v9847_v5 = vor.u32 %v11908_v17, %v9844_v57  ;;  %v8955_v61 = vor.u32 %v11688_v58, %v8954_v53  ;;  %v12175_v58 = vld [vmem:[%s16366_s3 + $0x78] sm:$0xff] }
 0x5df   : > { %v5543_v40 = vpop.f32.mrf.mxu2  ;;  %v4887_v25 = vpop.f32.mrf.mxu0  ;;  %7212 = vmatpush.bf16.msra.mxu3 %v12175_v58 }
 0x5e0   : > { %16530 = vst [vmem:[#allocation75_spill] sm:$0xff] %v14617_v7  ;;  %v14619_v26 = vadd.f32 %v5543_v40, %v5215_v9  ;;  %v5216_v12 = vpop.f32.mrf.mxu1  ;;  %v8959_v7 = vor.u32 %v11685_v4, %v8956_v6 }
 0x5e1   : > { %v5217_v42 = vadd.f32 %v5216_v12, %v4887_v25  ;;  %v8963_v25 = vor.u32 %v11689_v15, %v8962_v35  ;;  %v9872_v35 = vld [vmem:[%s13564_s24 + $0x804] sm:$0xf0]  ;;  %v8982_v15 = vld [vmem:[%s13564_s24 + $0xf0] sm:$0xf] }
 0x5e5   : > { %v5754_v27 = vpop.f32.mrf.mxu3 }
 0x5e6   : > { %v14630_v0 = vadd.f32 %v5754_v27, %v14170_v2  ;;  %v11695_v27 = vld [vmem:[%s13564_s24 + $0x108] sm:$0xf0] }
 0x5e7   : > { %v5545_v16 = vpop.f32.mrf.mxu2  ;;  %v4890_v40 = vpop.f32.mrf.mxu0 }
 0x5e8   : > { %16531 = vst [vmem:[#allocation76_spill] sm:$0xff] %v14630_v0  ;;  %v14632_v9 = vadd.f32 %v5545_v16, %v5217_v42  ;;  %v5219_v12 = vpop.f32.mrf.mxu1  ;;  %v11692_v16 = vld [vmem:[%s13564_s24 + $0xf4] sm:$0xf] }
 0x5e9   : > { %v5220_v45 = vadd.f32 %v5219_v12, %v4890_v40  ;;  %v11696_v40 = vld [vmem:[%s13564_s24 + $0x110] sm:$0xf0] }
 0x5ea   : > { %5796 = vmatmul.bf16.gmra.mxu3 %v9847_v5  ;;  %5965 = vmatmul.bf16.gmra.mxu0 %v8955_v61  ;;  %v8984_v5 = vld [vmem:[%s13564_s24 + $0x10c] sm:$0xf0]  ;;  %v8990_v61 = vld [vmem:[%s13564_s24 + $0xf8] sm:$0xf] }
 0x5eb   : > { %6294 = vmatmul.bf16.gmra.mxu1 %v8959_v7  ;;  %v11915_v7 = vld [vmem:[%s13564_s24 + $0x7ec] sm:$0xf]  ;;  %v8991_v58 = vor.u32 %v11696_v40, %v8990_v61  ;;  %v9010_v61 = vld [vmem:[%s13564_s24 + $0x128] sm:$0xf]  ;;  %v11702_v40 = vld [vmem:[%s13564_s24 + $0x140] sm:$0xf0] }
 0x5ec   : > { %10847 = vmatmul.msk.bf16.gmra.mxu2 %vm4433_vm0, %v8963_v25  ;;  %v9875_v12 = vor.u32 %v11915_v7, %v9872_v35 }
 0x5ed   : > { %v5757_v2 = vpop.f32.mrf.mxu3 }
 0x5ee   : > { %v14636_v17 = vadd.f32 %v5757_v2, %v14175_v11  ;;  %v8983_v2 = vor.u32 %v11695_v27, %v8982_v15 }
 0x5ef   : > { %v5548_v42 = vpop.f32.mrf.mxu2  ;;  %v4892_v53 = vpop.f32.mrf.mxu0 }
 0x5f0   : > { %16532 = vst [vmem:[#allocation77_spill] sm:$0xff] %v14636_v17  ;;  %v14638_v57 = vadd.f32 %v5548_v42, %v5220_v45  ;;  %v5221_v4 = vpop.f32.mrf.mxu1 }
 0x5f1   : > { %v5222_v6 = vadd.f32 %v5221_v4, %v4892_v53  ;;  %v8987_v53 = vor.u32 %v11692_v16, %v8984_v5  ;;  %v9900_v5 = vld [vmem:[%s13564_s24 + $0x83c] sm:$0xf0] }
 0x5f5   : > { %v5759_v11 = vpop.f32.mrf.mxu3 }
 0x5f6   : > { %v14652_v45 = vadd.f32 %v5759_v11, %v14188_v29  ;;  %v11699_v11 = vld [vmem:[%s13564_s24 + $0x12c] sm:$0xf] }
 0x5f7   : > { %v5550_v25 = vpop.f32.mrf.mxu2  ;;  %v4895_v17 = vpop.f32.mrf.mxu0 }
 0x5f8   : > { %16533 = vst [vmem:[#allocation78_spill] sm:$0xff] %v14652_v45  ;;  %v14654_v42 = vadd.f32 %v5550_v25, %v5222_v6  ;;  %v5224_v4 = vpop.f32.mrf.mxu1  ;;  %v9012_v25 = vld [vmem:[%s13564_s24 + $0x144] sm:$0xf0] }
 0x5f9   : > { %v5225_v0 = vadd.f32 %v5224_v4, %v4895_v17  ;;  %v11922_v17 = vld [vmem:[%s13564_s24 + $0x824] sm:$0xf] }
 0x5fa   : > { %5801 = vmatmul.bf16.gmra.mxu3 %v9875_v12  ;;  %5970 = vmatmul.bf16.gmra.mxu0 %v8983_v2  ;;  %v9018_v12 = vld [vmem:[%s13564_s24 + $0x130] sm:$0xf]  ;;  %v11703_v2 = vld [vmem:[%s13564_s24 + $0x148] sm:$0xf0] }
 0x5fb   : > { %6299 = vmatmul.bf16.gmra.mxu1 %v8987_v53 }
 0x5fc   : > { %10848 = vmatmul.msk.bf16.gmra.mxu2 %vm4433_vm0, %v8991_v58 }
 0x5fd   : > { %v5762_v29 = vpop.f32.mrf.mxu3 }
 0x5fe   : > { %v14658_v7 = vadd.f32 %v5762_v29, %v14193_v56  ;;  %v9903_v56 = vor.u32 %v11922_v17, %v9900_v5  ;;  %v9011_v29 = vor.u32 %v11702_v40, %v9010_v61 }
 0x5ff   : > { %v5553_v6 = vpop.f32.mrf.mxu2  ;;  %v4897_v15 = vpop.f32.mrf.mxu0 }
 0x600   : > { %16534 = vst [vmem:[#allocation79_spill] sm:$0xff] %v14658_v7  ;;  %v14660_v35 = vadd.f32 %v5553_v6, %v5225_v0  ;;  %v5226_v27 = vpop.f32.mrf.mxu1 }
 0x601   : > { %v5227_v16 = vadd.f32 %v5226_v27, %v4897_v15  ;;  %v9015_v15 = vor.u32 %v11699_v11, %v9012_v25  ;;  %v9019_v27 = vor.u32 %v11703_v2, %v9018_v12  ;;  %v9928_v25 = vld [vmem:[%s13564_s24 + $0x874] sm:$0xf0]  ;;  %v9038_v12 = vld [vmem:[%s13564_s24 + $0x160] sm:$0xf]  ;;  %v11709_v2 = vld [vmem:[%s13564_s24 + $0x178] sm:$0xf0] }
 0x605   : > { %v5764_v53 = vpop.f32.mrf.mxu3 }
 0x606   : > { %v14671_v4 = vadd.f32 %v5764_v53, %v14212_v36  ;;  %v11706_v53 = vld [vmem:[%s13564_s24 + $0x164] sm:$0xf] }
 0x607   : > { %v5555_v58 = vpop.f32.mrf.mxu2  ;;  %v4900_v6 = vpop.f32.mrf.mxu0 }
 0x608   : > { %16535 = vst [vmem:[#allocation80_spill] sm:$0xff] %v14671_v4  ;;  %v14673_v0 = vadd.f32 %v5555_v58, %v5227_v16  ;;  %v5229_v7 = vpop.f32.mrf.mxu1  ;;  %v9040_v58 = vld [vmem:[%s13564_s24 + $0x17c] sm:$0xf0] }
 0x609   : > { %v5230_v45 = vadd.f32 %v5229_v7, %v4900_v6  ;;  %v11929_v7 = vld [vmem:[%s13564_s24 + $0x85c] sm:$0xf] }
 0x60a   : > { %16536 = vst [vmem:[#allocation81_spill] sm:$0xff] %v14673_v0  ;;  %5806 = vmatmul.bf16.gmra.mxu3 %v9903_v56  ;;  %5975 = vmatmul.bf16.gmra.mxu0 %v9011_v29  ;;  %v9046_v56 = vld [vmem:[%s13564_s24 + $0x168] sm:$0xf]  ;;  %v11710_v29 = vld [vmem:[%s13564_s24 + $0x180] sm:$0xf0] }
 0x60b   : > { %6304 = vmatmul.bf16.gmra.mxu1 %v9015_v15 }
 0x60c   : > { %10849 = vmatmul.msk.bf16.gmra.mxu2 %vm4433_vm0, %v9019_v27 }
 0x60d   : > { %v5767_v36 = vpop.f32.mrf.mxu3 }
 0x60e   : > { %v14677_v17 = vadd.f32 %v5767_v36, %v14220_v52  ;;  %v9931_v52 = vor.u32 %v11929_v7, %v9928_v25  ;;  %v9039_v36 = vor.u32 %v11709_v2, %v9038_v12 }
 0x60f   : > { %v5558_v16 = vpop.f32.mrf.mxu2  ;;  %v4902_v61 = vpop.f32.mrf.mxu0 }
 0x610   : > { %16537 = vst [vmem:[#allocation82_spill] sm:$0xff] %v14677_v17  ;;  %v14679_v5 = vadd.f32 %v5558_v16, %v5230_v45  ;;  %v5231_v40 = vpop.f32.mrf.mxu1 }
 0x611   : > { %v5232_v11 = vadd.f32 %v5231_v40, %v4902_v61  ;;  %v9043_v61 = vor.u32 %v11706_v53, %v9040_v58  ;;  %v9047_v40 = vor.u32 %v11710_v29, %v9046_v56  ;;  %v9956_v58 = vld [vmem:[%s13564_s24 + $0x8ac] sm:$0xf0]  ;;  %v9066_v56 = vld [vmem:[%s13564_s24 + $0x198] sm:$0xf]  ;;  %v11716_v29 = vld [vmem:[%s13564_s24 + $0x1b0] sm:$0xf0] }
 0x615   : > { %v5769_v6 = vpop.f32.mrf.mxu3 }
 0x616   : > { %v14690_v27 = vadd.f32 %v5769_v6, %v14233_v10  ;;  %v11713_v6 = vld [vmem:[%s13564_s24 + $0x19c] sm:$0xf] }
 0x617   : > { %v5560_v15 = vpop.f32.mrf.mxu2  ;;  %v4905_v16 = vpop.f32.mrf.mxu0 }
 0x618   : > { %16538 = vst [vmem:[#allocation83_spill] sm:$0xff] %v14690_v27  ;;  %v14692_v45 = vadd.f32 %v5560_v15, %v5232_v11  ;;  %v5234_v0 = vpop.f32.mrf.mxu1  ;;  %v9068_v15 = vld [vmem:[%s13564_s24 + $0x1b4] sm:$0xf0] }
 0x619   : > { %v5235_v17 = vadd.f32 %v5234_v0, %v4905_v16  ;;  %v11936_v0 = vld [vmem:[%s13564_s24 + $0x894] sm:$0xf] }
 0x61a   : > { %16539 = vst [vmem:[#allocation84_spill] sm:$0xff] %v14692_v45  ;;  %5811 = vmatmul.bf16.gmra.mxu3 %v9931_v52  ;;  %5980 = vmatmul.bf16.gmra.mxu0 %v9039_v36  ;;  %v9074_v52 = vld [vmem:[%s13564_s24 + $0x1a0] sm:$0xf]  ;;  %v11717_v36 = vld [vmem:[%s13564_s24 + $0x1b8] sm:$0xf0] }
 0x61b   : > { %6309 = vmatmul.bf16.gmra.mxu1 %v9043_v61 }
 0x61c   : > { %10850 = vmatmul.msk.bf16.gmra.mxu2 %vm4433_vm0, %v9047_v40 }
 0x61d   : > { %v5772_v10 = vpop.f32.mrf.mxu3 }
 0x61e   : > { %v14696_v7 = vadd.f32 %v5772_v10, %v14238_v22  ;;  %v9959_v22 = vor.u32 %v11936_v0, %v9956_v58  ;;  %v9067_v10 = vor.u32 %v11716_v29, %v9066_v56 }
 0x61f   : > { %v5563_v11 = vpop.f32.mrf.mxu2  ;;  %v4907_v12 = vpop.f32.mrf.mxu0 }
 0x620   : > { %16540 = vst [vmem:[#allocation85_spill] sm:$0xff] %v14696_v7  ;;  %v14698_v25 = vadd.f32 %v5563_v11, %v5235_v17  ;;  %v5236_v2 = vpop.f32.mrf.mxu1 }
 0x621   : > { %v5237_v53 = vadd.f32 %v5236_v2, %v4907_v12  ;;  %v9071_v12 = vor.u32 %v11713_v6, %v9068_v15  ;;  %v9075_v2 = vor.u32 %v11717_v36, %v9074_v52  ;;  %v9984_v15 = vld [vmem:[%s13564_s24 + $0x8e4] sm:$0xf0]  ;;  %v9094_v52 = vld [vmem:[%s13564_s24 + $0x1d0] sm:$0xf]  ;;  %v11723_v36 = vld [vmem:[%s13564_s24 + $0x1e8] sm:$0xf0] }
 0x625   : > { %v5774_v16 = vpop.f32.mrf.mxu3 }
 0x626   : > { %v14709_v40 = vadd.f32 %v5774_v16, %v14251_v63  ;;  %v11720_v16 = vld [vmem:[%s13564_s24 + $0x1d4] sm:$0xf] }
 0x627   : > { %v5565_v61 = vpop.f32.mrf.mxu2  ;;  %v4910_v11 = vpop.f32.mrf.mxu0 }
 0x628   : > { %16541 = vst [vmem:[#allocation86_spill] sm:$0xff] %v14709_v40  ;;  %v14711_v17 = vadd.f32 %v5565_v61, %v5237_v53  ;;  %v5239_v45 = vpop.f32.mrf.mxu1  ;;  %v9096_v61 = vld [vmem:[%s13564_s24 + $0x1ec] sm:$0xf0] }
 0x629   : > { %v5240_v7 = vadd.f32 %v5239_v45, %v4910_v11  ;;  %v11943_v45 = vld [vmem:[%s13564_s24 + $0x8cc] sm:$0xf] }
 0x62a   : > { %16542 = vst [vmem:[#allocation87_spill] sm:$0xff] %v14711_v17  ;;  %5816 = vmatmul.bf16.gmra.mxu3 %v9959_v22  ;;  %5985 = vmatmul.bf16.gmra.mxu0 %v9067_v10  ;;  %v9102_v22 = vld [vmem:[%s13564_s24 + $0x1d8] sm:$0xf]  ;;  %v11724_v10 = vld [vmem:[%s13564_s24 + $0x1f0] sm:$0xf0]  ;;  %v9099_v17 = vor.u32 %v11720_v16, %v9096_v61 }
 0x62b   : > { %6314 = vmatmul.bf16.gmra.mxu1 %v9071_v12  ;;  %v11950_v16 = vld [vmem:[%s13564_s24 + $0x904] sm:$0xf]  ;;  %v10012_v61 = vld [vmem:[%s13564_s24 + $0x91c] sm:$0xf0] }
 0x62c   : > { %10851 = vmatmul.msk.bf16.gmra.mxu2 %vm4433_vm0, %v9075_v2 }
 0x62d   : > { %v5777_v63 = vpop.f32.mrf.mxu3 }
 0x62e   : > { %v14715_v0 = vadd.f32 %v5777_v63, %v14256_v13  ;;  %v9987_v13 = vor.u32 %v11943_v45, %v9984_v15  ;;  %v9095_v63 = vor.u32 %v11723_v36, %v9094_v52 }
 0x62f   : > { %v5568_v53 = vpop.f32.mrf.mxu2  ;;  %v4912_v56 = vpop.f32.mrf.mxu0 }
 0x630   : > { %16543 = vst [vmem:[#allocation88_spill] sm:$0xff] %v14715_v0  ;;  %v14717_v58 = vadd.f32 %v5568_v53, %v5240_v7  ;;  %v5241_v29 = vpop.f32.mrf.mxu1 }
 0x631   : > { %v5242_v6 = vadd.f32 %v5241_v29, %v4912_v56  ;;  %v9103_v56 = vor.u32 %v11724_v10, %v9102_v22  ;;  %v9122_v22 = vld [vmem:[%s13564_s24 + $0x208] sm:$0xf]  ;;  %v11727_v10 = vld [vmem:[%s13564_s24 + $0x20c] sm:$0xf] }
 0x635   : > { %v5779_v11 = vpop.f32.mrf.mxu3 }
 0x636   : > { %v14728_v2 = vadd.f32 %v5779_v11, %v14269_v55  ;;  %v9124_v11 = vld [vmem:[%s13564_s24 + $0x224] sm:$0xf0] }
 0x637   : > { %v5570_v12 = vpop.f32.mrf.mxu2  ;;  %v5951_v53 = vpop.f32.mrf.mxu0 }
 0x638   : > { %16544 = vst [vmem:[#allocation89_spill] sm:$0xff] %v14728_v2  ;;  %v14730_v7 = vadd.f32 %v5570_v12, %v5242_v6  ;;  %v5952_v29 = vadd.f32 %v5951_v53, %v14119_v23  ;;  %v6280_v0 = vpop.f32.mrf.mxu1  ;;  %v9130_v12 = vld [vmem:[%s13564_s24 + $0x210] sm:$0xf] }
 0x63a   : > { %16545 = vst [vmem:[#allocation90_spill] sm:$0xff] %v14730_v7  ;;  %v6281_v40 = vadd.f32 %v6280_v0, %v5952_v29  ;;  %5821 = vmatmul.bf16.gmra.mxu3 %v9987_v13  ;;  %5990 = vmatmul.bf16.gmra.mxu0 %v9095_v63  ;;  %v11731_v13 = vld [vmem:[%s13564_s24 + $0x228] sm:$0xf0] }
 0x63b   : > { %6319 = vmatmul.bf16.gmra.mxu1 %v9099_v17  ;;  %v11730_v17 = vld [vmem:[%s13564_s24 + $0x220] sm:$0xf0] }
 0x63c   : > { %10852 = vmatmul.msk.bf16.gmra.mxu2 %vm4433_vm0, %v9103_v56  ;;  %v9123_v56 = vor.u32 %v11730_v17, %v9122_v22 }
 0x63d   : > { %v5782_v55 = vpop.f32.mrf.mxu3 }
 0x63e   : > { %v14735_v6 = vadd.f32 %v5782_v55, %v14274_v49  ;;  %v9127_v55 = vor.u32 %v11727_v10, %v9124_v11  ;;  %v11957_v11 = vld [vmem:[%s13564_s24 + $0x93c] sm:$0xf] }
 0x63f   : > { %v6609_v45 = vpop.f32.mrf.mxu2  ;;  %v5953_v15 = vpop.f32.mrf.mxu0 }
 0x640   : > { %16546 = vst [vmem:[#allocation91_spill] sm:$0xff] %v14735_v6  ;;  %v14737_v23 = vadd.f32 %v6609_v45, %v6281_v40  ;;  %v5954_v0 = vadd.f32 %v5953_v15, %v14132_v47  ;;  %v6282_v52 = vpop.f32.mrf.mxu1  ;;  %v10015_v40 = vor.u32 %v11950_v16, %v10012_v61  ;;  %v9131_v45 = vor.u32 %v11731_v13, %v9130_v12  ;;  %v10040_v12 = vld [vmem:[%s13564_s24 + $0x954] sm:$0xf0]  ;;  %v9150_v13 = vld [vmem:[%s13564_s24 + $0x240] sm:$0xf] }
 0x642   : > { %16547 = vst [vmem:[#allocation92_spill] sm:$0xff] %v14737_v23  ;;  %v6283_v36 = vadd.f32 %v6282_v52, %v5954_v0 }
 0x645   : > { %v5784_v63 = vpop.f32.mrf.mxu3 }
 0x646   : > { %v14749_v49 = vadd.f32 %v5784_v63, %v14287_v30  ;;  %v11737_v63 = vld [vmem:[%s13564_s24 + $0x258] sm:$0xf0] }
 0x647   : > { %v6611_v53 = vpop.f32.mrf.mxu2  ;;  %v5956_v47 = vpop.f32.mrf.mxu0 }
 0x648   : > { %16548 = vst [vmem:[#allocation93_spill] sm:$0xff] %v14749_v49  ;;  %v14751_v29 = vadd.f32 %v6611_v53, %v6283_v36  ;;  %v5957_v15 = vadd.f32 %v5956_v47, %v14137_v48  ;;  %v6285_v0 = vpop.f32.mrf.mxu1  ;;  %v11734_v53 = vld [vmem:[%s13564_s24 + $0x244] sm:$0xf] }
 0x649   : > { %v11738_v47 = vld [vmem:[%s13564_s24 + $0x260] sm:$0xf0] }
 0x64a   : > { %v6286_v52 = vadd.f32 %v6285_v0, %v5957_v15  ;;  %5826 = vmatmul.bf16.gmra.mxu3 %v10015_v40  ;;  %5995 = vmatmul.bf16.gmra.mxu0 %v9123_v56  ;;  %v9152_v40 = vld [vmem:[%s13564_s24 + $0x25c] sm:$0xf0]  ;;  %v9158_v56 = vld [vmem:[%s13564_s24 + $0x248] sm:$0xf]  ;;  %v10043_v15 = vor.u32 %v11957_v11, %v10040_v12  ;;  %v9151_v0 = vor.u32 %v11737_v63, %v9150_v13  ;;  %v16554_v13 = vld [vmem:[#allocation38_spill] sm:$0xff] }
 0x64b   : > { %6324 = vmatmul.bf16.gmra.mxu1 %v9127_v55 }
 0x64c   : > { %10853 = vmatmul.msk.bf16.gmra.mxu2 %vm4433_vm0, %v9131_v45 }
 0x64d   : > { %v5787_v30 = vpop.f32.mrf.mxu3 }
 0x64e   : > { %v14756_v36 = vadd.f32 %v5787_v30, %v14292_v51  ;;  %v9155_v30 = vor.u32 %v11734_v53, %v9152_v40 }
 0x64f   : > { %v6614_v16 = vpop.f32.mrf.mxu2  ;;  %v5958_v61 = vpop.f32.mrf.mxu0 }
 0x650   : > { %16549 = vst [vmem:[#allocation94_spill] sm:$0xff] %v14756_v36  ;;  %v14758_v48 = vadd.f32 %v6614_v16, %v6286_v52  ;;  %v5959_v22 = vadd.f32 %v5958_v61, %v14150_v24  ;;  %v6287_v17 = vpop.f32.mrf.mxu1  ;;  %v9159_v16 = vor.u32 %v11738_v47, %v9158_v56  ;;  %v11964_v56 = vld [vmem:[%s13564_s24 + $0x974] sm:$0xf]  ;;  %v10068_v47 = vld [vmem:[%s13564_s24 + $0x98c] sm:$0xf0] }
 0x652   : > { %16550 = vst [vmem:[#allocation95_spill] sm:$0xff] %v14758_v48  ;;  %v6288_v10 = vadd.f32 %v6287_v17, %v5959_v22 }
 0x655   : > { %v5789_v55 = vpop.f32.mrf.mxu3 }
 0x656   : > { %v14770_v51 = vadd.f32 %v5789_v55, %v14305_v60  ;;  %v9178_v55 = vld [vmem:[%s13564_s24 + $0x278] sm:$0xf] }
 0x657   : > { %v6616_v45 = vpop.f32.mrf.mxu2  ;;  %v5961_v24 = vpop.f32.mrf.mxu0 }
 0x658   : > { %16551 = vst [vmem:[#allocation96_spill] sm:$0xff] %v14770_v51  ;;  %v14772_v52 = vadd.f32 %v6616_v45, %v6288_v10  ;;  %v5962_v61 = vadd.f32 %v5961_v24, %v14155_v34  ;;  %v6290_v22 = vpop.f32.mrf.mxu1  ;;  %v11744_v45 = vld [vmem:[%s13564_s24 + $0x290] sm:$0xf0]  ;;  %v9186_v24 = vld [vmem:[%s13564_s24 + $0x280] sm:$0xf] }
 0x65a   : > { %v6291_v17 = vadd.f32 %v6290_v22, %v5962_v61  ;;  %5831 = vmatmul.bf16.gmra.mxu3 %v10043_v15  ;;  %6000 = vmatmul.bf16.gmra.mxu0 %v9151_v0  ;;  %v11741_v15 = vld [vmem:[%s13564_s24 + $0x27c] sm:$0xf]  ;;  %v9180_v0 = vld [vmem:[%s13564_s24 + $0x294] sm:$0xf0] }
 0x65b   : > { %6329 = vmatmul.bf16.gmra.mxu1 %v9155_v30  ;;  %v11745_v30 = vld [vmem:[%s13564_s24 + $0x298] sm:$0xf0] }
 0x65c   : > { %10854 = vmatmul.msk.bf16.gmra.mxu2 %vm4433_vm0, %v9159_v16  ;;  %v16555_v61 = vld [vmem:[#allocation46_spill] sm:$0xff] }
 0x65d   : > { %v5792_v60 = vpop.f32.mrf.mxu3 }
 0x65e   : > { %v14777_v10 = vadd.f32 %v5792_v60, %v14310_v39  ;;  %v9179_v60 = vor.u32 %v11744_v45, %v9178_v55 }
 0x65f   : > { %v6619_v11 = vpop.f32.mrf.mxu2  ;;  %v5963_v12 = vpop.f32.mrf.mxu0 }
 0x660   : > { %16552 = vst [vmem:[#allocation97_spill] sm:$0xff] %v14777_v10  ;;  %v14779_v34 = vadd.f32 %v6619_v11, %v6291_v17  ;;  %v5964_v63 = vadd.f32 %v5963_v12, %v16554_v13  ;;  %v6292_v53 = vpop.f32.mrf.mxu1  ;;  %v10071_v17 = vor.u32 %v11964_v56, %v10068_v47  ;;  %v9183_v13 = vor.u32 %v11741_v15, %v9180_v0  ;;  %v16558_v56 = vld [vmem:[#allocation47_spill] sm:$0xff]  ;;  %v16561_v15 = vld [vmem:[#allocation40_spill] sm:$0xff] }
 0x662   : > { %16553 = vst [vmem:[#allocation98_spill] sm:$0xff] %v14779_v34  ;;  %v6293_v40 = vadd.f32 %v6292_v53, %v5964_v63  ;;  %v9187_v63 = vor.u32 %v11745_v30, %v9186_v24  ;;  %v16557_v53 = vld [vmem:[#allocation39_spill] sm:$0xff] }
 0x665   : > { %v5794_v16 = vpop.f32.mrf.mxu3 }
 0x666   : > { %v14791_v39 = vadd.f32 %v5794_v16, %v16555_v61  ;;  %v11971_v16 = vld [vmem:[%s13564_s24 + $0x9ac] sm:$0xf]  ;;  %v10096_v61 = vld [vmem:[%s13564_s24 + $0x9c4] sm:$0xf0] }
 0x667   : > { %v6621_v22 = vpop.f32.mrf.mxu2  ;;  %v5966_v12 = vpop.f32.mrf.mxu0 }
 0x668   : > { %16556 = vst [vmem:[#allocation38_spill] sm:$0xff] %v14791_v39  ;;  %v14793_v11 = vadd.f32 %v6621_v22, %v6293_v40  ;;  %v5967_v7 = vadd.f32 %v5966_v12, %v16557_v53  ;;  %v6295_v10 = vpop.f32.mrf.mxu1  ;;  %v9206_v22 = vld [vmem:[%s13564_s24 + $0x2b0] sm:$0xf] }
 0x669   : > { %v9208_v12 = vld [vmem:[%s13564_s24 + $0x2cc] sm:$0xf0] }
 0x66a   : > { %v6296_v51 = vadd.f32 %v6295_v10, %v5967_v7  ;;  %5836 = vmatmul.bf16.gmra.mxu3 %v10071_v17  ;;  %6005 = vmatmul.bf16.gmra.mxu0 %v9179_v60  ;;  %v12174_v10 = vld [vmem:[%s16366_s3 + $0x70] sm:$0xff]  ;;  %v11751_v17 = vld [vmem:[%s13564_s24 + $0x2c8] sm:$0xf0] }
 0x66b   : > { %6334 = vmatmul.bf16.gmra.mxu1 %v9183_v13  ;;  %7213 = vmatpush.bf16.msra.mxu3 %v12174_v10  ;;  %v11748_v60 = vld [vmem:[%s13564_s24 + $0x2b4] sm:$0xf]  ;;  %v9214_v13 = vld [vmem:[%s13564_s24 + $0x2b8] sm:$0xf] }
 0x66c   : > { %10855 = vmatmul.msk.bf16.gmra.mxu2 %vm4433_vm0, %v9187_v63  ;;  %v11752_v63 = vld [vmem:[%s13564_s24 + $0x2d0] sm:$0xf0]  ;;  %v9211_v10 = vor.u32 %v11748_v60, %v9208_v12  ;;  %v16566_v60 = vld [vmem:[#allocation42_spill] sm:$0xff] }
 0x66d   : > { %v5797_v40 = vpop.f32.mrf.mxu3 }
 0x66e   : > { %v14798_v47 = vadd.f32 %v5797_v40, %v16558_v56  ;;  %v10099_v56 = vor.u32 %v11971_v16, %v10096_v61 }
 0x66f   : > { %v6624_v55 = vpop.f32.mrf.mxu2  ;;  %v5968_v7 = vpop.f32.mrf.mxu0 }
 0x670   : > { %16559 = vst [vmem:[#allocation46_spill] sm:$0xff] %v14798_v47  ;;  %v14800_v45 = vadd.f32 %v6624_v55, %v6296_v51  ;;  %v5969_v0 = vadd.f32 %v5968_v7, %v16561_v15  ;;  %v6297_v24 = vpop.f32.mrf.mxu1  ;;  %v9207_v55 = vor.u32 %v11751_v17, %v9206_v22  ;;  %v9215_v15 = vor.u32 %v11752_v63, %v9214_v13  ;;  %v11978_v63 = vld [vmem:[%s13564_s24 + $0x9e4] sm:$0xf] }
 0x672   : > { %16560 = vst [vmem:[#allocation39_spill] sm:$0xff] %v14800_v45  ;;  %v6298_v30 = vadd.f32 %v6297_v24, %v5969_v0  ;;  %v16563_v0 = vld [vmem:[#allocation41_spill] sm:$0xff] }
 0x675   : > { %v5799_v51 = vpop.f32.mrf.mxu3 }
 0x676   : > { %v14815_v53 = vadd.f32 %v5799_v51, %v14344_v1  ;;  %v10124_v51 = vld [vmem:[%s13564_s24 + $0x9fc] sm:$0xf0] }
 0x677   : > { %v6626_v40 = vpop.f32.mrf.mxu2  ;;  %v5971_v7 = vpop.f32.mrf.mxu0 }
 0x678   : > { %16562 = vst [vmem:[#allocation47_spill] sm:$0xff] %v14815_v53  ;;  %v14817_v47 = vadd.f32 %v6626_v40, %v6298_v30  ;;  %v5972_v24 = vadd.f32 %v5971_v7, %v16563_v0  ;;  %v6300_v39 = vpop.f32.mrf.mxu1  ;;  %v16564_v30 = vld [vmem:[#allocation48_spill] sm:$0xff] }
 0x679   : > { %v9234_v40 = vld [vmem:[%s13564_s24 + $0x2e8] sm:$0xf] }
 0x67a   : > { %v6301_v36 = vadd.f32 %v6300_v39, %v5972_v24  ;;  %5841 = vmatmul.bf16.gmra.mxu3 %v10099_v56  ;;  %6010 = vmatmul.bf16.gmra.mxu0 %v9207_v55  ;;  %v11758_v56 = vld [vmem:[%s13564_s24 + $0x300] sm:$0xf0]  ;;  %v11755_v55 = vld [vmem:[%s13564_s24 + $0x2ec] sm:$0xf]  ;;  %v9236_v7 = vld [vmem:[%s13564_s24 + $0x304] sm:$0xf0] }
 0x67b   : > { %6339 = vmatmul.bf16.gmra.mxu1 %v9211_v10  ;;  %v9242_v10 = vld [vmem:[%s13564_s24 + $0x2f0] sm:$0xf] }
 0x67c   : > { %10856 = vmatmul.msk.bf16.gmra.mxu2 %vm4433_vm0, %v9215_v15  ;;  %v11759_v15 = vld [vmem:[%s13564_s24 + $0x308] sm:$0xf0]  ;;  %v16567_v24 = vld [vmem:[#allocation49_spill] sm:$0xff] }
 0x67d   : > { %v5802_v1 = vpop.f32.mrf.mxu3 }
 0x67e   : > { %v14822_v16 = vadd.f32 %v5802_v1, %v16564_v30 }
 0x67f   : > { %v6629_v61 = vpop.f32.mrf.mxu2  ;;  %v5973_v17 = vpop.f32.mrf.mxu0 }
 0x680   : > { %16565 = vst [vmem:[#allocation40_spill] sm:$0xff] %v14822_v16  ;;  %v14824_v22 = vadd.f32 %v6629_v61, %v6301_v36  ;;  %v5974_v39 = vadd.f32 %v5973_v17, %v16566_v60  ;;  %v6302_v12 = vpop.f32.mrf.mxu1  ;;  %v10127_v36 = vor.u32 %v11978_v63, %v10124_v51  ;;  %v9235_v61 = vor.u32 %v11758_v56, %v9234_v40  ;;  %v16570_v63 = vld [vmem:[#allocation50_spill] sm:$0xff] }
 0x681   : > { %v9239_v60 = vor.u32 %v11755_v55, %v9236_v7  ;;  %v16573_v7 = vld [vmem:[#allocation44_spill] sm:$0xff] }
 0x682   : > { %v6303_v13 = vadd.f32 %v6302_v12, %v5974_v39  ;;  %v9243_v39 = vor.u32 %v11759_v15, %v9242_v10  ;;  %v16569_v12 = vld [vmem:[#allocation43_spill] sm:$0xff]  ;;  %v11985_v15 = vld [vmem:[%s13564_s24 + $0xa1c] sm:$0xf] }
 0x685   : > { %v5804_v0 = vpop.f32.mrf.mxu3 }
 0x686   : > { %v14836_v1 = vadd.f32 %v5804_v0, %v16567_v24  ;;  %v10152_v0 = vld [vmem:[%s13564_s24 + $0xa34] sm:$0xf0]  ;;  %v9262_v24 = vld [vmem:[%s13564_s24 + $0x320] sm:$0xf] }
 0x687   : > { %v6631_v30 = vpop.f32.mrf.mxu2  ;;  %v5976_v17 = vpop.f32.mrf.mxu0 }
 0x688   : > { %16568 = vst [vmem:[#allocation41_spill] sm:$0xff] %v14836_v1  ;;  %v14838_v16 = vadd.f32 %v6631_v30, %v6303_v13  ;;  %v5977_v53 = vadd.f32 %v5976_v17, %v16569_v12  ;;  %v6305_v49 = vpop.f32.mrf.mxu1  ;;  %v11765_v30 = vld [vmem:[%s13564_s24 + $0x338] sm:$0xf0]  ;;  %v9270_v17 = vld [vmem:[%s13564_s24 + $0x328] sm:$0xf]  ;;  %v16574_v12 = vld [vmem:[#allocation51_spill] sm:$0xff] }
 0x68a   : > { %v6306_v6 = vadd.f32 %v6305_v49, %v5977_v53  ;;  %5846 = vmatmul.bf16.gmra.mxu3 %v10127_v36  ;;  %6015 = vmatmul.bf16.gmra.mxu0 %v9235_v61  ;;  %v11762_v36 = vld [vmem:[%s13564_s24 + $0x324] sm:$0xf]  ;;  %v9264_v61 = vld [vmem:[%s13564_s24 + $0x33c] sm:$0xf0] }
 0x68b   : > { %6344 = vmatmul.bf16.gmra.mxu1 %v9239_v60  ;;  %v11766_v60 = vld [vmem:[%s13564_s24 + $0x340] sm:$0xf0] }
 0x68c   : > { %10857 = vmatmul.msk.bf16.gmra.mxu2 %vm4433_vm0, %v9243_v39 }
 0x68d   : > { %v5807_v13 = vpop.f32.mrf.mxu3 }
 0x68e   : > { %v14843_v51 = vadd.f32 %v5807_v13, %v16570_v63 }
 0x68f   : > { %v6634_v40 = vpop.f32.mrf.mxu2  ;;  %v5978_v55 = vpop.f32.mrf.mxu0 }
 0x690   : > { %16571 = vst [vmem:[#allocation48_spill] sm:$0xff] %v14843_v51  ;;  %v14845_v56 = vadd.f32 %v6634_v40, %v6306_v6  ;;  %v5979_v49 = vadd.f32 %v5978_v55, %v16573_v7  ;;  %v6307_v53 = vpop.f32.mrf.mxu1  ;;  %v10155_v6 = vor.u32 %v11985_v15, %v10152_v0  ;;  %v9263_v40 = vor.u32 %v11765_v30, %v9262_v24  ;;  %v16577_v15 = vld [vmem:[#allocation52_spill] sm:$0xff] }
 0x691   : > { %v9267_v7 = vor.u32 %v11762_v36, %v9264_v61  ;;  %v16580_v61 = vld [vmem:[#allocation3_spill] sm:$0xff] }
 0x692   : > { %16572 = vst [vmem:[#allocation42_spill] sm:$0xff] %v14845_v56  ;;  %v6308_v10 = vadd.f32 %v6307_v53, %v5979_v49  ;;  %v9271_v49 = vor.u32 %v11766_v60, %v9270_v17  ;;  %v16576_v53 = vld [vmem:[#allocation45_spill] sm:$0xff] }
 0x693   : > { %v11992_v60 = vld [vmem:[%s13564_s24 + $0xa54] sm:$0xf] }
 0x695   : > { %v5809_v39 = vpop.f32.mrf.mxu3 }
 0x696   : > { %v14857_v13 = vadd.f32 %v5809_v39, %v16574_v12  ;;  %v10180_v39 = vld [vmem:[%s13564_s24 + $0xa6c] sm:$0xf0]  ;;  %v9290_v12 = vld [vmem:[%s13564_s24 + $0x358] sm:$0xf] }
 0x697   : > { %v6636_v63 = vpop.f32.mrf.mxu2  ;;  %v5981_v55 = vpop.f32.mrf.mxu0 }
 0x698   : > { %16575 = vst [vmem:[#allocation49_spill] sm:$0xff] %v14857_v13  ;;  %v14859_v51 = vadd.f32 %v6636_v63, %v6308_v10  ;;  %v5982_v1 = vadd.f32 %v5981_v55, %v16576_v53  ;;  %v6310_v2 = vpop.f32.mrf.mxu1  ;;  %v11772_v63 = vld [vmem:[%s13564_s24 + $0x370] sm:$0xf0]  ;;  %v9298_v55 = vld [vmem:[%s13564_s24 + $0x360] sm:$0xf] }
 0x69a   : > { %v6311_v27 = vadd.f32 %v6310_v2, %v5982_v1  ;;  %5851 = vmatmul.bf16.gmra.mxu3 %v10155_v6  ;;  %6020 = vmatmul.bf16.gmra.mxu0 %v9263_v40  ;;  %v11769_v6 = vld [vmem:[%s13564_s24 + $0x35c] sm:$0xf]  ;;  %v9292_v40 = vld [vmem:[%s13564_s24 + $0x374] sm:$0xf0] }
 0x69b   : > { %6349 = vmatmul.bf16.gmra.mxu1 %v9267_v7  ;;  %v11773_v7 = vld [vmem:[%s13564_s24 + $0x378] sm:$0xf0] }
 0x69c   : > { %10858 = vmatmul.msk.bf16.gmra.mxu2 %vm4433_vm0, %v9271_v49 }
 0x69d   : > { %v5812_v10 = vpop.f32.mrf.mxu3 }
 0x69e   : > { %v14864_v0 = vadd.f32 %v5812_v10, %v16577_v15  ;;  %v9291_v15 = vor.u32 %v11772_v63, %v9290_v12 }
 0x69f   : > { %v6639_v24 = vpop.f32.mrf.mxu2  ;;  %v5983_v36 = vpop.f32.mrf.mxu0 }
 0x6a0   : > { %16578 = vst [vmem:[#allocation43_spill] sm:$0xff] %v14864_v0  ;;  %v14866_v30 = vadd.f32 %v6639_v24, %v6311_v27  ;;  %v5984_v2 = vadd.f32 %v5983_v36, %v16580_v61  ;;  %v6312_v1 = vpop.f32.mrf.mxu1  ;;  %v10183_v27 = vor.u32 %v11992_v60, %v10180_v39  ;;  %v9295_v61 = vor.u32 %v11769_v6, %v9292_v40  ;;  %v16586_v6 = vld [vmem:[#allocation5_spill] sm:$0xff] }
 0x6a2   : > { %16579 = vst [vmem:[#allocation50_spill] sm:$0xff] %v14866_v30  ;;  %v6313_v17 = vadd.f32 %v6312_v1, %v5984_v2  ;;  %v9299_v2 = vor.u32 %v11773_v7, %v9298_v55  ;;  %v16582_v1 = vld [vmem:[#allocation4_spill] sm:$0xff] }
 0x6a3   : > { %v11999_v55 = vld [vmem:[%s13564_s24 + $0xa8c] sm:$0xf]  ;;  %v10208_v7 = vld [vmem:[%s13564_s24 + $0xaa4] sm:$0xf0] }
 0x6a5   : > { %v5814_v49 = vpop.f32.mrf.mxu3 }
 0x6a6   : > { %v14878_v53 = vadd.f32 %v5814_v49, %v14401_v31  ;;  %v9318_v49 = vld [vmem:[%s13564_s24 + $0x390] sm:$0xf] }
 0x6a7   : > { %v6641_v10 = vpop.f32.mrf.mxu2  ;;  %v5986_v36 = vpop.f32.mrf.mxu0 }
 0x6a8   : > { %16581 = vst [vmem:[#allocation44_spill] sm:$0xff] %v14878_v53  ;;  %v14880_v24 = vadd.f32 %v6641_v10, %v6313_v17  ;;  %v5987_v0 = vadd.f32 %v5986_v36, %v16582_v1  ;;  %v6315_v13 = vpop.f32.mrf.mxu1  ;;  %v16583_v17 = vld [vmem:[#allocation53_spill] sm:$0xff]  ;;  %v11779_v10 = vld [vmem:[%s13564_s24 + $0x3a8] sm:$0xf0]  ;;  %v9326_v36 = vld [vmem:[%s13564_s24 + $0x398] sm:$0xf] }
 0x6aa   : > { %v6316_v4 = vadd.f32 %v6315_v13, %v5987_v0  ;;  %5856 = vmatmul.bf16.gmra.mxu3 %v10183_v27  ;;  %6025 = vmatmul.bf16.gmra.mxu0 %v9291_v15  ;;  %v11776_v27 = vld [vmem:[%s13564_s24 + $0x394] sm:$0xf]  ;;  %v9320_v15 = vld [vmem:[%s13564_s24 + $0x3ac] sm:$0xf0] }
 0x6ab   : > { %6354 = vmatmul.bf16.gmra.mxu1 %v9295_v61  ;;  %v11780_v61 = vld [vmem:[%s13564_s24 + $0x3b0] sm:$0xf0] }
 0x6ac   : > { %10859 = vmatmul.msk.bf16.gmra.mxu2 %vm4433_vm0, %v9299_v2 }
 0x6ad   : > { %v5817_v31 = vpop.f32.mrf.mxu3 }
 0x6ae   : > { %v14885_v60 = vadd.f32 %v5817_v31, %v16583_v17  ;;  %v9319_v17 = vor.u32 %v11779_v10, %v9318_v49 }
 0x6af   : > { %v6644_v39 = vpop.f32.mrf.mxu2  ;;  %v5988_v63 = vpop.f32.mrf.mxu0 }
 0x6b0   : > { %16584 = vst [vmem:[#allocation51_spill] sm:$0xff] %v14885_v60  ;;  %v14887_v12 = vadd.f32 %v6644_v39, %v6316_v4  ;;  %v5989_v13 = vadd.f32 %v5988_v63, %v16586_v6  ;;  %v6317_v0 = vpop.f32.mrf.mxu1  ;;  %v10211_v4 = vor.u32 %v11999_v55, %v10208_v7  ;;  %v9323_v6 = vor.u32 %v11776_v27, %v9320_v15  ;;  %v16593_v27 = vld [vmem:[#allocation7_spill] sm:$0xff] }
 0x6b2   : > { %16585 = vst [vmem:[#allocation45_spill] sm:$0xff] %v14887_v12  ;;  %v6318_v40 = vadd.f32 %v6317_v0, %v5989_v13  ;;  %v9327_v13 = vor.u32 %v11780_v61, %v9326_v36  ;;  %v16589_v0 = vld [vmem:[#allocation6_spill] sm:$0xff]  ;;  %v12006_v36 = vld [vmem:[%s13564_s24 + $0xac4] sm:$0xf]  ;;  %v10236_v61 = vld [vmem:[%s13564_s24 + $0xadc] sm:$0xf0] }
 0x6b5   : > { %v5819_v2 = vpop.f32.mrf.mxu3 }
 0x6b6   : > { %v14899_v1 = vadd.f32 %v5819_v2, %v14419_v43  ;;  %v9346_v2 = vld [vmem:[%s13564_s24 + $0x3c8] sm:$0xf] }
 0x6b7   : > { %v6646_v31 = vpop.f32.mrf.mxu2  ;;  %v5991_v63 = vpop.f32.mrf.mxu0 }
 0x6b8   : > { %16587 = vst [vmem:[#allocation52_spill] sm:$0xff] %v14899_v1  ;;  %v14901_v39 = vadd.f32 %v6646_v31, %v6318_v40  ;;  %v5992_v60 = vadd.f32 %v5991_v63, %v16589_v0  ;;  %v6320_v53 = vpop.f32.mrf.mxu1  ;;  %v16590_v40 = vld [vmem:[#allocation55_spill] sm:$0xff]  ;;  %v9354_v63 = vld [vmem:[%s13564_s24 + $0x3d0] sm:$0xf] }
 0x6b9   : > { %v11786_v31 = vld [vmem:[%s13564_s24 + $0x3e0] sm:$0xf0] }
 0x6ba   : > { %16588 = vst [vmem:[#allocation3_spill] sm:$0xff] %v14901_v39  ;;  %v6321_v12 = vadd.f32 %v6320_v53, %v5992_v60  ;;  %5861 = vmatmul.bf16.gmra.mxu3 %v10211_v4  ;;  %6030 = vmatmul.bf16.gmra.mxu0 %v9319_v17  ;;  %v11783_v4 = vld [vmem:[%s13564_s24 + $0x3cc] sm:$0xf]  ;;  %v9348_v17 = vld [vmem:[%s13564_s24 + $0x3e4] sm:$0xf0] }
 0x6bb   : > { %6359 = vmatmul.bf16.gmra.mxu1 %v9323_v6  ;;  %v11787_v6 = vld [vmem:[%s13564_s24 + $0x3e8] sm:$0xf0] }
 0x6bc   : > { %10860 = vmatmul.msk.bf16.gmra.mxu2 %vm4433_vm0, %v9327_v13  ;;  %v11899_v39 = vld [vmem:[%s13564_s24 + $0x768] sm:$0xf0] }
 0x6bd   : > { %v5822_v43 = vpop.f32.mrf.mxu3 }
 0x6be   : > { %v14906_v55 = vadd.f32 %v5822_v43, %v16590_v40  ;;  %v9347_v40 = vor.u32 %v11786_v31, %v9346_v2  ;;  %v16599_v31 = vld [vmem:[#allocation9_spill] sm:$0xff] }
 0x6bf   : > { %v6649_v7 = vpop.f32.mrf.mxu2  ;;  %v5993_v10 = vpop.f32.mrf.mxu0 }
 0x6c0   : > { %16591 = vst [vmem:[#allocation4_spill] sm:$0xff] %v14906_v55  ;;  %v14908_v49 = vadd.f32 %v6649_v7, %v6321_v12  ;;  %v5994_v53 = vadd.f32 %v5993_v10, %v16593_v27  ;;  %v6322_v60 = vpop.f32.mrf.mxu1  ;;  %v10239_v12 = vor.u32 %v12006_v36, %v10236_v61  ;;  %v9351_v27 = vor.u32 %v11783_v4, %v9348_v17  ;;  %v12013_v17 = vld [vmem:[%s13564_s24 + $0xafc] sm:$0xf] }
 0x6c2   : > { %16592 = vst [vmem:[#allocation53_spill] sm:$0xff] %v14908_v49  ;;  %v6323_v15 = vadd.f32 %v6322_v60, %v5994_v53  ;;  %v9355_v53 = vor.u32 %v11787_v6, %v9354_v63  ;;  %v16596_v60 = vld [vmem:[#allocation8_spill] sm:$0xff]  ;;  %v10264_v63 = vld [vmem:[%s13564_s24 + $0xb14] sm:$0xf0]  ;;  %v9374_v6 = vld [vmem:[%s13564_s24 + $0x400] sm:$0xf] }
 0x6c5   : > { %v5824_v13 = vpop.f32.mrf.mxu3 }
 0x6c6   : > { %v14920_v0 = vadd.f32 %v5824_v13, %v14437_v54  ;;  %v11793_v13 = vld [vmem:[%s13564_s24 + $0x418] sm:$0xf0] }
 0x6c7   : > { %v6651_v43 = vpop.f32.mrf.mxu2  ;;  %v5996_v10 = vpop.f32.mrf.mxu0 }
 0x6c8   : > { %16594 = vst [vmem:[#allocation5_spill] sm:$0xff] %v14920_v0  ;;  %v14922_v7 = vadd.f32 %v6651_v43, %v6323_v15  ;;  %v5997_v55 = vadd.f32 %v5996_v10, %v16596_v60  ;;  %v6325_v1 = vpop.f32.mrf.mxu1  ;;  %v11790_v43 = vld [vmem:[%s13564_s24 + $0x404] sm:$0xf]  ;;  %v9375_v60 = vor.u32 %v11793_v13, %v9374_v6 }
 0x6c9   : > { %v11794_v10 = vld [vmem:[%s13564_s24 + $0x420] sm:$0xf0] }
 0x6ca   : > { %16595 = vst [vmem:[#allocation6_spill] sm:$0xff] %v14922_v7  ;;  %v6326_v49 = vadd.f32 %v6325_v1, %v5997_v55  ;;  %5866 = vmatmul.bf16.gmra.mxu3 %v10239_v12  ;;  %6035 = vmatmul.bf16.gmra.mxu0 %v9347_v40  ;;  %v9376_v12 = vld [vmem:[%s13564_s24 + $0x41c] sm:$0xf0]  ;;  %v9382_v40 = vld [vmem:[%s13564_s24 + $0x408] sm:$0xf] }
 0x6cb   : > { %6364 = vmatmul.bf16.gmra.mxu1 %v9351_v27 }
 0x6cc   : > { %10861 = vmatmul.msk.bf16.gmra.mxu2 %vm4433_vm0, %v9355_v53 }
 0x6cd   : > { %v5827_v54 = vpop.f32.mrf.mxu3 }
 0x6ce   : > { %v14927_v15 = vadd.f32 %v5827_v54, %v14442_v18 }
 0x6cf   : > { %v6654_v36 = vpop.f32.mrf.mxu2  ;;  %v5998_v2 = vpop.f32.mrf.mxu0 }
 0x6d0   : > { %16597 = vst [vmem:[#allocation55_spill] sm:$0xff] %v14927_v15  ;;  %v14929_v61 = vadd.f32 %v6654_v36, %v6326_v49  ;;  %v5999_v1 = vadd.f32 %v5998_v2, %v16599_v31  ;;  %v6327_v55 = vpop.f32.mrf.mxu1  ;;  %v10267_v49 = vor.u32 %v12013_v17, %v10264_v63  ;;  %v9379_v2 = vor.u32 %v11790_v43, %v9376_v12  ;;  %v16606_v43 = vld [vmem:[#allocation11_spill] sm:$0xff] }
 0x6d1   : > { %v9383_v31 = vor.u32 %v11794_v10, %v9382_v40  ;;  %v12020_v10 = vld [vmem:[%s13564_s24 + $0xb34] sm:$0xf] }
 0x6d2   : > { %16598 = vst [vmem:[#allocation7_spill] sm:$0xff] %v14929_v61  ;;  %v6328_v4 = vadd.f32 %v6327_v55, %v5999_v1  ;;  %v16602_v1 = vld [vmem:[#allocation10_spill] sm:$0xff] }
 0x6d5   : > { %v5829_v27 = vpop.f32.mrf.mxu3 }
 0x6d6   : > { %v14941_v18 = vadd.f32 %v5829_v27, %v14455_v8  ;;  %v10292_v27 = vld [vmem:[%s13564_s24 + $0xb4c] sm:$0xf0] }
 0x6d7   : > { %v6656_v53 = vpop.f32.mrf.mxu2  ;;  %v6001_v36 = vpop.f32.mrf.mxu0 }
 0x6d8   : > { %16600 = vst [vmem:[#allocation8_spill] sm:$0xff] %v14941_v18  ;;  %v14943_v54 = vadd.f32 %v6656_v53, %v6328_v4  ;;  %v6002_v55 = vadd.f32 %v6001_v36, %v16602_v1  ;;  %v6330_v15 = vpop.f32.mrf.mxu1  ;;  %v16603_v4 = vld [vmem:[#allocation60_spill] sm:$0xff]  ;;  %v9402_v53 = vld [vmem:[%s13564_s24 + $0x438] sm:$0xf] }
 0x6d9   : > { %v9404_v36 = vld [vmem:[%s13564_s24 + $0x454] sm:$0xf0] }
 0x6da   : > { %16601 = vst [vmem:[#allocation9_spill] sm:$0xff] %v14943_v54  ;;  %v6331_v0 = vadd.f32 %v6330_v15, %v6002_v55  ;;  %5871 = vmatmul.bf16.gmra.mxu3 %v10267_v49  ;;  %6040 = vmatmul.bf16.gmra.mxu0 %v9375_v60  ;;  %v11800_v49 = vld [vmem:[%s13564_s24 + $0x450] sm:$0xf0]  ;;  %v11797_v60 = vld [vmem:[%s13564_s24 + $0x43c] sm:$0xf] }
 0x6db   : > { %6369 = vmatmul.bf16.gmra.mxu1 %v9379_v2  ;;  %v9410_v2 = vld [vmem:[%s13564_s24 + $0x440] sm:$0xf]  ;;  %v11913_v54 = vld [vmem:[%s13564_s24 + $0x7d8] sm:$0xf0] }
 0x6dc   : > { %10862 = vmatmul.msk.bf16.gmra.mxu2 %vm4433_vm0, %v9383_v31  ;;  %v11801_v31 = vld [vmem:[%s13564_s24 + $0x458] sm:$0xf0] }
 0x6dd   : > { %v5832_v8 = vpop.f32.mrf.mxu3 }
 0x6de   : > { %v14948_v17 = vadd.f32 %v5832_v8, %v16603_v4  ;;  %v9403_v4 = vor.u32 %v11800_v49, %v9402_v53  ;;  %v16612_v53 = vld [vmem:[#allocation13_spill] sm:$0xff] }
 0x6df   : > { %v6659_v63 = vpop.f32.mrf.mxu2  ;;  %v6003_v13 = vpop.f32.mrf.mxu0 }
 0x6e0   : > { %16604 = vst [vmem:[#allocation10_spill] sm:$0xff] %v14948_v17  ;;  %v14950_v6 = vadd.f32 %v6659_v63, %v6331_v0  ;;  %v6004_v15 = vadd.f32 %v6003_v13, %v16606_v43  ;;  %v6332_v12 = vpop.f32.mrf.mxu1  ;;  %v10295_v0 = vor.u32 %v12020_v10, %v10292_v27  ;;  %v9407_v43 = vor.u32 %v11797_v60, %v9404_v36 }
 0x6e2   : > { %16605 = vst [vmem:[#allocation60_spill] sm:$0xff] %v14950_v6  ;;  %v6333_v40 = vadd.f32 %v6332_v12, %v6004_v15  ;;  %v9411_v15 = vor.u32 %v11801_v31, %v9410_v2  ;;  %v16609_v12 = vld [vmem:[#allocation12_spill] sm:$0xff] }
 0x6e3   : > { %v12027_v2 = vld [vmem:[%s13564_s24 + $0xb6c] sm:$0xf]  ;;  %v10320_v31 = vld [vmem:[%s13564_s24 + $0xb84] sm:$0xf0] }
 0x6e5   : > { %v5834_v1 = vpop.f32.mrf.mxu3 }
 0x6e6   : > { %v14962_v55 = vadd.f32 %v5834_v1, %v14476_v41  ;;  %v9430_v1 = vld [vmem:[%s13564_s24 + $0x470] sm:$0xf] }
 0x6e7   : > { %v6661_v8 = vpop.f32.mrf.mxu2  ;;  %v6006_v13 = vpop.f32.mrf.mxu0 }
 0x6e8   : > { %16607 = vst [vmem:[#allocation11_spill] sm:$0xff] %v14962_v55  ;;  %v14964_v63 = vadd.f32 %v6661_v8, %v6333_v40  ;;  %v6007_v17 = vadd.f32 %v6006_v13, %v16609_v12  ;;  %v6335_v18 = vpop.f32.mrf.mxu1  ;;  %v11807_v8 = vld [vmem:[%s13564_s24 + $0x488] sm:$0xf0]  ;;  %v11808_v13 = vld [vmem:[%s13564_s24 + $0x490] sm:$0xf0]  ;;  %v10323_v12 = vor.u32 %v12027_v2, %v10320_v31 }
 0x6ea   : > { %16608 = vst [vmem:[#allocation99_spill] sm:$0xff] %v14964_v63  ;;  %v6336_v6 = vadd.f32 %v6335_v18, %v6007_v17  ;;  %5876 = vmatmul.bf16.gmra.mxu3 %v10295_v0  ;;  %6045 = vmatmul.bf16.gmra.mxu0 %v9403_v4  ;;  %v12173_v17 = vld [vmem:[%s16366_s3 + $0x68] sm:$0xff]  ;;  %v9432_v0 = vld [vmem:[%s13564_s24 + $0x48c] sm:$0xf0]  ;;  %v9438_v4 = vld [vmem:[%s13564_s24 + $0x478] sm:$0xf] }
 0x6eb   : > { %6374 = vmatmul.bf16.gmra.mxu1 %v9407_v43  ;;  %7214 = vmatpush.bf16.msra.mxu3 %v12173_v17  ;;  %v11990_v63 = vld [vmem:[%s13564_s24 + $0xa40] sm:$0xf0] }
 0x6ec   : > { %10863 = vmatmul.msk.bf16.gmra.mxu2 %vm4433_vm0, %v9411_v15 }
 0x6ed   : > { %v5837_v41 = vpop.f32.mrf.mxu3 }
 0x6ee   : > { %v14969_v40 = vadd.f32 %v5837_v41, %v14484_v38  ;;  %v11804_v38 = vld [vmem:[%s13564_s24 + $0x474] sm:$0xf]  ;;  %v9431_v41 = vor.u32 %v11807_v8, %v9430_v1  ;;  %v16618_v8 = vld [vmem:[#allocation15_spill] sm:$0xff] }
 0x6ef   : > { %v6664_v10 = vpop.f32.mrf.mxu2  ;;  %v6008_v18 = vpop.f32.mrf.mxu0  ;;  %v9435_v17 = vor.u32 %v11804_v38, %v9432_v0 }
 0x6f0   : > { %16610 = vst [vmem:[#allocation12_spill] sm:$0xff] %v14969_v40  ;;  %v14971_v27 = vadd.f32 %v6664_v10, %v6336_v6  ;;  %v6009_v49 = vadd.f32 %v6008_v18, %v16612_v53  ;;  %v6337_v60 = vpop.f32.mrf.mxu1  ;;  %v9439_v53 = vor.u32 %v11808_v13, %v9438_v4  ;;  %v12034_v4 = vld [vmem:[%s13564_s24 + $0xba4] sm:$0xf]  ;;  %v10348_v13 = vld [vmem:[%s13564_s24 + $0xbbc] sm:$0xf0] }
 0x6f2   : > { %16611 = vst [vmem:[#allocation100_spill] sm:$0xff] %v14971_v27  ;;  %v6338_v36 = vadd.f32 %v6337_v60, %v6009_v49  ;;  %v16615_v49 = vld [vmem:[#allocation14_spill] sm:$0xff]  ;;  %v16696_v27 = vld [vmem:[#allocation79_spill] sm:$0xff] }
 0x6f5   : > { %v5839_v6 = vpop.f32.mrf.mxu3 }
 0x6f6   : > { %v14986_v43 = vadd.f32 %v5839_v6, %v14497_v14  ;;  %v9458_v6 = vld [vmem:[%s13564_s24 + $0x4a8] sm:$0xf] }
 0x6f7   : > { %v6666_v15 = vpop.f32.mrf.mxu2  ;;  %v6011_v18 = vpop.f32.mrf.mxu0 }
 0x6f8   : > { %16613 = vst [vmem:[#allocation13_spill] sm:$0xff] %v14986_v43  ;;  %v14988_v10 = vadd.f32 %v6666_v15, %v6338_v36  ;;  %v6012_v60 = vadd.f32 %v6011_v18, %v16615_v49  ;;  %v6340_v40 = vpop.f32.mrf.mxu1  ;;  %v11814_v15 = vld [vmem:[%s13564_s24 + $0x4c0] sm:$0xf0]  ;;  %v9466_v18 = vld [vmem:[%s13564_s24 + $0x4b0] sm:$0xf] }
 0x6fa   : > { %16614 = vst [vmem:[#allocation101_spill] sm:$0xff] %v14988_v10  ;;  %v6341_v55 = vadd.f32 %v6340_v40, %v6012_v60  ;;  %5881 = vmatmul.bf16.gmra.mxu3 %v10323_v12  ;;  %6050 = vmatmul.bf16.gmra.mxu0 %v9431_v41  ;;  %v11811_v12 = vld [vmem:[%s13564_s24 + $0x4ac] sm:$0xf]  ;;  %v9460_v41 = vld [vmem:[%s13564_s24 + $0x4c4] sm:$0xf0]  ;;  %v9459_v60 = vor.u32 %v11814_v15, %v9458_v6  ;;  %v16624_v15 = vld [vmem:[#allocation17_spill] sm:$0xff] }
 0x6fb   : > { %6379 = vmatmul.bf16.gmra.mxu1 %v9435_v17  ;;  %v11815_v17 = vld [vmem:[%s13564_s24 + $0x4c8] sm:$0xf0] }
 0x6fc   : > { %10864 = vmatmul.msk.bf16.gmra.mxu2 %vm4433_vm0, %v9439_v53 }
 0x6fd   : > { %v5842_v14 = vpop.f32.mrf.mxu3 }
 0x6fe   : > { %v14993_v36 = vadd.f32 %v5842_v14, %v14502_v46 }
 0x6ff   : > { %v6669_v2 = vpop.f32.mrf.mxu2  ;;  %v6013_v1 = vpop.f32.mrf.mxu0 }
 0x700   : > { %16616 = vst [vmem:[#allocation14_spill] sm:$0xff] %v14993_v36  ;;  %v14995_v31 = vadd.f32 %v6669_v2, %v6341_v55  ;;  %v6014_v40 = vadd.f32 %v6013_v1, %v16618_v8  ;;  %v6342_v38 = vpop.f32.mrf.mxu1  ;;  %v10351_v55 = vor.u32 %v12034_v4, %v10348_v13  ;;  %v9463_v1 = vor.u32 %v11811_v12, %v9460_v41 }
 0x701   : > { %v9467_v8 = vor.u32 %v11815_v17, %v9466_v18  ;;  %v12041_v18 = vld [vmem:[%s13564_s24 + $0xbdc] sm:$0xf]  ;;  %v10376_v17 = vld [vmem:[%s13564_s24 + $0xbf4] sm:$0xf0] }
 0x702   : > { %16617 = vst [vmem:[#allocation102_spill] sm:$0xff] %v14995_v31  ;;  %v6343_v0 = vadd.f32 %v6342_v38, %v6014_v40  ;;  %v16621_v40 = vld [vmem:[#allocation16_spill] sm:$0xff] }
 0x703   : > { %v11983_v31 = vld [vmem:[%s13564_s24 + $0xa08] sm:$0xf0] }
 0x705   : > { %v5844_v53 = vpop.f32.mrf.mxu3 }
 0x706   : > { %v15007_v46 = vadd.f32 %v5844_v53, %v14515_v28  ;;  %v9486_v53 = vld [vmem:[%s13564_s24 + $0x4e0] sm:$0xf] }
 0x707   : > { %v6671_v49 = vpop.f32.mrf.mxu2  ;;  %v6016_v2 = vpop.f32.mrf.mxu0 }
 0x708   : > { %16619 = vst [vmem:[#allocation15_spill] sm:$0xff] %v15007_v46  ;;  %v15009_v14 = vadd.f32 %v6671_v49, %v6343_v0  ;;  %v6017_v38 = vadd.f32 %v6016_v2, %v16621_v40  ;;  %v6345_v36 = vpop.f32.mrf.mxu1  ;;  %v11821_v49 = vld [vmem:[%s13564_s24 + $0x4f8] sm:$0xf0]  ;;  %v9494_v2 = vld [vmem:[%s13564_s24 + $0x4e8] sm:$0xf] }
 0x70a   : > { %16620 = vst [vmem:[#allocation103_spill] sm:$0xff] %v15009_v14  ;;  %v6346_v43 = vadd.f32 %v6345_v36, %v6017_v38  ;;  %5886 = vmatmul.bf16.gmra.mxu3 %v10351_v55  ;;  %6055 = vmatmul.bf16.gmra.mxu0 %v9459_v60  ;;  %v11818_v55 = vld [vmem:[%s13564_s24 + $0x4e4] sm:$0xf]  ;;  %v9488_v60 = vld [vmem:[%s13564_s24 + $0x4fc] sm:$0xf0]  ;;  %v9487_v38 = vor.u32 %v11821_v49, %v9486_v53 }
 0x70b   : > { %6384 = vmatmul.bf16.gmra.mxu1 %v9463_v1  ;;  %v11822_v1 = vld [vmem:[%s13564_s24 + $0x500] sm:$0xf0] }
 0x70c   : > { %10865 = vmatmul.msk.bf16.gmra.mxu2 %vm4433_vm0, %v9467_v8  ;;  %v16630_v49 = vld [vmem:[#allocation19_spill] sm:$0xff] }
 0x70d   : > { %v5847_v28 = vpop.f32.mrf.mxu3 }
 0x70e   : > { %v15014_v0 = vadd.f32 %v5847_v28, %v14520_v33 }
 0x70f   : > { %v6674_v4 = vpop.f32.mrf.mxu2  ;;  %v6018_v6 = vpop.f32.mrf.mxu0 }
 0x710   : > { %16622 = vst [vmem:[#allocation16_spill] sm:$0xff] %v15014_v0  ;;  %v15016_v13 = vadd.f32 %v6674_v4, %v6346_v43  ;;  %v6019_v36 = vadd.f32 %v6018_v6, %v16624_v15  ;;  %v6347_v12 = vpop.f32.mrf.mxu1  ;;  %v10379_v43 = vor.u32 %v12041_v18, %v10376_v17  ;;  %v9491_v6 = vor.u32 %v11818_v55, %v9488_v60 }
 0x711   : > { %v9495_v15 = vor.u32 %v11822_v1, %v9494_v2  ;;  %v12048_v2 = vld [vmem:[%s13564_s24 + $0xc14] sm:$0xf]  ;;  %v10404_v1 = vld [vmem:[%s13564_s24 + $0xc2c] sm:$0xf0] }
 0x712   : > { %16623 = vst [vmem:[#allocation104_spill] sm:$0xff] %v15016_v13  ;;  %v6348_v41 = vadd.f32 %v6347_v12, %v6019_v36  ;;  %v16627_v36 = vld [vmem:[#allocation18_spill] sm:$0xff] }
 0x715   : > { %v5849_v8 = vpop.f32.mrf.mxu3 }
 0x716   : > { %v15028_v33 = vadd.f32 %v5849_v8, %v14539_v32  ;;  %v9514_v8 = vld [vmem:[%s13564_s24 + $0x518] sm:$0xf] }
 0x717   : > { %v6676_v40 = vpop.f32.mrf.mxu2  ;;  %v6021_v4 = vpop.f32.mrf.mxu0 }
 0x718   : > { %16625 = vst [vmem:[#allocation17_spill] sm:$0xff] %v15028_v33  ;;  %v15030_v28 = vadd.f32 %v6676_v40, %v6348_v41  ;;  %v6022_v12 = vadd.f32 %v6021_v4, %v16627_v36  ;;  %v6350_v0 = vpop.f32.mrf.mxu1  ;;  %v11828_v40 = vld [vmem:[%s13564_s24 + $0x530] sm:$0xf0]  ;;  %v9522_v4 = vld [vmem:[%s13564_s24 + $0x520] sm:$0xf] }
 0x71a   : > { %16626 = vst [vmem:[#allocation105_spill] sm:$0xff] %v15030_v28  ;;  %v6351_v46 = vadd.f32 %v6350_v0, %v6022_v12  ;;  %5891 = vmatmul.bf16.gmra.mxu3 %v10379_v43  ;;  %6060 = vmatmul.bf16.gmra.mxu0 %v9487_v38  ;;  %v11825_v43 = vld [vmem:[%s13564_s24 + $0x51c] sm:$0xf]  ;;  %v9516_v38 = vld [vmem:[%s13564_s24 + $0x534] sm:$0xf0]  ;;  %v9515_v12 = vor.u32 %v11828_v40, %v9514_v8 }
 0x71b   : > { %6389 = vmatmul.bf16.gmra.mxu1 %v9491_v6  ;;  %v11829_v6 = vld [vmem:[%s13564_s24 + $0x538] sm:$0xf0] }
 0x71c   : > { %10866 = vmatmul.msk.bf16.gmra.mxu2 %vm4433_vm0, %v9495_v15  ;;  %v16636_v40 = vld [vmem:[#allocation54_spill] sm:$0xff] }
 0x71d   : > { %v5852_v32 = vpop.f32.mrf.mxu3 }
 0x71e   : > { %v15035_v41 = vadd.f32 %v5852_v32, %v14544_v62 }
 0x71f   : > { %v6679_v18 = vpop.f32.mrf.mxu2  ;;  %v6023_v53 = vpop.f32.mrf.mxu0 }
 0x720   : > { %16628 = vst [vmem:[#allocation18_spill] sm:$0xff] %v15035_v41  ;;  %v15037_v17 = vadd.f32 %v6679_v18, %v6351_v46  ;;  %v6024_v0 = vadd.f32 %v6023_v53, %v16630_v49  ;;  %v6352_v55 = vpop.f32.mrf.mxu1  ;;  %v10407_v46 = vor.u32 %v12048_v2, %v10404_v1  ;;  %v9519_v53 = vor.u32 %v11825_v43, %v9516_v38 }
 0x721   : > { %v9523_v49 = vor.u32 %v11829_v6, %v9522_v4  ;;  %v12055_v4 = vld [vmem:[%s13564_s24 + $0xc4c] sm:$0xf]  ;;  %v10432_v6 = vld [vmem:[%s13564_s24 + $0xc64] sm:$0xf0] }
 0x722   : > { %16629 = vst [vmem:[#allocation106_spill] sm:$0xff] %v15037_v17  ;;  %v6353_v60 = vadd.f32 %v6352_v55, %v6024_v0  ;;  %v16633_v0 = vld [vmem:[#allocation20_spill] sm:$0xff]  ;;  %v11969_v17 = vld [vmem:[%s13564_s24 + $0x998] sm:$0xf0] }
 0x725   : > { %v5854_v15 = vpop.f32.mrf.mxu3 }
 0x726   : > { %v15049_v62 = vadd.f32 %v5854_v15, %v14557_v37  ;;  %v9542_v15 = vld [vmem:[%s13564_s24 + $0x550] sm:$0xf] }
 0x727   : > { %v6681_v36 = vpop.f32.mrf.mxu2  ;;  %v6026_v18 = vpop.f32.mrf.mxu0 }
 0x728   : > { %16631 = vst [vmem:[#allocation19_spill] sm:$0xff] %v15049_v62  ;;  %v15051_v32 = vadd.f32 %v6681_v36, %v6353_v60  ;;  %v6027_v55 = vadd.f32 %v6026_v18, %v16633_v0  ;;  %v6355_v41 = vpop.f32.mrf.mxu1  ;;  %v11835_v36 = vld [vmem:[%s13564_s24 + $0x568] sm:$0xf0]  ;;  %v9550_v18 = vld [vmem:[%s13564_s24 + $0x558] sm:$0xf] }
 0x72a   : > { %16632 = vst [vmem:[#allocation107_spill] sm:$0xff] %v15051_v32  ;;  %v6356_v33 = vadd.f32 %v6355_v41, %v6027_v55  ;;  %5896 = vmatmul.bf16.gmra.mxu3 %v10407_v46  ;;  %6065 = vmatmul.bf16.gmra.mxu0 %v9515_v12  ;;  %v11832_v46 = vld [vmem:[%s13564_s24 + $0x554] sm:$0xf]  ;;  %v9544_v12 = vld [vmem:[%s13564_s24 + $0x56c] sm:$0xf0]  ;;  %v9543_v55 = vor.u32 %v11835_v36, %v9542_v15 }
 0x72b   : > { %6394 = vmatmul.bf16.gmra.mxu1 %v9519_v53  ;;  %v11836_v53 = vld [vmem:[%s13564_s24 + $0x570] sm:$0xf0] }
 0x72c   : > { %10867 = vmatmul.msk.bf16.gmra.mxu2 %vm4433_vm0, %v9523_v49 }
 0x72d   : > { %v5857_v37 = vpop.f32.mrf.mxu3 }
 0x72e   : > { %v15056_v60 = vadd.f32 %v5857_v37, %v14562_v50 }
 0x72f   : > { %v6684_v2 = vpop.f32.mrf.mxu2  ;;  %v6028_v8 = vpop.f32.mrf.mxu0 }
 0x730   : > { %16634 = vst [vmem:[#allocation20_spill] sm:$0xff] %v15056_v60  ;;  %v15058_v1 = vadd.f32 %v6684_v2, %v6356_v33  ;;  %v6029_v41 = vadd.f32 %v6028_v8, %v16636_v40  ;;  %v6357_v43 = vpop.f32.mrf.mxu1  ;;  %v10435_v33 = vor.u32 %v12055_v4, %v10432_v6  ;;  %v9547_v8 = vor.u32 %v11832_v46, %v9544_v12 }
 0x731   : > { %v9551_v40 = vor.u32 %v11836_v53, %v9550_v18  ;;  %v12062_v53 = vld [vmem:[%s13564_s24 + $0xc84] sm:$0xf] }
 0x732   : > { %16635 = vst [vmem:[#allocation108_spill] sm:$0xff] %v15058_v1  ;;  %v6358_v38 = vadd.f32 %v6357_v43, %v6029_v41  ;;  %v16638_v41 = vld [vmem:[#allocation22_spill] sm:$0xff]  ;;  %v10026_v1 = vld [vmem:[%s13564_s24 + $0x910] sm:$0xf] }
 0x735   : > { %v5859_v49 = vpop.f32.mrf.mxu3 }
 0x736   : > { %v15070_v50 = vadd.f32 %v5859_v49, %v14575_v20  ;;  %v10460_v49 = vld [vmem:[%s13564_s24 + $0xc9c] sm:$0xf0] }
 0x737   : > { %v6686_v0 = vpop.f32.mrf.mxu2  ;;  %v6031_v2 = vpop.f32.mrf.mxu0 }
 0x738   : > { %v15072_v37 = vadd.f32 %v6686_v0, %v6358_v38  ;;  %v6032_v43 = vadd.f32 %v6031_v2, %v16638_v41  ;;  %v6360_v60 = vpop.f32.mrf.mxu1  ;;  %v9570_v0 = vld [vmem:[%s13564_s24 + $0x588] sm:$0xf] }
 0x739   : > { %v9572_v2 = vld [vmem:[%s13564_s24 + $0x5a4] sm:$0xf0] }
 0x73a   : > { %16637 = vst [vmem:[#allocation54_spill] sm:$0xff] %v15072_v37  ;;  %v6361_v62 = vadd.f32 %v6360_v60, %v6032_v43  ;;  %5901 = vmatmul.bf16.gmra.mxu3 %v10435_v33  ;;  %6070 = vmatmul.bf16.gmra.mxu0 %v9543_v55  ;;  %v16641_v60 = vld [vmem:[#allocation56_spill] sm:$0xff]  ;;  %v11842_v33 = vld [vmem:[%s13564_s24 + $0x5a0] sm:$0xf0]  ;;  %v10463_v43 = vor.u32 %v12062_v53, %v10460_v49 }
 0x73b   : > { %6399 = vmatmul.bf16.gmra.mxu1 %v9547_v8  ;;  %v11839_v55 = vld [vmem:[%s13564_s24 + $0x58c] sm:$0xf]  ;;  %v9578_v8 = vld [vmem:[%s13564_s24 + $0x590] sm:$0xf]  ;;  %v11962_v37 = vld [vmem:[%s13564_s24 + $0x960] sm:$0xf0] }
 0x73c   : > { %10868 = vmatmul.msk.bf16.gmra.mxu2 %vm4433_vm0, %v9551_v40 }
 0x73d   : > { %v5862_v20 = vpop.f32.mrf.mxu3 }
 0x73e   : > { %v15077_v38 = vadd.f32 %v5862_v20, %v14581_v59  ;;  %v11843_v59 = vld [vmem:[%s13564_s24 + $0x5a8] sm:$0xf0]  ;;  %v9571_v20 = vor.u32 %v11842_v33, %v9570_v0 }
 0x73f   : > { %v6689_v4 = vpop.f32.mrf.mxu2  ;;  %v6033_v15 = vpop.f32.mrf.mxu0 }
 0x740   : > { %16639 = vst [vmem:[#allocation22_spill] sm:$0xff] %v15077_v38  ;;  %v15079_v6 = vadd.f32 %v6689_v4, %v6361_v62  ;;  %v6034_v36 = vadd.f32 %v6033_v15, %v16641_v60  ;;  %v6362_v46 = vpop.f32.mrf.mxu1  ;;  %v9575_v60 = vor.u32 %v11839_v55, %v9572_v2 }
 0x742   : > { %16640 = vst [vmem:[#allocation109_spill] sm:$0xff] %v15079_v6  ;;  %v6363_v18 = vadd.f32 %v6362_v46, %v6034_v36  ;;  %v9579_v36 = vor.u32 %v11843_v59, %v9578_v8  ;;  %v16642_v46 = vld [vmem:[#allocation57_spill] sm:$0xff]  ;;  %v12069_v8 = vld [vmem:[%s13564_s24 + $0xcbc] sm:$0xf]  ;;  %v10488_v59 = vld [vmem:[%s13564_s24 + $0xcd4] sm:$0xf0] }
 0x745   : > { %v5864_v40 = vpop.f32.mrf.mxu3 }
 0x746   : > { %v15093_v62 = vadd.f32 %v5864_v40, %v14594_v19  ;;  %v9598_v40 = vld [vmem:[%s13564_s24 + $0x5c0] sm:$0xf] }
 0x747   : > { %v6691_v41 = vpop.f32.mrf.mxu2  ;;  %v6036_v15 = vpop.f32.mrf.mxu0 }
 0x748   : > { %v15095_v4 = vadd.f32 %v6691_v41, %v6363_v18  ;;  %v6037_v12 = vadd.f32 %v6036_v15, %v16642_v46  ;;  %v6365_v6 = vpop.f32.mrf.mxu1  ;;  %v11849_v41 = vld [vmem:[%s13564_s24 + $0x5d8] sm:$0xf0]  ;;  %v9606_v15 = vld [vmem:[%s13564_s24 + $0x5c8] sm:$0xf]  ;;  %v10491_v46 = vor.u32 %v12069_v8, %v10488_v59 }
 0x74a   : > { %v6366_v38 = vadd.f32 %v6365_v6, %v6037_v12  ;;  %5906 = vmatmul.bf16.gmra.mxu3 %v10463_v43  ;;  %6075 = vmatmul.bf16.gmra.mxu0 %v9571_v20  ;;  %v16644_v6 = vld [vmem:[#allocation58_spill] sm:$0xff]  ;;  %v11846_v43 = vld [vmem:[%s13564_s24 + $0x5c4] sm:$0xf]  ;;  %v9600_v20 = vld [vmem:[%s13564_s24 + $0x5dc] sm:$0xf0] }
 0x74b   : > { %6404 = vmatmul.bf16.gmra.mxu1 %v9575_v60 }
 0x74c   : > { %10869 = vmatmul.msk.bf16.gmra.mxu2 %vm4433_vm0, %v9579_v36 }
 0x74d   : > { %v5867_v19 = vpop.f32.mrf.mxu3 }
 0x74e   : > { %v15102_v18 = vadd.f32 %v5867_v19, %v14600_v44  ;;  %v11850_v44 = vld [vmem:[%s13564_s24 + $0x5e0] sm:$0xf0]  ;;  %v9599_v19 = vor.u32 %v11849_v41, %v9598_v40 }
 0x74f   : > { %v6694_v53 = vpop.f32.mrf.mxu2  ;;  %v6038_v0 = vpop.f32.mrf.mxu0 }
 0x750   : > { %v15104_v49 = vadd.f32 %v6694_v53, %v6366_v38  ;;  %v6039_v12 = vadd.f32 %v6038_v0, %v16644_v6  ;;  %v6367_v33 = vpop.f32.mrf.mxu1  ;;  %v9603_v6 = vor.u32 %v11846_v43, %v9600_v20 }
 0x752   : > { %16643 = vst [vmem:[#allocation56_spill] sm:$0xff] %v15104_v49  ;;  %v6368_v2 = vadd.f32 %v6367_v33, %v6039_v12  ;;  %v9607_v12 = vor.u32 %v11850_v44, %v9606_v15  ;;  %v16645_v33 = vld [vmem:[#allocation59_spill] sm:$0xff]  ;;  %v12076_v15 = vld [vmem:[%s13564_s24 + $0xcf4] sm:$0xf]  ;;  %v10516_v44 = vld [vmem:[%s13564_s24 + $0xd0c] sm:$0xf0] }
 0x755   : > { %v5869_v60 = vpop.f32.mrf.mxu3 }
 0x756   : > { %v15118_v38 = vadd.f32 %v5869_v60, %v14613_v21  ;;  %v9626_v60 = vld [vmem:[%s13564_s24 + $0x5f8] sm:$0xf] }
 0x757   : > { %v6696_v36 = vpop.f32.mrf.mxu2  ;;  %v6041_v0 = vpop.f32.mrf.mxu0 }
 0x758   : > { %v15120_v53 = vadd.f32 %v6696_v36, %v6368_v2  ;;  %v6042_v55 = vadd.f32 %v6041_v0, %v16645_v33  ;;  %v6370_v23 = vpop.f32.mrf.mxu1  ;;  %v11856_v36 = vld [vmem:[%s13564_s24 + $0x610] sm:$0xf0]  ;;  %v9634_v0 = vld [vmem:[%s13564_s24 + $0x600] sm:$0xf]  ;;  %v10519_v33 = vor.u32 %v12076_v15, %v10516_v44 }
 0x75a   : > { %v6371_v48 = vadd.f32 %v6370_v23, %v6042_v55  ;;  %5911 = vmatmul.bf16.gmra.mxu3 %v10491_v46  ;;  %6080 = vmatmul.bf16.gmra.mxu0 %v9599_v19  ;;  %v16647_v23 = vld [vmem:[#allocation61_spill] sm:$0xff]  ;;  %v11853_v46 = vld [vmem:[%s13564_s24 + $0x5fc] sm:$0xf]  ;;  %v9628_v19 = vld [vmem:[%s13564_s24 + $0x614] sm:$0xf0] }
 0x75b   : > { %6409 = vmatmul.bf16.gmra.mxu1 %v9603_v6 }
 0x75c   : > { %10870 = vmatmul.msk.bf16.gmra.mxu2 %vm4433_vm0, %v9607_v12 }
 0x75d   : > { %v5872_v21 = vpop.f32.mrf.mxu3 }
 0x75e   : > { %v15127_v2 = vadd.f32 %v5872_v21, %v14619_v26  ;;  %v11857_v26 = vld [vmem:[%s13564_s24 + $0x618] sm:$0xf0]  ;;  %v9627_v21 = vor.u32 %v11856_v36, %v9626_v60 }
 0x75f   : > { %v6699_v8 = vpop.f32.mrf.mxu2  ;;  %v6043_v40 = vpop.f32.mrf.mxu0 }
 0x760   : > { %v15129_v59 = vadd.f32 %v6699_v8, %v6371_v48  ;;  %v6044_v55 = vadd.f32 %v6043_v40, %v16647_v23  ;;  %v6372_v41 = vpop.f32.mrf.mxu1  ;;  %v9631_v23 = vor.u32 %v11853_v46, %v9628_v19  ;;  %v12172_v19 = vld [vmem:[%s16366_s3 + $0x60] sm:$0xff]  ;;  %v16651_v46 = vld [vmem:[#allocation64_spill] sm:$0xff] }
 0x761   : > { %7215 = vmatpush.bf16.msra.mxu3 %v12172_v19 }
 0x762   : > { %16646 = vst [vmem:[#allocation57_spill] sm:$0xff] %v15129_v59  ;;  %v6373_v20 = vadd.f32 %v6372_v41, %v6044_v55  ;;  %v9635_v55 = vor.u32 %v11857_v26, %v9634_v0  ;;  %v16648_v41 = vld [vmem:[#allocation62_spill] sm:$0xff]  ;;  %v12083_v26 = vld [vmem:[%s13564_s24 + $0xd2c] sm:$0xf] }
 0x765   : > { %v5874_v6 = vpop.f32.mrf.mxu3 }
 0x766   : > { %v15143_v48 = vadd.f32 %v5874_v6, %v14632_v9  ;;  %v9654_v6 = vld [vmem:[%s13564_s24 + $0x630] sm:$0xf] }
 0x767   : > { %v6701_v12 = vpop.f32.mrf.mxu2  ;;  %v6046_v40 = vpop.f32.mrf.mxu0 }
 0x768   : > { %v15145_v8 = vadd.f32 %v6701_v12, %v6373_v20  ;;  %v6047_v43 = vadd.f32 %v6046_v40, %v16648_v41  ;;  %v6375_v49 = vpop.f32.mrf.mxu1  ;;  %v11863_v12 = vld [vmem:[%s13564_s24 + $0x648] sm:$0xf0]  ;;  %v11864_v40 = vld [vmem:[%s13564_s24 + $0x650] sm:$0xf0] }
 0x76a   : > { %v6376_v34 = vadd.f32 %v6375_v49, %v6047_v43  ;;  %5916 = vmatmul.bf16.gmra.mxu3 %v10519_v33  ;;  %6085 = vmatmul.bf16.gmra.mxu0 %v9627_v21  ;;  %v16650_v43 = vld [vmem:[#allocation63_spill] sm:$0xff]  ;;  %v11860_v33 = vld [vmem:[%s13564_s24 + $0x634] sm:$0xf]  ;;  %v9662_v21 = vld [vmem:[%s13564_s24 + $0x638] sm:$0xf] }
 0x76b   : > { %6414 = vmatmul.bf16.gmra.mxu1 %v9631_v23 }
 0x76c   : > { %10871 = vmatmul.msk.bf16.gmra.mxu2 %vm4433_vm0, %v9635_v55 }
 0x76d   : > { %v5877_v9 = vpop.f32.mrf.mxu3 }
 0x76e   : > { %v15152_v20 = vadd.f32 %v5877_v9, %v14638_v57  ;;  %v10544_v57 = vld [vmem:[%s13564_s24 + $0xd44] sm:$0xf0] }
 0x76f   : > { %v6704_v15 = vpop.f32.mrf.mxu2  ;;  %v6048_v49 = vpop.f32.mrf.mxu0  ;;  %v10547_v9 = vor.u32 %v12083_v26, %v10544_v57 }
 0x770   : > { %v15154_v44 = vadd.f32 %v6704_v15, %v6376_v34  ;;  %v6049_v60 = vadd.f32 %v6048_v49, %v16650_v43  ;;  %v6377_v36 = vpop.f32.mrf.mxu1  ;;  %v9656_v34 = vld [vmem:[%s13564_s24 + $0x64c] sm:$0xf0]  ;;  %v9655_v15 = vor.u32 %v11863_v12, %v9654_v6  ;;  %v16654_v12 = vld [vmem:[#allocation66_spill] sm:$0xff] }
 0x772   : > { %16649 = vst [vmem:[#allocation58_spill] sm:$0xff] %v15154_v44  ;;  %v6378_v0 = vadd.f32 %v6377_v36, %v6049_v60  ;;  %v9659_v60 = vor.u32 %v11860_v33, %v9656_v34  ;;  %v9663_v36 = vor.u32 %v11864_v40, %v9662_v21  ;;  %v12090_v34 = vld [vmem:[%s13564_s24 + $0xd64] sm:$0xf]  ;;  %v10572_v21 = vld [vmem:[%s13564_s24 + $0xd7c] sm:$0xf0] }
 0x773   : > { %v9682_v40 = vld [vmem:[%s13564_s24 + $0x668] sm:$0xf] }
 0x775   : > { %v5879_v23 = vpop.f32.mrf.mxu3 }
 0x776   : > { %v15171_v55 = vadd.f32 %v5879_v23, %v14654_v42  ;;  %v11870_v23 = vld [vmem:[%s13564_s24 + $0x680] sm:$0xf0] }
 0x777   : > { %v6706_v41 = vpop.f32.mrf.mxu2  ;;  %v6051_v43 = vpop.f32.mrf.mxu0 }
 0x778   : > { %v15173_v49 = vadd.f32 %v6706_v41, %v6378_v0  ;;  %v6052_v59 = vadd.f32 %v6051_v43, %v16651_v46  ;;  %v6380_v44 = vpop.f32.mrf.mxu1  ;;  %v11867_v41 = vld [vmem:[%s13564_s24 + $0x66c] sm:$0xf] }
 0x77a   : > { %v6381_v45 = vadd.f32 %v6380_v44, %v6052_v59  ;;  %5921 = vmatmul.bf16.gmra.mxu3 %v10547_v9  ;;  %6090 = vmatmul.bf16.gmra.mxu0 %v9655_v15  ;;  %v16653_v59 = vld [vmem:[#allocation65_spill] sm:$0xff]  ;;  %v9684_v9 = vld [vmem:[%s13564_s24 + $0x684] sm:$0xf0] }
 0x77b   : > { %6419 = vmatmul.bf16.gmra.mxu1 %v9659_v60  ;;  %v9690_v15 = vld [vmem:[%s13564_s24 + $0x670] sm:$0xf]  ;;  %v10575_v60 = vor.u32 %v12090_v34, %v10572_v21 }
 0x77c   : > { %10872 = vmatmul.msk.bf16.gmra.mxu2 %vm4433_vm0, %v9663_v36  ;;  %v9683_v36 = vor.u32 %v11870_v23, %v9682_v40 }
 0x77d   : > { %v5882_v42 = vpop.f32.mrf.mxu3 }
 0x77e   : > { %v15180_v46 = vadd.f32 %v5882_v42, %v14660_v35  ;;  %v11871_v35 = vld [vmem:[%s13564_s24 + $0x688] sm:$0xf0] }
 0x77f   : > { %v6709_v0 = vpop.f32.mrf.mxu2  ;;  %v6053_v57 = vpop.f32.mrf.mxu0 }
 0x780   : > { %v15182_v26 = vadd.f32 %v6709_v0, %v6381_v45  ;;  %v6054_v44 = vadd.f32 %v6053_v57, %v16653_v59  ;;  %v6382_v6 = vpop.f32.mrf.mxu1  ;;  %v9687_v57 = vor.u32 %v11867_v41, %v9684_v9  ;;  %v9691_v59 = vor.u32 %v11871_v35, %v9690_v15  ;;  %v12097_v35 = vld [vmem:[%s13564_s24 + $0xd9c] sm:$0xf]  ;;  %v16657_v9 = vld [vmem:[#allocation67_spill] sm:$0xff] }
 0x782   : > { %16652 = vst [vmem:[#allocation59_spill] sm:$0xff] %v15182_v26  ;;  %v6383_v33 = vadd.f32 %v6382_v6, %v6054_v44 }
 0x785   : > { %v15195_v43 = vpop.f32.mrf.mxu3 }
 0x787   : > { %v6711_v45 = vpop.f32.mrf.mxu2  ;;  %v6056_v0 = vpop.f32.mrf.mxu0 }
 0x788   : > { %v15197_v42 = vadd.f32 %v6711_v45, %v6383_v33  ;;  %v6057_v44 = vadd.f32 %v6056_v0, %v16654_v12  ;;  %v6385_v6 = vpop.f32.mrf.mxu1  ;;  %v10600_v45 = vld [vmem:[%s13564_s24 + $0xdb4] sm:$0xf0]  ;;  %v11874_v0 = vld [vmem:[%s13564_s24 + $0x6a4] sm:$0xf] }
 0x78a   : > { %v6386_v26 = vadd.f32 %v6385_v6, %v6057_v44  ;;  %5926 = vmatmul.bf16.gmra.mxu3 %v10575_v60  ;;  %6095 = vmatmul.bf16.gmra.mxu0 %v9683_v36  ;;  %v9710_v60 = vld [vmem:[%s13564_s24 + $0x6a0] sm:$0xf]  ;;  %v11877_v36 = vld [vmem:[%s13564_s24 + $0x6b8] sm:$0xf0]  ;;  %v10603_v6 = vor.u32 %v12097_v35, %v10600_v45 }
 0x78b   : > { %6424 = vmatmul.bf16.gmra.mxu1 %v9687_v57  ;;  %v9712_v57 = vld [vmem:[%s13564_s24 + $0x6bc] sm:$0xf0] }
 0x78c   : > { %10873 = vmatmul.msk.bf16.gmra.mxu2 %vm4433_vm0, %v9691_v59  ;;  %v9718_v59 = vld [vmem:[%s13564_s24 + $0x6a8] sm:$0xf] }
 0x78d   : > { %v5887_v33 = vpop.f32.mrf.mxu3 }
 0x78e   : > { %v15204_v12 = vadd.f32 %v5887_v33, %v14679_v5  ;;  %v11878_v5 = vld [vmem:[%s13564_s24 + $0x6c0] sm:$0xf0]  ;;  %v9711_v33 = vor.u32 %v11877_v36, %v9710_v60  ;;  %v16659_v36 = vld [vmem:[#allocation68_spill] sm:$0xff] }
 0x78f   : > { %v6714_v34 = vpop.f32.mrf.mxu2  ;;  %v6058_v40 = vpop.f32.mrf.mxu0  ;;  %v9719_v19 = vor.u32 %v11878_v5, %v9718_v59  ;;  %v16661_v59 = vld [vmem:[#allocation69_spill] sm:$0xff] }
 0x790   : > { %v15206_v21 = vadd.f32 %v6714_v34, %v6386_v26  ;;  %v6059_v23 = vadd.f32 %v6058_v40, %v14531_v3  ;;  %v6387_v41 = vpop.f32.mrf.mxu1  ;;  %v9715_v40 = vor.u32 %v11874_v0, %v9712_v57 }
 0x792   : > { %16655 = vst [vmem:[#allocation61_spill] sm:$0xff] %v15206_v21  ;;  %v6388_v15 = vadd.f32 %v6387_v41, %v6059_v23 }
 0x795   : > { %v15219_v44 = vpop.f32.mrf.mxu3 }
 0x797   : > { %v6716_v26 = vpop.f32.mrf.mxu2  ;;  %v6061_v3 = vpop.f32.mrf.mxu0 }
 0x798   : > { %v15221_v34 = vadd.f32 %v6716_v26, %v6388_v15  ;;  %v6062_v23 = vadd.f32 %v6061_v3, %v16657_v9  ;;  %v6390_v41 = vpop.f32.mrf.mxu1  ;;  %v12104_v26 = vld [vmem:[%s13564_s24 + $0xdd4] sm:$0xf]  ;;  %v11881_v3 = vld [vmem:[%s13564_s24 + $0x6dc] sm:$0xf] }
 0x79a   : > { %16656 = vst [vmem:[#allocation62_spill] sm:$0xff] %v15221_v34  ;;  %v6391_v56 = vadd.f32 %v6390_v41, %v6062_v23  ;;  %5931 = vmatmul.bf16.gmra.mxu3 %v10603_v6  ;;  %6100 = vmatmul.bf16.gmra.mxu0 %v9711_v33  ;;  %v10628_v6 = vld [vmem:[%s13564_s24 + $0xdec] sm:$0xf0]  ;;  %v11884_v33 = vld [vmem:[%s13564_s24 + $0x6f0] sm:$0xf0] }
 0x79b   : > { %6429 = vmatmul.bf16.gmra.mxu1 %v9715_v40  ;;  %v9740_v40 = vld [vmem:[%s13564_s24 + $0x6f4] sm:$0xf0]  ;;  %v9746_v23 = vld [vmem:[%s13564_s24 + $0x6e0] sm:$0xf] }
 0x79c   : > { %10874 = vmatmul.msk.bf16.gmra.mxu2 %vm4433_vm0, %v9719_v19  ;;  %v9738_v19 = vld [vmem:[%s13564_s24 + $0x6d8] sm:$0xf] }
 0x79d   : > { %v5892_v15 = vpop.f32.mrf.mxu3 }
 0x79e   : > { %v15228_v9 = vadd.f32 %v5892_v15, %v14698_v25  ;;  %v11885_v25 = vld [vmem:[%s13564_s24 + $0x6f8] sm:$0xf0]  ;;  %v10631_v15 = vor.u32 %v12104_v26, %v10628_v6 }
 0x79f   : > { %v6719_v35 = vpop.f32.mrf.mxu2  ;;  %v6063_v60 = vpop.f32.mrf.mxu0  ;;  %v9747_v34 = vor.u32 %v11885_v25, %v9746_v23 }
 0x7a0   : > { %v15230_v45 = vadd.f32 %v6719_v35, %v6391_v56  ;;  %v6064_v0 = vadd.f32 %v6063_v60, %v16659_v36  ;;  %v6392_v57 = vpop.f32.mrf.mxu1  ;;  %v9739_v35 = vor.u32 %v11884_v33, %v9738_v19  ;;  %v9743_v36 = vor.u32 %v11881_v3, %v9740_v40  ;;  %v16663_v33 = vld [vmem:[#allocation70_spill] sm:$0xff] }
 0x7a2   : > { %16658 = vst [vmem:[#allocation63_spill] sm:$0xff] %v15230_v45  ;;  %v6393_v5 = vadd.f32 %v6392_v57, %v6064_v0 }
 0x7a5   : > { %v15243_v41 = vpop.f32.mrf.mxu3 }
 0x7a7   : > { %v6721_v56 = vpop.f32.mrf.mxu2  ;;  %v6066_v60 = vpop.f32.mrf.mxu0 }
 0x7a8   : > { %v15245_v21 = vadd.f32 %v6721_v56, %v6393_v5  ;;  %v6067_v0 = vadd.f32 %v6066_v60, %v16661_v59  ;;  %v6395_v57 = vpop.f32.mrf.mxu1  ;;  %v11888_v60 = vld [vmem:[%s13564_s24 + $0x714] sm:$0xf] }
 0x7aa   : > { %16660 = vst [vmem:[#allocation64_spill] sm:$0xff] %v15245_v21  ;;  %v6396_v30 = vadd.f32 %v6395_v57, %v6067_v0  ;;  %5936 = vmatmul.bf16.gmra.mxu3 %v10631_v15  ;;  %6105 = vmatmul.bf16.gmra.mxu0 %v9739_v35  ;;  %v9766_v15 = vld [vmem:[%s13564_s24 + $0x710] sm:$0xf]  ;;  %v11891_v35 = vld [vmem:[%s13564_s24 + $0x728] sm:$0xf0] }
 0x7ab   : > { %6434 = vmatmul.bf16.gmra.mxu1 %v9743_v36  ;;  %v9768_v36 = vld [vmem:[%s13564_s24 + $0x72c] sm:$0xf0]  ;;  %v11892_v0 = vld [vmem:[%s13564_s24 + $0x730] sm:$0xf0] }
 0x7ac   : > { %10875 = vmatmul.msk.bf16.gmra.mxu2 %vm4433_vm0, %v9747_v34  ;;  %v9774_v34 = vld [vmem:[%s13564_s24 + $0x718] sm:$0xf]  ;;  %v9771_v45 = vor.u32 %v11888_v60, %v9768_v36 }
 0x7ad   : > { %v5897_v5 = vpop.f32.mrf.mxu3 }
 0x7ae   : > { %v15252_v26 = vadd.f32 %v5897_v5, %v14717_v58  ;;  %v9767_v5 = vor.u32 %v11891_v35, %v9766_v15  ;;  %v16667_v15 = vld [vmem:[#allocation21_spill] sm:$0xff] }
 0x7af   : > { %v6724_v59 = vpop.f32.mrf.mxu2  ;;  %v6068_v19 = vpop.f32.mrf.mxu0 }
 0x7b0   : > { %v15254_v6 = vadd.f32 %v6724_v59, %v6396_v30  ;;  %v6069_v3 = vadd.f32 %v6068_v19, %v16663_v33  ;;  %v6397_v40 = vpop.f32.mrf.mxu1  ;;  %v9775_v19 = vor.u32 %v11892_v0, %v9774_v34  ;;  %v16666_v33 = vld [vmem:[#allocation71_spill] sm:$0xff]  ;;  %v16670_v0 = vld [vmem:[#allocation72_spill] sm:$0xff] }
 0x7b2   : > { %16662 = vst [vmem:[#allocation65_spill] sm:$0xff] %v15254_v6  ;;  %v6398_v56 = vadd.f32 %v6397_v40, %v6069_v3  ;;  %v11895_v3 = vld [vmem:[%s13564_s24 + $0x74c] sm:$0xf] }
 0x7b5   : > { %v15265_v57 = vpop.f32.mrf.mxu3 }
 0x7b7   : > { %v6726_v58 = vpop.f32.mrf.mxu2  ;;  %v6071_v59 = vpop.f32.mrf.mxu0 }
 0x7b8   : > { %v15267_v30 = vadd.f32 %v6726_v58, %v6398_v56  ;;  %v6072_v21 = vadd.f32 %v6071_v59, %v16666_v33  ;;  %v6400_v25 = vpop.f32.mrf.mxu1  ;;  %v9794_v33 = vld [vmem:[%s13564_s24 + $0x748] sm:$0xf] }
 0x7ba   : > { %16665 = vst [vmem:[#allocation66_spill] sm:$0xff] %v15267_v30  ;;  %v6401_v40 = vadd.f32 %v6400_v25, %v6072_v21  ;;  %6110 = vmatmul.bf16.gmra.mxu0 %v9767_v5  ;;  %v9796_v30 = vld [vmem:[%s13564_s24 + $0x764] sm:$0xf0] }
 0x7bb   : > { %6439 = vmatmul.bf16.gmra.mxu1 %v9771_v45  ;;  %v11898_v45 = vld [vmem:[%s13564_s24 + $0x760] sm:$0xf0] }
 0x7bc   : > { %10876 = vmatmul.msk.bf16.gmra.mxu2 %vm4433_vm0, %v9775_v19  ;;  %v9802_v19 = vld [vmem:[%s13564_s24 + $0x750] sm:$0xf] }
 0x7bd   : > { %v5902_v56 = vpop.f32.mrf.mxu3 }
 0x7be   : > { %v15274_v35 = vadd.f32 %v5902_v56, %v16667_v15  ;;  %v9795_v15 = vor.u32 %v11898_v45, %v9794_v33 }
 0x7bf   : > { %v6729_v60 = vpop.f32.mrf.mxu2  ;;  %v6073_v34 = vpop.f32.mrf.mxu0 }
 0x7c0   : > { %16668 = vst [vmem:[#allocation67_spill] sm:$0xff] %v15274_v35  ;;  %v15276_v36 = vadd.f32 %v6729_v60, %v6401_v40  ;;  %v6074_v58 = vadd.f32 %v6073_v34, %v16670_v0  ;;  %v6402_v59 = vpop.f32.mrf.mxu1  ;;  %v9799_v35 = vor.u32 %v11895_v3, %v9796_v30  ;;  %v9803_v34 = vor.u32 %v11899_v39, %v9802_v19  ;;  %v16674_v0 = vld [vmem:[#allocation73_spill] sm:$0xff]  ;;  %v16675_v30 = vld [vmem:[#allocation24_spill] sm:$0xff]  ;;  %v16678_v19 = vld [vmem:[#allocation74_spill] sm:$0xff] }
 0x7c2   : > { %16669 = vst [vmem:[#allocation68_spill] sm:$0xff] %v15276_v36  ;;  %v6403_v5 = vadd.f32 %v6402_v59, %v6074_v58  ;;  %v9824_v58 = vld [vmem:[%s13564_s24 + $0x79c] sm:$0xf0] }
 0x7c5   : > { %v15287_v6 = vpop.f32.mrf.mxu3 }
 0x7c6   : > { %16672 = vst [vmem:[#allocation69_spill] sm:$0xff] %v15287_v6  ;;  %v12011_v6 = vld [vmem:[%s13564_s24 + $0xae8] sm:$0xf0] }
 0x7c7   : > { %v6731_v56 = vpop.f32.mrf.mxu2  ;;  %v6076_v60 = vpop.f32.mrf.mxu0 }
 0x7c8   : > { %v15289_v40 = vadd.f32 %v6731_v56, %v6403_v5  ;;  %v6077_v23 = vadd.f32 %v6076_v60, %v16674_v0  ;;  %v6405_v25 = vpop.f32.mrf.mxu1  ;;  %v11902_v0 = vld [vmem:[%s13564_s24 + $0x784] sm:$0xf] }
 0x7ca   : > { %16673 = vst [vmem:[#allocation70_spill] sm:$0xff] %v15289_v40  ;;  %v6406_v59 = vadd.f32 %v6405_v25, %v6077_v23  ;;  %6115 = vmatmul.bf16.gmra.mxu0 %v9795_v15  ;;  %v9822_v15 = vld [vmem:[%s13564_s24 + $0x780] sm:$0xf]  ;;  %v11906_v40 = vld [vmem:[%s13564_s24 + $0x7a0] sm:$0xf0] }
 0x7cb   : > { %6444 = vmatmul.bf16.gmra.mxu1 %v9799_v35  ;;  %v11905_v35 = vld [vmem:[%s13564_s24 + $0x798] sm:$0xf0] }
 0x7cc   : > { %10877 = vmatmul.msk.bf16.gmra.mxu2 %vm4433_vm0, %v9803_v34  ;;  %v9830_v34 = vld [vmem:[%s13564_s24 + $0x788] sm:$0xf] }
 0x7cd   : > { %v5907_v5 = vpop.f32.mrf.mxu3 }
 0x7ce   : > { %v15296_v39 = vadd.f32 %v5907_v5, %v16675_v30  ;;  %v9823_v30 = vor.u32 %v11905_v35, %v9822_v15 }
 0x7cf   : > { %v6734_v3 = vpop.f32.mrf.mxu2  ;;  %v6078_v45 = vpop.f32.mrf.mxu0 }
 0x7d0   : > { %16676 = vst [vmem:[#allocation71_spill] sm:$0xff] %v15296_v39  ;;  %v15298_v33 = vadd.f32 %v6734_v3, %v6406_v59  ;;  %v6079_v56 = vadd.f32 %v6078_v45, %v16678_v19  ;;  %v6407_v60 = vpop.f32.mrf.mxu1  ;;  %v9827_v39 = vor.u32 %v11902_v0, %v9824_v58  ;;  %v9831_v45 = vor.u32 %v11906_v40, %v9830_v34  ;;  %v16681_v19 = vld [vmem:[#allocation75_spill] sm:$0xff]  ;;  %v16682_v58 = vld [vmem:[#allocation26_spill] sm:$0xff]  ;;  %v16685_v34 = vld [vmem:[#allocation76_spill] sm:$0xff] }
 0x7d2   : > { %16677 = vst [vmem:[#allocation21_spill] sm:$0xff] %v15298_v33  ;;  %v6408_v25 = vadd.f32 %v6407_v60, %v6079_v56  ;;  %v11909_v56 = vld [vmem:[%s13564_s24 + $0x7bc] sm:$0xf] }
 0x7d5   : > { %v15309_v7 = vpop.f32.mrf.mxu3 }
 0x7d6   : > { %16679 = vst [vmem:[#allocation72_spill] sm:$0xff] %v15309_v7 }
 0x7d7   : > { %v6736_v5 = vpop.f32.mrf.mxu2  ;;  %v6081_v3 = vpop.f32.mrf.mxu0 }
 0x7d8   : > { %v15311_v59 = vadd.f32 %v6736_v5, %v6408_v25  ;;  %v6082_v36 = vadd.f32 %v6081_v3, %v16681_v19  ;;  %v6410_v23 = vpop.f32.mrf.mxu1  ;;  %v9850_v19 = vld [vmem:[%s13564_s24 + $0x7b8] sm:$0xf] }
 0x7da   : > { %16680 = vst [vmem:[#allocation73_spill] sm:$0xff] %v15311_v59  ;;  %v6411_v60 = vadd.f32 %v6410_v23, %v6082_v36  ;;  %6120 = vmatmul.bf16.gmra.mxu0 %v9823_v30  ;;  %v9852_v59 = vld [vmem:[%s13564_s24 + $0x7d4] sm:$0xf0] }
 0x7db   : > { %6449 = vmatmul.bf16.gmra.mxu1 %v9827_v39  ;;  %v11912_v39 = vld [vmem:[%s13564_s24 + $0x7d0] sm:$0xf0] }
 0x7dc   : > { %10878 = vmatmul.msk.bf16.gmra.mxu2 %vm4433_vm0, %v9831_v45  ;;  %v9858_v45 = vld [vmem:[%s13564_s24 + $0x7c0] sm:$0xf] }
 0x7dd   : > { %v5912_v25 = vpop.f32.mrf.mxu3 }
 0x7de   : > { %v15318_v40 = vadd.f32 %v5912_v25, %v16682_v58  ;;  %v9851_v58 = vor.u32 %v11912_v39, %v9850_v19  ;;  %v16690_v19 = vld [vmem:[#allocation28_spill] sm:$0xff] }
 0x7df   : > { %v6739_v15 = vpop.f32.mrf.mxu2  ;;  %v6083_v0 = vpop.f32.mrf.mxu0 }
 0x7e0   : > { %16683 = vst [vmem:[#allocation24_spill] sm:$0xff] %v15318_v40  ;;  %v15320_v35 = vadd.f32 %v6739_v15, %v6411_v60  ;;  %v6084_v5 = vadd.f32 %v6083_v0, %v16685_v34  ;;  %v6412_v3 = vpop.f32.mrf.mxu1  ;;  %v9855_v40 = vor.u32 %v11909_v56, %v9852_v59  ;;  %v9859_v0 = vor.u32 %v11913_v54, %v9858_v45  ;;  %v16689_v34 = vld [vmem:[#allocation77_spill] sm:$0xff]  ;;  %v16693_v45 = vld [vmem:[#allocation78_spill] sm:$0xff] }
 0x7e2   : > { %16684 = vst [vmem:[#allocation74_spill] sm:$0xff] %v15320_v35  ;;  %v6413_v30 = vadd.f32 %v6412_v3, %v6084_v5  ;;  %v11997_v35 = vld [vmem:[%s13564_s24 + $0xa78] sm:$0xf0] }
 0x7e5   : > { %v15331_v33 = vpop.f32.mrf.mxu3 }
 0x7e6   : > { %16687 = vst [vmem:[#allocation75_spill] sm:$0xff] %v15331_v33  ;;  %v12004_v33 = vld [vmem:[%s13564_s24 + $0xab0] sm:$0xf0] }
 0x7e7   : > { %v6741_v25 = vpop.f32.mrf.mxu2  ;;  %v6086_v15 = vpop.f32.mrf.mxu0 }
 0x7e8   : > { %v15333_v60 = vadd.f32 %v6741_v25, %v6413_v30  ;;  %v6087_v61 = vadd.f32 %v6086_v15, %v16689_v34  ;;  %v6415_v7 = vpop.f32.mrf.mxu1  ;;  %v11916_v34 = vld [vmem:[%s13564_s24 + $0x7f4] sm:$0xf] }
 0x7ea   : > { %16688 = vst [vmem:[#allocation26_spill] sm:$0xff] %v15333_v60  ;;  %v6416_v3 = vadd.f32 %v6415_v7, %v6087_v61  ;;  %6125 = vmatmul.bf16.gmra.mxu0 %v9851_v58  ;;  %v12171_v61 = vld [vmem:[%s16366_s3 + $0x58] sm:$0xff]  ;;  %v9878_v58 = vld [vmem:[%s13564_s24 + $0x7f0] sm:$0xf] }
 0x7eb   : > { %6454 = vmatmul.bf16.gmra.mxu1 %v9855_v40  ;;  %7216 = vmatpush.bf16.msra.mxu3 %v12171_v61 }
 0x7ec   : > { %10879 = vmatmul.msk.bf16.gmra.mxu2 %vm4433_vm0, %v9859_v0  ;;  %v11919_v0 = vld [vmem:[%s13564_s24 + $0x808] sm:$0xf0] }
 0x7ed   : > { %v5917_v30 = vpop.f32.mrf.mxu3 }
 0x7ee   : > { %v15340_v54 = vadd.f32 %v5917_v30, %v16690_v19  ;;  %v9880_v30 = vld [vmem:[%s13564_s24 + $0x80c] sm:$0xf0]  ;;  %v9886_v19 = vld [vmem:[%s13564_s24 + $0x7f8] sm:$0xf] }
 0x7ef   : > { %v6744_v59 = vpop.f32.mrf.mxu2  ;;  %v6088_v39 = vpop.f32.mrf.mxu0  ;;  %v9883_v7 = vor.u32 %v11916_v34, %v9880_v30  ;;  %v16700_v34 = vld [vmem:[#allocation80_spill] sm:$0xff] }
 0x7f0   : > { %16691 = vst [vmem:[#allocation76_spill] sm:$0xff] %v15340_v54  ;;  %v15342_v56 = vadd.f32 %v6744_v59, %v6416_v3  ;;  %v6089_v25 = vadd.f32 %v6088_v39, %v16693_v45  ;;  %v6417_v15 = vpop.f32.mrf.mxu1  ;;  %v11920_v3 = vld [vmem:[%s13564_s24 + $0x810] sm:$0xf0]  ;;  %v9879_v39 = vor.u32 %v11919_v0, %v9878_v58 }
 0x7f2   : > { %16692 = vst [vmem:[#allocation77_spill] sm:$0xff] %v15342_v56  ;;  %v6418_v40 = vadd.f32 %v6417_v15, %v6089_v25  ;;  %v9887_v56 = vor.u32 %v11920_v3, %v9886_v19  ;;  %v9908_v15 = vld [vmem:[%s13564_s24 + $0x844] sm:$0xf0] }
 0x7f5   : > { %v15356_v59 = vpop.f32.mrf.mxu3 }
 0x7f6   : > { %16694 = vst [vmem:[#allocation28_spill] sm:$0xff] %v15356_v59 }
 0x7f7   : > { %v6746_v5 = vpop.f32.mrf.mxu2  ;;  %v6091_v23 = vpop.f32.mrf.mxu0 }
 0x7f8   : > { %v15358_v45 = vadd.f32 %v6746_v5, %v6418_v40  ;;  %v6092_v60 = vadd.f32 %v6091_v23, %v16696_v27  ;;  %v6420_v25 = vpop.f32.mrf.mxu1  ;;  %v16697_v40 = vld [vmem:[#allocation30_spill] sm:$0xff] }
 0x7fa   : > { %16695 = vst [vmem:[#allocation78_spill] sm:$0xff] %v15358_v45  ;;  %v6421_v61 = vadd.f32 %v6420_v25, %v6092_v60  ;;  %6130 = vmatmul.bf16.gmra.mxu0 %v9879_v39  ;;  %v9906_v39 = vld [vmem:[%s13564_s24 + $0x828] sm:$0xf]  ;;  %v11923_v25 = vld [vmem:[%s13564_s24 + $0x82c] sm:$0xf] }
 0x7fb   : > { %6459 = vmatmul.bf16.gmra.mxu1 %v9883_v7  ;;  %v11926_v7 = vld [vmem:[%s13564_s24 + $0x840] sm:$0xf0]  ;;  %v11927_v45 = vld [vmem:[%s13564_s24 + $0x848] sm:$0xf0] }
 0x7fc   : > { %10880 = vmatmul.msk.bf16.gmra.mxu2 %vm4433_vm0, %v9887_v56  ;;  %v9914_v56 = vld [vmem:[%s13564_s24 + $0x830] sm:$0xf] }
 0x7fd   : > { %v5922_v5 = vpop.f32.mrf.mxu3 }
 0x7fe   : > { %v15365_v58 = vadd.f32 %v5922_v5, %v16697_v40  ;;  %v9907_v40 = vor.u32 %v11926_v7, %v9906_v39 }
 0x7ff   : > { %v6749_v27 = vpop.f32.mrf.mxu2  ;;  %v6093_v0 = vpop.f32.mrf.mxu0 }
 0x800   : > { %16698 = vst [vmem:[#allocation79_spill] sm:$0xff] %v15365_v58  ;;  %v15367_v23 = vadd.f32 %v6749_v27, %v6421_v61  ;;  %v6094_v30 = vadd.f32 %v6093_v0, %v16700_v34  ;;  %v6422_v19 = vpop.f32.mrf.mxu1  ;;  %v9911_v58 = vor.u32 %v11923_v25, %v9908_v15  ;;  %v9915_v0 = vor.u32 %v11927_v45, %v9914_v56  ;;  %v16703_v34 = vld [vmem:[#allocation82_spill] sm:$0xff]  ;;  %v16704_v15 = vld [vmem:[#allocation32_spill] sm:$0xff]  ;;  %v16707_v56 = vld [vmem:[#allocation83_spill] sm:$0xff] }
 0x802   : > { %16699 = vst [vmem:[#allocation30_spill] sm:$0xff] %v15367_v23  ;;  %v6423_v3 = vadd.f32 %v6422_v19, %v6094_v30  ;;  %v9936_v30 = vld [vmem:[%s13564_s24 + $0x87c] sm:$0xf0] }
 0x805   : > { %v15378_v10 = vpop.f32.mrf.mxu3 }
 0x806   : > { %16701 = vst [vmem:[#allocation80_spill] sm:$0xff] %v15378_v10 }
 0x807   : > { %v6751_v5 = vpop.f32.mrf.mxu2  ;;  %v6096_v27 = vpop.f32.mrf.mxu0 }
 0x808   : > { %v15380_v61 = vadd.f32 %v6751_v5, %v6423_v3  ;;  %v6097_v59 = vadd.f32 %v6096_v27, %v16703_v34  ;;  %v6425_v60 = vpop.f32.mrf.mxu1  ;;  %v11930_v34 = vld [vmem:[%s13564_s24 + $0x864] sm:$0xf] }
 0x80a   : > { %16702 = vst [vmem:[#allocation110_spill] sm:$0xff] %v15380_v61  ;;  %v6426_v19 = vadd.f32 %v6425_v60, %v6097_v59  ;;  %6135 = vmatmul.bf16.gmra.mxu0 %v9907_v40  ;;  %v9934_v40 = vld [vmem:[%s13564_s24 + $0x860] sm:$0xf]  ;;  %v11934_v61 = vld [vmem:[%s13564_s24 + $0x880] sm:$0xf0] }
 0x80b   : > { %6464 = vmatmul.bf16.gmra.mxu1 %v9911_v58  ;;  %v11933_v58 = vld [vmem:[%s13564_s24 + $0x878] sm:$0xf0] }
 0x80c   : > { %10881 = vmatmul.msk.bf16.gmra.mxu2 %vm4433_vm0, %v9915_v0  ;;  %v9942_v0 = vld [vmem:[%s13564_s24 + $0x868] sm:$0xf] }
 0x80d   : > { %v5927_v3 = vpop.f32.mrf.mxu3 }
 0x80e   : > { %v15387_v45 = vadd.f32 %v5927_v3, %v16704_v15  ;;  %v9935_v15 = vor.u32 %v11933_v58, %v9934_v40 }
 0x80f   : > { %v6754_v39 = vpop.f32.mrf.mxu2  ;;  %v6098_v25 = vpop.f32.mrf.mxu0 }
 0x810   : > { %16705 = vst [vmem:[#allocation82_spill] sm:$0xff] %v15387_v45  ;;  %v15389_v7 = vadd.f32 %v6754_v39, %v6426_v19  ;;  %v6099_v5 = vadd.f32 %v6098_v25, %v16707_v56  ;;  %v6427_v27 = vpop.f32.mrf.mxu1  ;;  %v9939_v45 = vor.u32 %v11930_v34, %v9936_v30  ;;  %v9943_v25 = vor.u32 %v11934_v61, %v9942_v0  ;;  %v16710_v56 = vld [vmem:[#allocation85_spill] sm:$0xff]  ;;  %v16711_v30 = vld [vmem:[#allocation34_spill] sm:$0xff] }
 0x811   : > { %v16714_v0 = vld [vmem:[#allocation86_spill] sm:$0xff] }
 0x812   : > { %16706 = vst [vmem:[#allocation32_spill] sm:$0xff] %v15389_v7  ;;  %v6428_v60 = vadd.f32 %v6427_v27, %v6099_v5  ;;  %v9964_v5 = vld [vmem:[%s13564_s24 + $0x8b4] sm:$0xf0] }
 0x815   : > { %v15400_v14 = vpop.f32.mrf.mxu3 }
 0x816   : > { %16708 = vst [vmem:[#allocation83_spill] sm:$0xff] %v15400_v14  ;;  %v11979_v14 = vld [vmem:[%s13564_s24 + $0x9ec] sm:$0xf] }
 0x817   : > { %v6756_v3 = vpop.f32.mrf.mxu2  ;;  %v6101_v39 = vpop.f32.mrf.mxu0 }
 0x818   : > { %v15402_v19 = vadd.f32 %v6756_v3, %v6428_v60  ;;  %v6102_v23 = vadd.f32 %v6101_v39, %v16710_v56  ;;  %v6430_v59 = vpop.f32.mrf.mxu1  ;;  %v11937_v56 = vld [vmem:[%s13564_s24 + $0x89c] sm:$0xf] }
 0x81a   : > { %16709 = vst [vmem:[#allocation111_spill] sm:$0xff] %v15402_v19  ;;  %v6431_v27 = vadd.f32 %v6430_v59, %v6102_v23  ;;  %6140 = vmatmul.bf16.gmra.mxu0 %v9935_v15  ;;  %v9962_v15 = vld [vmem:[%s13564_s24 + $0x898] sm:$0xf]  ;;  %v11941_v19 = vld [vmem:[%s13564_s24 + $0x8b8] sm:$0xf0] }
 0x81b   : > { %6469 = vmatmul.bf16.gmra.mxu1 %v9939_v45  ;;  %v11940_v45 = vld [vmem:[%s13564_s24 + $0x8b0] sm:$0xf0] }
 0x81c   : > { %10882 = vmatmul.msk.bf16.gmra.mxu2 %vm4433_vm0, %v9943_v25  ;;  %v9970_v25 = vld [vmem:[%s13564_s24 + $0x8a0] sm:$0xf] }
 0x81d   : > { %v5932_v60 = vpop.f32.mrf.mxu3 }
 0x81e   : > { %v15409_v61 = vadd.f32 %v5932_v60, %v16711_v30  ;;  %v9963_v30 = vor.u32 %v11940_v45, %v9962_v15 }
 0x81f   : > { %v6759_v40 = vpop.f32.mrf.mxu2  ;;  %v6103_v34 = vpop.f32.mrf.mxu0 }
 0x820   : > { %16712 = vst [vmem:[#allocation85_spill] sm:$0xff] %v15409_v61  ;;  %v15411_v58 = vadd.f32 %v6759_v40, %v6431_v27  ;;  %v6104_v3 = vadd.f32 %v6103_v34, %v16714_v0  ;;  %v6432_v39 = vpop.f32.mrf.mxu1  ;;  %v9967_v61 = vor.u32 %v11937_v56, %v9964_v5  ;;  %v9971_v34 = vor.u32 %v11941_v19, %v9970_v25  ;;  %v16717_v0 = vld [vmem:[#allocation88_spill] sm:$0xff]  ;;  %v16721_v25 = vld [vmem:[#allocation89_spill] sm:$0xff] }
 0x821   : > { %v16718_v5 = vld [vmem:[#allocation36_spill] sm:$0xff] }
 0x822   : > { %16713 = vst [vmem:[#allocation34_spill] sm:$0xff] %v15411_v58  ;;  %v6433_v59 = vadd.f32 %v6432_v39, %v6104_v3  ;;  %v9992_v3 = vld [vmem:[%s13564_s24 + $0x8ec] sm:$0xf0] }
 0x825   : > { %v15422_v28 = vpop.f32.mrf.mxu3 }
 0x826   : > { %16715 = vst [vmem:[#allocation86_spill] sm:$0xff] %v15422_v28 }
 0x827   : > { %v6761_v60 = vpop.f32.mrf.mxu2  ;;  %v6106_v40 = vpop.f32.mrf.mxu0 }
 0x828   : > { %v15424_v27 = vadd.f32 %v6761_v60, %v6433_v59  ;;  %v6107_v7 = vadd.f32 %v6106_v40, %v16717_v0  ;;  %v6435_v23 = vpop.f32.mrf.mxu1  ;;  %v11944_v0 = vld [vmem:[%s13564_s24 + $0x8d4] sm:$0xf] }
 0x82a   : > { %16716 = vst [vmem:[#allocation112_spill] sm:$0xff] %v15424_v27  ;;  %v6436_v39 = vadd.f32 %v6435_v23, %v6107_v7  ;;  %6145 = vmatmul.bf16.gmra.mxu0 %v9963_v30  ;;  %v9990_v30 = vld [vmem:[%s13564_s24 + $0x8d0] sm:$0xf]  ;;  %v11948_v27 = vld [vmem:[%s13564_s24 + $0x8f0] sm:$0xf0] }
 0x82b   : > { %6474 = vmatmul.bf16.gmra.mxu1 %v9967_v61  ;;  %v11947_v61 = vld [vmem:[%s13564_s24 + $0x8e8] sm:$0xf0] }
 0x82c   : > { %10883 = vmatmul.msk.bf16.gmra.mxu2 %vm4433_vm0, %v9971_v34  ;;  %v9998_v34 = vld [vmem:[%s13564_s24 + $0x8d8] sm:$0xf] }
 0x82d   : > { %v5937_v59 = vpop.f32.mrf.mxu3 }
 0x82e   : > { %v15431_v19 = vadd.f32 %v5937_v59, %v16718_v5  ;;  %v9991_v59 = vor.u32 %v11947_v61, %v9990_v30 }
 0x82f   : > { %v6764_v15 = vpop.f32.mrf.mxu2  ;;  %v6108_v56 = vpop.f32.mrf.mxu0 }
 0x830   : > { %16719 = vst [vmem:[#allocation88_spill] sm:$0xff] %v15431_v19  ;;  %v15433_v45 = vadd.f32 %v6764_v15, %v6436_v39  ;;  %v6109_v60 = vadd.f32 %v6108_v56, %v16721_v25  ;;  %v6437_v40 = vpop.f32.mrf.mxu1  ;;  %v9995_v15 = vor.u32 %v11944_v0, %v9992_v3  ;;  %v9999_v56 = vor.u32 %v11948_v27, %v9998_v34  ;;  %v16723_v25 = vld [vmem:[#allocation91_spill] sm:$0xff]  ;;  %v16724_v27 = vld [vmem:[#allocation93_spill] sm:$0xff]  ;;  %v10018_v34 = vld [vmem:[%s13564_s24 + $0x908] sm:$0xf] }
 0x832   : > { %16720 = vst [vmem:[#allocation36_spill] sm:$0xff] %v15433_v45  ;;  %v6438_v23 = vadd.f32 %v6437_v40, %v6109_v60  ;;  %v10020_v45 = vld [vmem:[%s13564_s24 + $0x924] sm:$0xf0]  ;;  %v11955_v40 = vld [vmem:[%s13564_s24 + $0x928] sm:$0xf0] }
 0x837   : > { %v6766_v32 = vpop.f32.mrf.mxu2  ;;  %v6111_v39 = vpop.f32.mrf.mxu0 }
 0x838   : > { %v15444_v5 = vadd.f32 %v6766_v32, %v6438_v23  ;;  %v6112_v19 = vadd.f32 %v6111_v39, %v16723_v25  ;;  %v6440_v60 = vpop.f32.mrf.mxu1  ;;  %v11954_v39 = vld [vmem:[%s13564_s24 + $0x920] sm:$0xf0]  ;;  %v11951_v25 = vld [vmem:[%s13564_s24 + $0x90c] sm:$0xf] }
 0x83a   : > { %16722 = vst [vmem:[#allocation89_spill] sm:$0xff] %v15444_v5  ;;  %v6441_v7 = vadd.f32 %v6440_v60, %v6112_v19  ;;  %6150 = vmatmul.bf16.gmra.mxu0 %v9991_v59  ;;  %v10019_v19 = vor.u32 %v11954_v39, %v10018_v34  ;;  %v16725_v60 = vld [vmem:[#allocation94_spill] sm:$0xff] }
 0x83b   : > { %6479 = vmatmul.bf16.gmra.mxu1 %v9995_v15 }
 0x83c   : > { %10884 = vmatmul.msk.bf16.gmra.mxu2 %vm4433_vm0, %v9999_v56  ;;  %v10027_v56 = vor.u32 %v11955_v40, %v10026_v1  ;;  %v10046_v1 = vld [vmem:[%s13564_s24 + $0x940] sm:$0xf]  ;;  %v11961_v40 = vld [vmem:[%s13564_s24 + $0x958] sm:$0xf0] }
 0x83f   : > { %v6769_v32 = vpop.f32.mrf.mxu2  ;;  %v6113_v3 = vpop.f32.mrf.mxu0 }
 0x840   : > { %v15450_v23 = vadd.f32 %v6769_v32, %v6441_v7  ;;  %v6114_v30 = vadd.f32 %v6113_v3, %v16724_v27  ;;  %v6442_v61 = vpop.f32.mrf.mxu1  ;;  %v10023_v7 = vor.u32 %v11951_v25, %v10020_v45  ;;  %v11958_v25 = vld [vmem:[%s13564_s24 + $0x944] sm:$0xf] }
 0x842   : > { %v6443_v0 = vadd.f32 %v6442_v61, %v6114_v30 }
 0x847   : > { %v6771_v5 = vpop.f32.mrf.mxu2  ;;  %v6116_v15 = vpop.f32.mrf.mxu0 }
 0x848   : > { %v15459_v59 = vadd.f32 %v6771_v5, %v6443_v0  ;;  %v6117_v32 = vadd.f32 %v6116_v15, %v16725_v60  ;;  %v6445_v3 = vpop.f32.mrf.mxu1  ;;  %v16726_v0 = vld [vmem:[#allocation96_spill] sm:$0xff]  ;;  %v10048_v15 = vld [vmem:[%s13564_s24 + $0x95c] sm:$0xf0] }
 0x849   : > { %v10054_v60 = vld [vmem:[%s13564_s24 + $0x948] sm:$0xf] }
 0x84a   : > { %v6446_v27 = vadd.f32 %v6445_v3, %v6117_v32  ;;  %6155 = vmatmul.bf16.gmra.mxu0 %v10019_v19  ;;  %v10047_v32 = vor.u32 %v11961_v40, %v10046_v1  ;;  %v10055_v3 = vor.u32 %v11962_v37, %v10054_v60  ;;  %v10074_v37 = vld [vmem:[%s13564_s24 + $0x978] sm:$0xf]  ;;  %v11965_v60 = vld [vmem:[%s13564_s24 + $0x97c] sm:$0xf] }
 0x84b   : > { %6484 = vmatmul.bf16.gmra.mxu1 %v10023_v7 }
 0x84c   : > { %10885 = vmatmul.msk.bf16.gmra.mxu2 %vm4433_vm0, %v10027_v56  ;;  %v10051_v56 = vor.u32 %v11958_v25, %v10048_v15  ;;  %v11968_v15 = vld [vmem:[%s13564_s24 + $0x990] sm:$0xf0] }
 0x84f   : > { %v6774_v30 = vpop.f32.mrf.mxu2  ;;  %v6118_v61 = vpop.f32.mrf.mxu0 }
 0x850   : > { %v15463_v5 = vadd.f32 %v6774_v30, %v6446_v27  ;;  %v6119_v34 = vadd.f32 %v6118_v61, %v16726_v0  ;;  %v6447_v45 = vpop.f32.mrf.mxu1  ;;  %v16727_v27 = vld [vmem:[#allocation97_spill] sm:$0xff] }
 0x852   : > { %v6448_v39 = vadd.f32 %v6447_v45, %v6119_v34 }
 0x857   : > { %v6776_v58 = vpop.f32.mrf.mxu2  ;;  %v6121_v7 = vpop.f32.mrf.mxu0 }
 0x858   : > { %v15472_v19 = vadd.f32 %v6776_v58, %v6448_v39  ;;  %v6122_v30 = vadd.f32 %v6121_v7, %v16727_v27  ;;  %v6450_v61 = vpop.f32.mrf.mxu1  ;;  %v16728_v39 = vld [vmem:[#allocation38_spill] sm:$0xff]  ;;  %v10082_v27 = vld [vmem:[%s13564_s24 + $0x980] sm:$0xf] }
 0x859   : > { %v10076_v7 = vld [vmem:[%s13564_s24 + $0x994] sm:$0xf0] }
 0x85a   : > { %v6451_v0 = vadd.f32 %v6450_v61, %v6122_v30  ;;  %6160 = vmatmul.bf16.gmra.mxu0 %v10047_v32  ;;  %v10075_v30 = vor.u32 %v11968_v15, %v10074_v37  ;;  %v10083_v61 = vor.u32 %v11969_v17, %v10082_v27  ;;  %v12170_v17 = vld [vmem:[%s16366_s3 + $0x50] sm:$0xff]  ;;  %v11975_v27 = vld [vmem:[%s13564_s24 + $0x9c8] sm:$0xf0] }
 0x85b   : > { %6489 = vmatmul.bf16.gmra.mxu1 %v10051_v56  ;;  %7217 = vmatpush.bf16.msra.mxu3 %v12170_v17 }
 0x85c   : > { %10886 = vmatmul.msk.bf16.gmra.mxu2 %vm4433_vm0, %v10055_v3  ;;  %v10079_v3 = vor.u32 %v11965_v60, %v10076_v7  ;;  %v10102_v7 = vld [vmem:[%s13564_s24 + $0x9b0] sm:$0xf] }
 0x85f   : > { %v6779_v34 = vpop.f32.mrf.mxu2  ;;  %v6123_v45 = vpop.f32.mrf.mxu0 }
 0x860   : > { %v15476_v58 = vadd.f32 %v6779_v34, %v6451_v0  ;;  %v6124_v1 = vadd.f32 %v6123_v45, %v16728_v39  ;;  %v6452_v40 = vpop.f32.mrf.mxu1  ;;  %v16729_v0 = vld [vmem:[#allocation46_spill] sm:$0xff] }
 0x862   : > { %v6453_v25 = vadd.f32 %v6452_v40, %v6124_v1 }
 0x867   : > { %v6781_v28 = vpop.f32.mrf.mxu2  ;;  %v6126_v56 = vpop.f32.mrf.mxu0 }
 0x868   : > { %v15485_v32 = vadd.f32 %v6781_v28, %v6453_v25  ;;  %v6127_v34 = vadd.f32 %v6126_v56, %v16729_v0  ;;  %v6455_v45 = vpop.f32.mrf.mxu1  ;;  %v16730_v25 = vld [vmem:[#allocation47_spill] sm:$0xff]  ;;  %v10104_v56 = vld [vmem:[%s13564_s24 + $0x9cc] sm:$0xf0]  ;;  %v11976_v0 = vld [vmem:[%s13564_s24 + $0x9d0] sm:$0xf0] }
 0x86a   : > { %v6456_v39 = vadd.f32 %v6455_v45, %v6127_v34  ;;  %6165 = vmatmul.bf16.gmra.mxu0 %v10075_v30  ;;  %v11972_v30 = vld [vmem:[%s13564_s24 + $0x9b4] sm:$0xf]  ;;  %v10103_v34 = vor.u32 %v11975_v27, %v10102_v7 }
 0x86b   : > { %6494 = vmatmul.bf16.gmra.mxu1 %v10079_v3  ;;  %v10110_v3 = vld [vmem:[%s13564_s24 + $0x9b8] sm:$0xf]  ;;  %v16732_v27 = vld [vmem:[#allocation41_spill] sm:$0xff] }
 0x86c   : > { %10887 = vmatmul.msk.bf16.gmra.mxu2 %vm4433_vm0, %v10083_v61  ;;  %v10111_v13 = vor.u32 %v11976_v0, %v10110_v3  ;;  %v10130_v3 = vld [vmem:[%s13564_s24 + $0x9e8] sm:$0xf]  ;;  %v11982_v0 = vld [vmem:[%s13564_s24 + $0xa00] sm:$0xf0] }
 0x86f   : > { %v6784_v1 = vpop.f32.mrf.mxu2  ;;  %v6128_v40 = vpop.f32.mrf.mxu0 }
 0x870   : > { %v15489_v28 = vadd.f32 %v6784_v1, %v6456_v39  ;;  %v6129_v37 = vadd.f32 %v6128_v40, %v16730_v25  ;;  %v6457_v15 = vpop.f32.mrf.mxu1  ;;  %v10107_v1 = vor.u32 %v11972_v30, %v10104_v56  ;;  %v16731_v40 = vld [vmem:[#allocation40_spill] sm:$0xff] }
 0x872   : > { %v6458_v60 = vadd.f32 %v6457_v15, %v6129_v37 }
 0x877   : > { %v6786_v61 = vpop.f32.mrf.mxu2  ;;  %v6131_v39 = vpop.f32.mrf.mxu0 }
 0x878   : > { %v15501_v45 = vadd.f32 %v6786_v61, %v6458_v60  ;;  %v6132_v17 = vadd.f32 %v6131_v39, %v16731_v40  ;;  %v6460_v25 = vpop.f32.mrf.mxu1  ;;  %v10132_v39 = vld [vmem:[%s13564_s24 + $0xa04] sm:$0xf0]  ;;  %v10138_v40 = vld [vmem:[%s13564_s24 + $0x9f0] sm:$0xf] }
 0x87a   : > { %v6461_v37 = vadd.f32 %v6460_v25, %v6132_v17  ;;  %6170 = vmatmul.bf16.gmra.mxu0 %v10103_v34  ;;  %v10131_v17 = vor.u32 %v11982_v0, %v10130_v3  ;;  %v10139_v25 = vor.u32 %v11983_v31, %v10138_v40  ;;  %v10158_v31 = vld [vmem:[%s13564_s24 + $0xa20] sm:$0xf]  ;;  %v11986_v40 = vld [vmem:[%s13564_s24 + $0xa24] sm:$0xf] }
 0x87b   : > { %6499 = vmatmul.bf16.gmra.mxu1 %v10107_v1  ;;  %v10135_v1 = vor.u32 %v11979_v14, %v10132_v39  ;;  %v11989_v39 = vld [vmem:[%s13564_s24 + $0xa38] sm:$0xf0] }
 0x87c   : > { %10888 = vmatmul.msk.bf16.gmra.mxu2 %vm4433_vm0, %v10111_v13 }
 0x87f   : > { %v6789_v15 = vpop.f32.mrf.mxu2  ;;  %v6133_v7 = vpop.f32.mrf.mxu0 }
 0x880   : > { %v15505_v60 = vadd.f32 %v6789_v15, %v6461_v37  ;;  %v6134_v61 = vadd.f32 %v6133_v7, %v16732_v27  ;;  %v6462_v30 = vpop.f32.mrf.mxu1  ;;  %v16733_v37 = vld [vmem:[#allocation48_spill] sm:$0xff] }
 0x882   : > { %v6463_v56 = vadd.f32 %v6462_v30, %v6134_v61 }
 0x887   : > { %v6791_v10 = vpop.f32.mrf.mxu2  ;;  %v6136_v13 = vpop.f32.mrf.mxu0 }
 0x888   : > { %v15514_v34 = vadd.f32 %v6791_v10, %v6463_v56  ;;  %v6137_v15 = vadd.f32 %v6136_v13, %v16733_v37  ;;  %v6465_v7 = vpop.f32.mrf.mxu1  ;;  %v16734_v56 = vld [vmem:[#allocation49_spill] sm:$0xff]  ;;  %v10160_v13 = vld [vmem:[%s13564_s24 + $0xa3c] sm:$0xf0]  ;;  %v10166_v37 = vld [vmem:[%s13564_s24 + $0xa28] sm:$0xf] }
 0x88a   : > { %v6466_v27 = vadd.f32 %v6465_v7, %v6137_v15  ;;  %6175 = vmatmul.bf16.gmra.mxu0 %v10131_v17  ;;  %v10159_v15 = vor.u32 %v11989_v39, %v10158_v31  ;;  %v10167_v7 = vor.u32 %v11990_v63, %v10166_v37  ;;  %v10186_v63 = vld [vmem:[%s13564_s24 + $0xa58] sm:$0xf]  ;;  %v11993_v37 = vld [vmem:[%s13564_s24 + $0xa5c] sm:$0xf] }
 0x88b   : > { %6504 = vmatmul.bf16.gmra.mxu1 %v10135_v1 }
 0x88c   : > { %10889 = vmatmul.msk.bf16.gmra.mxu2 %vm4433_vm0, %v10139_v25  ;;  %v10163_v25 = vor.u32 %v11986_v40, %v10160_v13  ;;  %v11996_v13 = vld [vmem:[%s13564_s24 + $0xa70] sm:$0xf0] }
 0x88f   : > { %v6794_v61 = vpop.f32.mrf.mxu2  ;;  %v6138_v30 = vpop.f32.mrf.mxu0 }
 0x890   : > { %v15518_v10 = vadd.f32 %v6794_v61, %v6466_v27  ;;  %v6139_v3 = vadd.f32 %v6138_v30, %v16734_v56  ;;  %v6467_v14 = vpop.f32.mrf.mxu1  ;;  %v16735_v27 = vld [vmem:[#allocation43_spill] sm:$0xff] }
 0x892   : > { %v6468_v0 = vadd.f32 %v6467_v14, %v6139_v3 }
 0x897   : > { %v6796_v54 = vpop.f32.mrf.mxu2  ;;  %v6141_v1 = vpop.f32.mrf.mxu0 }
 0x898   : > { %v15527_v17 = vadd.f32 %v6796_v54, %v6468_v0  ;;  %v6142_v61 = vadd.f32 %v6141_v1, %v16735_v27  ;;  %v6470_v30 = vpop.f32.mrf.mxu1  ;;  %v16736_v0 = vld [vmem:[#allocation44_spill] sm:$0xff]  ;;  %v10188_v1 = vld [vmem:[%s13564_s24 + $0xa74] sm:$0xf0]  ;;  %v10194_v27 = vld [vmem:[%s13564_s24 + $0xa60] sm:$0xf] }
 0x89a   : > { %v6471_v56 = vadd.f32 %v6470_v30, %v6142_v61  ;;  %6180 = vmatmul.bf16.gmra.mxu0 %v10159_v15  ;;  %v10187_v61 = vor.u32 %v11996_v13, %v10186_v63  ;;  %v10195_v30 = vor.u32 %v11997_v35, %v10194_v27  ;;  %v10214_v35 = vld [vmem:[%s13564_s24 + $0xa90] sm:$0xf]  ;;  %v12000_v27 = vld [vmem:[%s13564_s24 + $0xa94] sm:$0xf] }
 0x89b   : > { %6509 = vmatmul.bf16.gmra.mxu1 %v10163_v25 }
 0x89c   : > { %10890 = vmatmul.msk.bf16.gmra.mxu2 %vm4433_vm0, %v10167_v7  ;;  %v10191_v7 = vor.u32 %v11993_v37, %v10188_v1  ;;  %v12003_v1 = vld [vmem:[%s13564_s24 + $0xaa8] sm:$0xf0] }
 0x89f   : > { %v6799_v3 = vpop.f32.mrf.mxu2  ;;  %v6143_v14 = vpop.f32.mrf.mxu0 }
 0x8a0   : > { %v15531_v54 = vadd.f32 %v6799_v3, %v6471_v56  ;;  %v6144_v31 = vadd.f32 %v6143_v14, %v16736_v0  ;;  %v6472_v39 = vpop.f32.mrf.mxu1  ;;  %v16737_v56 = vld [vmem:[#allocation51_spill] sm:$0xff] }
 0x8a2   : > { %v6473_v40 = vadd.f32 %v6472_v39, %v6144_v31 }
 0x8a7   : > { %v6801_v36 = vpop.f32.mrf.mxu2  ;;  %v6146_v25 = vpop.f32.mrf.mxu0 }
 0x8a8   : > { %v15540_v15 = vadd.f32 %v6801_v36, %v6473_v40  ;;  %v6147_v3 = vadd.f32 %v6146_v25, %v16737_v56  ;;  %v6475_v14 = vpop.f32.mrf.mxu1  ;;  %v16739_v40 = vld [vmem:[#allocation52_spill] sm:$0xff]  ;;  %v10216_v25 = vld [vmem:[%s13564_s24 + $0xaac] sm:$0xf0]  ;;  %v10222_v56 = vld [vmem:[%s13564_s24 + $0xa98] sm:$0xf] }
 0x8aa   : > { %v6476_v0 = vadd.f32 %v6475_v14, %v6147_v3  ;;  %6185 = vmatmul.bf16.gmra.mxu0 %v10187_v61  ;;  %v10215_v3 = vor.u32 %v12003_v1, %v10214_v35  ;;  %v10223_v14 = vor.u32 %v12004_v33, %v10222_v56  ;;  %v10242_v33 = vld [vmem:[%s13564_s24 + $0xac8] sm:$0xf]  ;;  %v12007_v56 = vld [vmem:[%s13564_s24 + $0xacc] sm:$0xf] }
 0x8ab   : > { %6514 = vmatmul.bf16.gmra.mxu1 %v10191_v7 }
 0x8ac   : > { %10891 = vmatmul.msk.bf16.gmra.mxu2 %vm4433_vm0, %v10195_v30  ;;  %v10219_v30 = vor.u32 %v12000_v27, %v10216_v25  ;;  %v12010_v25 = vld [vmem:[%s13564_s24 + $0xae0] sm:$0xf0] }
 0x8af   : > { %v6804_v31 = vpop.f32.mrf.mxu2  ;;  %v6148_v39 = vpop.f32.mrf.mxu0 }
 0x8b0   : > { %v15544_v36 = vadd.f32 %v6804_v31, %v6476_v0  ;;  %v6149_v63 = vadd.f32 %v6148_v39, %v16739_v40  ;;  %v6477_v13 = vpop.f32.mrf.mxu1  ;;  %v16741_v0 = vld [vmem:[#allocation4_spill] sm:$0xff] }
 0x8b2   : > { %16738 = vst [vmem:[#allocation91_spill] sm:$0xff] %v15544_v36  ;;  %v6478_v37 = vadd.f32 %v6477_v13, %v6149_v63  ;;  %v16776_v36 = vmax.f32 %v14751_v29, %v15095_v4 }
 0x8b7   : > { %v6806_v21 = vpop.f32.mrf.mxu2  ;;  %v6151_v7 = vpop.f32.mrf.mxu0 }
 0x8b8   : > { %v15553_v61 = vadd.f32 %v6806_v21, %v6478_v37  ;;  %v6152_v31 = vadd.f32 %v6151_v7, %v16741_v0  ;;  %v6480_v39 = vpop.f32.mrf.mxu1  ;;  %v16743_v37 = vld [vmem:[#allocation5_spill] sm:$0xff]  ;;  %v10244_v7 = vld [vmem:[%s13564_s24 + $0xae4] sm:$0xf0] }
 0x8b9   : > { %v10250_v0 = vld [vmem:[%s13564_s24 + $0xad0] sm:$0xf] }
 0x8ba   : > { %16740 = vst [vmem:[#allocation93_spill] sm:$0xff] %v15553_v61  ;;  %v6481_v40 = vadd.f32 %v6480_v39, %v6152_v31  ;;  %6190 = vmatmul.bf16.gmra.mxu0 %v10215_v3  ;;  %v10243_v31 = vor.u32 %v12010_v25, %v10242_v33  ;;  %v10251_v39 = vor.u32 %v12011_v6, %v10250_v0  ;;  %v10270_v6 = vld [vmem:[%s13564_s24 + $0xb00] sm:$0xf]  ;;  %v10278_v0 = vld [vmem:[%s13564_s24 + $0xb08] sm:$0xf] }
 0x8bb   : > { %6519 = vmatmul.bf16.gmra.mxu1 %v10219_v30 }
 0x8bc   : > { %10892 = vmatmul.msk.bf16.gmra.mxu2 %vm4433_vm0, %v10223_v14  ;;  %v10247_v14 = vor.u32 %v12007_v56, %v10244_v7  ;;  %v12017_v7 = vld [vmem:[%s13564_s24 + $0xb18] sm:$0xf0] }
 0x8bf   : > { %v6809_v63 = vpop.f32.mrf.mxu2  ;;  %v6153_v13 = vpop.f32.mrf.mxu0 }
 0x8c0   : > { %v15557_v21 = vadd.f32 %v6809_v63, %v6481_v40  ;;  %v6154_v35 = vadd.f32 %v6153_v13, %v16743_v37  ;;  %v6482_v1 = vpop.f32.mrf.mxu1  ;;  %v16745_v40 = vld [vmem:[#allocation55_spill] sm:$0xff] }
 0x8c2   : > { %16742 = vst [vmem:[#allocation94_spill] sm:$0xff] %v15557_v21  ;;  %v6483_v27 = vadd.f32 %v6482_v1, %v6154_v35 }
 0x8c7   : > { %v6811_v61 = vpop.f32.mrf.mxu2  ;;  %v6156_v30 = vpop.f32.mrf.mxu0 }
 0x8c8   : > { %v15566_v3 = vadd.f32 %v6811_v61, %v6483_v27  ;;  %v6157_v63 = vadd.f32 %v6156_v30, %v16745_v40  ;;  %v6485_v13 = vpop.f32.mrf.mxu1  ;;  %v16747_v27 = vld [vmem:[#allocation8_spill] sm:$0xff]  ;;  %v12018_v30 = vld [vmem:[%s13564_s24 + $0xb20] sm:$0xf0] }
 0x8c9   : > { %v12014_v40 = vld [vmem:[%s13564_s24 + $0xb04] sm:$0xf] }
 0x8ca   : > { %16744 = vst [vmem:[#allocation96_spill] sm:$0xff] %v15566_v3  ;;  %v6486_v37 = vadd.f32 %v6485_v13, %v6157_v63  ;;  %6195 = vmatmul.bf16.gmra.mxu0 %v10243_v31  ;;  %v10272_v3 = vld [vmem:[%s13564_s24 + $0xb1c] sm:$0xf0]  ;;  %v10271_v63 = vor.u32 %v12017_v7, %v10270_v6 }
 0x8cb   : > { %6524 = vmatmul.bf16.gmra.mxu1 %v10247_v14  ;;  %v10275_v13 = vor.u32 %v12014_v40, %v10272_v3  ;;  %v10298_v3 = vld [vmem:[%s13564_s24 + $0xb38] sm:$0xf]  ;;  %v10306_v40 = vld [vmem:[%s13564_s24 + $0xb40] sm:$0xf] }
 0x8cc   : > { %10893 = vmatmul.msk.bf16.gmra.mxu2 %vm4433_vm0, %v10251_v39  ;;  %v10279_v39 = vor.u32 %v12018_v30, %v10278_v0  ;;  %v12024_v30 = vld [vmem:[%s13564_s24 + $0xb50] sm:$0xf0] }
 0x8cf   : > { %v6814_v35 = vpop.f32.mrf.mxu2  ;;  %v6158_v1 = vpop.f32.mrf.mxu0 }
 0x8d0   : > { %v15570_v61 = vadd.f32 %v6814_v35, %v6486_v37  ;;  %v6159_v33 = vadd.f32 %v6158_v1, %v16747_v27  ;;  %v6487_v25 = vpop.f32.mrf.mxu1  ;;  %v16749_v37 = vld [vmem:[#allocation10_spill] sm:$0xff] }
 0x8d2   : > { %16746 = vst [vmem:[#allocation97_spill] sm:$0xff] %v15570_v61  ;;  %v6488_v56 = vadd.f32 %v6487_v25, %v6159_v33 }
 0x8d7   : > { %v6816_v21 = vpop.f32.mrf.mxu2  ;;  %v6161_v14 = vpop.f32.mrf.mxu0 }
 0x8d8   : > { %v15579_v31 = vadd.f32 %v6816_v21, %v6488_v56  ;;  %v6162_v35 = vadd.f32 %v6161_v14, %v16749_v37  ;;  %v6490_v1 = vpop.f32.mrf.mxu1  ;;  %v16751_v56 = vld [vmem:[#allocation11_spill] sm:$0xff]  ;;  %v12025_v14 = vld [vmem:[%s13564_s24 + $0xb58] sm:$0xf0] }
 0x8d9   : > { %v12021_v37 = vld [vmem:[%s13564_s24 + $0xb3c] sm:$0xf] }
 0x8da   : > { %16748 = vst [vmem:[#allocation38_spill] sm:$0xff] %v15579_v31  ;;  %v6491_v27 = vadd.f32 %v6490_v1, %v6162_v35  ;;  %6200 = vmatmul.bf16.gmra.mxu0 %v10271_v63  ;;  %v10300_v31 = vld [vmem:[%s13564_s24 + $0xb54] sm:$0xf0]  ;;  %v10299_v35 = vor.u32 %v12024_v30, %v10298_v3 }
 0x8db   : > { %6529 = vmatmul.bf16.gmra.mxu1 %v10275_v13  ;;  %v10307_v13 = vor.u32 %v12025_v14, %v10306_v40  ;;  %v10303_v1 = vor.u32 %v12021_v37, %v10300_v31  ;;  %v12169_v31 = vld [vmem:[%s16366_s3 + $0x48] sm:$0xff]  ;;  %v10326_v14 = vld [vmem:[%s13564_s24 + $0xb70] sm:$0xf] }
 0x8dc   : > { %10894 = vmatmul.msk.bf16.gmra.mxu2 %vm4433_vm0, %v10279_v39  ;;  %7218 = vmatpush.bf16.msra.mxu3 %v12169_v31  ;;  %v12031_v37 = vld [vmem:[%s13564_s24 + $0xb88] sm:$0xf0] }
 0x8df   : > { %v6819_v33 = vpop.f32.mrf.mxu2  ;;  %v6163_v25 = vpop.f32.mrf.mxu0 }
 0x8e0   : > { %v15583_v21 = vadd.f32 %v6819_v33, %v6491_v27  ;;  %v6164_v6 = vadd.f32 %v6163_v25, %v16751_v56  ;;  %v6492_v7 = vpop.f32.mrf.mxu1  ;;  %v16753_v27 = vld [vmem:[#allocation12_spill] sm:$0xff] }
 0x8e2   : > { %16750 = vst [vmem:[#allocation46_spill] sm:$0xff] %v15583_v21  ;;  %v6493_v0 = vadd.f32 %v6492_v7, %v6164_v6 }
 0x8e7   : > { %v6821_v61 = vpop.f32.mrf.mxu2  ;;  %v6166_v39 = vpop.f32.mrf.mxu0 }
 0x8e8   : > { %v15592_v63 = vadd.f32 %v6821_v61, %v6493_v0  ;;  %v6167_v33 = vadd.f32 %v6166_v39, %v16753_v27  ;;  %v6495_v25 = vpop.f32.mrf.mxu1  ;;  %v16755_v0 = vld [vmem:[#allocation13_spill] sm:$0xff] }
 0x8e9   : > { %v12032_v39 = vld [vmem:[%s13564_s24 + $0xb90] sm:$0xf0] }
 0x8ea   : > { %16752 = vst [vmem:[#allocation47_spill] sm:$0xff] %v15592_v63  ;;  %v6496_v56 = vadd.f32 %v6495_v25, %v6167_v33  ;;  %6205 = vmatmul.bf16.gmra.mxu0 %v10299_v35  ;;  %v10334_v35 = vld [vmem:[%s13564_s24 + $0xb78] sm:$0xf]  ;;  %v12028_v27 = vld [vmem:[%s13564_s24 + $0xb74] sm:$0xf]  ;;  %v10327_v33 = vor.u32 %v12031_v37, %v10326_v14  ;;  %v16759_v37 = vld [vmem:[#allocation15_spill] sm:$0xff] }
 0x8eb   : > { %6534 = vmatmul.bf16.gmra.mxu1 %v10303_v1  ;;  %v10356_v63 = vld [vmem:[%s13564_s24 + $0xbc4] sm:$0xf0] }
 0x8ec   : > { %10895 = vmatmul.msk.bf16.gmra.mxu2 %vm4433_vm0, %v10307_v13  ;;  %v10328_v13 = vld [vmem:[%s13564_s24 + $0xb8c] sm:$0xf0] }
 0x8ef   : > { %v6824_v6 = vpop.f32.mrf.mxu2  ;;  %v6168_v7 = vpop.f32.mrf.mxu0 }
 0x8f0   : > { %v15596_v61 = vadd.f32 %v6824_v6, %v6496_v56  ;;  %v6169_v3 = vadd.f32 %v6168_v7, %v16755_v0  ;;  %v6497_v30 = vpop.f32.mrf.mxu1  ;;  %v10335_v6 = vor.u32 %v12032_v39, %v10334_v35  ;;  %v16757_v7 = vld [vmem:[#allocation14_spill] sm:$0xff] }
 0x8f2   : > { %16754 = vst [vmem:[#allocation40_spill] sm:$0xff] %v15596_v61  ;;  %v6498_v40 = vadd.f32 %v6497_v30, %v6169_v3  ;;  %v10331_v61 = vor.u32 %v12028_v27, %v10328_v13  ;;  %v10354_v27 = vld [vmem:[%s13564_s24 + $0xba8] sm:$0xf]  ;;  %v12038_v13 = vld [vmem:[%s13564_s24 + $0xbc0] sm:$0xf0] }
 0x8f7   : > { %v6826_v1 = vpop.f32.mrf.mxu2  ;;  %v6171_v56 = vpop.f32.mrf.mxu0 }
 0x8f8   : > { %v15608_v25 = vadd.f32 %v6826_v1, %v6498_v40  ;;  %v6172_v31 = vadd.f32 %v6171_v56, %v16757_v7  ;;  %v6500_v0 = vpop.f32.mrf.mxu1  ;;  %v12039_v56 = vld [vmem:[%s13564_s24 + $0xbc8] sm:$0xf0] }
 0x8f9   : > { %v12035_v7 = vld [vmem:[%s13564_s24 + $0xbac] sm:$0xf] }
 0x8fa   : > { %16756 = vst [vmem:[#allocation41_spill] sm:$0xff] %v15608_v25  ;;  %v6501_v3 = vadd.f32 %v6500_v0, %v6172_v31  ;;  %6210 = vmatmul.bf16.gmra.mxu0 %v10327_v33  ;;  %v10362_v25 = vld [vmem:[%s13564_s24 + $0xbb0] sm:$0xf]  ;;  %v10355_v31 = vor.u32 %v12038_v13, %v10354_v27  ;;  %v10359_v0 = vor.u32 %v12035_v7, %v10356_v63  ;;  %v10382_v63 = vld [vmem:[%s13564_s24 + $0xbe0] sm:$0xf] }
 0x8fb   : > { %6539 = vmatmul.bf16.gmra.mxu1 %v10331_v61  ;;  %v10390_v7 = vld [vmem:[%s13564_s24 + $0xbe8] sm:$0xf] }
 0x8fc   : > { %10896 = vmatmul.msk.bf16.gmra.mxu2 %vm4433_vm0, %v10335_v6  ;;  %v10363_v6 = vor.u32 %v12039_v56, %v10362_v25  ;;  %v12045_v56 = vld [vmem:[%s13564_s24 + $0xbf8] sm:$0xf0] }
 0x8ff   : > { %v6829_v30 = vpop.f32.mrf.mxu2  ;;  %v6173_v14 = vpop.f32.mrf.mxu0 }
 0x900   : > { %v15612_v40 = vadd.f32 %v6829_v30, %v6501_v3  ;;  %v6174_v1 = vadd.f32 %v6173_v14, %v16759_v37  ;;  %v6502_v35 = vpop.f32.mrf.mxu1  ;;  %v16761_v3 = vld [vmem:[#allocation16_spill] sm:$0xff] }
 0x902   : > { %16758 = vst [vmem:[#allocation48_spill] sm:$0xff] %v15612_v40  ;;  %v6503_v39 = vadd.f32 %v6502_v35, %v6174_v1 }
 0x907   : > { %v6831_v21 = vpop.f32.mrf.mxu2  ;;  %v6176_v61 = vpop.f32.mrf.mxu0 }
 0x908   : > { %v15621_v33 = vadd.f32 %v6831_v21, %v6503_v39  ;;  %v6177_v30 = vadd.f32 %v6176_v61, %v16761_v3  ;;  %v6505_v14 = vpop.f32.mrf.mxu1  ;;  %v16763_v39 = vld [vmem:[#allocation17_spill] sm:$0xff]  ;;  %v12046_v61 = vld [vmem:[%s13564_s24 + $0xc00] sm:$0xf0] }
 0x909   : > { %v12042_v3 = vld [vmem:[%s13564_s24 + $0xbe4] sm:$0xf] }
 0x90a   : > { %16760 = vst [vmem:[#allocation49_spill] sm:$0xff] %v15621_v33  ;;  %v6506_v37 = vadd.f32 %v6505_v14, %v6177_v30  ;;  %6215 = vmatmul.bf16.gmra.mxu0 %v10355_v31  ;;  %v10384_v33 = vld [vmem:[%s13564_s24 + $0xbfc] sm:$0xf0]  ;;  %v10383_v30 = vor.u32 %v12045_v56, %v10382_v63 }
 0x90b   : > { %6544 = vmatmul.bf16.gmra.mxu1 %v10359_v0  ;;  %v10391_v0 = vor.u32 %v12046_v61, %v10390_v7  ;;  %v10387_v14 = vor.u32 %v12042_v3, %v10384_v33  ;;  %v10410_v33 = vld [vmem:[%s13564_s24 + $0xc18] sm:$0xf]  ;;  %v12052_v61 = vld [vmem:[%s13564_s24 + $0xc30] sm:$0xf0]  ;;  %v10418_v3 = vld [vmem:[%s13564_s24 + $0xc20] sm:$0xf] }
 0x90c   : > { %10897 = vmatmul.msk.bf16.gmra.mxu2 %vm4433_vm0, %v10363_v6 }
 0x90f   : > { %v6834_v1 = vpop.f32.mrf.mxu2  ;;  %v6178_v35 = vpop.f32.mrf.mxu0 }
 0x910   : > { %v15625_v21 = vadd.f32 %v6834_v1, %v6506_v37  ;;  %v6179_v27 = vadd.f32 %v6178_v35, %v16763_v39  ;;  %v6507_v25 = vpop.f32.mrf.mxu1  ;;  %v16765_v37 = vld [vmem:[#allocation18_spill] sm:$0xff] }
 0x912   : > { %16762 = vst [vmem:[#allocation43_spill] sm:$0xff] %v15625_v21  ;;  %v6508_v13 = vadd.f32 %v6507_v25, %v6179_v27 }
 0x917   : > { %v6836_v40 = vpop.f32.mrf.mxu2  ;;  %v6181_v6 = vpop.f32.mrf.mxu0 }
 0x918   : > { %v15634_v31 = vadd.f32 %v6836_v40, %v6508_v13  ;;  %v6182_v1 = vadd.f32 %v6181_v6, %v16765_v37  ;;  %v6510_v35 = vpop.f32.mrf.mxu1  ;;  %v16767_v13 = vld [vmem:[#allocation19_spill] sm:$0xff]  ;;  %v12053_v6 = vld [vmem:[%s13564_s24 + $0xc38] sm:$0xf0] }
 0x919   : > { %v12049_v37 = vld [vmem:[%s13564_s24 + $0xc1c] sm:$0xf] }
 0x91a   : > { %16764 = vst [vmem:[#allocation44_spill] sm:$0xff] %v15634_v31  ;;  %v6511_v39 = vadd.f32 %v6510_v35, %v6182_v1  ;;  %6220 = vmatmul.bf16.gmra.mxu0 %v10383_v30  ;;  %v10412_v31 = vld [vmem:[%s13564_s24 + $0xc34] sm:$0xf0]  ;;  %v10411_v1 = vor.u32 %v12052_v61, %v10410_v33 }
 0x91b   : > { %6549 = vmatmul.bf16.gmra.mxu1 %v10387_v14  ;;  %v10419_v14 = vor.u32 %v12053_v6, %v10418_v3  ;;  %v10415_v35 = vor.u32 %v12049_v37, %v10412_v31  ;;  %v12165_v6 = vld [vmem:[%s16366_s3 + $0x28] sm:$0xff] }
 0x91c   : > { %10898 = vmatmul.msk.bf16.gmra.mxu2 %vm4433_vm0, %v10391_v0 }
 0x91f   : > { %v6839_v27 = vpop.f32.mrf.mxu2  ;;  %v6183_v25 = vpop.f32.mrf.mxu0 }
 0x920   : > { %v15638_v40 = vadd.f32 %v6839_v27, %v6511_v39  ;;  %v6184_v63 = vadd.f32 %v6183_v25, %v16767_v13  ;;  %v6512_v56 = vpop.f32.mrf.mxu1  ;;  %v12168_v39 = vld [vmem:[%s16366_s3 + $0x40] sm:$0xff]  ;;  %v16769_v27 = vld [vmem:[#allocation20_spill] sm:$0xff] }
 0x921   : > { %7219 = vmatpush.bf16.msra.mxu3 %v12168_v39  ;;  %v12056_v39 = vld [vmem:[%s13564_s24 + $0xc54] sm:$0xf] }
 0x922   : > { %16766 = vst [vmem:[#allocation51_spill] sm:$0xff] %v15638_v40  ;;  %v6513_v7 = vadd.f32 %v6512_v56, %v6184_v63  ;;  %v12167_v63 = vld [vmem:[%s16366_s3 + $0x38] sm:$0xff] }
 0x925   : > { %7280 = vmatpush.bf16.msrb.mxu3 %v12167_v63 }
 0x927   : > { %v6841_v21 = vpop.f32.mrf.mxu2  ;;  %v6186_v0 = vpop.f32.mrf.mxu0 }
 0x928   : > { %v15647_v30 = vadd.f32 %v6841_v21, %v6513_v7  ;;  %v6187_v25 = vadd.f32 %v6186_v0, %v16769_v27  ;;  %v6515_v13 = vpop.f32.mrf.mxu1  ;;  %v12166_v21 = vld [vmem:[%s16366_s3 + $0x30] sm:$0xff]  ;;  %v12059_v0 = vld [vmem:[%s13564_s24 + $0xc68] sm:$0xf0] }
 0x929   : > { %7281 = vmatpush.bf16.msrb.mxu3 %v12166_v21  ;;  %v10440_v27 = vld [vmem:[%s13564_s24 + $0xc6c] sm:$0xf0] }
 0x92a   : > { %16768 = vst [vmem:[#allocation52_spill] sm:$0xff] %v15647_v30  ;;  %v6516_v56 = vadd.f32 %v6515_v13, %v6187_v25  ;;  %6225 = vmatmul.bf16.gmra.mxu0 %v10411_v1  ;;  %v10438_v1 = vld [vmem:[%s13564_s24 + $0xc50] sm:$0xf]  ;;  %v12164_v25 = vld [vmem:[%s16366_s3 + $0x20] sm:$0xff] }
 0x92b   : > { %6554 = vmatmul.bf16.gmra.mxu1 %v10415_v35  ;;  %v12060_v35 = vld [vmem:[%s13564_s24 + $0xc70] sm:$0xf0]  ;;  %v10439_v63 = vor.u32 %v12059_v0, %v10438_v1 }
 0x92c   : > { %10899 = vmatmul.msk.bf16.gmra.mxu2 %vm4433_vm0, %v10419_v14  ;;  %v10446_v14 = vld [vmem:[%s13564_s24 + $0xc58] sm:$0xf] }
 0x92d   : > { %7282 = vmatpush.bf16.msrb.mxu3 %v12165_v6  ;;  %v10447_v21 = vor.u32 %v12060_v35, %v10446_v14 }
 0x92f   : > { %v6844_v31 = vpop.f32.mrf.mxu2  ;;  %v6188_v33 = vpop.f32.mrf.mxu0 }
 0x930   : > { %v15660_v7 = vadd.f32 %v6844_v31, %v6516_v56  ;;  %v6189_v61 = vadd.f32 %v6188_v33, %v15070_v50  ;;  %v6517_v3 = vpop.f32.mrf.mxu1  ;;  %v10443_v31 = vor.u32 %v12056_v39, %v10440_v27  ;;  %v12161_v27 = vld [vmem:[%s16366_s3 + $0x8] sm:$0xff] }
 0x931   : > { %7283 = vmatpush.bf16.msrb.mxu3 %v12164_v25 }
 0x932   : > { %16770 = vst [vmem:[#allocation4_spill] sm:$0xff] %v15660_v7  ;;  %v6518_v37 = vadd.f32 %v6517_v3, %v6189_v61  ;;  %v12163_v61 = vld [vmem:[%s16366_s3 + $0x18] sm:$0xff] }
 0x933   : > { %v16772_v3 = vld [vmem:[#allocation22_spill] sm:$0xff] }
 0x935   : > { %7284 = vmatpush.bf16.msrb.mxu3 %v12163_v61 }
 0x937   : > { %v6846_v13 = vpop.f32.mrf.mxu2  ;;  %v6191_v56 = vpop.f32.mrf.mxu0 }
 0x938   : > { %v15675_v50 = vadd.f32 %v6846_v13, %v6518_v37  ;;  %v6520_v33 = vpop.f32.mrf.mxu1  ;;  %v6192_v6 = vadd.f32 %v6191_v56, %v16772_v3  ;;  %v12162_v37 = vld [vmem:[%s16366_s3 + $0x10] sm:$0xff]  ;;  %v10466_v56 = vld [vmem:[%s13564_s24 + $0xc88] sm:$0xf]  ;;  %v12066_v3 = vld [vmem:[%s13564_s24 + $0xca0] sm:$0xf0] }
 0x939   : > { %7285 = vmatpush.bf16.msrb.mxu3 %v12162_v37  ;;  %v12067_v37 = vld [vmem:[%s13564_s24 + $0xca8] sm:$0xf0] }
 0x93a   : > { %16771 = vst [vmem:[#allocation5_spill] sm:$0xff] %v15675_v50  ;;  %6230 = vmatmul.bf16.gmra.mxu0 %v10439_v63  ;;  %v6521_v1 = vadd.f32 %v6520_v33, %v6192_v6  ;;  %v15693_v63 = vld [vmem:[%s16365_s2] ss:$0 sm:$0xff]  ;;  %v10474_v6 = vld [vmem:[%s13564_s24 + $0xc90] sm:$0xf] }
 0x93b   : > { %6559 = vmatmul.bf16.gmra.mxu1 %v10443_v31  ;;  %v16774_v31 = vld [vmem:[#allocation109_spill] sm:$0xff]  ;;  %v10475_v30 = vor.u32 %v12067_v37, %v10474_v6  ;;  %v16777_v37 = vld [vmem:[#allocation95_spill] sm:$0xff] }
 0x93c   : > { %10900 = vmatmul.msk.bf16.gmra.mxu2 %vm4433_vm0, %v10447_v21  ;;  %v16773_v21 = vld [vmem:[#allocation92_spill] sm:$0xff] }
 0x93d   : > { %7286 = vmatpush.bf16.msrb.mxu3 %v12161_v27  ;;  %v16775_v33 = vmax.f32 %v16773_v21, %v16774_v31 }
 0x93f   : > { %v6849_v0 = vpop.f32.mrf.mxu2  ;;  %v6193_v35 = vpop.f32.mrf.mxu0 }
 0x940   : > { %v6850_v14 = vadd.f32 %v6849_v0, %v6521_v1  ;;  %v6522_v39 = vpop.f32.mrf.mxu1  ;;  %v6194_v13 = vadd.f32 %v6193_v35, %v15093_v62  ;;  %v12063_v1 = vld [vmem:[%s13564_s24 + $0xc8c] sm:$0xf]  ;;  %v10468_v0 = vld [vmem:[%s13564_s24 + $0xca4] sm:$0xf0]  ;;  %v12160_v62 = vld [vmem:[%s16366_s3] sm:$0xff]  ;;  %v10467_v35 = vor.u32 %v12066_v3, %v10466_v56 }
 0x941   : > { %7287 = vmatpush.bf16.msrb.mxu3 %v12160_v62  ;;  %v10471_v21 = vor.u32 %v12063_v1, %v10468_v0  ;;  %v16778_v1 = vld [vmem:[#allocation56_spill] sm:$0xff] }
 0x942   : > { %v6961_v25 = vmax.f32 %v15450_v23, %v6850_v14  ;;  %v6523_v23 = vadd.f32 %v6522_v39, %v6194_v13  ;;  %v16779_v0 = vmax.f32 %v16777_v37, %v16778_v1 }
 0x944   : > { %v6993_v61 = vmax.f32 %v16775_v33, %v6961_v25 }
 0x946   : > { %v7029_v50 = vadd.f32 %v15693_v63, %v6993_v61 }
 0x947   : > { %v6851_v14 = vpop.f32.mrf.mxu2  ;;  %v6196_v7 = vpop.f32.mrf.mxu0 }
 0x948   : > { %v6852_v27 = vadd.f32 %v6851_v14, %v6523_v23  ;;  %v6525_v25 = vpop.f32.mrf.mxu1  ;;  %v6197_v33 = vadd.f32 %v6196_v7, %v15102_v18  ;;  %v7061_v40 = vmax.f32 %v7029_v50, 0.0  ;;  %v10494_v23 = vld [vmem:[%s13564_s24 + $0xcc0] sm:$0xf]  ;;  %v12073_v14 = vld [vmem:[%s13564_s24 + $0xcd8] sm:$0xf0] }
 0x94a   : > { %v6962_v31 = vmax.f32 %v15459_v59, %v6852_v27  ;;  %6235 = vmatmul.bf16.gmra.mxu0 %v10467_v35  ;;  %v6526_v56 = vadd.f32 %v6525_v25, %v6197_v33  ;;  %v7093_v59 = vpack.c.bf16 %v7061_v40, %v7061_v40  ;;  %v10502_v35 = vld [vmem:[%s13564_s24 + $0xcc8] sm:$0xf]  ;;  %v12074_v40 = vld [vmem:[%s13564_s24 + $0xce0] sm:$0xf0] }
 0x94b   : > { %6564 = vmatmul.bf16.gmra.mxu1 %v10471_v21  ;;  %v12070_v27 = vld [vmem:[%s13564_s24 + $0xcc4] sm:$0xf]  ;;  %v10496_v21 = vld [vmem:[%s13564_s24 + $0xcdc] sm:$0xf0] }
 0x94c   : > { %v6994_v39 = vmax.f32 %v16776_v36, %v6962_v31  ;;  %10901 = vmatmul.msk.bf16.gmra.mxu2 %vm4433_vm0, %v10475_v30  ;;  %v7228_v30 = vunpack.c.l.b16 %v7093_v59 }
 0x94e   : > { %v7030_v13 = vadd.f32 %v15693_v63, %v6994_v39  ;;  %v10495_v39 = vor.u32 %v12073_v14, %v10494_v23 }
 0x94f   : > { %v6854_v61 = vpop.f32.mrf.mxu2  ;;  %v6198_v50 = vpop.f32.mrf.mxu0 }
 0x950   : > { %v7062_v18 = vmax.f32 %v7030_v13, 0.0  ;;  %v6855_v7 = vadd.f32 %v6854_v61, %v6526_v56  ;;  %v6527_v3 = vpop.f32.mrf.mxu1  ;;  %v6199_v36 = vadd.f32 %v6198_v50, %v15118_v38  ;;  %v10503_v56 = vor.u32 %v12074_v40, %v10502_v35  ;;  %v16781_v35 = vld [vmem:[#allocation98_spill] sm:$0xff]  ;;  %v16782_v40 = vld [vmem:[#allocation57_spill] sm:$0xff] }
 0x951   : > { %v10499_v61 = vor.u32 %v12070_v27, %v10496_v21  ;;  %v16783_v27 = vmax.f32 %v16781_v35, %v16782_v40  ;;  %v12179_v40 = vld [vmem:[%s16366_s3 + $0x98] sm:$0xff] }
 0x952   : > { %v7094_v29 = vpack.c.bf16 %v7062_v18, %v7062_v18  ;;  %v6963_v4 = vmax.f32 %v15463_v5, %v6855_v7  ;;  %v6528_v31 = vadd.f32 %v6527_v3, %v6199_v36 }
 0x954   : > { %v7229_v6 = vunpack.c.l.b16 %v7094_v29  ;;  %v6995_v62 = vmax.f32 %v16779_v0, %v6963_v4  ;;  %v16780_v29 = vmax.f32 %v14772_v52, %v15120_v53 }
 0x956   : > { %v15726_v25 = vpack.c.b16 %v7229_v6, %v7228_v30  ;;  %v7031_v5 = vadd.f32 %v15693_v63, %v6995_v62  ;;  %v12183_v62 = vld [vmem:[%s16366_s3 + $0xb8] sm:$0xff] }
 0x957   : > { %v6856_v33 = vpop.f32.mrf.mxu2  ;;  %v6201_v13 = vpop.f32.mrf.mxu0 }
 0x958   : > { %v6857_v38 = vadd.f32 %v6856_v33, %v6528_v31  ;;  %v6530_v59 = vpop.f32.mrf.mxu1  ;;  %v6202_v7 = vadd.f32 %v6201_v13, %v15127_v2  ;;  %v7063_v50 = vmax.f32 %v7031_v5, 0.0  ;;  %v10522_v31 = vld [vmem:[%s13564_s24 + $0xcf8] sm:$0xf]  ;;  %v12080_v33 = vld [vmem:[%s13564_s24 + $0xd10] sm:$0xf0] }
 0x959   : > { %v12081_v5 = vld [vmem:[%s13564_s24 + $0xd18] sm:$0xf0]  ;;  %v10524_v13 = vld [vmem:[%s13564_s24 + $0xd14] sm:$0xf0] }
 0x95a   : > { %v6964_v18 = vmax.f32 %v15472_v19, %v6857_v38  ;;  %6240 = vmatmul.bf16.gmra.mxu0 %v10495_v39  ;;  %v6531_v36 = vadd.f32 %v6530_v59, %v6202_v7  ;;  %v7095_v19 = vpack.c.bf16 %v7063_v50, %v7063_v50  ;;  %v10530_v39 = vld [vmem:[%s13564_s24 + $0xd00] sm:$0xf]  ;;  %v12077_v38 = vld [vmem:[%s13564_s24 + $0xcfc] sm:$0xf] }
 0x95b   : > { %6569 = vmatmul.bf16.gmra.mxu1 %v10499_v61  ;;  %v10531_v50 = vor.u32 %v12081_v5, %v10530_v39 }
 0x95c   : > { %v6996_v4 = vmax.f32 %v16780_v29, %v6964_v18  ;;  %10902 = vmatmul.msk.bf16.gmra.mxu2 %vm4433_vm0, %v10503_v56  ;;  %v7160_v23 = vunpack.c.l.b16 %v7095_v19  ;;  %v10527_v29 = vor.u32 %v12077_v38, %v10524_v13  ;;  %v10550_v38 = vld [vmem:[%s13564_s24 + $0xd30] sm:$0xf]  ;;  %v12087_v13 = vld [vmem:[%s13564_s24 + $0xd48] sm:$0xf0] }
 0x95e   : > { %v7032_v3 = vadd.f32 %v15693_v63, %v6996_v4 }
 0x95f   : > { %v6859_v30 = vpop.f32.mrf.mxu2  ;;  %v6203_v37 = vpop.f32.mrf.mxu0 }
 0x960   : > { %v7064_v2 = vmax.f32 %v7032_v3, 0.0  ;;  %v6860_v6 = vadd.f32 %v6859_v30, %v6531_v36  ;;  %v6532_v1 = vpop.f32.mrf.mxu1  ;;  %v6204_v0 = vadd.f32 %v6203_v37, %v15143_v48  ;;  %v10523_v48 = vor.u32 %v12080_v33, %v10522_v31  ;;  %v12182_v3 = vld [vmem:[%s16366_s3 + $0xb0] sm:$0xff]  ;;  %v12181_v37 = vld [vmem:[%s16366_s3 + $0xa8] sm:$0xff]  ;;  %v16785_v31 = vld [vmem:[#allocation39_spill] sm:$0xff] }
 0x961   : > { %v16786_v33 = vld [vmem:[#allocation58_spill] sm:$0xff] }
 0x962   : > { %v7096_v52 = vpack.c.bf16 %v7064_v2, %v7064_v2  ;;  %v6965_v53 = vmax.f32 %v15476_v58, %v6860_v6  ;;  %v6533_v58 = vadd.f32 %v6532_v1, %v6204_v0  ;;  %v16784_v2 = vmax.f32 %v14793_v11, %v15145_v8 }
 0x963   : > { %v16787_v39 = vmax.f32 %v16785_v31, %v16786_v33  ;;  %v10578_v33 = vld [vmem:[%s13564_s24 + $0xd68] sm:$0xf] }
 0x964   : > { %v7161_v14 = vunpack.c.l.b16 %v7096_v52  ;;  %v6997_v21 = vmax.f32 %v16783_v27, %v6965_v53 }
 0x966   : > { %v7162_v56 = vpack.c.b16 %v7161_v14, %v7160_v23  ;;  %v7033_v59 = vadd.f32 %v15693_v63, %v6997_v21 }
 0x967   : > { %v6861_v61 = vpop.f32.mrf.mxu2  ;;  %v6206_v7 = vpop.f32.mrf.mxu0 }
 0x968   : > { %v6862_v18 = vadd.f32 %v6861_v61, %v6533_v58  ;;  %7220 = vmatmul.bf16.vlgmr.msra.gmra.mxu3 %v7162_v56  ;;  %v6535_v4 = vpop.f32.mrf.mxu1  ;;  %v6207_v30 = vadd.f32 %v6206_v7, %v15152_v20  ;;  %v7065_v19 = vmax.f32 %v7033_v59, 0.0  ;;  %v10558_v56 = vld [vmem:[%s13564_s24 + $0xd38] sm:$0xf]  ;;  %v12088_v58 = vld [vmem:[%s13564_s24 + $0xd50] sm:$0xf0] }
 0x969   : > { %7365 = vmatpush.bf16.msra.mxu3 %v12183_v62  ;;  %v12180_v62 = vld [vmem:[%s16366_s3 + $0xa0] sm:$0xff]  ;;  %v12084_v61 = vld [vmem:[%s13564_s24 + $0xd34] sm:$0xf] }
 0x96a   : > { %v6966_v36 = vmax.f32 %v15485_v32, %v6862_v18  ;;  %6245 = vmatmul.bf16.gmra.mxu0 %v10523_v48  ;;  %v6536_v52 = vadd.f32 %v6535_v4, %v6207_v30  ;;  %v7097_v20 = vpack.c.bf16 %v7065_v19, %v7065_v19  ;;  %v10552_v48 = vld [vmem:[%s13564_s24 + $0xd4c] sm:$0xf0]  ;;  %v10551_v18 = vor.u32 %v12087_v13, %v10550_v38  ;;  %v12095_v38 = vld [vmem:[%s13564_s24 + $0xd88] sm:$0xf0] }
 0x96b   : > { %6574 = vmatmul.bf16.gmra.mxu1 %v10527_v29  ;;  %v10559_v4 = vor.u32 %v12088_v58, %v10558_v56  ;;  %v12178_v30 = vld [vmem:[%s16366_s3 + $0x90] sm:$0xff]  ;;  %v12091_v13 = vld [vmem:[%s13564_s24 + $0xd6c] sm:$0xf]  ;;  %v10580_v56 = vld [vmem:[%s13564_s24 + $0xd84] sm:$0xf0] }
 0x96c   : > { %v6998_v6 = vmax.f32 %v16784_v2, %v6966_v36  ;;  %10903 = vmatmul.msk.bf16.gmra.mxu2 %vm4433_vm0, %v10531_v50  ;;  %v7313_v27 = vunpack.c.l.b16 %v7097_v20  ;;  %v16789_v20 = vld [vmem:[#allocation81_spill] sm:$0xff] }
 0x96d   : > { %7366 = vmatpush.bf16.msra.mxu3 %v12182_v3  ;;  %v10555_v3 = vor.u32 %v12084_v61, %v10552_v48  ;;  %v12190_v61 = vld [vmem:[%s16366_s3 + $0xf0] sm:$0xff] }
 0x96e   : > { %v7034_v1 = vadd.f32 %v15693_v63, %v6998_v6 }
 0x96f   : > { %v6864_v32 = vpop.f32.mrf.mxu2  ;;  %v6208_v11 = vpop.f32.mrf.mxu0 }
 0x970   : > { %v7066_v53 = vmax.f32 %v7034_v1, 0.0  ;;  %v6865_v0 = vadd.f32 %v6864_v32, %v6536_v52  ;;  %v6537_v8 = vpop.f32.mrf.mxu1  ;;  %v6209_v35 = vadd.f32 %v6208_v11, %v15171_v55 }
 0x971   : > { %7367 = vmatpush.bf16.msra.mxu3 %v12181_v37  ;;  %v16788_v37 = vmax.f32 %v14817_v47, %v15173_v49 }
 0x972   : > { %v7098_v23 = vpack.c.bf16 %v7066_v53, %v7066_v53  ;;  %v6967_v14 = vmax.f32 %v15489_v28, %v6865_v0  ;;  %v6538_v59 = vadd.f32 %v6537_v8, %v6209_v35  ;;  %v12176_v8 = vld [vmem:[%s16366_s3 + $0x80] sm:$0xff] }
 0x974   : > { %v7314_v21 = vunpack.c.l.b16 %v7098_v23  ;;  %v6999_v5 = vmax.f32 %v16787_v39, %v6967_v14  ;;  %v12094_v39 = vld [vmem:[%s13564_s24 + $0xd80] sm:$0xf0] }
 0x975   : > { %7368 = vmatpush.bf16.msra.mxu3 %v12180_v62 }
 0x976   : > { %v7315_v28 = vpack.c.b16 %v7314_v21, %v7313_v27  ;;  %v7035_v7 = vadd.f32 %v15693_v63, %v6999_v5  ;;  %v16790_v27 = vld [vmem:[#allocation59_spill] sm:$0xff]  ;;  %v10586_v5 = vld [vmem:[%s13564_s24 + $0xd70] sm:$0xf] }
 0x977   : > { %v6866_v55 = vpop.f32.mrf.mxu2  ;;  %v6211_v29 = vpop.f32.mrf.mxu0  ;;  %v16791_v21 = vmax.f32 %v14824_v22, %v16790_v27 }
 0x978   : > { %v6867_v50 = vadd.f32 %v6866_v55, %v6538_v59  ;;  %7288 = vmatmul.bf16.vlgmr.msrb.gmra.mxu3 %v15726_v25  ;;  %v6540_v36 = vpop.f32.mrf.mxu1  ;;  %v6212_v2 = vadd.f32 %v6211_v29, %v15180_v46  ;;  %v7067_v6 = vmax.f32 %v7035_v7, 0.0  ;;  %v12177_v25 = vld [vmem:[%s16366_s3 + $0x88] sm:$0xff]  ;;  %v5885_v46 = vadd.f32 %v15195_v43, %v16789_v20  ;;  %v12191_v43 = vld [vmem:[%s16366_s3 + $0xf8] sm:$0xff] }
 0x979   : > { %7369 = vmatpush.bf16.msra.mxu3 %v12179_v40  ;;  %v10579_v59 = vor.u32 %v12094_v39, %v10578_v33  ;;  %v10587_v7 = vor.u32 %v12095_v38, %v10586_v5 }
 0x97a   : > { %v6968_v19 = vmax.f32 %v15501_v45, %v6867_v50  ;;  %6250 = vmatmul.bf16.gmra.mxu0 %v10551_v18  ;;  %v6541_v32 = vadd.f32 %v6540_v36, %v6212_v2  ;;  %v7099_v53 = vpack.c.bf16 %v7067_v6, %v7067_v6  ;;  %v10583_v50 = vor.u32 %v12091_v13, %v10580_v56  ;;  %v12189_v36 = vld [vmem:[%s16366_s3 + $0xe8] sm:$0xff] }
 0x97b   : > { %6579 = vmatmul.bf16.gmra.mxu1 %v10555_v3 }
 0x97c   : > { %v7000_v1 = vmax.f32 %v16788_v37, %v6968_v19  ;;  %10904 = vmatmul.msk.bf16.gmra.mxu2 %vm4433_vm0, %v10559_v4  ;;  %v7400_v35 = vunpack.c.l.b16 %v7099_v53  ;;  %v16792_v19 = vmax.f32 %v14838_v16, %v15197_v42  ;;  %v16793_v37 = vld [vmem:[#allocation84_spill] sm:$0xff]  ;;  %v12187_v53 = vld [vmem:[%s16366_s3 + $0xd8] sm:$0xff] }
 0x97d   : > { %7370 = vmatpush.bf16.msra.mxu3 %v12178_v30 }
 0x97e   : > { %v7036_v52 = vadd.f32 %v15693_v63, %v7000_v1  ;;  %v5890_v1 = vadd.f32 %v15219_v44, %v16793_v37 }
 0x97f   : > { %v6869_v45 = vpop.f32.mrf.mxu2  ;;  %v6213_v0 = vpop.f32.mrf.mxu0 }
 0x980   : > { %v7068_v47 = vmax.f32 %v7036_v52, 0.0  ;;  %v6870_v49 = vadd.f32 %v6869_v45, %v6541_v32  ;;  %v6542_v11 = vpop.f32.mrf.mxu1  ;;  %v6214_v14 = vadd.f32 %v6213_v0, %v5885_v46  ;;  %v16795_v0 = vld [vmem:[#allocation61_spill] sm:$0xff] }
 0x981   : > { %7371 = vmatpush.bf16.msra.mxu3 %v12177_v25 }
 0x982   : > { %v7100_v62 = vpack.c.bf16 %v7068_v47, %v7068_v47  ;;  %v6969_v23 = vmax.f32 %v15505_v60, %v6870_v49  ;;  %v6543_v60 = vadd.f32 %v6542_v11, %v6214_v14  ;;  %v16794_v49 = vld [vmem:[#allocation42_spill] sm:$0xff]  ;;  %v10614_v14 = vld [vmem:[%s13564_s24 + $0xda8] sm:$0xf] }
 0x983   : > { %v16796_v11 = vmax.f32 %v16794_v49, %v16795_v0  ;;  %v12197_v0 = vld [vmem:[%s16366_s3 + $0x128] sm:$0xff] }
 0x984   : > { %v7401_v40 = vunpack.c.l.b16 %v7100_v62  ;;  %v7001_v31 = vmax.f32 %v16791_v21, %v6969_v23  ;;  %v10606_v62 = vld [vmem:[%s13564_s24 + $0xda0] sm:$0xf]  ;;  %v12101_v23 = vld [vmem:[%s13564_s24 + $0xdb8] sm:$0xf0]  ;;  %v12186_v21 = vld [vmem:[%s16366_s3 + $0xd0] sm:$0xff] }
 0x985   : > { %7372 = vmatpush.bf16.msra.mxu3 %v12176_v8  ;;  %v10607_v33 = vor.u32 %v12101_v23, %v10606_v62 }
 0x986   : > { %v15814_v58 = vpack.c.b16 %v7401_v40, %v7400_v35  ;;  %v7037_v22 = vadd.f32 %v15693_v63, %v7001_v31  ;;  %v12098_v35 = vld [vmem:[%s13564_s24 + $0xda4] sm:$0xf]  ;;  %v10608_v40 = vld [vmem:[%s13564_s24 + $0xdbc] sm:$0xf0] }
 0x987   : > { %v6871_v48 = vpop.f32.mrf.mxu2  ;;  %v6216_v18 = vpop.f32.mrf.mxu0  ;;  %v10611_v56 = vor.u32 %v12098_v35, %v10608_v40 }
 0x988   : > { %v6872_v55 = vadd.f32 %v6871_v48, %v6543_v60  ;;  %7373 = vmatmul.bf16.vlgmr.msra.gmra.mxu3 %v7315_v28  ;;  %v6545_v29 = vpop.f32.mrf.mxu1  ;;  %v6217_v3 = vadd.f32 %v6216_v18, %v15204_v12  ;;  %v7069_v30 = vmax.f32 %v7037_v22, 0.0  ;;  %v12188_v12 = vld [vmem:[%s16366_s3 + $0xe0] sm:$0xff] }
 0x989   : > { %7452 = vmatpush.bf16.msrb.mxu3 %v12191_v43  ;;  %v12102_v43 = vld [vmem:[%s13564_s24 + $0xdc0] sm:$0xf0] }
 0x98a   : > { %v6970_v4 = vmax.f32 %v15514_v34, %v6872_v55  ;;  %6255 = vmatmul.bf16.gmra.mxu0 %v10579_v59  ;;  %v6546_v6 = vadd.f32 %v6545_v29, %v6217_v3  ;;  %v7101_v16 = vpack.c.bf16 %v7069_v30, %v7069_v30  ;;  %v10615_v13 = vor.u32 %v12102_v43, %v10614_v14  ;;  %v12185_v59 = vld [vmem:[%s16366_s3 + $0xc8] sm:$0xff]  ;;  %v16797_v55 = vld [vmem:[#allocation62_spill] sm:$0xff]  ;;  %v16799_v3 = vld [vmem:[#allocation87_spill] sm:$0xff] }
 0x98b   : > { %6584 = vmatmul.bf16.gmra.mxu1 %v10583_v50  ;;  %v16798_v18 = vmax.f32 %v14859_v51, %v16797_v55  ;;  %v5895_v51 = vadd.f32 %v15243_v41, %v16799_v3  ;;  %v12198_v41 = vld [vmem:[%s16366_s3 + $0x130] sm:$0xff]  ;;  %v16806_v55 = vld [vmem:[#allocation91_spill] sm:$0xff] }
 0x98c   : > { %v7002_v2 = vmax.f32 %v16792_v19, %v6970_v4  ;;  %10905 = vmatmul.msk.bf16.gmra.mxu2 %vm4433_vm0, %v10587_v7  ;;  %v7487_v47 = vunpack.c.l.b16 %v7101_v16  ;;  %v12199_v4 = vld [vmem:[%s16366_s3 + $0x138] sm:$0xff] }
 0x98d   : > { %7453 = vmatpush.bf16.msrb.mxu3 %v12190_v61  ;;  %v16800_v16 = vld [vmem:[#allocation50_spill] sm:$0xff] }
 0x98e   : > { %v7038_v28 = vadd.f32 %v15693_v63, %v7002_v2 }
 0x98f   : > { %v6874_v34 = vpop.f32.mrf.mxu2  ;;  %v6218_v52 = vpop.f32.mrf.mxu0 }
 0x990   : > { %v7070_v42 = vmax.f32 %v7038_v28, 0.0  ;;  %v6875_v25 = vadd.f32 %v6874_v34, %v6546_v6  ;;  %v6547_v32 = vpop.f32.mrf.mxu1  ;;  %v6219_v46 = vadd.f32 %v6218_v52, %v5890_v1 }
 0x991   : > { %7454 = vmatpush.bf16.msrb.mxu3 %v12189_v36 }
 0x992   : > { %v7102_v45 = vpack.c.bf16 %v7070_v42, %v7070_v42  ;;  %v6971_v20 = vmax.f32 %v15518_v10, %v6875_v25  ;;  %v6548_v10 = vadd.f32 %v6547_v32, %v6219_v46  ;;  %v16801_v42 = vld [vmem:[#allocation63_spill] sm:$0xff]  ;;  %v10634_v32 = vld [vmem:[%s13564_s24 + $0xdd8] sm:$0xf]  ;;  %v12109_v46 = vld [vmem:[%s13564_s24 + $0xdf8] sm:$0xf0] }
 0x993   : > { %v16802_v25 = vmax.f32 %v16800_v16, %v16801_v42  ;;  %v12192_v16 = vld [vmem:[%s16366_s3 + $0x100] sm:$0xff] }
 0x994   : > { %v7488_v44 = vunpack.c.l.b16 %v7102_v45  ;;  %v7003_v8 = vmax.f32 %v16796_v11, %v6971_v20  ;;  %v12108_v45 = vld [vmem:[%s13564_s24 + $0xdf0] sm:$0xf0]  ;;  %v10642_v20 = vld [vmem:[%s13564_s24 + $0xde0] sm:$0xf] }
 0x995   : > { %7455 = vmatpush.bf16.msrb.mxu3 %v12188_v12  ;;  %v10635_v11 = vor.u32 %v12108_v45, %v10634_v32  ;;  %v10643_v14 = vor.u32 %v12109_v46, %v10642_v20  ;;  %v12207_v20 = vld [vmem:[%s16366_s3 + $0x178] sm:$0xff] }
 0x996   : > { %v15848_v27 = vpack.c.b16 %v7488_v44, %v7487_v47  ;;  %v7039_v39 = vadd.f32 %v15693_v63, %v7003_v8 }
 0x997   : > { %v6876_v31 = vpop.f32.mrf.mxu2  ;;  %v6221_v38 = vpop.f32.mrf.mxu0 }
 0x998   : > { %v6877_v5 = vadd.f32 %v6876_v31, %v6548_v10  ;;  %v6550_v60 = vpop.f32.mrf.mxu1  ;;  %v6222_v48 = vadd.f32 %v6221_v38, %v15228_v9  ;;  %v7071_v22 = vmax.f32 %v7039_v39, 0.0  ;;  %v12184_v9 = vld [vmem:[%s16366_s3 + $0xc0] sm:$0xff]  ;;  %v16803_v31 = vld [vmem:[#allocation64_spill] sm:$0xff] }
 0x999   : > { %7456 = vmatpush.bf16.msrb.mxu3 %v12187_v53  ;;  %v10636_v53 = vld [vmem:[%s13564_s24 + $0xdf4] sm:$0xf0]  ;;  %v12196_v10 = vld [vmem:[%s16366_s3 + $0x120] sm:$0xff] }
 0x99a   : > { %v6972_v61 = vmax.f32 %v15527_v17, %v6877_v5  ;;  %6260 = vmatmul.bf16.gmra.mxu0 %v10607_v33  ;;  %v6551_v29 = vadd.f32 %v6550_v60, %v6222_v48  ;;  %v7103_v36 = vpack.c.bf16 %v7071_v22, %v7071_v22  ;;  %v16804_v33 = vmax.f32 %v14880_v24, %v16803_v31 }
 0x99b   : > { %6589 = vmatmul.bf16.gmra.mxu1 %v10611_v56 }
 0x99c   : > { %v7004_v7 = vmax.f32 %v16798_v18, %v6972_v61  ;;  %10906 = vmatmul.msk.bf16.gmra.mxu2 %vm4433_vm0, %v10615_v13  ;;  %v7574_v37 = vunpack.c.l.b16 %v7103_v36  ;;  %v16805_v13 = vld [vmem:[#allocation90_spill] sm:$0xff] }
 0x99d   : > { %7457 = vmatpush.bf16.msrb.mxu3 %v12186_v21  ;;  %v5900_v56 = vadd.f32 %v15265_v57, %v16805_v13 }
 0x99e   : > { %v7040_v50 = vadd.f32 %v15693_v63, %v7004_v7 }
 0x99f   : > { %v6879_v17 = vpop.f32.mrf.mxu2  ;;  %v6223_v2 = vpop.f32.mrf.mxu0 }
 0x9a0   : > { %v7072_v30 = vmax.f32 %v7040_v50, 0.0  ;;  %v6880_v19 = vadd.f32 %v6879_v17, %v6551_v29  ;;  %v6552_v28 = vpop.f32.mrf.mxu1  ;;  %v6224_v34 = vadd.f32 %v6223_v2, %v5895_v51  ;;  %v12194_v50 = vld [vmem:[%s16366_s3 + $0x110] sm:$0xff] }
 0x9a1   : > { %7458 = vmatpush.bf16.msrb.mxu3 %v12185_v59  ;;  %v16807_v17 = vld [vmem:[#allocation45_spill] sm:$0xff] }
 0x9a2   : > { %v7104_v6 = vpack.c.bf16 %v7072_v30, %v7072_v30  ;;  %v6973_v12 = vmax.f32 %v15531_v54, %v6880_v19  ;;  %v12105_v54 = vld [vmem:[%s13564_s24 + $0xddc] sm:$0xf]  ;;  %v6553_v44 = vadd.f32 %v6552_v28, %v6224_v34  ;;  %v12193_v19 = vld [vmem:[%s16366_s3 + $0x108] sm:$0xff]  ;;  %v16810_v34 = vld [vmem:[#allocation93_spill] sm:$0xff] }
 0x9a3   : > { %v10639_v43 = vor.u32 %v12105_v54, %v10636_v53 }
 0x9a4   : > { %v7575_v1 = vunpack.c.l.b16 %v7104_v6  ;;  %v7005_v52 = vmax.f32 %v16802_v25, %v6973_v12  ;;  %v16812_v25 = vld [vmem:[#allocation3_spill] sm:$0xff] }
 0x9a5   : > { %7459 = vmatpush.bf16.msrb.mxu3 %v12184_v9 }
 0x9a6   : > { %v15886_v47 = vpack.c.b16 %v7575_v1, %v7574_v37  ;;  %v7041_v8 = vadd.f32 %v15693_v63, %v7005_v52  ;;  %v16811_v37 = vld [vmem:[#allocation67_spill] sm:$0xff]  ;;  %v16813_v52 = vld [vmem:[#allocation66_spill] sm:$0xff] }
 0x9a7   : > { %v6881_v49 = vpop.f32.mrf.mxu2  ;;  %v6226_v23 = vpop.f32.mrf.mxu0  ;;  %v16814_v32 = vmax.f32 %v16812_v25, %v16813_v52 }
 0x9a8   : > { %7460 = vmatmul.bf16.vlgmr.msrb.gmra.mxu3 %v15814_v58  ;;  %v6882_v62 = vadd.f32 %v6881_v49, %v6553_v44  ;;  %v6555_v58 = vpop.f32.mrf.mxu1  ;;  %v6227_v40 = vadd.f32 %v6226_v23, %v15252_v26  ;;  %v7073_v21 = vmax.f32 %v7041_v8, 0.0  ;;  %v12195_v26 = vld [vmem:[%s16366_s3 + $0x118] sm:$0xff]  ;;  %v16815_v44 = vld [vmem:[#allocation23_spill] sm:$0xff]  ;;  %v16816_v49 = vld [vmem:[#allocation69_spill] sm:$0xff] }
 0x9a9   : > { %7539 = vmatpush.bf16.msra.mxu3 %v12199_v4  ;;  %v16808_v4 = vld [vmem:[#allocation65_spill] sm:$0xff] }
 0x9aa   : > { %v6974_v35 = vmax.f32 %v15540_v15, %v6882_v62  ;;  %6265 = vmatmul.bf16.gmra.mxu0 %v10635_v11  ;;  %v6556_v38 = vadd.f32 %v6555_v58, %v6227_v40  ;;  %v7105_v60 = vpack.c.bf16 %v7073_v21, %v7073_v21  ;;  %v16809_v3 = vmax.f32 %v16807_v17, %v16808_v4  ;;  %v12203_v4 = vld [vmem:[%s16366_s3 + $0x158] sm:$0xff] }
 0x9ab   : > { %6594 = vmatmul.bf16.gmra.mxu1 %v10639_v43 }
 0x9ac   : > { %v7006_v39 = vmax.f32 %v16804_v33, %v6974_v35  ;;  %10907 = vmatmul.msk.bf16.gmra.mxu2 %vm4433_vm0, %v10643_v14  ;;  %v7661_v29 = vunpack.c.l.b16 %v7105_v60  ;;  %v12206_v14 = vld [vmem:[%s16366_s3 + $0x170] sm:$0xff]  ;;  %v16817_v35 = vld [vmem:[#allocation94_spill] sm:$0xff] }
 0x9ad   : > { %7540 = vmatpush.bf16.msra.mxu3 %v12198_v41  ;;  %v16818_v33 = vld [vmem:[#allocation53_spill] sm:$0xff] }
 0x9ae   : > { %v7042_v5 = vadd.f32 %v15693_v63, %v7006_v39  ;;  %v16819_v39 = vld [vmem:[#allocation68_spill] sm:$0xff] }
 0x9af   : > { %v6884_v15 = vpop.f32.mrf.mxu2  ;;  %v6228_v24 = vpop.f32.mrf.mxu0 }
 0x9b0   : > { %v7074_v61 = vmax.f32 %v7042_v5, 0.0  ;;  %v6885_v48 = vadd.f32 %v6884_v15, %v6556_v38  ;;  %v6557_v59 = vpop.f32.mrf.mxu1  ;;  %v6229_v7 = vadd.f32 %v6228_v24, %v5900_v56  ;;  %v16820_v5 = vmax.f32 %v16818_v33, %v16819_v39  ;;  %v12205_v15 = vld [vmem:[%s16366_s3 + $0x168] sm:$0xff]  ;;  %v16835_v33 = vld [vmem:[#allocation73_spill] sm:$0xff] }
 0x9b1   : > { %7541 = vmatpush.bf16.msra.mxu3 %v12197_v0  ;;  %v5905_v0 = vadd.f32 %v16816_v49, %v16815_v44 }
 0x9b2   : > { %v7106_v22 = vpack.c.bf16 %v7074_v61, %v7074_v61  ;;  %v6975_v18 = vmax.f32 %v16806_v55, %v6885_v48  ;;  %v6558_v36 = vadd.f32 %v6557_v59, %v6229_v7  ;;  %v12204_v48 = vld [vmem:[%s16366_s3 + $0x160] sm:$0xff]  ;;  %v16821_v59 = vld [vmem:[#allocation96_spill] sm:$0xff] }
 0x9b3   : > { %v16822_v55 = vld [vmem:[#allocation71_spill] sm:$0xff] }
 0x9b4   : > { %v7662_v9 = vunpack.c.l.b16 %v7106_v22  ;;  %v7007_v57 = vmax.f32 %v16809_v3, %v6975_v18 }
 0x9b5   : > { %7542 = vmatpush.bf16.msra.mxu3 %v12196_v10 }
 0x9b6   : > { %v15914_v51 = vpack.c.b16 %v7662_v9, %v7661_v29  ;;  %v7043_v2 = vadd.f32 %v15693_v63, %v7007_v57  ;;  %v16824_v29 = vld [vmem:[#allocation70_spill] sm:$0xff] }
 0x9b7   : > { %v6886_v30 = vpop.f32.mrf.mxu2  ;;  %v6231_v6 = vpop.f32.mrf.mxu0 }
 0x9b8   : > { %v6887_v28 = vadd.f32 %v6886_v30, %v6558_v36  ;;  %v6560_v12 = vpop.f32.mrf.mxu1  ;;  %v6232_v1 = vadd.f32 %v6231_v6, %v16811_v37  ;;  %v7075_v42 = vmax.f32 %v7043_v2, 0.0  ;;  %v16826_v30 = vld [vmem:[#allocation25_spill] sm:$0xff] }
 0x9b9   : > { %7543 = vmatpush.bf16.msra.mxu3 %v12195_v26 }
 0x9ba   : > { %v6976_v41 = vmax.f32 %v16810_v34, %v6887_v28  ;;  %v6561_v54 = vadd.f32 %v6560_v12, %v6232_v1  ;;  %v7107_v11 = vpack.c.bf16 %v7075_v42, %v7075_v42 }
 0x9bc   : > { %v7008_v45 = vmax.f32 %v16814_v32, %v6976_v41  ;;  %v7748_v21 = vunpack.c.l.b16 %v7107_v11  ;;  %v12202_v41 = vld [vmem:[%s16366_s3 + $0x150] sm:$0xff] }
 0x9bd   : > { %7544 = vmatpush.bf16.msra.mxu3 %v12194_v50  ;;  %v16823_v50 = vld [vmem:[#allocation6_spill] sm:$0xff] }
 0x9be   : > { %v7044_v46 = vadd.f32 %v15693_v63, %v7008_v45  ;;  %v16825_v9 = vmax.f32 %v16823_v50, %v16824_v29  ;;  %v16829_v45 = vld [vmem:[#allocation7_spill] sm:$0xff]  ;;  %v16839_v50 = vld [vmem:[#allocation46_spill] sm:$0xff] }
 0x9bf   : > { %v6889_v53 = vpop.f32.mrf.mxu2  ;;  %v6233_v23 = vpop.f32.mrf.mxu0 }
 0x9c0   : > { %v7076_v8 = vmax.f32 %v7044_v46, 0.0  ;;  %v6890_v62 = vadd.f32 %v6889_v53, %v6561_v54  ;;  %v6562_v43 = vpop.f32.mrf.mxu1  ;;  %v6234_v10 = vadd.f32 %v6233_v23, %v5905_v0  ;;  %v12201_v53 = vld [vmem:[%s16366_s3 + $0x148] sm:$0xff]  ;;  %v12200_v23 = vld [vmem:[%s16366_s3 + $0x140] sm:$0xff] }
 0x9c1   : > { %7545 = vmatpush.bf16.msra.mxu3 %v12193_v19  ;;  %v16827_v19 = vld [vmem:[#allocation72_spill] sm:$0xff] }
 0x9c2   : > { %v7108_v58 = vpack.c.bf16 %v7076_v8, %v7076_v8  ;;  %v6977_v40 = vmax.f32 %v16817_v35, %v6890_v62  ;;  %v6563_v13 = vadd.f32 %v6562_v43, %v6234_v10  ;;  %v5910_v2 = vadd.f32 %v16827_v19, %v16826_v30  ;;  %v12215_v43 = vld [vmem:[%s16366_s3 + $0x1b8] sm:$0xff]  ;;  %v12212_v19 = vld [vmem:[%s16366_s3 + $0x1a0] sm:$0xff] }
 0x9c4   : > { %v7749_v31 = vunpack.c.l.b16 %v7108_v58  ;;  %v7009_v38 = vmax.f32 %v16820_v5, %v6977_v40  ;;  %v16832_v58 = vld [vmem:[#allocation38_spill] sm:$0xff]  ;;  %v16833_v40 = vld [vmem:[#allocation24_spill] sm:$0xff] }
 0x9c5   : > { %7546 = vmatpush.bf16.msra.mxu3 %v12192_v16  ;;  %v16828_v16 = vld [vmem:[#allocation97_spill] sm:$0xff] }
 0x9c6   : > { %v15945_v26 = vpack.c.b16 %v7749_v31, %v7748_v21  ;;  %v7045_v60 = vadd.f32 %v15693_v63, %v7009_v38  ;;  %v16834_v31 = vld [vmem:[#allocation9_spill] sm:$0xff] }
 0x9c7   : > { %v6891_v56 = vpop.f32.mrf.mxu2  ;;  %v16836_v39 = vmax.f32 %v16834_v31, %v16835_v33  ;;  %v12214_v38 = vld [vmem:[%s16366_s3 + $0x1b0] sm:$0xff]  ;;  %v16850_v33 = vld [vmem:[#allocation40_spill] sm:$0xff] }
 0x9c8   : > { %7547 = vmatmul.bf16.vlgmr.msra.gmra.mxu3 %v15848_v27  ;;  %v6892_v61 = vadd.f32 %v6891_v56, %v6563_v13  ;;  %v6236_v27 = vpop.f32.mrf.mxu0  ;;  %v6565_v24 = vpop.f32.mrf.mxu1  ;;  %v7077_v7 = vmax.f32 %v7045_v60, 0.0  ;;  %v16837_v60 = vld [vmem:[#allocation27_spill] sm:$0xff] }
 0x9c9   : > { %7626 = vmatpush.bf16.msrb.mxu3 %v12207_v20  ;;  %v6237_v18 = vadd.f32 %v6236_v27, %v16822_v55  ;;  %v16830_v20 = vld [vmem:[#allocation21_spill] sm:$0xff] }
 0x9ca   : > { %v6978_v22 = vmax.f32 %v16821_v59, %v6892_v61  ;;  %v7109_v28 = vpack.c.bf16 %v7077_v7, %v7077_v7  ;;  %v16831_v46 = vmax.f32 %v16829_v45, %v16830_v20  ;;  %v16838_v61 = vld [vmem:[#allocation75_spill] sm:$0xff] }
 0x9cb   : > { %v6566_v57 = vadd.f32 %v6565_v24, %v6237_v18  ;;  %v5915_v27 = vadd.f32 %v16838_v61, %v16837_v60  ;;  %v12213_v18 = vld [vmem:[%s16366_s3 + $0x1a8] sm:$0xff]  ;;  %v16845_v20 = vld [vmem:[#allocation99_spill] sm:$0xff]  ;;  %v16852_v60 = vld [vmem:[#allocation77_spill] sm:$0xff] }
 0x9cc   : > { %v7010_v17 = vmax.f32 %v16825_v9, %v6978_v22  ;;  %v7835_v52 = vunpack.c.l.b16 %v7109_v28 }
 0x9cd   : > { %7627 = vmatpush.bf16.msrb.mxu3 %v12206_v14 }
 0x9ce   : > { %v7046_v3 = vadd.f32 %v15693_v63, %v7010_v17  ;;  %v15997_v17 = vpop.f32.mrf.mxu3 }
 0x9cf   : > { %v6894_v36 = vpop.f32.mrf.mxu2 }
 0x9d0   : > { %v7078_v6 = vmax.f32 %v7046_v3, 0.0  ;;  %v6895_v12 = vadd.f32 %v6894_v36, %v6566_v57  ;;  %v6238_v34 = vpop.f32.mrf.mxu0  ;;  %v6567_v37 = vpop.f32.mrf.mxu1  ;;  %v16840_v3 = vld [vmem:[#allocation60_spill] sm:$0xff]  ;;  %v16841_v57 = vld [vmem:[#allocation74_spill] sm:$0xff] }
 0x9d1   : > { %7628 = vmatpush.bf16.msrb.mxu3 %v12205_v15  ;;  %v6239_v25 = vadd.f32 %v6238_v34, %v5910_v2  ;;  %v16842_v36 = vmax.f32 %v16840_v3, %v16841_v57  ;;  %v12222_v57 = vld [vmem:[%s16366_s3 + $0x1f0] sm:$0xff] }
 0x9d2   : > { %v7110_v1 = vpack.c.bf16 %v7078_v6, %v7078_v6  ;;  %v6979_v42 = vmax.f32 %v16828_v16, %v6895_v12  ;;  %v16843_v16 = vld [vmem:[#allocation47_spill] sm:$0xff] }
 0x9d3   : > { %v6568_v49 = vadd.f32 %v6567_v37, %v6239_v25  ;;  %v16844_v25 = vld [vmem:[#allocation76_spill] sm:$0xff] }
 0x9d4   : > { %v7836_v32 = vunpack.c.l.b16 %v7110_v1  ;;  %v7011_v54 = vmax.f32 %v16831_v46, %v6979_v42  ;;  %v12211_v1 = vld [vmem:[%s16366_s3 + $0x198] sm:$0xff] }
 0x9d5   : > { %7629 = vmatpush.bf16.msrb.mxu3 %v12204_v48  ;;  %v16846_v46 = vld [vmem:[#allocation26_spill] sm:$0xff] }
 0x9d6   : > { %v15972_v44 = vpack.c.b16 %v7836_v32, %v7835_v52  ;;  %v7047_v11 = vadd.f32 %v15693_v63, %v7011_v54  ;;  %v16847_v54 = vmax.f32 %v16845_v20, %v16846_v46 }
 0x9d7   : > { %v6896_v0 = vpop.f32.mrf.mxu2 }
 0x9d8   : > { %v6897_v8 = vadd.f32 %v6896_v0, %v6568_v49  ;;  %v6241_v62 = vpop.f32.mrf.mxu0  ;;  %v6570_v14 = vpop.f32.mrf.mxu1  ;;  %v7079_v21 = vmax.f32 %v7047_v11, 0.0  ;;  %v12210_v49 = vld [vmem:[%s16366_s3 + $0x190] sm:$0xff] }
 0x9d9   : > { %7630 = vmatpush.bf16.msrb.mxu3 %v12203_v4  ;;  %v6242_v10 = vadd.f32 %v6241_v62, %v16833_v40  ;;  %v16848_v62 = vld [vmem:[#allocation29_spill] sm:$0xff] }
 0x9da   : > { %v6980_v35 = vmax.f32 %v16832_v58, %v6897_v8  ;;  %v7111_v48 = vpack.c.bf16 %v7079_v21, %v7079_v21  ;;  %v12209_v21 = vld [vmem:[%s16366_s3 + $0x188] sm:$0xff] }
 0x9db   : > { %v6571_v13 = vadd.f32 %v6570_v14, %v6242_v10 }
 0x9dc   : > { %v7012_v5 = vmax.f32 %v16836_v39, %v6980_v35 }
 0x9dd   : > { %7631 = vmatpush.bf16.msrb.mxu3 %v12202_v41 }
 0x9de   : > { %v7048_v15 = vadd.f32 %v15693_v63, %v7012_v5 }
 0x9df   : > { %v6899_v56 = vpop.f32.mrf.mxu2 }
 0x9e0   : > { %v7080_v24 = vmax.f32 %v7048_v15, 0.0  ;;  %v6900_v59 = vadd.f32 %v6899_v56, %v6571_v13  ;;  %v6243_v22 = vpop.f32.mrf.mxu0  ;;  %v6572_v55 = vpop.f32.mrf.mxu1  ;;  %v16851_v56 = vld [vmem:[#allocation100_spill] sm:$0xff] }
 0x9e1   : > { %7632 = vmatpush.bf16.msrb.mxu3 %v12201_v53  ;;  %v6244_v9 = vadd.f32 %v6243_v22, %v5915_v27  ;;  %v16853_v61 = vmax.f32 %v16851_v56, %v16852_v60  ;;  %v12223_v22 = vld [vmem:[%s16366_s3 + $0x1f8] sm:$0xff] }
 0x9e2   : > { %v7112_v7 = vpack.c.bf16 %v7080_v24, %v7080_v24  ;;  %v6981_v29 = vmax.f32 %v16839_v50, %v6900_v59  ;;  %v16866_v60 = vld [vmem:[#allocation82_spill] sm:$0xff] }
 0x9e3   : > { %v6573_v28 = vadd.f32 %v6572_v55, %v6244_v9  ;;  %v16854_v9 = vld [vmem:[#allocation41_spill] sm:$0xff] }
 0x9e4   : > { %v7923_v4 = vunpack.c.l.b16 %v7112_v7  ;;  %v7013_v30 = vmax.f32 %v16842_v36, %v6981_v29 }
 0x9e5   : > { %7633 = vmatpush.bf16.msrb.mxu3 %v12200_v23  ;;  %v16849_v23 = vld [vmem:[#allocation28_spill] sm:$0xff] }
 0x9e6   : > { %v7049_v12 = vadd.f32 %v15693_v63, %v7013_v30  ;;  %v5920_v14 = vadd.f32 %v16849_v23, %v16848_v62 }
 0x9e7   : > { %v6901_v6 = vpop.f32.mrf.mxu2 }
 0x9e8   : > { %7634 = vmatmul.bf16.vlgmr.msrb.gmra.mxu3 %v15886_v47  ;;  %v7922_v47 = vunpack.c.l.b16 %v7111_v48  ;;  %v6902_v34 = vadd.f32 %v6901_v6, %v6573_v28  ;;  %v6246_v41 = vpop.f32.mrf.mxu0  ;;  %v6575_v37 = vpop.f32.mrf.mxu1  ;;  %v7081_v45 = vmax.f32 %v7049_v12, 0.0  ;;  %v12208_v48 = vld [vmem:[%s16366_s3 + $0x180] sm:$0xff]  ;;  %v16857_v28 = vld [vmem:[#allocation78_spill] sm:$0xff] }
 0x9e9   : > { %7713 = vmatpush.bf16.msra.mxu3 %v12215_v43  ;;  %v6247_v52 = vadd.f32 %v6246_v41, %v16844_v25  ;;  %v16860_v25 = vld [vmem:[#allocation80_spill] sm:$0xff] }
 0x9ea   : > { %v16005_v2 = vpack.c.b16 %v7923_v4, %v7922_v47  ;;  %v6982_v42 = vmax.f32 %v16843_v16, %v6902_v34  ;;  %v7113_v43 = vpack.c.bf16 %v7081_v45, %v7081_v45  ;;  %v16855_v4 = vld [vmem:[#allocation79_spill] sm:$0xff] }
 0x9eb   : > { %v7221_v32 = vpop.f32.mrf.mxu3  ;;  %v6576_v11 = vadd.f32 %v6575_v37, %v6247_v52 }
 0x9ec   : > { %v7014_v53 = vmax.f32 %v16847_v54, %v6982_v42  ;;  %v8009_v15 = vunpack.c.l.b16 %v7113_v43  ;;  %v16859_v42 = vld [vmem:[#allocation31_spill] sm:$0xff]  ;;  %v16863_v43 = vld [vmem:[#allocation30_spill] sm:$0xff] }
 0x9ed   : > { %7714 = vmatpush.bf16.msra.mxu3 %v12214_v38  ;;  %v5925_v52 = vadd.f32 %v16860_v25, %v16859_v42  ;;  %v12231_v42 = vld [vmem:[%s16366_s3 + $0x238] sm:$0xff] }
 0x9ee   : > { %v7050_v0 = vadd.f32 %v15693_v63, %v7014_v53 }
 0x9ef   : > { %v6904_v8 = vpop.f32.mrf.mxu2 }
 0x9f0   : > { %v7082_v58 = vmax.f32 %v7050_v0, 0.0  ;;  %v6905_v35 = vadd.f32 %v6904_v8, %v6576_v11  ;;  %v6248_v40 = vpop.f32.mrf.mxu0  ;;  %v6577_v10 = vpop.f32.mrf.mxu1  ;;  %v12220_v11 = vld [vmem:[%s16366_s3 + $0x1e0] sm:$0xff] }
 0x9f1   : > { %7715 = vmatpush.bf16.msra.mxu3 %v12213_v18  ;;  %v6249_v5 = vadd.f32 %v6248_v40, %v5920_v14  ;;  %v16862_v14 = vld [vmem:[#allocation102_spill] sm:$0xff] }
 0x9f2   : > { %v7114_v31 = vpack.c.bf16 %v7082_v58, %v7082_v58  ;;  %v6983_v39 = vmax.f32 %v16850_v33, %v6905_v35  ;;  %v16864_v58 = vmax.f32 %v16862_v14, %v16863_v43  ;;  %v16876_v14 = vld [vmem:[#allocation44_spill] sm:$0xff] }
 0x9f3   : > { %v16026_v38 = vpop.f32.mrf.mxu3  ;;  %v6578_v59 = vadd.f32 %v6577_v10, %v6249_v5 }
 0x9f4   : > { %v8010_v13 = vunpack.c.l.b16 %v7114_v31  ;;  %v7015_v27 = vmax.f32 %v16853_v61, %v6983_v39 }
 0x9f5   : > { %7716 = vmatpush.bf16.msra.mxu3 %v12212_v19  ;;  %v16856_v19 = vld [vmem:[#allocation101_spill] sm:$0xff] }
 0x9f6   : > { %v16034_v24 = vpack.c.b16 %v8010_v13, %v8009_v15  ;;  %v7051_v18 = vadd.f32 %v15693_v63, %v7015_v27  ;;  %v16858_v6 = vmax.f32 %v16856_v19, %v16857_v28  ;;  %v16865_v13 = vld [vmem:[#allocation49_spill] sm:$0xff] }
 0x9f7   : > { %v6906_v55 = vpop.f32.mrf.mxu2  ;;  %v12218_v27 = vld [vmem:[%s16366_s3 + $0x1d0] sm:$0xff] }
 0x9f8   : > { %v6907_v7 = vadd.f32 %v6906_v55, %v6578_v59  ;;  %v6251_v50 = vpop.f32.mrf.mxu0  ;;  %v6580_v29 = vpop.f32.mrf.mxu1  ;;  %v7083_v30 = vmax.f32 %v7051_v18, 0.0  ;;  %v16868_v55 = vld [vmem:[#allocation110_spill] sm:$0xff] }
 0x9f9   : > { %7717 = vmatpush.bf16.msra.mxu3 %v12211_v1  ;;  %v6252_v3 = vadd.f32 %v6251_v50, %v16855_v4  ;;  %v12221_v1 = vld [vmem:[%s16366_s3 + $0x1e8] sm:$0xff] }
 0x9fa   : > { %v6984_v47 = vmax.f32 %v16854_v9, %v6907_v7  ;;  %v7115_v45 = vpack.c.bf16 %v7083_v30, %v7083_v30 }
 0x9fb   : > { %v7289_v36 = vpop.f32.mrf.mxu3  ;;  %v6581_v37 = vadd.f32 %v6580_v29, %v6252_v3  ;;  %v16870_v3 = vld [vmem:[#allocation33_spill] sm:$0xff] }
 0x9fc   : > { %v7016_v12 = vmax.f32 %v16858_v6, %v6984_v47  ;;  %v7290_v34 = vadd.f32 %v7289_v36, %v7221_v32  ;;  %v8096_v62 = vunpack.c.l.b16 %v7115_v45  ;;  %v12217_v47 = vld [vmem:[%s16366_s3 + $0x1c8] sm:$0xff] }
 0x9fd   : > { %7718 = vmatpush.bf16.msra.mxu3 %v12210_v49  ;;  %v16861_v49 = vld [vmem:[#allocation48_spill] sm:$0xff] }
 0x9fe   : > { %v7052_v41 = vadd.f32 %v15693_v63, %v7016_v12  ;;  %v16873_v45 = vld [vmem:[#allocation104_spill] sm:$0xff] }
 0x9ff   : > { %v6909_v16 = vpop.f32.mrf.mxu2 }
 0xa00   : > { %v7084_v20 = vmax.f32 %v7052_v41, 0.0  ;;  %v6910_v46 = vadd.f32 %v6909_v16, %v6581_v37  ;;  %v6253_v54 = vpop.f32.mrf.mxu0  ;;  %v6582_v53 = vpop.f32.mrf.mxu1  ;;  %v16872_v41 = vld [vmem:[#allocation43_spill] sm:$0xff] }
 0xa01   : > { %7719 = vmatpush.bf16.msra.mxu3 %v12209_v21  ;;  %v6254_v0 = vadd.f32 %v6253_v54, %v5925_v52  ;;  %v12219_v21 = vld [vmem:[%s16366_s3 + $0x1d8] sm:$0xff]  ;;  %v12216_v16 = vld [vmem:[%s16366_s3 + $0x1c0] sm:$0xff] }
 0xa02   : > { %v7116_v32 = vpack.c.bf16 %v7084_v20, %v7084_v20  ;;  %v16874_v20 = vld [vmem:[#allocation32_spill] sm:$0xff] }
 0xa03   : > { %v16059_v8 = vpop.f32.mrf.mxu3  ;;  %v6583_v10 = vadd.f32 %v6582_v53, %v6254_v0 }
 0xa04   : > { %v8097_v23 = vunpack.c.l.b16 %v7116_v32 }
 0xa05   : > { %7720 = vmatpush.bf16.msra.mxu3 %v12208_v48 }
 0xa06   : > { %v16064_v40 = vpack.c.b16 %v8097_v23, %v8096_v62 }
 0xa07   : > { %v6911_v31 = vpop.f32.mrf.mxu2 }
 0xa08   : > { %7721 = vmatmul.bf16.vlgmr.msra.gmra.mxu3 %v15914_v51  ;;  %v6985_v51 = vmax.f32 %v16861_v49, %v6910_v46  ;;  %v6912_v39 = vadd.f32 %v6911_v31, %v6583_v10  ;;  %v6256_v5 = vpop.f32.mrf.mxu0  ;;  %v6585_v15 = vpop.f32.mrf.mxu1  ;;  %v16875_v46 = vmax.f32 %v16873_v45, %v16874_v20  ;;  %v12229_v10 = vld [vmem:[%s16366_s3 + $0x228] sm:$0xff]  ;;  %v16878_v31 = vld [vmem:[#allocation105_spill] sm:$0xff] }
 0xa09   : > { %7800 = vmatpush.bf16.msrb.mxu3 %v12223_v22  ;;  %v6257_v61 = vadd.f32 %v6256_v5, %v16866_v60  ;;  %v16867_v22 = vld [vmem:[#allocation103_spill] sm:$0xff]  ;;  %v16887_v20 = vld [vmem:[#allocation52_spill] sm:$0xff] }
 0xa0a   : > { %v7017_v35 = vmax.f32 %v16864_v58, %v6985_v51  ;;  %v6986_v56 = vmax.f32 %v16865_v13, %v6912_v39  ;;  %v16869_v18 = vmax.f32 %v16867_v22, %v16868_v55  ;;  %v12230_v51 = vld [vmem:[%s16366_s3 + $0x230] sm:$0xff]  ;;  %v16881_v60 = vld [vmem:[#allocation35_spill] sm:$0xff] }
 0xa0b   : > { %v7374_v48 = vpop.f32.mrf.mxu3  ;;  %v6586_v9 = vadd.f32 %v6585_v15, %v6257_v61  ;;  %v16877_v58 = vld [vmem:[#allocation85_spill] sm:$0xff]  ;;  %v16882_v61 = vld [vmem:[#allocation86_spill] sm:$0xff] }
 0xa0c   : > { %v7053_v33 = vadd.f32 %v15693_v63, %v7017_v35  ;;  %v7018_v7 = vmax.f32 %v16869_v18, %v6986_v56  ;;  %v16078_v50 = vadd.f32 %v7374_v48, %v7290_v34  ;;  %v16083_v63 = vld [vmem:[%s16365_s2] ss:$0 sm:$0xff] }
 0xa0d   : > { %7801 = vmatpush.bf16.msrb.mxu3 %v12222_v57  ;;  %v16871_v57 = vld [vmem:[#allocation83_spill] sm:$0xff] }
 0xa0e   : > { %v7085_v59 = vmax.f32 %v7053_v33, 0.0  ;;  %v7054_v29 = vadd.f32 %v16083_v63, %v7018_v7  ;;  %v5930_v36 = vadd.f32 %v16871_v57, %v16870_v3  ;;  %v16879_v33 = vld [vmem:[#allocation111_spill] sm:$0xff]  ;;  %v12227_v3 = vld [vmem:[%s16366_s3 + $0x218] sm:$0xff] }
 0xa0f   : > { %v6914_v4 = vpop.f32.mrf.mxu2  ;;  %v16880_v39 = vmax.f32 %v16878_v31, %v16879_v33  ;;  %v12228_v56 = vld [vmem:[%s16366_s3 + $0x220] sm:$0xff] }
 0xa10   : > { %v7117_v30 = vpack.c.bf16 %v7085_v59, %v7085_v59  ;;  %v7086_v19 = vmax.f32 %v7054_v29, 0.0  ;;  %v6915_v28 = vadd.f32 %v6914_v4, %v6586_v9  ;;  %v6258_v6 = vpop.f32.mrf.mxu0  ;;  %v6587_v12 = vpop.f32.mrf.mxu1  ;;  %v16883_v9 = vld [vmem:[#allocation51_spill] sm:$0xff] }
 0xa11   : > { %7802 = vmatpush.bf16.msrb.mxu3 %v12221_v1  ;;  %v6259_v1 = vadd.f32 %v6258_v6, %v5930_v36 }
 0xa12   : > { %v7118_v34 = vpack.c.bf16 %v7086_v19, %v7086_v19  ;;  %v6987_v37 = vmax.f32 %v16872_v41, %v6915_v28  ;;  %v8183_v25 = vunpack.c.l.b16 %v7117_v30  ;;  %v16884_v30 = vld [vmem:[#allocation106_spill] sm:$0xff] }
 0xa13   : > { %v6588_v32 = vadd.f32 %v6587_v12, %v6259_v1  ;;  %v16122_v59 = vpop.f32.mrf.mxu3  ;;  %v16885_v19 = vld [vmem:[#allocation34_spill] sm:$0xff] }
 0xa14   : > { %v8184_v52 = vunpack.c.l.b16 %v7118_v34  ;;  %v7019_v54 = vmax.f32 %v16875_v46, %v6987_v37  ;;  %v16886_v28 = vmax.f32 %v16884_v30, %v16885_v19  ;;  %v12226_v37 = vld [vmem:[%s16366_s3 + $0x210] sm:$0xff]  ;;  %v16898_v19 = vld [vmem:[#allocation54_spill] sm:$0xff] }
 0xa15   : > { %7803 = vmatpush.bf16.msrb.mxu3 %v12220_v11 }
 0xa16   : > { %v16101_v53 = vpack.c.b16 %v8184_v52, %v8183_v25  ;;  %v7055_v0 = vadd.f32 %v16083_v63, %v7019_v54  ;;  %v16888_v54 = vld [vmem:[#allocation88_spill] sm:$0xff] }
 0xa17   : > { %v6916_v49 = vpop.f32.mrf.mxu2 }
 0xa18   : > { %v6917_v11 = vadd.f32 %v6916_v49, %v6588_v32  ;;  %v6261_v62 = vpop.f32.mrf.mxu0  ;;  %v6590_v23 = vpop.f32.mrf.mxu1  ;;  %v12225_v49 = vld [vmem:[%s16366_s3 + $0x208] sm:$0xff] }
 0xa19   : > { %7804 = vmatpush.bf16.msrb.mxu3 %v12219_v21  ;;  %v6262_v35 = vadd.f32 %v6261_v62, %v16877_v58  ;;  %v7087_v21 = vmax.f32 %v7055_v0, 0.0  ;;  %v16889_v0 = vld [vmem:[#allocation107_spill] sm:$0xff] }
 0xa1a   : > { %v6988_v43 = vmax.f32 %v16876_v14, %v6917_v11  ;;  %v16890_v11 = vld [vmem:[#allocation112_spill] sm:$0xff]  ;;  %v12224_v58 = vld [vmem:[%s16366_s3 + $0x200] sm:$0xff] }
 0xa1b   : > { %v6591_v13 = vadd.f32 %v6590_v23, %v6262_v35  ;;  %v7119_v48 = vpack.c.bf16 %v7087_v21, %v7087_v21  ;;  %v16891_v62 = vmax.f32 %v16889_v0, %v16890_v11  ;;  %v16892_v35 = vld [vmem:[#allocation37_spill] sm:$0xff]  ;;  %v12247_v0 = vld [vmem:[%s16366_s3 + $0x2b8] sm:$0xff]  ;;  %v12245_v11 = vld [vmem:[%s16366_s3 + $0x2a8] sm:$0xff] }
 0xa1c   : > { %v7020_v5 = vmax.f32 %v16880_v39, %v6988_v43 }
 0xa1d   : > { %7805 = vmatpush.bf16.msrb.mxu3 %v12218_v27  ;;  %v5935_v27 = vadd.f32 %v16882_v61, %v16881_v60  ;;  %v8270_v57 = vunpack.c.l.b16 %v7119_v48  ;;  %v16894_v48 = vld [vmem:[#allocation108_spill] sm:$0xff] }
 0xa1e   : > { %v7056_v15 = vadd.f32 %v16083_v63, %v7020_v5  ;;  %v12239_v5 = vld [vmem:[%s16366_s3 + $0x278] sm:$0xff] }
 0xa20   : > { %v7088_v22 = vmax.f32 %v7056_v15, 0.0  ;;  %v6263_v18 = vpop.f32.mrf.mxu0  ;;  %v6592_v7 = vpop.f32.mrf.mxu1 }
 0xa21   : > { %7806 = vmatpush.bf16.msrb.mxu3 %v12217_v47  ;;  %v6264_v4 = vadd.f32 %v6263_v18, %v5935_v27  ;;  %v12238_v18 = vld [vmem:[%s16366_s3 + $0x270] sm:$0xff] }
 0xa22   : > { %v7120_v29 = vpack.c.bf16 %v7088_v22, %v7088_v22  ;;  %v16895_v22 = vld [vmem:[#allocation36_spill] sm:$0xff] }
 0xa23   : > { %v6593_v34 = vadd.f32 %v6592_v7, %v6264_v4 }
 0xa24   : > { %v8271_v36 = vunpack.c.l.b16 %v7120_v29 }
 0xa25   : > { %7807 = vmatpush.bf16.msrb.mxu3 %v12216_v16 }
 0xa26   : > { %v16131_v12 = vpack.c.b16 %v8271_v36, %v8270_v57  ;;  %v16897_v57 = vld [vmem:[#allocation5_spill] sm:$0xff] }
 0xa28   : > { %7808 = vmatmul.bf16.vlgmr.msrb.gmra.mxu3 %v15945_v26  ;;  %v6919_v26 = vpop.f32.mrf.mxu2  ;;  %v6266_v25 = vpop.f32.mrf.mxu0 }
 0xa29   : > { %7887 = vmatpush.bf16.msra.mxu3 %v12231_v42  ;;  %v6920_v55 = vadd.f32 %v6919_v26, %v6591_v13  ;;  %v6595_v45 = vpop.f32.mrf.mxu1  ;;  %v6267_v32 = vadd.f32 %v6266_v25, %v16888_v54  ;;  %v16893_v13 = vld [vmem:[#allocation4_spill] sm:$0xff] }
 0xa2b   : > { %v6989_v47 = vmax.f32 %v16883_v9, %v6920_v55  ;;  %v7461_v42 = vpop.f32.mrf.mxu3  ;;  %v6596_v43 = vadd.f32 %v6595_v45, %v6267_v32  ;;  %v16896_v55 = vmax.f32 %v16894_v48, %v16895_v22  ;;  %v12263_v48 = vld [vmem:[%s16366_s3 + $0x338] sm:$0xff] }
 0xa2c   : > { %v7466_v52 = vadd.f32 %v7461_v42, %v16078_v50  ;;  %v12235_v42 = vld [vmem:[%s16366_s3 + $0x258] sm:$0xff] }
 0xa2d   : > { %7888 = vmatpush.bf16.msra.mxu3 %v12230_v51  ;;  %v7021_v6 = vmax.f32 %v16886_v28, %v6989_v47  ;;  %v16899_v28 = vld [vmem:[#allocation89_spill] sm:$0xff] }
 0xa2f   : > { %v7057_v1 = vadd.f32 %v16083_v63, %v7021_v6  ;;  %v16900_v6 = vmax.f32 %v16898_v19, %v16899_v28  ;;  %v12270_v19 = vld [vmem:[%s16366_s3 + $0x370] sm:$0xff]  ;;  %v12269_v28 = vld [vmem:[%s16366_s3 + $0x368] sm:$0xff] }
 0xa30   : > { %v6921_v41 = vpop.f32.mrf.mxu2  ;;  %v6268_v39 = vpop.f32.mrf.mxu0 }
 0xa31   : > { %7889 = vmatpush.bf16.msra.mxu3 %v12229_v10  ;;  %v6922_v16 = vadd.f32 %v6921_v41, %v6593_v34  ;;  %v7089_v51 = vmax.f32 %v7057_v1, 0.0  ;;  %v5940_v10 = vadd.f32 %v15997_v17, %v16892_v35  ;;  %v6597_v60 = vpop.f32.mrf.mxu1 }
 0xa33   : > { %v6990_v46 = vmax.f32 %v16887_v20, %v6922_v16  ;;  %v7121_v21 = vpack.c.bf16 %v7089_v51, %v7089_v51  ;;  %v7463_v41 = vpop.f32.mrf.mxu3  ;;  %v12232_v51 = vld [vmem:[%s16366_s3 + $0x240] sm:$0xff] }
 0xa35   : > { %7890 = vmatpush.bf16.msra.mxu3 %v12228_v56  ;;  %v7022_v23 = vmax.f32 %v16891_v62, %v6990_v46  ;;  %v6269_v56 = vadd.f32 %v6268_v39, %v5940_v10  ;;  %v8357_v61 = vunpack.c.l.b16 %v7121_v21  ;;  %v12234_v46 = vld [vmem:[%s16366_s3 + $0x250] sm:$0xff]  ;;  %v12244_v62 = vld [vmem:[%s16366_s3 + $0x2a0] sm:$0xff]  ;;  %v12241_v10 = vld [vmem:[%s16366_s3 + $0x288] sm:$0xff] }
 0xa37   : > { %v7058_v14 = vadd.f32 %v16083_v63, %v7022_v23  ;;  %v6598_v29 = vadd.f32 %v6597_v60, %v6269_v56  ;;  %v12249_v60 = vld [vmem:[%s16366_s3 + $0x2c8] sm:$0xff] }
 0xa38   : > { %v6924_v50 = vpop.f32.mrf.mxu2 }
 0xa39   : > { %7891 = vmatpush.bf16.msra.mxu3 %v12227_v3  ;;  %v7090_v31 = vmax.f32 %v7058_v14, 0.0  ;;  %v6925_v33 = vadd.f32 %v6924_v50, %v6596_v43  ;;  %v12237_v3 = vld [vmem:[%s16366_s3 + $0x268] sm:$0xff]  ;;  %v12243_v14 = vld [vmem:[%s16366_s3 + $0x298] sm:$0xff]  ;;  %v7292_v50 = vadd.f32 %v16059_v8, %v16026_v38 }
 0xa3a   : > { %v12255_v38 = vld [vmem:[%s16366_s3 + $0x2f8] sm:$0xff] }
 0xa3b   : > { %v7122_v15 = vpack.c.bf16 %v7090_v31, %v7090_v31  ;;  %v6991_v26 = vmax.f32 %v16893_v13, %v6925_v33  ;;  %v7380_v35 = vadd.f32 %v16122_v59, %v7292_v50  ;;  %v12240_v33 = vld [vmem:[%s16366_s3 + $0x280] sm:$0xff]  ;;  %v12254_v59 = vld [vmem:[%s16366_s3 + $0x2f0] sm:$0xff]  ;;  %v12251_v13 = vld [vmem:[%s16366_s3 + $0x2d8] sm:$0xff] }
 0xa3d   : > { %7892 = vmatpush.bf16.msra.mxu3 %v12226_v37  ;;  %v8358_v27 = vunpack.c.l.b16 %v7122_v15  ;;  %v7023_v17 = vmax.f32 %v16896_v55, %v6991_v26  ;;  %v7467_v21 = vadd.f32 %v7463_v41, %v7380_v35  ;;  %v12252_v15 = vld [vmem:[%s16366_s3 + $0x2e0] sm:$0xff]  ;;  %v12262_v55 = vld [vmem:[%s16366_s3 + $0x330] sm:$0xff]  ;;  %v12281_v35 = vld [vmem:[%s16366_s3 + $0x3c8] sm:$0xff] }
 0xa3f   : > { %v16162_v7 = vpack.c.b16 %v8358_v27, %v8357_v61  ;;  %v7059_v47 = vadd.f32 %v16083_v63, %v7023_v17  ;;  %v12248_v61 = vld [vmem:[%s16366_s3 + $0x2c0] sm:$0xff]  ;;  %v12261_v17 = vld [vmem:[%s16366_s3 + $0x328] sm:$0xff] }
 0xa40   : > { %v6926_v9 = vpop.f32.mrf.mxu2 }
 0xa41   : > { %7893 = vmatpush.bf16.msra.mxu3 %v12225_v49  ;;  %v6927_v4 = vadd.f32 %v6926_v9, %v6598_v29  ;;  %v7091_v30 = vmax.f32 %v7059_v47, 0.0  ;;  %v12259_v29 = vld [vmem:[%s16366_s3 + $0x318] sm:$0xff] }
 0xa43   : > { %v6992_v36 = vmax.f32 %v16897_v57, %v6927_v4  ;;  %v7123_v1 = vpack.c.bf16 %v7091_v30, %v7091_v30  ;;  %v12257_v4 = vld [vmem:[%s16366_s3 + $0x308] sm:$0xff] }
 0xa45   : > { %7894 = vmatpush.bf16.msra.mxu3 %v12224_v58  ;;  %v7024_v34 = vmax.f32 %v16900_v6, %v6992_v36  ;;  %v8444_v45 = vunpack.c.l.b16 %v7123_v1  ;;  %v12271_v36 = vld [vmem:[%s16366_s3 + $0x378] sm:$0xff]  ;;  %v12268_v6 = vld [vmem:[%s16366_s3 + $0x360] sm:$0xff] }
 0xa46   : > { %v12264_v1 = vld [vmem:[%s16366_s3 + $0x340] sm:$0xff] }
 0xa47   : > { %v7060_v37 = vadd.f32 %v16083_v63, %v7024_v34  ;;  %v12233_v63 = vld [vmem:[%s16366_s3 + $0x248] sm:$0xff]  ;;  %v12267_v34 = vld [vmem:[%s16366_s3 + $0x358] sm:$0xff] }
 0xa48   : > { %7895 = vmatmul.bf16.vlgmr.msra.gmra.mxu3 %v15972_v44  ;;  %v12236_v44 = vld [vmem:[%s16366_s3 + $0x260] sm:$0xff] }
 0xa49   : > { %7974 = vmatpush.bf16.msrb.mxu3 %v12239_v5  ;;  %v7092_v16 = vmax.f32 %v7060_v37, 0.0  ;;  %v12253_v5 = vld [vmem:[%s16366_s3 + $0x2e8] sm:$0xff] }
 0xa4a   : > { %v12265_v37 = vld [vmem:[%s16366_s3 + $0x348] sm:$0xff] }
 0xa4b   : > { %v7124_v25 = vpack.c.bf16 %v7092_v16, %v7092_v16  ;;  %v7548_v54 = vpop.f32.mrf.mxu3 }
 0xa4c   : > { %v7553_v49 = vadd.f32 %v7548_v54, %v7466_v52  ;;  %v12246_v52 = vld [vmem:[%s16366_s3 + $0x2b0] sm:$0xff]  ;;  %v12275_v54 = vld [vmem:[%s16366_s3 + $0x398] sm:$0xff] }
 0xa4d   : > { %7975 = vmatpush.bf16.msrb.mxu3 %v12238_v18  ;;  %v8445_v20 = vunpack.c.l.b16 %v7124_v25  ;;  %v12260_v18 = vld [vmem:[%s16366_s3 + $0x320] sm:$0xff] }
 0xa4f   : > { %v16183_v32 = vpack.c.b16 %v8445_v20, %v8444_v45  ;;  %v12278_v45 = vld [vmem:[%s16366_s3 + $0x3b0] sm:$0xff]  ;;  %v12277_v20 = vld [vmem:[%s16366_s3 + $0x3a8] sm:$0xff] }
 0xa51   : > { %7976 = vmatpush.bf16.msrb.mxu3 %v12237_v3  ;;  %v12256_v3 = vld [vmem:[%s16366_s3 + $0x300] sm:$0xff] }
 0xa53   : > { %v7550_v23 = vpop.f32.mrf.mxu3 }
 0xa54   : > { %v7554_v31 = vadd.f32 %v7550_v23, %v7467_v21  ;;  %v12286_v23 = vld [vmem:[%s16366_s3 + $0x3f0] sm:$0xff] }
 0xa55   : > { %7977 = vmatpush.bf16.msrb.mxu3 %v12236_v44 }
 0xa59   : > { %7978 = vmatpush.bf16.msrb.mxu3 %v12235_v42  ;;  %v12279_v42 = vld [vmem:[%s16366_s3 + $0x3b8] sm:$0xff] }
 0xa5d   : > { %7979 = vmatpush.bf16.msrb.mxu3 %v12234_v46  ;;  %v12276_v46 = vld [vmem:[%s16366_s3 + $0x3a0] sm:$0xff] }
 0xa61   : > { %7980 = vmatpush.bf16.msrb.mxu3 %v12233_v63 }
 0xa65   : > { %7981 = vmatpush.bf16.msrb.mxu3 %v12232_v51  ;;  %v12273_v51 = vld [vmem:[%s16366_s3 + $0x388] sm:$0xff] }
 0xa68   : > { %7982 = vmatmul.bf16.vlgmr.msrb.gmra.mxu3 %v16005_v2  ;;  %v12242_v2 = vld [vmem:[%s16366_s3 + $0x290] sm:$0xff] }
 0xa69   : > { %8061 = vmatpush.bf16.msra.mxu3 %v12247_v0  ;;  %v12272_v0 = vld [vmem:[%s16366_s3 + $0x380] sm:$0xff] }
 0xa6b   : > { %v7635_v43 = vpop.f32.mrf.mxu3 }
 0xa6c   : > { %v7640_v58 = vadd.f32 %v7635_v43, %v7553_v49  ;;  %v12283_v43 = vld [vmem:[%s16366_s3 + $0x3d8] sm:$0xff] }
 0xa6d   : > { %8062 = vmatpush.bf16.msra.mxu3 %v12246_v52 }
 0xa71   : > { %8063 = vmatpush.bf16.msra.mxu3 %v12245_v11  ;;  %v12287_v11 = vld [vmem:[%s16366_s3 + $0x3f8] sm:$0xff] }
 0xa73   : > { %v7637_v39 = vpop.f32.mrf.mxu3 }
 0xa74   : > { %v7641_v8 = vadd.f32 %v7637_v39, %v7554_v31 }
 0xa75   : > { %8064 = vmatpush.bf16.msra.mxu3 %v12244_v62 }
 0xa79   : > { %8065 = vmatpush.bf16.msra.mxu3 %v12243_v14  ;;  %v12285_v14 = vld [vmem:[%s16366_s3 + $0x3e8] sm:$0xff] }
 0xa7d   : > { %8066 = vmatpush.bf16.msra.mxu3 %v12242_v2  ;;  %v12284_v2 = vld [vmem:[%s16366_s3 + $0x3e0] sm:$0xff] }
 0xa81   : > { %8067 = vmatpush.bf16.msra.mxu3 %v12241_v10  ;;  %v12280_v10 = vld [vmem:[%s16366_s3 + $0x3c0] sm:$0xff] }
 0xa85   : > { %8068 = vmatpush.bf16.msra.mxu3 %v12240_v33 }
 0xa88   : > { %8069 = vmatmul.bf16.vlgmr.msra.gmra.mxu3 %v16034_v24  ;;  %v12250_v24 = vld [vmem:[%s16366_s3 + $0x2d0] sm:$0xff] }
 0xa89   : > { %8148 = vmatpush.bf16.msrb.mxu3 %v12255_v38 }
 0xa8b   : > { %v7722_v26 = vpop.f32.mrf.mxu3 }
 0xa8c   : > { %v7727_v56 = vadd.f32 %v7722_v26, %v7640_v58 }
 0xa8d   : > { %8149 = vmatpush.bf16.msrb.mxu3 %v12254_v59 }
 0xa91   : > { %8150 = vmatpush.bf16.msrb.mxu3 %v12253_v5 }
 0xa93   : > { %v7724_v27 = vpop.f32.mrf.mxu3 }
 0xa94   : > { %v7728_v22 = vadd.f32 %v7724_v27, %v7641_v8 }
 0xa95   : > { %8151 = vmatpush.bf16.msrb.mxu3 %v12252_v15 }
 0xa99   : > { %8152 = vmatpush.bf16.msrb.mxu3 %v12251_v13 }
 0xa9d   : > { %8153 = vmatpush.bf16.msrb.mxu3 %v12250_v24 }
 0xaa1   : > { %8154 = vmatpush.bf16.msrb.mxu3 %v12249_v60 }
 0xaa5   : > { %8155 = vmatpush.bf16.msrb.mxu3 %v12248_v61 }
 0xaa8   : > { %8156 = vmatmul.bf16.vlgmr.msrb.gmra.mxu3 %v16064_v40  ;;  %v12258_v40 = vld [vmem:[%s16366_s3 + $0x310] sm:$0xff] }
 0xaa9   : > { %8235 = vmatpush.bf16.msra.mxu3 %v12263_v48 }
 0xaab   : > { %v7809_v9 = vpop.f32.mrf.mxu3 }
 0xaac   : > { %v7814_v47 = vadd.f32 %v7809_v9, %v7727_v56 }
 0xaad   : > { %8236 = vmatpush.bf16.msra.mxu3 %v12262_v55 }
 0xab1   : > { %8237 = vmatpush.bf16.msra.mxu3 %v12261_v17 }
 0xab3   : > { %v7811_v57 = vpop.f32.mrf.mxu3 }
 0xab4   : > { %v7815_v30 = vadd.f32 %v7811_v57, %v7728_v22 }
 0xab5   : > { %8238 = vmatpush.bf16.msra.mxu3 %v12260_v18 }
 0xab9   : > { %8239 = vmatpush.bf16.msra.mxu3 %v12259_v29 }
 0xabd   : > { %8240 = vmatpush.bf16.msra.mxu3 %v12258_v40 }
 0xac1   : > { %8241 = vmatpush.bf16.msra.mxu3 %v12257_v4 }
 0xac5   : > { %8242 = vmatpush.bf16.msra.mxu3 %v12256_v3 }
 0xac8   : > { %8243 = vmatmul.bf16.vlgmr.msra.gmra.mxu3 %v16101_v53  ;;  %v12266_v53 = vld [vmem:[%s16366_s3 + $0x350] sm:$0xff] }
 0xac9   : > { %8322 = vmatpush.bf16.msrb.mxu3 %v12271_v36 }
 0xacb   : > { %v7896_v44 = vpop.f32.mrf.mxu3 }
 0xacc   : > { %v7901_v41 = vadd.f32 %v7896_v44, %v7814_v47 }
 0xacd   : > { %8323 = vmatpush.bf16.msrb.mxu3 %v12270_v19 }
 0xad1   : > { %8324 = vmatpush.bf16.msrb.mxu3 %v12269_v28 }
 0xad3   : > { %v7898_v16 = vpop.f32.mrf.mxu3 }
 0xad4   : > { %v7902_v25 = vadd.f32 %v7898_v16, %v7815_v30 }
 0xad5   : > { %8325 = vmatpush.bf16.msrb.mxu3 %v12268_v6 }
 0xad9   : > { %8326 = vmatpush.bf16.msrb.mxu3 %v12267_v34 }
 0xadd   : > { %8327 = vmatpush.bf16.msrb.mxu3 %v12266_v53 }
 0xae1   : > { %8328 = vmatpush.bf16.msrb.mxu3 %v12265_v37 }
 0xae5   : > { %8329 = vmatpush.bf16.msrb.mxu3 %v12264_v1 }
 0xae8   : > { %8330 = vmatmul.bf16.vlgmr.msrb.gmra.mxu3 %v16131_v12  ;;  %v12274_v12 = vld [vmem:[%s16366_s3 + $0x390] sm:$0xff] }
 0xae9   : > { %8409 = vmatpush.bf16.msra.mxu3 %v12279_v42 }
 0xaeb   : > { %v7983_v49 = vpop.f32.mrf.mxu3 }
 0xaec   : > { %v7988_v63 = vadd.f32 %v7983_v49, %v7901_v41 }
 0xaed   : > { %8410 = vmatpush.bf16.msra.mxu3 %v12278_v45 }
 0xaf1   : > { %8411 = vmatpush.bf16.msra.mxu3 %v12277_v20 }
 0xaf3   : > { %v7985_v52 = vpop.f32.mrf.mxu3 }
 0xaf4   : > { %v7989_v62 = vadd.f32 %v7985_v52, %v7902_v25 }
 0xaf5   : > { %8412 = vmatpush.bf16.msra.mxu3 %v12276_v46 }
 0xaf9   : > { %8413 = vmatpush.bf16.msra.mxu3 %v12275_v54 }
 0xafd   : > { %8414 = vmatpush.bf16.msra.mxu3 %v12274_v12 }
 0xb01   : > { %8415 = vmatpush.bf16.msra.mxu3 %v12273_v51 }
 0xb05   : > { %8416 = vmatpush.bf16.msra.mxu3 %v12272_v0 }
 0xb08   : > { %8417 = vmatmul.bf16.vlgmr.msra.gmra.mxu3 %v16162_v7  ;;  %v12282_v7 = vld [vmem:[%s16366_s3 + $0x3d0] sm:$0xff] }
 0xb09   : > { %8496 = vmatpush.bf16.msrb.mxu3 %v12287_v11 }
 0xb0b   : > { %v8070_v50 = vpop.f32.mrf.mxu3 }
 0xb0c   : > { %v8075_v58 = vadd.f32 %v8070_v50, %v7988_v63 }
 0xb0d   : > { %8497 = vmatpush.bf16.msrb.mxu3 %v12286_v23 }
 0xb11   : > { %8498 = vmatpush.bf16.msrb.mxu3 %v12285_v14 }
 0xb13   : > { %v8072_v21 = vpop.f32.mrf.mxu3 }
 0xb14   : > { %v8076_v31 = vadd.f32 %v8072_v21, %v7989_v62 }
 0xb15   : > { %8499 = vmatpush.bf16.msrb.mxu3 %v12284_v2 }
 0xb19   : > { %8500 = vmatpush.bf16.msrb.mxu3 %v12283_v43 }
 0xb1d   : > { %8501 = vmatpush.bf16.msrb.mxu3 %v12282_v7 }
 0xb21   : > { %8502 = vmatpush.bf16.msrb.mxu3 %v12281_v35 }
 0xb25   : > { %8503 = vmatpush.bf16.msrb.mxu3 %v12280_v10 }
 0xb28   : > { %8504 = vmatmul.bf16.vlgmr.msrb.gmra.mxu3 %v16183_v32  ;;  %v12340_v32 = vld [vmem:[%s16367_s4] ss:$0 sm:$0xff] }
 0xb2b   : > { %v8157_v33 = vpop.f32.mrf.mxu3 }
 0xb2c   : > { %v8162_v24 = vadd.f32 %v8157_v33, %v8075_v58 }
 0xb33   : > { %v8159_v39 = vpop.f32.mrf.mxu3 }
 0xb34   : > { %v8163_v27 = vadd.f32 %v8159_v39, %v8076_v31 }
 0xb4b   : > { %v8244_v38 = vpop.f32.mrf.mxu3 }
 0xb4c   : > { %v8249_v26 = vadd.f32 %v8244_v38, %v8162_v24 }
 0xb53   : > { %v8246_v8 = vpop.f32.mrf.mxu3 }
 0xb54   : > { %v8250_v22 = vadd.f32 %v8246_v8, %v8163_v27 }
 0xb6b   : > { %v8331_v59 = vpop.f32.mrf.mxu3 }
 0xb6c   : > { %v8336_v56 = vadd.f32 %v8331_v59, %v8249_v26 }
 0xb73   : > { %v8333_v5 = vpop.f32.mrf.mxu3 }
 0xb74   : > { %v8337_v17 = vadd.f32 %v8333_v5, %v8250_v22 }
 0xb8b   : > { %v8418_v15 = vpop.f32.mrf.mxu3 }
 0xb8c   : > { %v8423_v60 = vadd.f32 %v8418_v15, %v8336_v56 }
 0xb93   : > { %v8420_v13 = vpop.f32.mrf.mxu3 }
 0xb94   : > { %v8424_v18 = vadd.f32 %v8420_v13, %v8337_v17 }
 0xbab   : > { %v8505_v61 = vpop.f32.mrf.mxu3 }
 0xbac   : > { %v8510_v48 = vadd.f32 %v8505_v61, %v8423_v60 }
 0xbae   : > { %v8516_v55 = vadd.f32 %v12340_v32, %v8510_v48 }
 0xbb0   : > { %8518 = vst [vmem:[%s1278_s20] sm:$0xff] %v8516_v55 }
 0xbb3   : > { %v8507_v29 = vpop.f32.mrf.mxu3 }
 0xbb4   : > { %v8511_v40 = vadd.f32 %v8507_v29, %v8424_v18 }
 0xbb6   : > { %v8517_v9 = vadd.f32 %v12340_v32, %v8511_v40 }
 0xbb8   : > { %8519 = vst [vmem:[%s1278_s20 + $0x8] sm:$0xff] %v8517_v9 }
 0xbb9 PF: > { %p12_p9 = scmp.ge.s32.totalorder %s12413_s22, 4   ;;  %s16901_s18 = smov %s12360_s19 }
 0xbba   : > { %s16902_s19 = smov %s12422_s25  ;;  %s16903_s20 = smov %s12413_s22 }
 0xbbb   :  { %14 = sbr.rel (!%p12_p9) target bundleno = 2 (0x2), region = 122 }

</bundles_post_ra>
